<compile_context>
chip_gen: v6e
topology: v6e:2x2x1
jax: 0.10.0
libtpu: 0.0.40
codegen_flags: <defaults>
</compile_context>

<pallas_src>
import functools

import numpy as np
import jax
import jax.numpy as jnp
from jax.experimental import pallas as pl
from jax.experimental.pallas import tpu as pltpu


# ----------------------------------------------------------------------------
# In-kernel LSTM: hoisted input projection + unrolled recurrence over T steps.
# ----------------------------------------------------------------------------
def _lstm_last_state(x2d, w_ih_ref, w_hh_ref, b_ref, T, B, H):
    """x2d: (T*B, Din) f32 value (time-major, flattened).
    w_ih/w_hh: bf16 refs (Din,4H)/(H,4H); b: f32 ref (1,4H) = b_ih + b_hh.
    Returns h_T: (B, H) f32."""
    # Hoisted input projection: one MXU call with M = T*B instead of T calls
    # with M = B (and the bias is folded in once).
    gx = jnp.dot(x2d.astype(jnp.bfloat16), w_ih_ref[...],
                 preferred_element_type=jnp.float32) + b_ref[...]   # (T*B, 4H)

    h = None
    c = None
    # T is small & static -> trace-time unrolled loop with static slices.
    for t in range(T):
        gates = gx[t * B:(t + 1) * B, :]                            # (B, 4H)
        if t > 0:
            gates = gates + jnp.dot(h.astype(jnp.bfloat16), w_hh_ref[...],
                                    preferred_element_type=jnp.float32)
        i = jax.nn.sigmoid(gates[:, 0 * H:1 * H])
        f = jax.nn.sigmoid(gates[:, 1 * H:2 * H])
        g = jnp.tanh(gates[:, 2 * H:3 * H])
        o = jax.nn.sigmoid(gates[:, 3 * H:4 * H])
        c = i * g if t == 0 else f * c + i * g
        h = o * jnp.tanh(c)
    return h


# ----------------------------------------------------------------------------
# Fully fused kernel: 3 LSTMs -> mask -> fc0..fc3 -> sigmoid.
# ----------------------------------------------------------------------------
def _fused_kernel(T, B,
                  xc_ref, xp_ref, xb_ref, xs_ref, mask_ref,
                  wih0_ref, whh0_ref, br0_ref,
                  wih1_ref, whh1_ref, br1_ref,
                  wih2_ref, whh2_ref, br2_ref,
                  w0_ref, b0_ref,
                  w1a_ref, w1b_ref, b1_ref,
                  w2a_ref, w2b_ref, w2c_ref, b2_ref,
                  w3_ref, b3_ref,
                  out_ref):
    H0 = whh0_ref.shape[0]
    H1 = whh1_ref.shape[0]
    H2 = whh2_ref.shape[0]

    h0 = _lstm_last_state(xc_ref[...], wih0_ref, whh0_ref, br0_ref, T, B, H0)
    h1 = _lstm_last_state(xp_ref[...], wih1_ref, whh1_ref, br1_ref, T, B, H1)
    h2 = _lstm_last_state(xb_ref[...], wih2_ref, whh2_ref, br2_ref, T, B, H2)

    # pad_packed_sequence + [:, -1, :]: rows shorter than maxlen get zeros.
    m = mask_ref[...]                                   # (B, 1) f32
    o0 = h0 * m
    o1 = h1 * m
    o2 = h2 * m

    def dot(a, w_ref):
        return jnp.dot(a.astype(jnp.bfloat16), w_ref[...],
                       preferred_element_type=jnp.float32)

    # fc0 -> relu -> [dropout=id] -> fc1 -> relu -> [dropout=id]
    #      -> fc2 -> relu -> fc3 -> sigmoid   (concats as split matmuls)
    x0 = jnp.maximum(dot(o0, w0_ref) + b0_ref[...], 0.0)
    x1 = jnp.maximum(dot(x0, w1a_ref) + dot(o1, w1b_ref) + b1_ref[...], 0.0)
    x2 = jnp.maximum(dot(x1, w2a_ref) + dot(o2, w2b_ref)
                     + dot(xs_ref[...], w2c_ref) + b2_ref[...], 0.0)
    logits = jnp.dot(x2, w3_ref[...],
                     preferred_element_type=jnp.float32) + b3_ref[...]
    out_ref[...] = jax.nn.sigmoid(logits)


# ----------------------------------------------------------------------------
# Parameter construction (deterministic, synthetic). Matmul weights in bf16,
# biases (and the tiny final fc3 weight) in f32.
# ----------------------------------------------------------------------------
def init_params(key,
                CNN_embeded_size=256, h_RNN_0=256, h_RNN_1=64, h_RNN_2=16,
                h_FC0_dim=128, h_FC1_dim=64, h_FC2_dim=86):
    ks = iter(jax.random.split(key, 32))

    def mat(shape, dtype=jnp.bfloat16, scale=0.1):
        return (scale * jax.random.normal(next(ks), shape)).astype(dtype)

    def lstm(din, h):
        return dict(w_ih=mat((din, 4 * h)),
                    w_hh=mat((h, 4 * h)),
                    b=mat((1, 4 * h), jnp.float32))      # b_ih + b_hh combined

    return dict(
        rnn0=lstm(CNN_embeded_size, h_RNN_0),
        rnn1=lstm(8, h_RNN_1),
        rnn2=lstm(4, h_RNN_2),
        head=dict(
            w0=mat((h_RNN_0, h_FC0_dim)),
            b0=mat((1, h_FC0_dim), jnp.float32),
            w1a=mat((h_FC0_dim, h_FC1_dim)),             # rows for fc0 output
            w1b=mat((h_RNN_1, h_FC1_dim)),               # rows for RNN_1 output
            b1=mat((1, h_FC1_dim), jnp.float32),
            w2a=mat((h_FC1_dim, h_FC2_dim)),             # rows for fc1 output
            w2b=mat((h_RNN_2, h_FC2_dim)),               # rows for RNN_2 output
            w2c=mat((5, h_FC2_dim)),                     # rows for xs_2d
            b2=mat((1, h_FC2_dim), jnp.float32),
            w3=mat((h_FC2_dim, 1), jnp.float32),
            b3=mat((1, 1), jnp.float32),
        ),
    )


# ----------------------------------------------------------------------------
# Forward wrapper: host-side length handling + a single pallas_call.
# ----------------------------------------------------------------------------
def decoder_rnn_imbs_forward(params, xc_3d, xp_3d, xb_3d, xs_2d, x_lengths):
    lengths = np.asarray(x_lengths)                  # host data, as in PyTorch
    B = xc_3d.shape[0]
    maxlen = int(lengths.max())                      # static -> retrace per new maxlen

    # Host-computed last-step mask (no device sync, no XLA glue ops).
    mask = jnp.asarray((lengths == maxlen).astype(np.float32).reshape(B, 1))

    def tm2d(x):  # (B, T, D) -> time-major flattened (maxlen*B, D)
        x = jnp.transpose(x[:, :maxlen].astype(jnp.float32), (1, 0, 2))
        return x.reshape(maxlen * B, x.shape[-1])

    p0, p1, p2, ph = (params["rnn0"], params["rnn1"],
                      params["rnn2"], params["head"])

    args = (tm2d(xc_3d), tm2d(xp_3d), tm2d(xb_3d),
            xs_2d.astype(jnp.float32), mask,
            p0["w_ih"], p0["w_hh"], p0["b"],
            p1["w_ih"], p1["w_hh"], p1["b"],
            p2["w_ih"], p2["w_hh"], p2["b"],
            ph["w0"], ph["b0"],
            ph["w1a"], ph["w1b"], ph["b1"],
            ph["w2a"], ph["w2b"], ph["w2c"], ph["b2"],
            ph["w3"], ph["b3"])

    vmem_spec = pl.BlockSpec(memory_space=pltpu.MemorySpace.VMEM)
    return pl.pallas_call(
        functools.partial(_fused_kernel, maxlen, B),
        out_shape=jax.ShapeDtypeStruct((B, 1), jnp.float32),
        in_specs=[vmem_spec] * len(args),
        out_specs=vmem_spec,
    )(*args)


if __name__ == "__main__":
    key = jax.random.PRNGKey(0)
    kp, k0, k1, k2, k3 = jax.random.split(key, 5)

    B, T = 2, 8
    CNN_embeded_size = 256

    params = init_params(kp)

    xc_3d = jax.random.normal(k0, (B, T, CNN_embeded_size), dtype=jnp.float32)
    xp_3d = jax.random.normal(k1, (B, T, 8), dtype=jnp.float32)
    xb_3d = jax.random.normal(k2, (B, T, 4), dtype=jnp.float32)
    xs_2d = jax.random.normal(k3, (B, 5), dtype=jnp.float32)
    x_lengths = np.array([8, 5], dtype=np.int32)     # host-side, as in PyTorch

    out = decoder_rnn_imbs_forward(params, xc_3d, xp_3d, xb_3d, xs_2d,
                                   x_lengths)
    out = jax.block_until_ready(out)
    assert out.shape == (B, 1), out.shape
    assert bool(jnp.all(jnp.isfinite(out)))
    print("KERNEL_OK")
</pallas_src>

<mosaic_0001>
module attributes {stable_mosaic.version = 11 : i64} {
  func.func @_fused_kernel(%arg0: memref<16x256xf32, #tpu.memory_space<vmem>>, %arg1: memref<16x8xf32, #tpu.memory_space<vmem>>, %arg2: memref<16x4xf32, #tpu.memory_space<vmem>>, %arg3: memref<2x5xf32, #tpu.memory_space<vmem>>, %arg4: memref<2x1xf32, #tpu.memory_space<vmem>>, %arg5: memref<256x1024xbf16, #tpu.memory_space<vmem>>, %arg6: memref<256x1024xbf16, #tpu.memory_space<vmem>>, %arg7: memref<1x1024xf32, #tpu.memory_space<vmem>>, %arg8: memref<8x256xbf16, #tpu.memory_space<vmem>>, %arg9: memref<64x256xbf16, #tpu.memory_space<vmem>>, %arg10: memref<1x256xf32, #tpu.memory_space<vmem>>, %arg11: memref<4x64xbf16, #tpu.memory_space<vmem>>, %arg12: memref<16x64xbf16, #tpu.memory_space<vmem>>, %arg13: memref<1x64xf32, #tpu.memory_space<vmem>>, %arg14: memref<256x128xbf16, #tpu.memory_space<vmem>>, %arg15: memref<1x128xf32, #tpu.memory_space<vmem>>, %arg16: memref<128x64xbf16, #tpu.memory_space<vmem>>, %arg17: memref<64x64xbf16, #tpu.memory_space<vmem>>, %arg18: memref<1x64xf32, #tpu.memory_space<vmem>>, %arg19: memref<64x86xbf16, #tpu.memory_space<vmem>>, %arg20: memref<16x86xbf16, #tpu.memory_space<vmem>>, %arg21: memref<5x86xbf16, #tpu.memory_space<vmem>>, %arg22: memref<1x86xf32, #tpu.memory_space<vmem>>, %arg23: memref<86x1xf32, #tpu.memory_space<vmem>>, %arg24: memref<1x1xf32, #tpu.memory_space<vmem>>, %arg25: memref<2x1xf32, #tpu.memory_space<vmem>>) attributes {dimension_semantics = [], scalar_prefetch = 0 : i64, scratch_operands = 0 : i64, tpu.core_type = #tpu.core_type<tc>} {
    %c0 = arith.constant 0 : index
    %c0_0 = arith.constant 0 : index
    %0 = vector.load %arg0[%c0, %c0_0] : memref<16x256xf32, #tpu.memory_space<vmem>>, vector<16x256xf32>
    %1 = arith.truncf %0 : vector<16x256xf32> to vector<16x256xbf16>
    %c0_1 = arith.constant 0 : index
    %c0_2 = arith.constant 0 : index
    %2 = vector.load %arg5[%c0_1, %c0_2] : memref<256x1024xbf16, #tpu.memory_space<vmem>>, vector<256x1024xbf16>
    %cst = arith.constant dense<0.000000e+00> : vector<16x1024xf32>
    %3 = tpu.matmul %1, %2, %cst {dimension_numbers = #tpu.dot_dimension_numbers<[1], [0], [0], [1], [0, 0, 1, 1], [], []>} : vector<16x256xbf16>, vector<256x1024xbf16>, vector<16x1024xf32> -> vector<16x1024xf32>
    %c0_3 = arith.constant 0 : index
    %c0_4 = arith.constant 0 : index
    %4 = vector.load %arg7[%c0_3, %c0_4] : memref<1x1024xf32, #tpu.memory_space<vmem>>, vector<1x1024xf32>
    %5 = vector.broadcast %4 : vector<1x1024xf32> to vector<16x1024xf32>
    %6 = arith.addf %3, %5 : vector<16x1024xf32>
    %7 = vector.extract_strided_slice %6 {offsets = [0, 0], sizes = [2, 1024], strides = [1, 1]} : vector<16x1024xf32> to vector<2x1024xf32>
    %8 = vector.extract_strided_slice %7 {offsets = [0, 0], sizes = [2, 256], strides = [1, 1]} : vector<2x1024xf32> to vector<2x256xf32>
    %9 = arith.negf %8 : vector<2x256xf32>
    %10 = math.exp %9 : vector<2x256xf32>
    %cst_5 = arith.constant 1.000000e+00 : f32
    %11 = vector.broadcast %cst_5 : f32 to vector<2x256xf32>
    %12 = arith.addf %11, %10 : vector<2x256xf32>
    %13 = arith.divf %11, %12 : vector<2x256xf32>
    %14 = vector.extract_strided_slice %7 {offsets = [0, 512], sizes = [2, 256], strides = [1, 1]} : vector<2x1024xf32> to vector<2x256xf32>
    %15 = math.tanh %14 : vector<2x256xf32>
    %16 = vector.extract_strided_slice %7 {offsets = [0, 768], sizes = [2, 256], strides = [1, 1]} : vector<2x1024xf32> to vector<2x256xf32>
    %17 = arith.negf %16 : vector<2x256xf32>
    %18 = math.exp %17 : vector<2x256xf32>
    %cst_6 = arith.constant 1.000000e+00 : f32
    %19 = vector.broadcast %cst_6 : f32 to vector<2x256xf32>
    %20 = arith.addf %19, %18 : vector<2x256xf32>
    %21 = arith.divf %19, %20 : vector<2x256xf32>
    %22 = arith.mulf %13, %15 : vector<2x256xf32>
    %23 = math.tanh %22 : vector<2x256xf32>
    %24 = arith.mulf %21, %23 : vector<2x256xf32>
    %25 = vector.extract_strided_slice %6 {offsets = [2, 0], sizes = [2, 1024], strides = [1, 1]} : vector<16x1024xf32> to vector<2x1024xf32>
    %26 = arith.truncf %24 : vector<2x256xf32> to vector<2x256xbf16>
    %c0_7 = arith.constant 0 : index
    %c0_8 = arith.constant 0 : index
    %27 = vector.load %arg6[%c0_7, %c0_8] : memref<256x1024xbf16, #tpu.memory_space<vmem>>, vector<256x1024xbf16>
    %cst_9 = arith.constant dense<0.000000e+00> : vector<2x1024xf32>
    %28 = tpu.matmul %26, %27, %cst_9 {dimension_numbers = #tpu.dot_dimension_numbers<[1], [0], [0], [1], [0, 0, 1, 1], [], []>} : vector<2x256xbf16>, vector<256x1024xbf16>, vector<2x1024xf32> -> vector<2x1024xf32>
    %29 = arith.addf %25, %28 : vector<2x1024xf32>
    %30 = vector.extract_strided_slice %29 {offsets = [0, 0], sizes = [2, 256], strides = [1, 1]} : vector<2x1024xf32> to vector<2x256xf32>
    %31 = arith.negf %30 : vector<2x256xf32>
    %32 = math.exp %31 : vector<2x256xf32>
    %cst_10 = arith.constant 1.000000e+00 : f32
    %33 = vector.broadcast %cst_10 : f32 to vector<2x256xf32>
    %34 = arith.addf %33, %32 : vector<2x256xf32>
    %35 = arith.divf %33, %34 : vector<2x256xf32>
    %36 = vector.extract_strided_slice %29 {offsets = [0, 256], sizes = [2, 256], strides = [1, 1]} : vector<2x1024xf32> to vector<2x256xf32>
    %37 = arith.negf %36 : vector<2x256xf32>
    %38 = math.exp %37 : vector<2x256xf32>
    %cst_11 = arith.constant 1.000000e+00 : f32
    %39 = vector.broadcast %cst_11 : f32 to vector<2x256xf32>
    %40 = arith.addf %39, %38 : vector<2x256xf32>
    %41 = arith.divf %39, %40 : vector<2x256xf32>
    %42 = vector.extract_strided_slice %29 {offsets = [0, 512], sizes = [2, 256], strides = [1, 1]} : vector<2x1024xf32> to vector<2x256xf32>
    %43 = math.tanh %42 : vector<2x256xf32>
    %44 = vector.extract_strided_slice %29 {offsets = [0, 768], sizes = [2, 256], strides = [1, 1]} : vector<2x1024xf32> to vector<2x256xf32>
    %45 = arith.negf %44 : vector<2x256xf32>
    %46 = math.exp %45 : vector<2x256xf32>
    %cst_12 = arith.constant 1.000000e+00 : f32
    %47 = vector.broadcast %cst_12 : f32 to vector<2x256xf32>
    %48 = arith.addf %47, %46 : vector<2x256xf32>
    %49 = arith.divf %47, %48 : vector<2x256xf32>
    %50 = arith.mulf %41, %22 : vector<2x256xf32>
    %51 = arith.mulf %35, %43 : vector<2x256xf32>
    %52 = arith.addf %50, %51 : vector<2x256xf32>
    %53 = math.tanh %52 : vector<2x256xf32>
    %54 = arith.mulf %49, %53 : vector<2x256xf32>
    %55 = vector.extract_strided_slice %6 {offsets = [4, 0], sizes = [2, 1024], strides = [1, 1]} : vector<16x1024xf32> to vector<2x1024xf32>
    %56 = arith.truncf %54 : vector<2x256xf32> to vector<2x256xbf16>
    %c0_13 = arith.constant 0 : index
    %c0_14 = arith.constant 0 : index
    %57 = vector.load %arg6[%c0_13, %c0_14] : memref<256x1024xbf16, #tpu.memory_space<vmem>>, vector<256x1024xbf16>
    %cst_15 = arith.constant dense<0.000000e+00> : vector<2x1024xf32>
    %58 = tpu.matmul %56, %57, %cst_15 {dimension_numbers = #tpu.dot_dimension_numbers<[1], [0], [0], [1], [0, 0, 1, 1], [], []>} : vector<2x256xbf16>, vector<256x1024xbf16>, vector<2x1024xf32> -> vector<2x1024xf32>
    %59 = arith.addf %55, %58 : vector<2x1024xf32>
    %60 = vector.extract_strided_slice %59 {offsets = [0, 0], sizes = [2, 256], strides = [1, 1]} : vector<2x1024xf32> to vector<2x256xf32>
    %61 = arith.negf %60 : vector<2x256xf32>
    %62 = math.exp %61 : vector<2x256xf32>
    %cst_16 = arith.constant 1.000000e+00 : f32
    %63 = vector.broadcast %cst_16 : f32 to vector<2x256xf32>
    %64 = arith.addf %63, %62 : vector<2x256xf32>
    %65 = arith.divf %63, %64 : vector<2x256xf32>
    %66 = vector.extract_strided_slice %59 {offsets = [0, 256], sizes = [2, 256], strides = [1, 1]} : vector<2x1024xf32> to vector<2x256xf32>
    %67 = arith.negf %66 : vector<2x256xf32>
    %68 = math.exp %67 : vector<2x256xf32>
    %cst_17 = arith.constant 1.000000e+00 : f32
    %69 = vector.broadcast %cst_17 : f32 to vector<2x256xf32>
    %70 = arith.addf %69, %68 : vector<2x256xf32>
    %71 = arith.divf %69, %70 : vector<2x256xf32>
    %72 = vector.extract_strided_slice %59 {offsets = [0, 512], sizes = [2, 256], strides = [1, 1]} : vector<2x1024xf32> to vector<2x256xf32>
    %73 = math.tanh %72 : vector<2x256xf32>
    %74 = vector.extract_strided_slice %59 {offsets = [0, 768], sizes = [2, 256], strides = [1, 1]} : vector<2x1024xf32> to vector<2x256xf32>
    %75 = arith.negf %74 : vector<2x256xf32>
    %76 = math.exp %75 : vector<2x256xf32>
    %cst_18 = arith.constant 1.000000e+00 : f32
    %77 = vector.broadcast %cst_18 : f32 to vector<2x256xf32>
    %78 = arith.addf %77, %76 : vector<2x256xf32>
    %79 = arith.divf %77, %78 : vector<2x256xf32>
    %80 = arith.mulf %71, %52 : vector<2x256xf32>
    %81 = arith.mulf %65, %73 : vector<2x256xf32>
    %82 = arith.addf %80, %81 : vector<2x256xf32>
    %83 = math.tanh %82 : vector<2x256xf32>
    %84 = arith.mulf %79, %83 : vector<2x256xf32>
    %85 = vector.extract_strided_slice %6 {offsets = [6, 0], sizes = [2, 1024], strides = [1, 1]} : vector<16x1024xf32> to vector<2x1024xf32>
    %86 = arith.truncf %84 : vector<2x256xf32> to vector<2x256xbf16>
    %c0_19 = arith.constant 0 : index
    %c0_20 = arith.constant 0 : index
    %87 = vector.load %arg6[%c0_19, %c0_20] : memref<256x1024xbf16, #tpu.memory_space<vmem>>, vector<256x1024xbf16>
    %cst_21 = arith.constant dense<0.000000e+00> : vector<2x1024xf32>
    %88 = tpu.matmul %86, %87, %cst_21 {dimension_numbers = #tpu.dot_dimension_numbers<[1], [0], [0], [1], [0, 0, 1, 1], [], []>} : vector<2x256xbf16>, vector<256x1024xbf16>, vector<2x1024xf32> -> vector<2x1024xf32>
    %89 = arith.addf %85, %88 : vector<2x1024xf32>
    %90 = vector.extract_strided_slice %89 {offsets = [0, 0], sizes = [2, 256], strides = [1, 1]} : vector<2x1024xf32> to vector<2x256xf32>
    %91 = arith.negf %90 : vector<2x256xf32>
    %92 = math.exp %91 : vector<2x256xf32>
    %cst_22 = arith.constant 1.000000e+00 : f32
    %93 = vector.broadcast %cst_22 : f32 to vector<2x256xf32>
    %94 = arith.addf %93, %92 : vector<2x256xf32>
    %95 = arith.divf %93, %94 : vector<2x256xf32>
    %96 = vector.extract_strided_slice %89 {offsets = [0, 256], sizes = [2, 256], strides = [1, 1]} : vector<2x1024xf32> to vector<2x256xf32>
    %97 = arith.negf %96 : vector<2x256xf32>
    %98 = math.exp %97 : vector<2x256xf32>
    %cst_23 = arith.constant 1.000000e+00 : f32
    %99 = vector.broadcast %cst_23 : f32 to vector<2x256xf32>
    %100 = arith.addf %99, %98 : vector<2x256xf32>
    %101 = arith.divf %99, %100 : vector<2x256xf32>
    %102 = vector.extract_strided_slice %89 {offsets = [0, 512], sizes = [2, 256], strides = [1, 1]} : vector<2x1024xf32> to vector<2x256xf32>
    %103 = math.tanh %102 : vector<2x256xf32>
    %104 = vector.extract_strided_slice %89 {offsets = [0, 768], sizes = [2, 256], strides = [1, 1]} : vector<2x1024xf32> to vector<2x256xf32>
    %105 = arith.negf %104 : vector<2x256xf32>
    %106 = math.exp %105 : vector<2x256xf32>
    %cst_24 = arith.constant 1.000000e+00 : f32
    %107 = vector.broadcast %cst_24 : f32 to vector<2x256xf32>
    %108 = arith.addf %107, %106 : vector<2x256xf32>
    %109 = arith.divf %107, %108 : vector<2x256xf32>
    %110 = arith.mulf %101, %82 : vector<2x256xf32>
    %111 = arith.mulf %95, %103 : vector<2x256xf32>
    %112 = arith.addf %110, %111 : vector<2x256xf32>
    %113 = math.tanh %112 : vector<2x256xf32>
    %114 = arith.mulf %109, %113 : vector<2x256xf32>
    %115 = vector.extract_strided_slice %6 {offsets = [8, 0], sizes = [2, 1024], strides = [1, 1]} : vector<16x1024xf32> to vector<2x1024xf32>
    %116 = arith.truncf %114 : vector<2x256xf32> to vector<2x256xbf16>
    %c0_25 = arith.constant 0 : index
    %c0_26 = arith.constant 0 : index
    %117 = vector.load %arg6[%c0_25, %c0_26] : memref<256x1024xbf16, #tpu.memory_space<vmem>>, vector<256x1024xbf16>
    %cst_27 = arith.constant dense<0.000000e+00> : vector<2x1024xf32>
    %118 = tpu.matmul %116, %117, %cst_27 {dimension_numbers = #tpu.dot_dimension_numbers<[1], [0], [0], [1], [0, 0, 1, 1], [], []>} : vector<2x256xbf16>, vector<256x1024xbf16>, vector<2x1024xf32> -> vector<2x1024xf32>
    %119 = arith.addf %115, %118 : vector<2x1024xf32>
    %120 = vector.extract_strided_slice %119 {offsets = [0, 0], sizes = [2, 256], strides = [1, 1]} : vector<2x1024xf32> to vector<2x256xf32>
    %121 = arith.negf %120 : vector<2x256xf32>
    %122 = math.exp %121 : vector<2x256xf32>
    %cst_28 = arith.constant 1.000000e+00 : f32
    %123 = vector.broadcast %cst_28 : f32 to vector<2x256xf32>
    %124 = arith.addf %123, %122 : vector<2x256xf32>
    %125 = arith.divf %123, %124 : vector<2x256xf32>
    %126 = vector.extract_strided_slice %119 {offsets = [0, 256], sizes = [2, 256], strides = [1, 1]} : vector<2x1024xf32> to vector<2x256xf32>
    %127 = arith.negf %126 : vector<2x256xf32>
    %128 = math.exp %127 : vector<2x256xf32>
    %cst_29 = arith.constant 1.000000e+00 : f32
    %129 = vector.broadcast %cst_29 : f32 to vector<2x256xf32>
    %130 = arith.addf %129, %128 : vector<2x256xf32>
    %131 = arith.divf %129, %130 : vector<2x256xf32>
    %132 = vector.extract_strided_slice %119 {offsets = [0, 512], sizes = [2, 256], strides = [1, 1]} : vector<2x1024xf32> to vector<2x256xf32>
    %133 = math.tanh %132 : vector<2x256xf32>
    %134 = vector.extract_strided_slice %119 {offsets = [0, 768], sizes = [2, 256], strides = [1, 1]} : vector<2x1024xf32> to vector<2x256xf32>
    %135 = arith.negf %134 : vector<2x256xf32>
    %136 = math.exp %135 : vector<2x256xf32>
    %cst_30 = arith.constant 1.000000e+00 : f32
    %137 = vector.broadcast %cst_30 : f32 to vector<2x256xf32>
    %138 = arith.addf %137, %136 : vector<2x256xf32>
    %139 = arith.divf %137, %138 : vector<2x256xf32>
    %140 = arith.mulf %131, %112 : vector<2x256xf32>
    %141 = arith.mulf %125, %133 : vector<2x256xf32>
    %142 = arith.addf %140, %141 : vector<2x256xf32>
    %143 = math.tanh %142 : vector<2x256xf32>
    %144 = arith.mulf %139, %143 : vector<2x256xf32>
    %145 = vector.extract_strided_slice %6 {offsets = [10, 0], sizes = [2, 1024], strides = [1, 1]} : vector<16x1024xf32> to vector<2x1024xf32>
    %146 = arith.truncf %144 : vector<2x256xf32> to vector<2x256xbf16>
    %c0_31 = arith.constant 0 : index
    %c0_32 = arith.constant 0 : index
    %147 = vector.load %arg6[%c0_31, %c0_32] : memref<256x1024xbf16, #tpu.memory_space<vmem>>, vector<256x1024xbf16>
    %cst_33 = arith.constant dense<0.000000e+00> : vector<2x1024xf32>
    %148 = tpu.matmul %146, %147, %cst_33 {dimension_numbers = #tpu.dot_dimension_numbers<[1], [0], [0], [1], [0, 0, 1, 1], [], []>} : vector<2x256xbf16>, vector<256x1024xbf16>, vector<2x1024xf32> -> vector<2x1024xf32>
    %149 = arith.addf %145, %148 : vector<2x1024xf32>
    %150 = vector.extract_strided_slice %149 {offsets = [0, 0], sizes = [2, 256], strides = [1, 1]} : vector<2x1024xf32> to vector<2x256xf32>
    %151 = arith.negf %150 : vector<2x256xf32>
    %152 = math.exp %151 : vector<2x256xf32>
    %cst_34 = arith.constant 1.000000e+00 : f32
    %153 = vector.broadcast %cst_34 : f32 to vector<2x256xf32>
    %154 = arith.addf %153, %152 : vector<2x256xf32>
    %155 = arith.divf %153, %154 : vector<2x256xf32>
    %156 = vector.extract_strided_slice %149 {offsets = [0, 256], sizes = [2, 256], strides = [1, 1]} : vector<2x1024xf32> to vector<2x256xf32>
    %157 = arith.negf %156 : vector<2x256xf32>
    %158 = math.exp %157 : vector<2x256xf32>
    %cst_35 = arith.constant 1.000000e+00 : f32
    %159 = vector.broadcast %cst_35 : f32 to vector<2x256xf32>
    %160 = arith.addf %159, %158 : vector<2x256xf32>
    %161 = arith.divf %159, %160 : vector<2x256xf32>
    %162 = vector.extract_strided_slice %149 {offsets = [0, 512], sizes = [2, 256], strides = [1, 1]} : vector<2x1024xf32> to vector<2x256xf32>
    %163 = math.tanh %162 : vector<2x256xf32>
    %164 = vector.extract_strided_slice %149 {offsets = [0, 768], sizes = [2, 256], strides = [1, 1]} : vector<2x1024xf32> to vector<2x256xf32>
    %165 = arith.negf %164 : vector<2x256xf32>
    %166 = math.exp %165 : vector<2x256xf32>
    %cst_36 = arith.constant 1.000000e+00 : f32
    %167 = vector.broadcast %cst_36 : f32 to vector<2x256xf32>
    %168 = arith.addf %167, %166 : vector<2x256xf32>
    %169 = arith.divf %167, %168 : vector<2x256xf32>
    %170 = arith.mulf %161, %142 : vector<2x256xf32>
    %171 = arith.mulf %155, %163 : vector<2x256xf32>
    %172 = arith.addf %170, %171 : vector<2x256xf32>
    %173 = math.tanh %172 : vector<2x256xf32>
    %174 = arith.mulf %169, %173 : vector<2x256xf32>
    %175 = vector.extract_strided_slice %6 {offsets = [12, 0], sizes = [2, 1024], strides = [1, 1]} : vector<16x1024xf32> to vector<2x1024xf32>
    %176 = arith.truncf %174 : vector<2x256xf32> to vector<2x256xbf16>
    %c0_37 = arith.constant 0 : index
    %c0_38 = arith.constant 0 : index
    %177 = vector.load %arg6[%c0_37, %c0_38] : memref<256x1024xbf16, #tpu.memory_space<vmem>>, vector<256x1024xbf16>
    %cst_39 = arith.constant dense<0.000000e+00> : vector<2x1024xf32>
    %178 = tpu.matmul %176, %177, %cst_39 {dimension_numbers = #tpu.dot_dimension_numbers<[1], [0], [0], [1], [0, 0, 1, 1], [], []>} : vector<2x256xbf16>, vector<256x1024xbf16>, vector<2x1024xf32> -> vector<2x1024xf32>
    %179 = arith.addf %175, %178 : vector<2x1024xf32>
    %180 = vector.extract_strided_slice %179 {offsets = [0, 0], sizes = [2, 256], strides = [1, 1]} : vector<2x1024xf32> to vector<2x256xf32>
    %181 = arith.negf %180 : vector<2x256xf32>
    %182 = math.exp %181 : vector<2x256xf32>
    %cst_40 = arith.constant 1.000000e+00 : f32
    %183 = vector.broadcast %cst_40 : f32 to vector<2x256xf32>
    %184 = arith.addf %183, %182 : vector<2x256xf32>
    %185 = arith.divf %183, %184 : vector<2x256xf32>
    %186 = vector.extract_strided_slice %179 {offsets = [0, 256], sizes = [2, 256], strides = [1, 1]} : vector<2x1024xf32> to vector<2x256xf32>
    %187 = arith.negf %186 : vector<2x256xf32>
    %188 = math.exp %187 : vector<2x256xf32>
    %cst_41 = arith.constant 1.000000e+00 : f32
    %189 = vector.broadcast %cst_41 : f32 to vector<2x256xf32>
    %190 = arith.addf %189, %188 : vector<2x256xf32>
    %191 = arith.divf %189, %190 : vector<2x256xf32>
    %192 = vector.extract_strided_slice %179 {offsets = [0, 512], sizes = [2, 256], strides = [1, 1]} : vector<2x1024xf32> to vector<2x256xf32>
    %193 = math.tanh %192 : vector<2x256xf32>
    %194 = vector.extract_strided_slice %179 {offsets = [0, 768], sizes = [2, 256], strides = [1, 1]} : vector<2x1024xf32> to vector<2x256xf32>
    %195 = arith.negf %194 : vector<2x256xf32>
    %196 = math.exp %195 : vector<2x256xf32>
    %cst_42 = arith.constant 1.000000e+00 : f32
    %197 = vector.broadcast %cst_42 : f32 to vector<2x256xf32>
    %198 = arith.addf %197, %196 : vector<2x256xf32>
    %199 = arith.divf %197, %198 : vector<2x256xf32>
    %200 = arith.mulf %191, %172 : vector<2x256xf32>
    %201 = arith.mulf %185, %193 : vector<2x256xf32>
    %202 = arith.addf %200, %201 : vector<2x256xf32>
    %203 = math.tanh %202 : vector<2x256xf32>
    %204 = arith.mulf %199, %203 : vector<2x256xf32>
    %205 = vector.extract_strided_slice %6 {offsets = [14, 0], sizes = [2, 1024], strides = [1, 1]} : vector<16x1024xf32> to vector<2x1024xf32>
    %206 = arith.truncf %204 : vector<2x256xf32> to vector<2x256xbf16>
    %c0_43 = arith.constant 0 : index
    %c0_44 = arith.constant 0 : index
    %207 = vector.load %arg6[%c0_43, %c0_44] : memref<256x1024xbf16, #tpu.memory_space<vmem>>, vector<256x1024xbf16>
    %cst_45 = arith.constant dense<0.000000e+00> : vector<2x1024xf32>
    %208 = tpu.matmul %206, %207, %cst_45 {dimension_numbers = #tpu.dot_dimension_numbers<[1], [0], [0], [1], [0, 0, 1, 1], [], []>} : vector<2x256xbf16>, vector<256x1024xbf16>, vector<2x1024xf32> -> vector<2x1024xf32>
    %209 = arith.addf %205, %208 : vector<2x1024xf32>
    %210 = vector.extract_strided_slice %209 {offsets = [0, 0], sizes = [2, 256], strides = [1, 1]} : vector<2x1024xf32> to vector<2x256xf32>
    %211 = arith.negf %210 : vector<2x256xf32>
    %212 = math.exp %211 : vector<2x256xf32>
    %cst_46 = arith.constant 1.000000e+00 : f32
    %213 = vector.broadcast %cst_46 : f32 to vector<2x256xf32>
    %214 = arith.addf %213, %212 : vector<2x256xf32>
    %215 = arith.divf %213, %214 : vector<2x256xf32>
    %216 = vector.extract_strided_slice %209 {offsets = [0, 256], sizes = [2, 256], strides = [1, 1]} : vector<2x1024xf32> to vector<2x256xf32>
    %217 = arith.negf %216 : vector<2x256xf32>
    %218 = math.exp %217 : vector<2x256xf32>
    %cst_47 = arith.constant 1.000000e+00 : f32
    %219 = vector.broadcast %cst_47 : f32 to vector<2x256xf32>
    %220 = arith.addf %219, %218 : vector<2x256xf32>
    %221 = arith.divf %219, %220 : vector<2x256xf32>
    %222 = vector.extract_strided_slice %209 {offsets = [0, 512], sizes = [2, 256], strides = [1, 1]} : vector<2x1024xf32> to vector<2x256xf32>
    %223 = math.tanh %222 : vector<2x256xf32>
    %224 = vector.extract_strided_slice %209 {offsets = [0, 768], sizes = [2, 256], strides = [1, 1]} : vector<2x1024xf32> to vector<2x256xf32>
    %225 = arith.negf %224 : vector<2x256xf32>
    %226 = math.exp %225 : vector<2x256xf32>
    %cst_48 = arith.constant 1.000000e+00 : f32
    %227 = vector.broadcast %cst_48 : f32 to vector<2x256xf32>
    %228 = arith.addf %227, %226 : vector<2x256xf32>
    %229 = arith.divf %227, %228 : vector<2x256xf32>
    %230 = arith.mulf %221, %202 : vector<2x256xf32>
    %231 = arith.mulf %215, %223 : vector<2x256xf32>
    %232 = arith.addf %230, %231 : vector<2x256xf32>
    %233 = math.tanh %232 : vector<2x256xf32>
    %234 = arith.mulf %229, %233 : vector<2x256xf32>
    %c0_49 = arith.constant 0 : index
    %c0_50 = arith.constant 0 : index
    %235 = vector.load %arg1[%c0_49, %c0_50] : memref<16x8xf32, #tpu.memory_space<vmem>>, vector<16x8xf32>
    %236 = arith.truncf %235 : vector<16x8xf32> to vector<16x8xbf16>
    %c0_51 = arith.constant 0 : index
    %c0_52 = arith.constant 0 : index
    %237 = vector.load %arg8[%c0_51, %c0_52] : memref<8x256xbf16, #tpu.memory_space<vmem>>, vector<8x256xbf16>
    %cst_53 = arith.constant dense<0.000000e+00> : vector<16x256xf32>
    %238 = tpu.matmul %236, %237, %cst_53 {dimension_numbers = #tpu.dot_dimension_numbers<[1], [0], [0], [1], [0, 0, 1, 1], [], []>} : vector<16x8xbf16>, vector<8x256xbf16>, vector<16x256xf32> -> vector<16x256xf32>
    %c0_54 = arith.constant 0 : index
    %c0_55 = arith.constant 0 : index
    %239 = vector.load %arg10[%c0_54, %c0_55] : memref<1x256xf32, #tpu.memory_space<vmem>>, vector<1x256xf32>
    %240 = vector.broadcast %239 : vector<1x256xf32> to vector<16x256xf32>
    %241 = arith.addf %238, %240 : vector<16x256xf32>
    %242 = vector.extract_strided_slice %241 {offsets = [0, 0], sizes = [2, 256], strides = [1, 1]} : vector<16x256xf32> to vector<2x256xf32>
    %243 = vector.extract_strided_slice %242 {offsets = [0, 0], sizes = [2, 64], strides = [1, 1]} : vector<2x256xf32> to vector<2x64xf32>
    %244 = arith.negf %243 : vector<2x64xf32>
    %245 = math.exp %244 : vector<2x64xf32>
    %cst_56 = arith.constant 1.000000e+00 : f32
    %246 = vector.broadcast %cst_56 : f32 to vector<2x64xf32>
    %247 = arith.addf %246, %245 : vector<2x64xf32>
    %248 = arith.divf %246, %247 : vector<2x64xf32>
    %249 = vector.extract_strided_slice %242 {offsets = [0, 128], sizes = [2, 64], strides = [1, 1]} : vector<2x256xf32> to vector<2x64xf32>
    %250 = math.tanh %249 : vector<2x64xf32>
    %251 = vector.extract_strided_slice %242 {offsets = [0, 192], sizes = [2, 64], strides = [1, 1]} : vector<2x256xf32> to vector<2x64xf32>
    %252 = arith.negf %251 : vector<2x64xf32>
    %253 = math.exp %252 : vector<2x64xf32>
    %cst_57 = arith.constant 1.000000e+00 : f32
    %254 = vector.broadcast %cst_57 : f32 to vector<2x64xf32>
    %255 = arith.addf %254, %253 : vector<2x64xf32>
    %256 = arith.divf %254, %255 : vector<2x64xf32>
    %257 = arith.mulf %248, %250 : vector<2x64xf32>
    %258 = math.tanh %257 : vector<2x64xf32>
    %259 = arith.mulf %256, %258 : vector<2x64xf32>
    %260 = vector.extract_strided_slice %241 {offsets = [2, 0], sizes = [2, 256], strides = [1, 1]} : vector<16x256xf32> to vector<2x256xf32>
    %261 = arith.truncf %259 : vector<2x64xf32> to vector<2x64xbf16>
    %c0_58 = arith.constant 0 : index
    %c0_59 = arith.constant 0 : index
    %262 = vector.load %arg9[%c0_58, %c0_59] : memref<64x256xbf16, #tpu.memory_space<vmem>>, vector<64x256xbf16>
    %cst_60 = arith.constant dense<0.000000e+00> : vector<2x256xf32>
    %263 = tpu.matmul %261, %262, %cst_60 {dimension_numbers = #tpu.dot_dimension_numbers<[1], [0], [0], [1], [0, 0, 1, 1], [], []>} : vector<2x64xbf16>, vector<64x256xbf16>, vector<2x256xf32> -> vector<2x256xf32>
    %264 = arith.addf %260, %263 : vector<2x256xf32>
    %265 = vector.extract_strided_slice %264 {offsets = [0, 0], sizes = [2, 64], strides = [1, 1]} : vector<2x256xf32> to vector<2x64xf32>
    %266 = arith.negf %265 : vector<2x64xf32>
    %267 = math.exp %266 : vector<2x64xf32>
    %cst_61 = arith.constant 1.000000e+00 : f32
    %268 = vector.broadcast %cst_61 : f32 to vector<2x64xf32>
    %269 = arith.addf %268, %267 : vector<2x64xf32>
    %270 = arith.divf %268, %269 : vector<2x64xf32>
    %271 = vector.extract_strided_slice %264 {offsets = [0, 64], sizes = [2, 64], strides = [1, 1]} : vector<2x256xf32> to vector<2x64xf32>
    %272 = arith.negf %271 : vector<2x64xf32>
    %273 = math.exp %272 : vector<2x64xf32>
    %cst_62 = arith.constant 1.000000e+00 : f32
    %274 = vector.broadcast %cst_62 : f32 to vector<2x64xf32>
    %275 = arith.addf %274, %273 : vector<2x64xf32>
    %276 = arith.divf %274, %275 : vector<2x64xf32>
    %277 = vector.extract_strided_slice %264 {offsets = [0, 128], sizes = [2, 64], strides = [1, 1]} : vector<2x256xf32> to vector<2x64xf32>
    %278 = math.tanh %277 : vector<2x64xf32>
    %279 = vector.extract_strided_slice %264 {offsets = [0, 192], sizes = [2, 64], strides = [1, 1]} : vector<2x256xf32> to vector<2x64xf32>
    %280 = arith.negf %279 : vector<2x64xf32>
    %281 = math.exp %280 : vector<2x64xf32>
    %cst_63 = arith.constant 1.000000e+00 : f32
    %282 = vector.broadcast %cst_63 : f32 to vector<2x64xf32>
    %283 = arith.addf %282, %281 : vector<2x64xf32>
    %284 = arith.divf %282, %283 : vector<2x64xf32>
    %285 = arith.mulf %276, %257 : vector<2x64xf32>
    %286 = arith.mulf %270, %278 : vector<2x64xf32>
    %287 = arith.addf %285, %286 : vector<2x64xf32>
    %288 = math.tanh %287 : vector<2x64xf32>
    %289 = arith.mulf %284, %288 : vector<2x64xf32>
    %290 = vector.extract_strided_slice %241 {offsets = [4, 0], sizes = [2, 256], strides = [1, 1]} : vector<16x256xf32> to vector<2x256xf32>
    %291 = arith.truncf %289 : vector<2x64xf32> to vector<2x64xbf16>
    %c0_64 = arith.constant 0 : index
    %c0_65 = arith.constant 0 : index
    %292 = vector.load %arg9[%c0_64, %c0_65] : memref<64x256xbf16, #tpu.memory_space<vmem>>, vector<64x256xbf16>
    %cst_66 = arith.constant dense<0.000000e+00> : vector<2x256xf32>
    %293 = tpu.matmul %291, %292, %cst_66 {dimension_numbers = #tpu.dot_dimension_numbers<[1], [0], [0], [1], [0, 0, 1, 1], [], []>} : vector<2x64xbf16>, vector<64x256xbf16>, vector<2x256xf32> -> vector<2x256xf32>
    %294 = arith.addf %290, %293 : vector<2x256xf32>
    %295 = vector.extract_strided_slice %294 {offsets = [0, 0], sizes = [2, 64], strides = [1, 1]} : vector<2x256xf32> to vector<2x64xf32>
    %296 = arith.negf %295 : vector<2x64xf32>
    %297 = math.exp %296 : vector<2x64xf32>
    %cst_67 = arith.constant 1.000000e+00 : f32
    %298 = vector.broadcast %cst_67 : f32 to vector<2x64xf32>
    %299 = arith.addf %298, %297 : vector<2x64xf32>
    %300 = arith.divf %298, %299 : vector<2x64xf32>
    %301 = vector.extract_strided_slice %294 {offsets = [0, 64], sizes = [2, 64], strides = [1, 1]} : vector<2x256xf32> to vector<2x64xf32>
    %302 = arith.negf %301 : vector<2x64xf32>
    %303 = math.exp %302 : vector<2x64xf32>
    %cst_68 = arith.constant 1.000000e+00 : f32
    %304 = vector.broadcast %cst_68 : f32 to vector<2x64xf32>
    %305 = arith.addf %304, %303 : vector<2x64xf32>
    %306 = arith.divf %304, %305 : vector<2x64xf32>
    %307 = vector.extract_strided_slice %294 {offsets = [0, 128], sizes = [2, 64], strides = [1, 1]} : vector<2x256xf32> to vector<2x64xf32>
    %308 = math.tanh %307 : vector<2x64xf32>
    %309 = vector.extract_strided_slice %294 {offsets = [0, 192], sizes = [2, 64], strides = [1, 1]} : vector<2x256xf32> to vector<2x64xf32>
    %310 = arith.negf %309 : vector<2x64xf32>
    %311 = math.exp %310 : vector<2x64xf32>
    %cst_69 = arith.constant 1.000000e+00 : f32
    %312 = vector.broadcast %cst_69 : f32 to vector<2x64xf32>
    %313 = arith.addf %312, %311 : vector<2x64xf32>
    %314 = arith.divf %312, %313 : vector<2x64xf32>
    %315 = arith.mulf %306, %287 : vector<2x64xf32>
    %316 = arith.mulf %300, %308 : vector<2x64xf32>
    %317 = arith.addf %315, %316 : vector<2x64xf32>
    %318 = math.tanh %317 : vector<2x64xf32>
    %319 = arith.mulf %314, %318 : vector<2x64xf32>
    %320 = vector.extract_strided_slice %241 {offsets = [6, 0], sizes = [2, 256], strides = [1, 1]} : vector<16x256xf32> to vector<2x256xf32>
    %321 = arith.truncf %319 : vector<2x64xf32> to vector<2x64xbf16>
    %c0_70 = arith.constant 0 : index
    %c0_71 = arith.constant 0 : index
    %322 = vector.load %arg9[%c0_70, %c0_71] : memref<64x256xbf16, #tpu.memory_space<vmem>>, vector<64x256xbf16>
    %cst_72 = arith.constant dense<0.000000e+00> : vector<2x256xf32>
    %323 = tpu.matmul %321, %322, %cst_72 {dimension_numbers = #tpu.dot_dimension_numbers<[1], [0], [0], [1], [0, 0, 1, 1], [], []>} : vector<2x64xbf16>, vector<64x256xbf16>, vector<2x256xf32> -> vector<2x256xf32>
    %324 = arith.addf %320, %323 : vector<2x256xf32>
    %325 = vector.extract_strided_slice %324 {offsets = [0, 0], sizes = [2, 64], strides = [1, 1]} : vector<2x256xf32> to vector<2x64xf32>
    %326 = arith.negf %325 : vector<2x64xf32>
    %327 = math.exp %326 : vector<2x64xf32>
    %cst_73 = arith.constant 1.000000e+00 : f32
    %328 = vector.broadcast %cst_73 : f32 to vector<2x64xf32>
    %329 = arith.addf %328, %327 : vector<2x64xf32>
    %330 = arith.divf %328, %329 : vector<2x64xf32>
    %331 = vector.extract_strided_slice %324 {offsets = [0, 64], sizes = [2, 64], strides = [1, 1]} : vector<2x256xf32> to vector<2x64xf32>
    %332 = arith.negf %331 : vector<2x64xf32>
    %333 = math.exp %332 : vector<2x64xf32>
    %cst_74 = arith.constant 1.000000e+00 : f32
    %334 = vector.broadcast %cst_74 : f32 to vector<2x64xf32>
    %335 = arith.addf %334, %333 : vector<2x64xf32>
    %336 = arith.divf %334, %335 : vector<2x64xf32>
    %337 = vector.extract_strided_slice %324 {offsets = [0, 128], sizes = [2, 64], strides = [1, 1]} : vector<2x256xf32> to vector<2x64xf32>
    %338 = math.tanh %337 : vector<2x64xf32>
    %339 = vector.extract_strided_slice %324 {offsets = [0, 192], sizes = [2, 64], strides = [1, 1]} : vector<2x256xf32> to vector<2x64xf32>
    %340 = arith.negf %339 : vector<2x64xf32>
    %341 = math.exp %340 : vector<2x64xf32>
    %cst_75 = arith.constant 1.000000e+00 : f32
    %342 = vector.broadcast %cst_75 : f32 to vector<2x64xf32>
    %343 = arith.addf %342, %341 : vector<2x64xf32>
    %344 = arith.divf %342, %343 : vector<2x64xf32>
    %345 = arith.mulf %336, %317 : vector<2x64xf32>
    %346 = arith.mulf %330, %338 : vector<2x64xf32>
    %347 = arith.addf %345, %346 : vector<2x64xf32>
    %348 = math.tanh %347 : vector<2x64xf32>
    %349 = arith.mulf %344, %348 : vector<2x64xf32>
    %350 = vector.extract_strided_slice %241 {offsets = [8, 0], sizes = [2, 256], strides = [1, 1]} : vector<16x256xf32> to vector<2x256xf32>
    %351 = arith.truncf %349 : vector<2x64xf32> to vector<2x64xbf16>
    %c0_76 = arith.constant 0 : index
    %c0_77 = arith.constant 0 : index
    %352 = vector.load %arg9[%c0_76, %c0_77] : memref<64x256xbf16, #tpu.memory_space<vmem>>, vector<64x256xbf16>
    %cst_78 = arith.constant dense<0.000000e+00> : vector<2x256xf32>
    %353 = tpu.matmul %351, %352, %cst_78 {dimension_numbers = #tpu.dot_dimension_numbers<[1], [0], [0], [1], [0, 0, 1, 1], [], []>} : vector<2x64xbf16>, vector<64x256xbf16>, vector<2x256xf32> -> vector<2x256xf32>
    %354 = arith.addf %350, %353 : vector<2x256xf32>
    %355 = vector.extract_strided_slice %354 {offsets = [0, 0], sizes = [2, 64], strides = [1, 1]} : vector<2x256xf32> to vector<2x64xf32>
    %356 = arith.negf %355 : vector<2x64xf32>
    %357 = math.exp %356 : vector<2x64xf32>
    %cst_79 = arith.constant 1.000000e+00 : f32
    %358 = vector.broadcast %cst_79 : f32 to vector<2x64xf32>
    %359 = arith.addf %358, %357 : vector<2x64xf32>
    %360 = arith.divf %358, %359 : vector<2x64xf32>
    %361 = vector.extract_strided_slice %354 {offsets = [0, 64], sizes = [2, 64], strides = [1, 1]} : vector<2x256xf32> to vector<2x64xf32>
    %362 = arith.negf %361 : vector<2x64xf32>
    %363 = math.exp %362 : vector<2x64xf32>
    %cst_80 = arith.constant 1.000000e+00 : f32
    %364 = vector.broadcast %cst_80 : f32 to vector<2x64xf32>
    %365 = arith.addf %364, %363 : vector<2x64xf32>
    %366 = arith.divf %364, %365 : vector<2x64xf32>
    %367 = vector.extract_strided_slice %354 {offsets = [0, 128], sizes = [2, 64], strides = [1, 1]} : vector<2x256xf32> to vector<2x64xf32>
    %368 = math.tanh %367 : vector<2x64xf32>
    %369 = vector.extract_strided_slice %354 {offsets = [0, 192], sizes = [2, 64], strides = [1, 1]} : vector<2x256xf32> to vector<2x64xf32>
    %370 = arith.negf %369 : vector<2x64xf32>
    %371 = math.exp %370 : vector<2x64xf32>
    %cst_81 = arith.constant 1.000000e+00 : f32
    %372 = vector.broadcast %cst_81 : f32 to vector<2x64xf32>
    %373 = arith.addf %372, %371 : vector<2x64xf32>
    %374 = arith.divf %372, %373 : vector<2x64xf32>
    %375 = arith.mulf %366, %347 : vector<2x64xf32>
    %376 = arith.mulf %360, %368 : vector<2x64xf32>
    %377 = arith.addf %375, %376 : vector<2x64xf32>
    %378 = math.tanh %377 : vector<2x64xf32>
    %379 = arith.mulf %374, %378 : vector<2x64xf32>
    %380 = vector.extract_strided_slice %241 {offsets = [10, 0], sizes = [2, 256], strides = [1, 1]} : vector<16x256xf32> to vector<2x256xf32>
    %381 = arith.truncf %379 : vector<2x64xf32> to vector<2x64xbf16>
    %c0_82 = arith.constant 0 : index
    %c0_83 = arith.constant 0 : index
    %382 = vector.load %arg9[%c0_82, %c0_83] : memref<64x256xbf16, #tpu.memory_space<vmem>>, vector<64x256xbf16>
    %cst_84 = arith.constant dense<0.000000e+00> : vector<2x256xf32>
    %383 = tpu.matmul %381, %382, %cst_84 {dimension_numbers = #tpu.dot_dimension_numbers<[1], [0], [0], [1], [0, 0, 1, 1], [], []>} : vector<2x64xbf16>, vector<64x256xbf16>, vector<2x256xf32> -> vector<2x256xf32>
    %384 = arith.addf %380, %383 : vector<2x256xf32>
    %385 = vector.extract_strided_slice %384 {offsets = [0, 0], sizes = [2, 64], strides = [1, 1]} : vector<2x256xf32> to vector<2x64xf32>
    %386 = arith.negf %385 : vector<2x64xf32>
    %387 = math.exp %386 : vector<2x64xf32>
    %cst_85 = arith.constant 1.000000e+00 : f32
    %388 = vector.broadcast %cst_85 : f32 to vector<2x64xf32>
    %389 = arith.addf %388, %387 : vector<2x64xf32>
    %390 = arith.divf %388, %389 : vector<2x64xf32>
    %391 = vector.extract_strided_slice %384 {offsets = [0, 64], sizes = [2, 64], strides = [1, 1]} : vector<2x256xf32> to vector<2x64xf32>
    %392 = arith.negf %391 : vector<2x64xf32>
    %393 = math.exp %392 : vector<2x64xf32>
    %cst_86 = arith.constant 1.000000e+00 : f32
    %394 = vector.broadcast %cst_86 : f32 to vector<2x64xf32>
    %395 = arith.addf %394, %393 : vector<2x64xf32>
    %396 = arith.divf %394, %395 : vector<2x64xf32>
    %397 = vector.extract_strided_slice %384 {offsets = [0, 128], sizes = [2, 64], strides = [1, 1]} : vector<2x256xf32> to vector<2x64xf32>
    %398 = math.tanh %397 : vector<2x64xf32>
    %399 = vector.extract_strided_slice %384 {offsets = [0, 192], sizes = [2, 64], strides = [1, 1]} : vector<2x256xf32> to vector<2x64xf32>
    %400 = arith.negf %399 : vector<2x64xf32>
    %401 = math.exp %400 : vector<2x64xf32>
    %cst_87 = arith.constant 1.000000e+00 : f32
    %402 = vector.broadcast %cst_87 : f32 to vector<2x64xf32>
    %403 = arith.addf %402, %401 : vector<2x64xf32>
    %404 = arith.divf %402, %403 : vector<2x64xf32>
    %405 = arith.mulf %396, %377 : vector<2x64xf32>
    %406 = arith.mulf %390, %398 : vector<2x64xf32>
    %407 = arith.addf %405, %406 : vector<2x64xf32>
    %408 = math.tanh %407 : vector<2x64xf32>
    %409 = arith.mulf %404, %408 : vector<2x64xf32>
    %410 = vector.extract_strided_slice %241 {offsets = [12, 0], sizes = [2, 256], strides = [1, 1]} : vector<16x256xf32> to vector<2x256xf32>
    %411 = arith.truncf %409 : vector<2x64xf32> to vector<2x64xbf16>
    %c0_88 = arith.constant 0 : index
    %c0_89 = arith.constant 0 : index
    %412 = vector.load %arg9[%c0_88, %c0_89] : memref<64x256xbf16, #tpu.memory_space<vmem>>, vector<64x256xbf16>
    %cst_90 = arith.constant dense<0.000000e+00> : vector<2x256xf32>
    %413 = tpu.matmul %411, %412, %cst_90 {dimension_numbers = #tpu.dot_dimension_numbers<[1], [0], [0], [1], [0, 0, 1, 1], [], []>} : vector<2x64xbf16>, vector<64x256xbf16>, vector<2x256xf32> -> vector<2x256xf32>
    %414 = arith.addf %410, %413 : vector<2x256xf32>
    %415 = vector.extract_strided_slice %414 {offsets = [0, 0], sizes = [2, 64], strides = [1, 1]} : vector<2x256xf32> to vector<2x64xf32>
    %416 = arith.negf %415 : vector<2x64xf32>
    %417 = math.exp %416 : vector<2x64xf32>
    %cst_91 = arith.constant 1.000000e+00 : f32
    %418 = vector.broadcast %cst_91 : f32 to vector<2x64xf32>
    %419 = arith.addf %418, %417 : vector<2x64xf32>
    %420 = arith.divf %418, %419 : vector<2x64xf32>
    %421 = vector.extract_strided_slice %414 {offsets = [0, 64], sizes = [2, 64], strides = [1, 1]} : vector<2x256xf32> to vector<2x64xf32>
    %422 = arith.negf %421 : vector<2x64xf32>
    %423 = math.exp %422 : vector<2x64xf32>
    %cst_92 = arith.constant 1.000000e+00 : f32
    %424 = vector.broadcast %cst_92 : f32 to vector<2x64xf32>
    %425 = arith.addf %424, %423 : vector<2x64xf32>
    %426 = arith.divf %424, %425 : vector<2x64xf32>
    %427 = vector.extract_strided_slice %414 {offsets = [0, 128], sizes = [2, 64], strides = [1, 1]} : vector<2x256xf32> to vector<2x64xf32>
    %428 = math.tanh %427 : vector<2x64xf32>
    %429 = vector.extract_strided_slice %414 {offsets = [0, 192], sizes = [2, 64], strides = [1, 1]} : vector<2x256xf32> to vector<2x64xf32>
    %430 = arith.negf %429 : vector<2x64xf32>
    %431 = math.exp %430 : vector<2x64xf32>
    %cst_93 = arith.constant 1.000000e+00 : f32
    %432 = vector.broadcast %cst_93 : f32 to vector<2x64xf32>
    %433 = arith.addf %432, %431 : vector<2x64xf32>
    %434 = arith.divf %432, %433 : vector<2x64xf32>
    %435 = arith.mulf %426, %407 : vector<2x64xf32>
    %436 = arith.mulf %420, %428 : vector<2x64xf32>
    %437 = arith.addf %435, %436 : vector<2x64xf32>
    %438 = math.tanh %437 : vector<2x64xf32>
    %439 = arith.mulf %434, %438 : vector<2x64xf32>
    %440 = vector.extract_strided_slice %241 {offsets = [14, 0], sizes = [2, 256], strides = [1, 1]} : vector<16x256xf32> to vector<2x256xf32>
    %441 = arith.truncf %439 : vector<2x64xf32> to vector<2x64xbf16>
    %c0_94 = arith.constant 0 : index
    %c0_95 = arith.constant 0 : index
    %442 = vector.load %arg9[%c0_94, %c0_95] : memref<64x256xbf16, #tpu.memory_space<vmem>>, vector<64x256xbf16>
    %cst_96 = arith.constant dense<0.000000e+00> : vector<2x256xf32>
    %443 = tpu.matmul %441, %442, %cst_96 {dimension_numbers = #tpu.dot_dimension_numbers<[1], [0], [0], [1], [0, 0, 1, 1], [], []>} : vector<2x64xbf16>, vector<64x256xbf16>, vector<2x256xf32> -> vector<2x256xf32>
    %444 = arith.addf %440, %443 : vector<2x256xf32>
    %445 = vector.extract_strided_slice %444 {offsets = [0, 0], sizes = [2, 64], strides = [1, 1]} : vector<2x256xf32> to vector<2x64xf32>
    %446 = arith.negf %445 : vector<2x64xf32>
    %447 = math.exp %446 : vector<2x64xf32>
    %cst_97 = arith.constant 1.000000e+00 : f32
    %448 = vector.broadcast %cst_97 : f32 to vector<2x64xf32>
    %449 = arith.addf %448, %447 : vector<2x64xf32>
    %450 = arith.divf %448, %449 : vector<2x64xf32>
    %451 = vector.extract_strided_slice %444 {offsets = [0, 64], sizes = [2, 64], strides = [1, 1]} : vector<2x256xf32> to vector<2x64xf32>
    %452 = arith.negf %451 : vector<2x64xf32>
    %453 = math.exp %452 : vector<2x64xf32>
    %cst_98 = arith.constant 1.000000e+00 : f32
    %454 = vector.broadcast %cst_98 : f32 to vector<2x64xf32>
    %455 = arith.addf %454, %453 : vector<2x64xf32>
    %456 = arith.divf %454, %455 : vector<2x64xf32>
    %457 = vector.extract_strided_slice %444 {offsets = [0, 128], sizes = [2, 64], strides = [1, 1]} : vector<2x256xf32> to vector<2x64xf32>
    %458 = math.tanh %457 : vector<2x64xf32>
    %459 = vector.extract_strided_slice %444 {offsets = [0, 192], sizes = [2, 64], strides = [1, 1]} : vector<2x256xf32> to vector<2x64xf32>
    %460 = arith.negf %459 : vector<2x64xf32>
    %461 = math.exp %460 : vector<2x64xf32>
    %cst_99 = arith.constant 1.000000e+00 : f32
    %462 = vector.broadcast %cst_99 : f32 to vector<2x64xf32>
    %463 = arith.addf %462, %461 : vector<2x64xf32>
    %464 = arith.divf %462, %463 : vector<2x64xf32>
    %465 = arith.mulf %456, %437 : vector<2x64xf32>
    %466 = arith.mulf %450, %458 : vector<2x64xf32>
    %467 = arith.addf %465, %466 : vector<2x64xf32>
    %468 = math.tanh %467 : vector<2x64xf32>
    %469 = arith.mulf %464, %468 : vector<2x64xf32>
    %c0_100 = arith.constant 0 : index
    %c0_101 = arith.constant 0 : index
    %470 = vector.load %arg2[%c0_100, %c0_101] : memref<16x4xf32, #tpu.memory_space<vmem>>, vector<16x4xf32>
    %471 = arith.truncf %470 : vector<16x4xf32> to vector<16x4xbf16>
    %c0_102 = arith.constant 0 : index
    %c0_103 = arith.constant 0 : index
    %472 = vector.load %arg11[%c0_102, %c0_103] : memref<4x64xbf16, #tpu.memory_space<vmem>>, vector<4x64xbf16>
    %cst_104 = arith.constant dense<0.000000e+00> : vector<16x64xf32>
    %473 = tpu.matmul %471, %472, %cst_104 {dimension_numbers = #tpu.dot_dimension_numbers<[1], [0], [0], [1], [0, 0, 1, 1], [], []>} : vector<16x4xbf16>, vector<4x64xbf16>, vector<16x64xf32> -> vector<16x64xf32>
    %c0_105 = arith.constant 0 : index
    %c0_106 = arith.constant 0 : index
    %474 = vector.load %arg13[%c0_105, %c0_106] : memref<1x64xf32, #tpu.memory_space<vmem>>, vector<1x64xf32>
    %475 = vector.broadcast %474 : vector<1x64xf32> to vector<16x64xf32>
    %476 = arith.addf %473, %475 : vector<16x64xf32>
    %477 = vector.extract_strided_slice %476 {offsets = [0, 0], sizes = [2, 64], strides = [1, 1]} : vector<16x64xf32> to vector<2x64xf32>
    %478 = vector.extract_strided_slice %477 {offsets = [0, 0], sizes = [2, 16], strides = [1, 1]} : vector<2x64xf32> to vector<2x16xf32>
    %479 = arith.negf %478 : vector<2x16xf32>
    %480 = math.exp %479 : vector<2x16xf32>
    %cst_107 = arith.constant 1.000000e+00 : f32
    %481 = vector.broadcast %cst_107 : f32 to vector<2x16xf32>
    %482 = arith.addf %481, %480 : vector<2x16xf32>
    %483 = arith.divf %481, %482 : vector<2x16xf32>
    %484 = vector.extract_strided_slice %477 {offsets = [0, 32], sizes = [2, 16], strides = [1, 1]} : vector<2x64xf32> to vector<2x16xf32>
    %485 = math.tanh %484 : vector<2x16xf32>
    %486 = vector.extract_strided_slice %477 {offsets = [0, 48], sizes = [2, 16], strides = [1, 1]} : vector<2x64xf32> to vector<2x16xf32>
    %487 = arith.negf %486 : vector<2x16xf32>
    %488 = math.exp %487 : vector<2x16xf32>
    %cst_108 = arith.constant 1.000000e+00 : f32
    %489 = vector.broadcast %cst_108 : f32 to vector<2x16xf32>
    %490 = arith.addf %489, %488 : vector<2x16xf32>
    %491 = arith.divf %489, %490 : vector<2x16xf32>
    %492 = arith.mulf %483, %485 : vector<2x16xf32>
    %493 = math.tanh %492 : vector<2x16xf32>
    %494 = arith.mulf %491, %493 : vector<2x16xf32>
    %495 = vector.extract_strided_slice %476 {offsets = [2, 0], sizes = [2, 64], strides = [1, 1]} : vector<16x64xf32> to vector<2x64xf32>
    %496 = arith.truncf %494 : vector<2x16xf32> to vector<2x16xbf16>
    %c0_109 = arith.constant 0 : index
    %c0_110 = arith.constant 0 : index
    %497 = vector.load %arg12[%c0_109, %c0_110] : memref<16x64xbf16, #tpu.memory_space<vmem>>, vector<16x64xbf16>
    %cst_111 = arith.constant dense<0.000000e+00> : vector<2x64xf32>
    %498 = tpu.matmul %496, %497, %cst_111 {dimension_numbers = #tpu.dot_dimension_numbers<[1], [0], [0], [1], [0, 0, 1, 1], [], []>} : vector<2x16xbf16>, vector<16x64xbf16>, vector<2x64xf32> -> vector<2x64xf32>
    %499 = arith.addf %495, %498 : vector<2x64xf32>
    %500 = vector.extract_strided_slice %499 {offsets = [0, 0], sizes = [2, 16], strides = [1, 1]} : vector<2x64xf32> to vector<2x16xf32>
    %501 = arith.negf %500 : vector<2x16xf32>
    %502 = math.exp %501 : vector<2x16xf32>
    %cst_112 = arith.constant 1.000000e+00 : f32
    %503 = vector.broadcast %cst_112 : f32 to vector<2x16xf32>
    %504 = arith.addf %503, %502 : vector<2x16xf32>
    %505 = arith.divf %503, %504 : vector<2x16xf32>
    %506 = vector.extract_strided_slice %499 {offsets = [0, 16], sizes = [2, 16], strides = [1, 1]} : vector<2x64xf32> to vector<2x16xf32>
    %507 = arith.negf %506 : vector<2x16xf32>
    %508 = math.exp %507 : vector<2x16xf32>
    %cst_113 = arith.constant 1.000000e+00 : f32
    %509 = vector.broadcast %cst_113 : f32 to vector<2x16xf32>
    %510 = arith.addf %509, %508 : vector<2x16xf32>
    %511 = arith.divf %509, %510 : vector<2x16xf32>
    %512 = vector.extract_strided_slice %499 {offsets = [0, 32], sizes = [2, 16], strides = [1, 1]} : vector<2x64xf32> to vector<2x16xf32>
    %513 = math.tanh %512 : vector<2x16xf32>
    %514 = vector.extract_strided_slice %499 {offsets = [0, 48], sizes = [2, 16], strides = [1, 1]} : vector<2x64xf32> to vector<2x16xf32>
    %515 = arith.negf %514 : vector<2x16xf32>
    %516 = math.exp %515 : vector<2x16xf32>
    %cst_114 = arith.constant 1.000000e+00 : f32
    %517 = vector.broadcast %cst_114 : f32 to vector<2x16xf32>
    %518 = arith.addf %517, %516 : vector<2x16xf32>
    %519 = arith.divf %517, %518 : vector<2x16xf32>
    %520 = arith.mulf %511, %492 : vector<2x16xf32>
    %521 = arith.mulf %505, %513 : vector<2x16xf32>
    %522 = arith.addf %520, %521 : vector<2x16xf32>
    %523 = math.tanh %522 : vector<2x16xf32>
    %524 = arith.mulf %519, %523 : vector<2x16xf32>
    %525 = vector.extract_strided_slice %476 {offsets = [4, 0], sizes = [2, 64], strides = [1, 1]} : vector<16x64xf32> to vector<2x64xf32>
    %526 = arith.truncf %524 : vector<2x16xf32> to vector<2x16xbf16>
    %c0_115 = arith.constant 0 : index
    %c0_116 = arith.constant 0 : index
    %527 = vector.load %arg12[%c0_115, %c0_116] : memref<16x64xbf16, #tpu.memory_space<vmem>>, vector<16x64xbf16>
    %cst_117 = arith.constant dense<0.000000e+00> : vector<2x64xf32>
    %528 = tpu.matmul %526, %527, %cst_117 {dimension_numbers = #tpu.dot_dimension_numbers<[1], [0], [0], [1], [0, 0, 1, 1], [], []>} : vector<2x16xbf16>, vector<16x64xbf16>, vector<2x64xf32> -> vector<2x64xf32>
    %529 = arith.addf %525, %528 : vector<2x64xf32>
    %530 = vector.extract_strided_slice %529 {offsets = [0, 0], sizes = [2, 16], strides = [1, 1]} : vector<2x64xf32> to vector<2x16xf32>
    %531 = arith.negf %530 : vector<2x16xf32>
    %532 = math.exp %531 : vector<2x16xf32>
    %cst_118 = arith.constant 1.000000e+00 : f32
    %533 = vector.broadcast %cst_118 : f32 to vector<2x16xf32>
    %534 = arith.addf %533, %532 : vector<2x16xf32>
    %535 = arith.divf %533, %534 : vector<2x16xf32>
    %536 = vector.extract_strided_slice %529 {offsets = [0, 16], sizes = [2, 16], strides = [1, 1]} : vector<2x64xf32> to vector<2x16xf32>
    %537 = arith.negf %536 : vector<2x16xf32>
    %538 = math.exp %537 : vector<2x16xf32>
    %cst_119 = arith.constant 1.000000e+00 : f32
    %539 = vector.broadcast %cst_119 : f32 to vector<2x16xf32>
    %540 = arith.addf %539, %538 : vector<2x16xf32>
    %541 = arith.divf %539, %540 : vector<2x16xf32>
    %542 = vector.extract_strided_slice %529 {offsets = [0, 32], sizes = [2, 16], strides = [1, 1]} : vector<2x64xf32> to vector<2x16xf32>
    %543 = math.tanh %542 : vector<2x16xf32>
    %544 = vector.extract_strided_slice %529 {offsets = [0, 48], sizes = [2, 16], strides = [1, 1]} : vector<2x64xf32> to vector<2x16xf32>
    %545 = arith.negf %544 : vector<2x16xf32>
    %546 = math.exp %545 : vector<2x16xf32>
    %cst_120 = arith.constant 1.000000e+00 : f32
    %547 = vector.broadcast %cst_120 : f32 to vector<2x16xf32>
    %548 = arith.addf %547, %546 : vector<2x16xf32>
    %549 = arith.divf %547, %548 : vector<2x16xf32>
    %550 = arith.mulf %541, %522 : vector<2x16xf32>
    %551 = arith.mulf %535, %543 : vector<2x16xf32>
    %552 = arith.addf %550, %551 : vector<2x16xf32>
    %553 = math.tanh %552 : vector<2x16xf32>
    %554 = arith.mulf %549, %553 : vector<2x16xf32>
    %555 = vector.extract_strided_slice %476 {offsets = [6, 0], sizes = [2, 64], strides = [1, 1]} : vector<16x64xf32> to vector<2x64xf32>
    %556 = arith.truncf %554 : vector<2x16xf32> to vector<2x16xbf16>
    %c0_121 = arith.constant 0 : index
    %c0_122 = arith.constant 0 : index
    %557 = vector.load %arg12[%c0_121, %c0_122] : memref<16x64xbf16, #tpu.memory_space<vmem>>, vector<16x64xbf16>
    %cst_123 = arith.constant dense<0.000000e+00> : vector<2x64xf32>
    %558 = tpu.matmul %556, %557, %cst_123 {dimension_numbers = #tpu.dot_dimension_numbers<[1], [0], [0], [1], [0, 0, 1, 1], [], []>} : vector<2x16xbf16>, vector<16x64xbf16>, vector<2x64xf32> -> vector<2x64xf32>
    %559 = arith.addf %555, %558 : vector<2x64xf32>
    %560 = vector.extract_strided_slice %559 {offsets = [0, 0], sizes = [2, 16], strides = [1, 1]} : vector<2x64xf32> to vector<2x16xf32>
    %561 = arith.negf %560 : vector<2x16xf32>
    %562 = math.exp %561 : vector<2x16xf32>
    %cst_124 = arith.constant 1.000000e+00 : f32
    %563 = vector.broadcast %cst_124 : f32 to vector<2x16xf32>
    %564 = arith.addf %563, %562 : vector<2x16xf32>
    %565 = arith.divf %563, %564 : vector<2x16xf32>
    %566 = vector.extract_strided_slice %559 {offsets = [0, 16], sizes = [2, 16], strides = [1, 1]} : vector<2x64xf32> to vector<2x16xf32>
    %567 = arith.negf %566 : vector<2x16xf32>
    %568 = math.exp %567 : vector<2x16xf32>
    %cst_125 = arith.constant 1.000000e+00 : f32
    %569 = vector.broadcast %cst_125 : f32 to vector<2x16xf32>
    %570 = arith.addf %569, %568 : vector<2x16xf32>
    %571 = arith.divf %569, %570 : vector<2x16xf32>
    %572 = vector.extract_strided_slice %559 {offsets = [0, 32], sizes = [2, 16], strides = [1, 1]} : vector<2x64xf32> to vector<2x16xf32>
    %573 = math.tanh %572 : vector<2x16xf32>
    %574 = vector.extract_strided_slice %559 {offsets = [0, 48], sizes = [2, 16], strides = [1, 1]} : vector<2x64xf32> to vector<2x16xf32>
    %575 = arith.negf %574 : vector<2x16xf32>
    %576 = math.exp %575 : vector<2x16xf32>
    %cst_126 = arith.constant 1.000000e+00 : f32
    %577 = vector.broadcast %cst_126 : f32 to vector<2x16xf32>
    %578 = arith.addf %577, %576 : vector<2x16xf32>
    %579 = arith.divf %577, %578 : vector<2x16xf32>
    %580 = arith.mulf %571, %552 : vector<2x16xf32>
    %581 = arith.mulf %565, %573 : vector<2x16xf32>
    %582 = arith.addf %580, %581 : vector<2x16xf32>
    %583 = math.tanh %582 : vector<2x16xf32>
    %584 = arith.mulf %579, %583 : vector<2x16xf32>
    %585 = vector.extract_strided_slice %476 {offsets = [8, 0], sizes = [2, 64], strides = [1, 1]} : vector<16x64xf32> to vector<2x64xf32>
    %586 = arith.truncf %584 : vector<2x16xf32> to vector<2x16xbf16>
    %c0_127 = arith.constant 0 : index
    %c0_128 = arith.constant 0 : index
    %587 = vector.load %arg12[%c0_127, %c0_128] : memref<16x64xbf16, #tpu.memory_space<vmem>>, vector<16x64xbf16>
    %cst_129 = arith.constant dense<0.000000e+00> : vector<2x64xf32>
    %588 = tpu.matmul %586, %587, %cst_129 {dimension_numbers = #tpu.dot_dimension_numbers<[1], [0], [0], [1], [0, 0, 1, 1], [], []>} : vector<2x16xbf16>, vector<16x64xbf16>, vector<2x64xf32> -> vector<2x64xf32>
    %589 = arith.addf %585, %588 : vector<2x64xf32>
    %590 = vector.extract_strided_slice %589 {offsets = [0, 0], sizes = [2, 16], strides = [1, 1]} : vector<2x64xf32> to vector<2x16xf32>
    %591 = arith.negf %590 : vector<2x16xf32>
    %592 = math.exp %591 : vector<2x16xf32>
    %cst_130 = arith.constant 1.000000e+00 : f32
    %593 = vector.broadcast %cst_130 : f32 to vector<2x16xf32>
    %594 = arith.addf %593, %592 : vector<2x16xf32>
    %595 = arith.divf %593, %594 : vector<2x16xf32>
    %596 = vector.extract_strided_slice %589 {offsets = [0, 16], sizes = [2, 16], strides = [1, 1]} : vector<2x64xf32> to vector<2x16xf32>
    %597 = arith.negf %596 : vector<2x16xf32>
    %598 = math.exp %597 : vector<2x16xf32>
    %cst_131 = arith.constant 1.000000e+00 : f32
    %599 = vector.broadcast %cst_131 : f32 to vector<2x16xf32>
    %600 = arith.addf %599, %598 : vector<2x16xf32>
    %601 = arith.divf %599, %600 : vector<2x16xf32>
    %602 = vector.extract_strided_slice %589 {offsets = [0, 32], sizes = [2, 16], strides = [1, 1]} : vector<2x64xf32> to vector<2x16xf32>
    %603 = math.tanh %602 : vector<2x16xf32>
    %604 = vector.extract_strided_slice %589 {offsets = [0, 48], sizes = [2, 16], strides = [1, 1]} : vector<2x64xf32> to vector<2x16xf32>
    %605 = arith.negf %604 : vector<2x16xf32>
    %606 = math.exp %605 : vector<2x16xf32>
    %cst_132 = arith.constant 1.000000e+00 : f32
    %607 = vector.broadcast %cst_132 : f32 to vector<2x16xf32>
    %608 = arith.addf %607, %606 : vector<2x16xf32>
    %609 = arith.divf %607, %608 : vector<2x16xf32>
    %610 = arith.mulf %601, %582 : vector<2x16xf32>
    %611 = arith.mulf %595, %603 : vector<2x16xf32>
    %612 = arith.addf %610, %611 : vector<2x16xf32>
    %613 = math.tanh %612 : vector<2x16xf32>
    %614 = arith.mulf %609, %613 : vector<2x16xf32>
    %615 = vector.extract_strided_slice %476 {offsets = [10, 0], sizes = [2, 64], strides = [1, 1]} : vector<16x64xf32> to vector<2x64xf32>
    %616 = arith.truncf %614 : vector<2x16xf32> to vector<2x16xbf16>
    %c0_133 = arith.constant 0 : index
    %c0_134 = arith.constant 0 : index
    %617 = vector.load %arg12[%c0_133, %c0_134] : memref<16x64xbf16, #tpu.memory_space<vmem>>, vector<16x64xbf16>
    %cst_135 = arith.constant dense<0.000000e+00> : vector<2x64xf32>
    %618 = tpu.matmul %616, %617, %cst_135 {dimension_numbers = #tpu.dot_dimension_numbers<[1], [0], [0], [1], [0, 0, 1, 1], [], []>} : vector<2x16xbf16>, vector<16x64xbf16>, vector<2x64xf32> -> vector<2x64xf32>
    %619 = arith.addf %615, %618 : vector<2x64xf32>
    %620 = vector.extract_strided_slice %619 {offsets = [0, 0], sizes = [2, 16], strides = [1, 1]} : vector<2x64xf32> to vector<2x16xf32>
    %621 = arith.negf %620 : vector<2x16xf32>
    %622 = math.exp %621 : vector<2x16xf32>
    %cst_136 = arith.constant 1.000000e+00 : f32
    %623 = vector.broadcast %cst_136 : f32 to vector<2x16xf32>
    %624 = arith.addf %623, %622 : vector<2x16xf32>
    %625 = arith.divf %623, %624 : vector<2x16xf32>
    %626 = vector.extract_strided_slice %619 {offsets = [0, 16], sizes = [2, 16], strides = [1, 1]} : vector<2x64xf32> to vector<2x16xf32>
    %627 = arith.negf %626 : vector<2x16xf32>
    %628 = math.exp %627 : vector<2x16xf32>
    %cst_137 = arith.constant 1.000000e+00 : f32
    %629 = vector.broadcast %cst_137 : f32 to vector<2x16xf32>
    %630 = arith.addf %629, %628 : vector<2x16xf32>
    %631 = arith.divf %629, %630 : vector<2x16xf32>
    %632 = vector.extract_strided_slice %619 {offsets = [0, 32], sizes = [2, 16], strides = [1, 1]} : vector<2x64xf32> to vector<2x16xf32>
    %633 = math.tanh %632 : vector<2x16xf32>
    %634 = vector.extract_strided_slice %619 {offsets = [0, 48], sizes = [2, 16], strides = [1, 1]} : vector<2x64xf32> to vector<2x16xf32>
    %635 = arith.negf %634 : vector<2x16xf32>
    %636 = math.exp %635 : vector<2x16xf32>
    %cst_138 = arith.constant 1.000000e+00 : f32
    %637 = vector.broadcast %cst_138 : f32 to vector<2x16xf32>
    %638 = arith.addf %637, %636 : vector<2x16xf32>
    %639 = arith.divf %637, %638 : vector<2x16xf32>
    %640 = arith.mulf %631, %612 : vector<2x16xf32>
    %641 = arith.mulf %625, %633 : vector<2x16xf32>
    %642 = arith.addf %640, %641 : vector<2x16xf32>
    %643 = math.tanh %642 : vector<2x16xf32>
    %644 = arith.mulf %639, %643 : vector<2x16xf32>
    %645 = vector.extract_strided_slice %476 {offsets = [12, 0], sizes = [2, 64], strides = [1, 1]} : vector<16x64xf32> to vector<2x64xf32>
    %646 = arith.truncf %644 : vector<2x16xf32> to vector<2x16xbf16>
    %c0_139 = arith.constant 0 : index
    %c0_140 = arith.constant 0 : index
    %647 = vector.load %arg12[%c0_139, %c0_140] : memref<16x64xbf16, #tpu.memory_space<vmem>>, vector<16x64xbf16>
    %cst_141 = arith.constant dense<0.000000e+00> : vector<2x64xf32>
    %648 = tpu.matmul %646, %647, %cst_141 {dimension_numbers = #tpu.dot_dimension_numbers<[1], [0], [0], [1], [0, 0, 1, 1], [], []>} : vector<2x16xbf16>, vector<16x64xbf16>, vector<2x64xf32> -> vector<2x64xf32>
    %649 = arith.addf %645, %648 : vector<2x64xf32>
    %650 = vector.extract_strided_slice %649 {offsets = [0, 0], sizes = [2, 16], strides = [1, 1]} : vector<2x64xf32> to vector<2x16xf32>
    %651 = arith.negf %650 : vector<2x16xf32>
    %652 = math.exp %651 : vector<2x16xf32>
    %cst_142 = arith.constant 1.000000e+00 : f32
    %653 = vector.broadcast %cst_142 : f32 to vector<2x16xf32>
    %654 = arith.addf %653, %652 : vector<2x16xf32>
    %655 = arith.divf %653, %654 : vector<2x16xf32>
    %656 = vector.extract_strided_slice %649 {offsets = [0, 16], sizes = [2, 16], strides = [1, 1]} : vector<2x64xf32> to vector<2x16xf32>
    %657 = arith.negf %656 : vector<2x16xf32>
    %658 = math.exp %657 : vector<2x16xf32>
    %cst_143 = arith.constant 1.000000e+00 : f32
    %659 = vector.broadcast %cst_143 : f32 to vector<2x16xf32>
    %660 = arith.addf %659, %658 : vector<2x16xf32>
    %661 = arith.divf %659, %660 : vector<2x16xf32>
    %662 = vector.extract_strided_slice %649 {offsets = [0, 32], sizes = [2, 16], strides = [1, 1]} : vector<2x64xf32> to vector<2x16xf32>
    %663 = math.tanh %662 : vector<2x16xf32>
    %664 = vector.extract_strided_slice %649 {offsets = [0, 48], sizes = [2, 16], strides = [1, 1]} : vector<2x64xf32> to vector<2x16xf32>
    %665 = arith.negf %664 : vector<2x16xf32>
    %666 = math.exp %665 : vector<2x16xf32>
    %cst_144 = arith.constant 1.000000e+00 : f32
    %667 = vector.broadcast %cst_144 : f32 to vector<2x16xf32>
    %668 = arith.addf %667, %666 : vector<2x16xf32>
    %669 = arith.divf %667, %668 : vector<2x16xf32>
    %670 = arith.mulf %661, %642 : vector<2x16xf32>
    %671 = arith.mulf %655, %663 : vector<2x16xf32>
    %672 = arith.addf %670, %671 : vector<2x16xf32>
    %673 = math.tanh %672 : vector<2x16xf32>
    %674 = arith.mulf %669, %673 : vector<2x16xf32>
    %675 = vector.extract_strided_slice %476 {offsets = [14, 0], sizes = [2, 64], strides = [1, 1]} : vector<16x64xf32> to vector<2x64xf32>
    %676 = arith.truncf %674 : vector<2x16xf32> to vector<2x16xbf16>
    %c0_145 = arith.constant 0 : index
    %c0_146 = arith.constant 0 : index
    %677 = vector.load %arg12[%c0_145, %c0_146] : memref<16x64xbf16, #tpu.memory_space<vmem>>, vector<16x64xbf16>
    %cst_147 = arith.constant dense<0.000000e+00> : vector<2x64xf32>
    %678 = tpu.matmul %676, %677, %cst_147 {dimension_numbers = #tpu.dot_dimension_numbers<[1], [0], [0], [1], [0, 0, 1, 1], [], []>} : vector<2x16xbf16>, vector<16x64xbf16>, vector<2x64xf32> -> vector<2x64xf32>
    %679 = arith.addf %675, %678 : vector<2x64xf32>
    %680 = vector.extract_strided_slice %679 {offsets = [0, 0], sizes = [2, 16], strides = [1, 1]} : vector<2x64xf32> to vector<2x16xf32>
    %681 = arith.negf %680 : vector<2x16xf32>
    %682 = math.exp %681 : vector<2x16xf32>
    %cst_148 = arith.constant 1.000000e+00 : f32
    %683 = vector.broadcast %cst_148 : f32 to vector<2x16xf32>
    %684 = arith.addf %683, %682 : vector<2x16xf32>
    %685 = arith.divf %683, %684 : vector<2x16xf32>
    %686 = vector.extract_strided_slice %679 {offsets = [0, 16], sizes = [2, 16], strides = [1, 1]} : vector<2x64xf32> to vector<2x16xf32>
    %687 = arith.negf %686 : vector<2x16xf32>
    %688 = math.exp %687 : vector<2x16xf32>
    %cst_149 = arith.constant 1.000000e+00 : f32
    %689 = vector.broadcast %cst_149 : f32 to vector<2x16xf32>
    %690 = arith.addf %689, %688 : vector<2x16xf32>
    %691 = arith.divf %689, %690 : vector<2x16xf32>
    %692 = vector.extract_strided_slice %679 {offsets = [0, 32], sizes = [2, 16], strides = [1, 1]} : vector<2x64xf32> to vector<2x16xf32>
    %693 = math.tanh %692 : vector<2x16xf32>
    %694 = vector.extract_strided_slice %679 {offsets = [0, 48], sizes = [2, 16], strides = [1, 1]} : vector<2x64xf32> to vector<2x16xf32>
    %695 = arith.negf %694 : vector<2x16xf32>
    %696 = math.exp %695 : vector<2x16xf32>
    %cst_150 = arith.constant 1.000000e+00 : f32
    %697 = vector.broadcast %cst_150 : f32 to vector<2x16xf32>
    %698 = arith.addf %697, %696 : vector<2x16xf32>
    %699 = arith.divf %697, %698 : vector<2x16xf32>
    %700 = arith.mulf %691, %672 : vector<2x16xf32>
    %701 = arith.mulf %685, %693 : vector<2x16xf32>
    %702 = arith.addf %700, %701 : vector<2x16xf32>
    %703 = math.tanh %702 : vector<2x16xf32>
    %704 = arith.mulf %699, %703 : vector<2x16xf32>
    %c0_151 = arith.constant 0 : index
    %c0_152 = arith.constant 0 : index
    %705 = vector.load %arg4[%c0_151, %c0_152] : memref<2x1xf32, #tpu.memory_space<vmem>>, vector<2x1xf32>
    %706 = vector.broadcast %705 : vector<2x1xf32> to vector<2x256xf32>
    %707 = arith.mulf %234, %706 : vector<2x256xf32>
    %708 = vector.broadcast %705 : vector<2x1xf32> to vector<2x64xf32>
    %709 = arith.mulf %469, %708 : vector<2x64xf32>
    %710 = vector.broadcast %705 : vector<2x1xf32> to vector<2x16xf32>
    %711 = arith.mulf %704, %710 : vector<2x16xf32>
    %712 = arith.truncf %707 : vector<2x256xf32> to vector<2x256xbf16>
    %c0_153 = arith.constant 0 : index
    %c0_154 = arith.constant 0 : index
    %713 = vector.load %arg14[%c0_153, %c0_154] : memref<256x128xbf16, #tpu.memory_space<vmem>>, vector<256x128xbf16>
    %cst_155 = arith.constant dense<0.000000e+00> : vector<2x128xf32>
    %714 = tpu.matmul %712, %713, %cst_155 {dimension_numbers = #tpu.dot_dimension_numbers<[1], [0], [0], [1], [0, 0, 1, 1], [], []>} : vector<2x256xbf16>, vector<256x128xbf16>, vector<2x128xf32> -> vector<2x128xf32>
    %c0_156 = arith.constant 0 : index
    %c0_157 = arith.constant 0 : index
    %715 = vector.load %arg15[%c0_156, %c0_157] : memref<1x128xf32, #tpu.memory_space<vmem>>, vector<1x128xf32>
    %716 = vector.broadcast %715 : vector<1x128xf32> to vector<2x128xf32>
    %717 = arith.addf %714, %716 : vector<2x128xf32>
    %cst_158 = arith.constant 0.000000e+00 : f32
    %718 = vector.broadcast %cst_158 : f32 to vector<2x128xf32>
    %719 = arith.maximumf %717, %718 : vector<2x128xf32>
    %720 = arith.truncf %719 : vector<2x128xf32> to vector<2x128xbf16>
    %c0_159 = arith.constant 0 : index
    %c0_160 = arith.constant 0 : index
    %721 = vector.load %arg16[%c0_159, %c0_160] : memref<128x64xbf16, #tpu.memory_space<vmem>>, vector<128x64xbf16>
    %cst_161 = arith.constant dense<0.000000e+00> : vector<2x64xf32>
    %722 = tpu.matmul %720, %721, %cst_161 {dimension_numbers = #tpu.dot_dimension_numbers<[1], [0], [0], [1], [0, 0, 1, 1], [], []>} : vector<2x128xbf16>, vector<128x64xbf16>, vector<2x64xf32> -> vector<2x64xf32>
    %723 = arith.truncf %709 : vector<2x64xf32> to vector<2x64xbf16>
    %c0_162 = arith.constant 0 : index
    %c0_163 = arith.constant 0 : index
    %724 = vector.load %arg17[%c0_162, %c0_163] : memref<64x64xbf16, #tpu.memory_space<vmem>>, vector<64x64xbf16>
    %cst_164 = arith.constant dense<0.000000e+00> : vector<2x64xf32>
    %725 = tpu.matmul %723, %724, %cst_164 {dimension_numbers = #tpu.dot_dimension_numbers<[1], [0], [0], [1], [0, 0, 1, 1], [], []>} : vector<2x64xbf16>, vector<64x64xbf16>, vector<2x64xf32> -> vector<2x64xf32>
    %726 = arith.addf %722, %725 : vector<2x64xf32>
    %c0_165 = arith.constant 0 : index
    %c0_166 = arith.constant 0 : index
    %727 = vector.load %arg18[%c0_165, %c0_166] : memref<1x64xf32, #tpu.memory_space<vmem>>, vector<1x64xf32>
    %728 = vector.broadcast %727 : vector<1x64xf32> to vector<2x64xf32>
    %729 = arith.addf %726, %728 : vector<2x64xf32>
    %cst_167 = arith.constant 0.000000e+00 : f32
    %730 = vector.broadcast %cst_167 : f32 to vector<2x64xf32>
    %731 = arith.maximumf %729, %730 : vector<2x64xf32>
    %732 = arith.truncf %731 : vector<2x64xf32> to vector<2x64xbf16>
    %c0_168 = arith.constant 0 : index
    %c0_169 = arith.constant 0 : index
    %733 = vector.load %arg19[%c0_168, %c0_169] : memref<64x86xbf16, #tpu.memory_space<vmem>>, vector<64x86xbf16>
    %cst_170 = arith.constant dense<0.000000e+00> : vector<2x86xf32>
    %734 = tpu.matmul %732, %733, %cst_170 {dimension_numbers = #tpu.dot_dimension_numbers<[1], [0], [0], [1], [0, 0, 1, 1], [], []>} : vector<2x64xbf16>, vector<64x86xbf16>, vector<2x86xf32> -> vector<2x86xf32>
    %735 = arith.truncf %711 : vector<2x16xf32> to vector<2x16xbf16>
    %c0_171 = arith.constant 0 : index
    %c0_172 = arith.constant 0 : index
    %736 = vector.load %arg20[%c0_171, %c0_172] : memref<16x86xbf16, #tpu.memory_space<vmem>>, vector<16x86xbf16>
    %cst_173 = arith.constant dense<0.000000e+00> : vector<2x86xf32>
    %737 = tpu.matmul %735, %736, %cst_173 {dimension_numbers = #tpu.dot_dimension_numbers<[1], [0], [0], [1], [0, 0, 1, 1], [], []>} : vector<2x16xbf16>, vector<16x86xbf16>, vector<2x86xf32> -> vector<2x86xf32>
    %738 = arith.addf %734, %737 : vector<2x86xf32>
    %c0_174 = arith.constant 0 : index
    %c0_175 = arith.constant 0 : index
    %739 = vector.load %arg3[%c0_174, %c0_175] : memref<2x5xf32, #tpu.memory_space<vmem>>, vector<2x5xf32>
    %740 = arith.truncf %739 : vector<2x5xf32> to vector<2x5xbf16>
    %c0_176 = arith.constant 0 : index
    %c0_177 = arith.constant 0 : index
    %741 = vector.load %arg21[%c0_176, %c0_177] : memref<5x86xbf16, #tpu.memory_space<vmem>>, vector<5x86xbf16>
    %cst_178 = arith.constant dense<0.000000e+00> : vector<2x86xf32>
    %742 = tpu.matmul %740, %741, %cst_178 {dimension_numbers = #tpu.dot_dimension_numbers<[1], [0], [0], [1], [0, 0, 1, 1], [], []>} : vector<2x5xbf16>, vector<5x86xbf16>, vector<2x86xf32> -> vector<2x86xf32>
    %743 = arith.addf %738, %742 : vector<2x86xf32>
    %c0_179 = arith.constant 0 : index
    %c0_180 = arith.constant 0 : index
    %744 = vector.load %arg22[%c0_179, %c0_180] : memref<1x86xf32, #tpu.memory_space<vmem>>, vector<1x86xf32>
    %745 = vector.broadcast %744 : vector<1x86xf32> to vector<2x86xf32>
    %746 = arith.addf %743, %745 : vector<2x86xf32>
    %cst_181 = arith.constant 0.000000e+00 : f32
    %747 = vector.broadcast %cst_181 : f32 to vector<2x86xf32>
    %748 = arith.maximumf %746, %747 : vector<2x86xf32>
    %c0_182 = arith.constant 0 : index
    %c0_183 = arith.constant 0 : index
    %749 = vector.load %arg23[%c0_182, %c0_183] : memref<86x1xf32, #tpu.memory_space<vmem>>, vector<86x1xf32>
    %cst_184 = arith.constant dense<0.000000e+00> : vector<2x1xf32>
    %750 = tpu.matmul %748, %749, %cst_184 {dimension_numbers = #tpu.dot_dimension_numbers<[1], [0], [0], [1], [0, 0, 1, 1], [], []>} : vector<2x86xf32>, vector<86x1xf32>, vector<2x1xf32> -> vector<2x1xf32>
    %c0_185 = arith.constant 0 : index
    %c0_186 = arith.constant 0 : index
    %751 = vector.load %arg24[%c0_185, %c0_186] : memref<1x1xf32, #tpu.memory_space<vmem>>, vector<1x1xf32>
    %752 = vector.broadcast %751 : vector<1x1xf32> to vector<2x1xf32>
    %753 = arith.addf %750, %752 : vector<2x1xf32>
    %754 = arith.negf %753 : vector<2x1xf32>
    %755 = math.exp %754 : vector<2x1xf32>
    %cst_187 = arith.constant 1.000000e+00 : f32
    %756 = vector.broadcast %cst_187 : f32 to vector<2x1xf32>
    %757 = arith.addf %756, %755 : vector<2x1xf32>
    %758 = arith.divf %756, %757 : vector<2x1xf32>
    %c0_188 = arith.constant 0 : index
    %c0_189 = arith.constant 0 : index
    %759 = vector.load %arg25[%c0_188, %c0_189] : memref<2x1xf32, #tpu.memory_space<vmem>>, vector<2x1xf32>
    tpu.vector_store %arg25[%c0_188, %c0_189], %758 {strides = array<i32>} : memref<2x1xf32, #tpu.memory_space<vmem>>, vector<2x1xf32>,
    return
  }
}

</mosaic_0001>

<bundles_post_ra>
// kernel: tpu_custom_call.1
= control target key start
LH: loop header
LB: loop body
LE: loop exit
PB: predicated region body
PF: predicated region fallthrough
CT: control target
= control target key end

     0   :  { %s9304_s0 = inlined_call_operand.vmem [shape: f32[16,256], index: 0, kind: input, shape index: {}]   ;;  %s9305_s1 = inlined_call_operand.vmem [shape: f32[16,8], index: 1, kind: input, shape index: {}]   ;;  %s9306_s2 = inlined_call_operand.vmem [shape: f32[16,4], index: 2, kind: input, shape index: {}]   ;;  %s9307_s3 = inlined_call_operand.hbm [shape: f32[2,5], index: 3, kind: input, shape index: {}]   ;;  %s9308_s4 = inlined_call_operand.vmem [shape: f32[2,1], index: 4, kind: input, shape index: {}]   ;;  %s9309_s5 = inlined_call_operand.hbm [shape: bf16[256,1024], index: 5, kind: input, shape index: {}]   ;;  %s9310_s6 = inlined_call_operand.hbm [shape: bf16[256,1024], index: 6, kind: input, shape index: {}]   ;;  %s9311_s7 = inlined_call_operand.hbm [shape: f32[1,1024], index: 7, kind: input, shape index: {}]   ;;  %s9312_s8 = inlined_call_operand.hbm [shape: bf16[8,256], index: 8, kind: input, shape index: {}]   ;;  %s9313_s9 = inlined_call_operand.vmem [shape: bf16[64,256], index: 9, kind: input, shape index: {}]   ;;  %s9314_s10 = inlined_call_operand.hbm [shape: f32[1,256], index: 10, kind: input, shape index: {}]   ;;  %s9315_s11 = inlined_call_operand.hbm [shape: bf16[4,64], index: 11, kind: input, shape index: {}]   ;;  %s9316_s12 = inlined_call_operand.hbm [shape: bf16[16,64], index: 12, kind: input, shape index: {}]   ;;  %s9317_s13 = inlined_call_operand.hbm [shape: f32[1,64], index: 13, kind: input, shape index: {}]   ;;  %s9318_s14 = inlined_call_operand.vmem [shape: bf16[256,128], index: 14, kind: input, shape index: {}]   ;;  %s9319_s15 = inlined_call_operand.hbm [shape: f32[1,128], index: 15, kind: input, shape index: {}]   ;;  %s9320_s16 = inlined_call_operand.vmem [shape: bf16[128,64], index: 16, kind: input, shape index: {}]   ;;  %s9321_s17 = inlined_call_operand.hbm [shape: bf16[64,64], index: 17, kind: input, shape index: {}]   ;;  %s9322_s18 = inlined_call_operand.hbm [shape: f32[1,64], index: 18, kind: input, shape index: {}]   ;;  %s9323_s19 = inlined_call_operand.hbm [shape: bf16[64,86], index: 19, kind: input, shape index: {}]   ;;  %s9324_s20 = inlined_call_operand.vmem [shape: bf16[16,86], index: 20, kind: input, shape index: {}]   ;;  %s9325_s21 = inlined_call_operand.vmem [shape: bf16[5,86], index: 21, kind: input, shape index: {}]   ;;  %s9326_s22 = inlined_call_operand.vmem [shape: f32[1,86], index: 22, kind: input, shape index: {}]   ;;  %s9327_s23 = inlined_call_operand.vmem [shape: f32[86,1], index: 23, kind: input, shape index: {}]   ;;  %s9328_s24 = inlined_call_operand.<no memory space> [shape: f32[1,1], index: 24, kind: input, shape index: {}]   ;;  %s9329_s25 = inlined_call_operand.vmem [shape: f32[2,1], index: 25, kind: output, shape index: {}]  }
   0x1   :  { %9641 = sst [smem:[#allocation181_spill]] %s9304_s0  ;;  %v30_v0 = vstv %s9328_s24 }
   0x2   :  { %9642 = sst [smem:[#allocation182_spill]] %s9305_s1  ;;  %31 = vst [vmem:[#allocation2] sm:$0x1] %v30_v0 }
   0x3   :  { %9643 = sst [smem:[#allocation183_spill]] %s9306_s2 }
   0x4   :  { %9644 = sst [smem:[#allocation184_spill]] %s9307_s3 }
   0x5   :  { %9645 = sst [smem:[#allocation185_spill]] %s9308_s4 }
   0x6   :  { %9646 = sst [smem:[#allocation186_spill]] %s9309_s5 }
   0x7   :  { %9647 = sst [smem:[#allocation187_spill]] %s9310_s6 }
   0x8   :  { %9648 = sst [smem:[#allocation188_spill]] %s9311_s7 }
   0x9   :  { %9649 = sst [smem:[#allocation189_spill]] %s9312_s8 }
   0xa   :  { %9650 = sst [smem:[#allocation190_spill]] %s9313_s9 }
   0xb   :  { %32 = vsyncpa [#allocation4], 0 }
   0xc   :  { %33 = vsyncpa [#allocation6], 0 }
   0xd   :  { %34 = vsyncpa [#allocation9], 0 }
   0xe   :  { %35 = vsyncpa [#allocation12], 0 }
   0xf   :  { %36 = vsyncpa [#allocation15], 0 }
  0x10   :  { %37 = vsyncpa [#allocation18], 0 }
  0x11   :  { %38 = vsyncpa [#allocation21], 0  ;;  %s7211_s6 = smov [#allocation5]  }
  0x12   :  { %s62_s30 = sshll.u32 %s7211_s6, 4  ;;  %s63_s30 = int_to_ptr.vmem [resolvable:$true] %s62_s30 }
  0x13   :  { %s6945_s7 = scalar_lea.vmem %s63_s30, 16384  ;;  %p6950_p1 = scmp.lt.s32.totalorder %s63_s30, %s63_s30 }
  0x14   :  { %p6946_p0 = scmp.ne.s32.totalorder %s63_s30, %s6945_s7  ;;  %p6951_p2 = scmp.lt.s32.totalorder %s6945_s7, %s6945_s7 }
  0x16   :  { %p6952_p3 = por %p6951_p2, %p6950_p1 }
  0x18   :  { %p6953_p4 = pnand %p6952_p3, %p6946_p0 }
  0x1a   :  { %6956 = shalt.err (!%p6953_p4)
}
  0x1b   :  { %s7212_s3 = smov 512   ;;  %s7213_s24 = smov 32  }
  0x1c   :  { %s9651_s8 = sld [smem:[#allocation186_spill]]  ;;  %s7214_s27 = smov [#allocation8]  }
  0x1d   :  { %s87_s4 = sshll.u32 %s7214_s27, 4  ;;  %s7215_s28 = smov [#allocation11]   ;;  %s88_s4 = int_to_ptr.vmem [resolvable:$true] %s87_s4 }
  0x1e   :  { %s109_s9 = sshll.u32 %s7215_s28, 4  ;;  %s6965_s5 = scalar_lea.vmem %s88_s4, 128  ;;  %s110_s9 = int_to_ptr.vmem [resolvable:$true] %s109_s9 }
  0x1f   :  { %p6966_p5 = scmp.ne.s32.totalorder %s88_s4, %s6965_s5  ;;  %p6970_p6 = scmp.lt.s32.totalorder %s88_s4, %s88_s4 }
  0x20   :  { %p6971_p7 = scmp.lt.s32.totalorder %s6965_s5, %s6965_s5 }
  0x22   :  { %68 = dma.hbm_to_vmem [thread:$0]  %s9651_s8, 16384, %s63_s30, [#allocation6], %s7212_s3, %s7212_s3, %s7213_s24  }
  0x23   :  { %p6972_p8 = por %p6971_p7, %p6970_p6 }
  0x25   :  { %p6973_p9 = pnand %p6972_p8, %p6966_p5 }
  0x27   :  { %6976 = shalt.err (!%p6973_p9)
}
  0x28   :  { %s9652_s2 = sld [smem:[#allocation188_spill]]  ;;  %s6985_s6 = scalar_lea.vmem %s110_s9, 32 }
  0x29   :  { %p6986_p10 = scmp.ne.s32.totalorder %s110_s9, %s6985_s6  ;;  %p6990_p11 = scmp.lt.s32.totalorder %s110_s9, %s110_s9 }
  0x2a   :  { %p6991_p12 = scmp.lt.s32.totalorder %s6985_s6, %s6985_s6 }
  0x2c   :  { %p6992_p13 = por %p6991_p12, %p6990_p11 }
  0x2e   :  { %90 = dma.hbm_to_vmem [thread:$0]  %s9652_s2, 128, %s88_s4, [#allocation9]  }
  0x2f   :  { %p6993_p0 = pnand %p6992_p13, %p6986_p10 }
  0x31   :  { %6996 = shalt.err (!%p6993_p0)
}
  0x32   :  { %112 = dma.hbm_to_vmem [thread:$0]  %s9314_s10, 32, %s110_s9, [#allocation12]  }
  0x33   :  { %s7216_s26 = smov [#allocation14]  }
  0x34   :  { %s128_s1 = sshll.u32 %s7216_s26, 4  ;;  %s129_s1 = int_to_ptr.vmem [resolvable:$true] %s128_s1 }
  0x35   :  { %s7005_s8 = scalar_lea.vmem %s129_s1, 128  ;;  %p7010_p2 = scmp.lt.s32.totalorder %s129_s1, %s129_s1 }
  0x36   :  { %p7006_p1 = scmp.ne.s32.totalorder %s129_s1, %s7005_s8  ;;  %p7011_p3 = scmp.lt.s32.totalorder %s7005_s8, %s7005_s8 }
  0x38   :  { %p7012_p4 = por %p7011_p3, %p7010_p2 }
  0x3a   :  { %p7013_p5 = pnand %p7012_p4, %p7006_p1 }
  0x3c   :  { %7016 = shalt.err (!%p7013_p5)
}
  0x3d   :  { %s7217_s27 = smov 64   ;;  %s7218_s4 = smov 4  }
  0x3e   :  { %134 = dma.hbm_to_vmem [thread:$0]  %s9316_s12, 128, %s129_s1, [#allocation15], %s7217_s27, %s7217_s27, %s7218_s4  }
  0x3f   :  { %s7219_s10 = smov [#allocation17]   ;;  %s7220_s0 = smov [#allocation20]  }
  0x40   :  { %s153_s9 = sshll.u32 %s7219_s10, 4  ;;  %s177_s29 = sshll.u32 %s7220_s0, 4  ;;  %s154_s9 = int_to_ptr.vmem [resolvable:$true] %s153_s9  ;;  %s178_s29 = int_to_ptr.vmem [resolvable:$true] %s177_s29 }
  0x41   :  { %s7025_s2 = scalar_lea.vmem %s154_s9, 16  ;;  %s7029_s6 = scalar_lea.vmem %s154_s9, 32 }
  0x42   :  { %p7026_p6 = scmp.ne.s32.totalorder %s154_s9, %s7025_s2  ;;  %p7030_p7 = scmp.lt.s32.totalorder %s154_s9, %s154_s9 }
  0x43   :  { %p7031_p8 = scmp.lt.s32.totalorder %s7029_s6, %s7025_s2 }
  0x45   :  { %p7032_p9 = por %p7031_p8, %p7030_p7 }
  0x47   :  { %p7033_p10 = pnand %p7032_p9, %p7026_p6 }
  0x49   :  { %7036 = shalt.err (!%p7033_p10)
}
  0x4a   :  { %156 = dma.hbm_to_vmem [thread:$0]  %s9319_s15, 16, %s154_s9, [#allocation18]  }
  0x4b   :  { %s7045_s26 = scalar_lea.vmem %s178_s29, 16  ;;  %s7049_s12 = scalar_lea.vmem %s178_s29, 32 }
  0x4c   :  { %p7046_p11 = scmp.ne.s32.totalorder %s178_s29, %s7045_s26  ;;  %p7050_p12 = scmp.lt.s32.totalorder %s178_s29, %s178_s29 }
  0x4d   :  { %p7051_p13 = scmp.lt.s32.totalorder %s7049_s12, %s7045_s26 }
  0x4f   :  { %p7052_p0 = por %p7051_p13, %p7050_p12 }
  0x51   :  { %p7053_p1 = pnand %p7052_p0, %p7046_p11 }
  0x53   :  { %7056 = shalt.err (!%p7053_p1)
}
  0x54   :  { %180 = dma.hbm_to_vmem [thread:$0]  %s9322_s18, 16, %s178_s29, [#allocation21]  }
  0x55   :  { %s7221_s28 = smov [#allocation3]   ;;  %s7222_s10 = smov [#allocation7]  }
  0x56   :  { %s51_s5 = sshll.u32 %s7221_s28, 4  ;;  %s74_s0 = sshll.u32 %s7222_s10, 4  ;;  %s52_s5 = int_to_ptr.vmem [resolvable:$true] %s51_s5  ;;  %s75_s0 = int_to_ptr.vmem [resolvable:$true] %s74_s0 }
  0x57   :  { %s7065_s2 = scalar_lea.vmem %s52_s5, 32  ;;  %p7070_p3 = scmp.lt.s32.totalorder %s52_s5, %s52_s5 }
  0x58   :  { %p7066_p2 = scmp.ne.s32.totalorder %s52_s5, %s7065_s2  ;;  %p7071_p4 = scmp.lt.s32.totalorder %s7065_s2, %s7065_s2 }
  0x5a   :  { %p7072_p5 = por %p7071_p4, %p7070_p3 }
  0x5c   :  { %p7073_p6 = pnand %p7072_p5, %p7066_p2 }
  0x5e   :  { %7076 = shalt.err (!%p7073_p6)
}
  0x5f   :  { %s9653_s6 = sld [smem:[#allocation184_spill]]  ;;  %s7085_s30 = scalar_lea.vmem %s75_s0, 16384 }
  0x60   :  { %p7086_p7 = scmp.ne.s32.totalorder %s75_s0, %s7085_s30  ;;  %p7090_p8 = scmp.lt.s32.totalorder %s75_s0, %s75_s0 }
  0x61   :  { %p7091_p9 = scmp.lt.s32.totalorder %s7085_s30, %s7085_s30 }
  0x63   :  { %p7092_p10 = por %p7091_p9, %p7090_p8 }
  0x65   :  { %54 = dma.hbm_to_vmem [thread:$0]  %s9653_s6, 32, %s52_s5, [#allocation4]  }
  0x66   :  { %p7093_p11 = pnand %p7092_p10, %p7086_p7 }
  0x68   :  { %7096 = shalt.err (!%p7093_p11)
}
  0x69   :  { %s9654_s7 = sld [smem:[#allocation187_spill]]  ;;  %s7223_s26 = smov [#allocation10]  }
  0x6a   :  { %s97_s12 = sshll.u32 %s7223_s26, 4  ;;  %s7224_s1 = smov [#allocation13]   ;;  %s98_s12 = int_to_ptr.vmem [resolvable:$true] %s97_s12 }
  0x6b   :  { %s119_s8 = sshll.u32 %s7224_s1, 4  ;;  %s7105_s28 = scalar_lea.vmem %s98_s12, 128  ;;  %s120_s8 = int_to_ptr.vmem [resolvable:$true] %s119_s8 }
  0x6c   :  { %p7106_p12 = scmp.ne.s32.totalorder %s98_s12, %s7105_s28  ;;  %p7110_p13 = scmp.lt.s32.totalorder %s98_s12, %s98_s12 }
  0x6d   :  { %p7111_p0 = scmp.lt.s32.totalorder %s7105_s28, %s7105_s28 }
  0x6f   :  { %80 = dma.hbm_to_vmem [thread:$0]  %s9654_s7, 16384, %s75_s0, [#allocation6], %s7212_s3, %s7212_s3, %s7213_s24  }
  0x70   :  { %p7112_p1 = por %p7111_p0, %p7110_p13 }
  0x72   :  { %p7113_p2 = pnand %p7112_p1, %p7106_p12 }
  0x74   :  { %7116 = shalt.err (!%p7113_p2)
}
  0x75   :  { %s9655_s2 = sld [smem:[#allocation189_spill]]  ;;  %s7125_s15 = scalar_lea.vmem %s120_s8, 32 }
  0x76   :  { %p7126_p3 = scmp.ne.s32.totalorder %s120_s8, %s7125_s15  ;;  %p7130_p4 = scmp.lt.s32.totalorder %s120_s8, %s120_s8 }
  0x77   :  { %p7131_p5 = scmp.lt.s32.totalorder %s7125_s15, %s7125_s15 }
  0x79   :  { %p7132_p6 = por %p7131_p5, %p7130_p4 }
  0x7b   :  { %100 = dma.hbm_to_vmem [thread:$0]  %s9655_s2, 128, %s98_s12, [#allocation9]  }
  0x7c   :  { %p7133_p7 = pnand %p7132_p6, %p7126_p3 }
  0x7e   :  { %7136 = shalt.err (!%p7133_p7)
}
  0x7f   :  { %122 = dma.hbm_to_vmem [thread:$0]  %s9315_s11, 32, %s120_s8, [#allocation12]  }
  0x80   :  { %s7225_s9 = smov [#allocation16]   ;;  %s7226_s30 = smov [#allocation19]  }
  0x81   :  { %s141_s6 = sshll.u32 %s7225_s9, 4  ;;  %s164_s18 = sshll.u32 %s7226_s30, 4  ;;  %s142_s6 = int_to_ptr.vmem [resolvable:$true] %s141_s6  ;;  %s165_s18 = int_to_ptr.vmem [resolvable:$true] %s164_s18 }
  0x82   :  { %s7145_s29 = scalar_lea.vmem %s142_s6, 16  ;;  %s7149_s7 = scalar_lea.vmem %s142_s6, 32 }
  0x83   :  { %p7146_p8 = scmp.ne.s32.totalorder %s142_s6, %s7145_s29  ;;  %p7150_p9 = scmp.lt.s32.totalorder %s142_s6, %s142_s6 }
  0x84   :  { %p7151_p10 = scmp.lt.s32.totalorder %s7149_s7, %s7145_s29 }
  0x86   :  { %p7152_p11 = por %p7151_p10, %p7150_p9 }
  0x88   :  { %p7153_p12 = pnand %p7152_p11, %p7146_p8 }
  0x8a   :  { %7156 = shalt.err (!%p7153_p12)
}
  0x8b   :  { %144 = dma.hbm_to_vmem [thread:$0]  %s9317_s13, 16, %s142_s6, [#allocation15]  }
  0x8c   :  { %s7165_s1 = scalar_lea.vmem %s165_s18, 512  ;;  %p7170_p0 = scmp.lt.s32.totalorder %s165_s18, %s165_s18 }
  0x8d   :  { %p7166_p13 = scmp.ne.s32.totalorder %s165_s18, %s7165_s1  ;;  %p7171_p1 = scmp.lt.s32.totalorder %s7165_s1, %s7165_s1 }
  0x8f   :  { %p7172_p2 = por %p7171_p1, %p7170_p0 }
  0x91   :  { %p7173_p3 = pnand %p7172_p2, %p7166_p13 }
  0x93   :  { %7176 = shalt.err (!%p7173_p3)
}
  0x94   :  { %170 = dma.hbm_to_vmem [thread:$0]  %s9321_s17, 512, %s165_s18, [#allocation18], %s7217_s27, %s7217_s27, %s7218_s4  }
  0x95   :  { %s7227_s28 = smov [#allocation22]  }
  0x96   :  { %s186_s5 = sshll.u32 %s7227_s28, 4  ;;  %s187_s5 = int_to_ptr.vmem [resolvable:$true] %s186_s5 }
  0x97   :  { %s7185_s10 = scalar_lea.vmem %s187_s5, 512  ;;  %p7190_p5 = scmp.lt.s32.totalorder %s187_s5, %s187_s5 }
  0x98   :  { %p7186_p4 = scmp.ne.s32.totalorder %s187_s5, %s7185_s10  ;;  %p7191_p6 = scmp.lt.s32.totalorder %s7185_s10, %s7185_s10 }
  0x9a   :  { %p7192_p7 = por %p7191_p6, %p7190_p5 }
  0x9c   :  { %p7193_p8 = pnand %p7192_p7, %p7186_p4 }
  0x9e   :  { %7196 = shalt.err (!%p7193_p8)
}
  0x9f   :  { %192 = dma.hbm_to_vmem [thread:$0]  %s9323_s19, 512, %s187_s5, [#allocation21], %s7217_s27, %s7217_s27, %s7218_s4  }
  0xa0   :  { %7197 = dma.done.wait [#allocation4], 32  }
  0xa1   :  { %7198 = vsyncadd [#allocation4], 4294967264 }
  0xa2   :  { %7199 = dma.done.wait [#allocation6], 32768  }
  0xa3   :  { %7200 = vsyncadd [#allocation6], 4294934528 }
  0xa4   :  { %7201 = dma.done.wait [#allocation9], 256  }
  0xa5   :  { %7202 = vsyncadd [#allocation9], 4294967040 }
  0xa6   :  { %7203 = dma.done.wait [#allocation12], 64  }
  0xa7   :  { %7204 = vsyncadd [#allocation12], 4294967232 }
  0xa8   :  { %7205 = dma.done.wait [#allocation15], 144  }
  0xa9   :  { %7206 = vsyncadd [#allocation15], 4294967152 }
  0xaa   :  { %7207 = dma.done.wait [#allocation18], 528  }
  0xab   :  { %7208 = vsyncadd [#allocation18], 4294966768 }
  0xac   :  { %7209 = dma.done.wait [#allocation21], 528  }
  0xad   :  { %7210 = vsyncadd [#allocation21], 4294966768  ;;  %v305_v1 = vld [vmem:[#allocation5 + $0x1c0] sm:$0xff]  ;;  %v306_v3 = vld [vmem:[#allocation5 + $0x1c8] sm:$0xff]  ;;  %s9656_s4 = sld [smem:[#allocation181_spill]]  ;;  %vm3826_vm0 = vcmask 1043456  }
  0xae   :  { %v309_v2 = vld [vmem:[#allocation5 + $0x1e0] sm:$0xff]  ;;  %v310_v5 = vld [vmem:[#allocation5 + $0x1e8] sm:$0xff]  ;;  %s10350_s7 = sld [smem:[#allocation182_spill]]  ;;  %vm3822_vm1 = vcmask 64512   ;;  %vm3948_vm2 = vcmask 523264   ;;  %vm4528_vm3 = vcmask 1041408  }
  0xaf   :  { %v5906_v4 = vcombine.high %v305_v1, %v309_v2  ;;  %v5905_v6 = vcombine.low %v305_v1, %v309_v2  ;;  %v297_v7 = vld [vmem:[#allocation5 + $0x180] sm:$0xff]  ;;  %v5908_v9 = vcombine.high %v306_v3, %v310_v5  ;;  %v5907_v10 = vcombine.low %v306_v3, %v310_v5  ;;  %v298_v12 = vld [vmem:[#allocation5 + $0x188] sm:$0xff]  ;;  %s10354_s8 = sld [smem:[#allocation190_spill]]  ;;  %s7231_s1 = smov 96  }
  0xb0   :  { %v301_v8 = vld [vmem:[#allocation5 + $0x1a0] sm:$0xff]  ;;  %v302_v13 = vld [vmem:[#allocation5 + $0x1a8] sm:$0xff]  ;;  %vm7230_vm4 = vmmov 0   ;;  %vm4524_vm5 = vcmask 31744   ;;  %s7232_s11 = smov 48   ;;  %s7234_s28 = smov 16  }
  0xb1   :  { %v5898_v11 = vcombine.high %v297_v7, %v301_v8  ;;  %v289_v14 = vld [vmem:[#allocation5 + $0x140] sm:$0xff]  ;;  %1059 = vmatprep.subr.bf16.mxu0 %v5906_v4  ;;  %v5900_v15 = vcombine.high %v298_v12, %v302_v13  ;;  %v290_v17 = vld [vmem:[#allocation5 + $0x148] sm:$0xff]  ;;  %1102 = vmatprep.subr.bf16.mxu1 %v5908_v9  ;;  %v5897_v19 = vcombine.low %v297_v7, %v301_v8  ;;  %vm4603_vm6 = vcmask 130048   ;;  %s10356_s18 = sld [smem:[#allocation185_spill]] }
  0xb2   :  { %v293_v16 = vld [vmem:[#allocation5 + $0x160] sm:$0xff]  ;;  %v294_v18 = vld [vmem:[#allocation5 + $0x168] sm:$0xff]  ;;  %1060 = vmatpush1.bf16.msra.mxu0 %v5905_v6  ;;  %1103 = vmatpush1.bf16.msra.mxu1 %v5907_v10  ;;  %v5899_v20 = vcombine.low %v298_v12, %v302_v13  ;;  %vm5678_vm7 = vcmask 1042432   ;;  %vm5674_vm8 = vcmask 39936   ;;  %vm5756_vm9 = vcmask 1045504  }
  0xb3   :  { %1061 = vmatprep.subr.bf16.mxu0 %v5898_v11  ;;  %v5890_v21 = vcombine.high %v289_v14, %v293_v16  ;;  %1104 = vmatprep.subr.bf16.mxu1 %v5900_v15  ;;  %v5892_v22 = vcombine.high %v290_v17, %v294_v18  ;;  %v281_v23 = vld [vmem:[#allocation5 + $0x100] sm:$0xff]  ;;  %v282_v25 = vld [vmem:[#allocation5 + $0x108] sm:$0xff]  ;;  %v5889_v27 = vcombine.low %v289_v14, %v293_v16  ;;  %v246_v55 = vld [vmem:[%s9656_s4 + $0x18] sm:$0xff]  ;;  %vm5752_vm10 = vcmask 703488  }
  0xb4   :  { %v285_v24 = vld [vmem:[#allocation5 + $0x120] sm:$0xff]  ;;  %v286_v26 = vld [vmem:[#allocation5 + $0x128] sm:$0xff]  ;;  %v5891_v28 = vcombine.low %v290_v17, %v294_v18  ;;  %vm5836_vm11 = vcmask 1024  }
  0xb5   :  { %v5882_v29 = vcombine.high %v281_v23, %v285_v24  ;;  %v5884_v30 = vcombine.high %v282_v25, %v286_v26  ;;  %v273_v31 = vld [vmem:[#allocation5 + $0xc0] sm:$0xff]  ;;  %v274_v33 = vld [vmem:[#allocation5 + $0xc8] sm:$0xff]  ;;  %v5881_v35 = vcombine.low %v281_v23, %v285_v24  ;;  %v5883_v36 = vcombine.low %v282_v25, %v286_v26 }
  0xb6   :  { %1062 = vmatpush1.bf16.msra.mxu0 %v5897_v19  ;;  %1105 = vmatpush1.bf16.msra.mxu1 %v5899_v20  ;;  %v277_v32 = vld [vmem:[#allocation5 + $0xe0] sm:$0xff]  ;;  %v278_v34 = vld [vmem:[#allocation5 + $0xe8] sm:$0xff] }
  0xb7   :  { %1063 = vmatprep.subr.bf16.mxu0 %v5890_v21  ;;  %1106 = vmatprep.subr.bf16.mxu1 %v5892_v22  ;;  %v5874_v37 = vcombine.high %v273_v31, %v277_v32  ;;  %v5876_v38 = vcombine.high %v274_v33, %v278_v34  ;;  %v265_v39 = vld [vmem:[#allocation5 + $0x80] sm:$0xff]  ;;  %v266_v41 = vld [vmem:[#allocation5 + $0x88] sm:$0xff]  ;;  %v5873_v43 = vcombine.low %v273_v31, %v277_v32 }
  0xb8   :  { %v269_v40 = vld [vmem:[#allocation5 + $0xa0] sm:$0xff]  ;;  %v270_v42 = vld [vmem:[#allocation5 + $0xa8] sm:$0xff]  ;;  %v5875_v44 = vcombine.low %v274_v33, %v278_v34 }
  0xb9   :  { %v5866_v45 = vcombine.high %v265_v39, %v269_v40  ;;  %v5868_v46 = vcombine.high %v266_v41, %v270_v42  ;;  %v257_v47 = vld [vmem:[#allocation5 + $0x40] sm:$0xff]  ;;  %v258_v49 = vld [vmem:[#allocation5 + $0x48] sm:$0xff]  ;;  %v5865_v51 = vcombine.low %v265_v39, %v269_v40  ;;  %v5867_v52 = vcombine.low %v266_v41, %v270_v42 }
  0xba   :  { %1064 = vmatpush1.bf16.msra.mxu0 %v5889_v27  ;;  %1107 = vmatpush1.bf16.msra.mxu1 %v5891_v28  ;;  %v261_v48 = vld [vmem:[#allocation5 + $0x60] sm:$0xff]  ;;  %v262_v50 = vld [vmem:[#allocation5 + $0x68] sm:$0xff] }
  0xbb   :  { %1065 = vmatprep.subr.bf16.mxu0 %v5882_v29  ;;  %1108 = vmatprep.subr.bf16.mxu1 %v5884_v30  ;;  %v5858_v53 = vcombine.high %v257_v47, %v261_v48  ;;  %v244_v54 = vld [vmem:[%s9656_s4 + $0x8] sm:$0xff]  ;;  %v5860_v56 = vcombine.high %v258_v49, %v262_v50  ;;  %v5857_v62 = vcombine.low %v257_v47, %v261_v48 }
  0xbc   :  { %v249_v57 = vld [vmem:[#allocation5] sm:$0xff]  ;;  %v7429_v59 = vpack.c.bf16 %v246_v55, %v244_v54  ;;  %v250_v60 = vld [vmem:[#allocation5 + $0x8] sm:$0xff]  ;;  %v5859_v63 = vcombine.low %v258_v49, %v262_v50 }
  0xbd   :  { %v253_v58 = vld [vmem:[#allocation5 + $0x20] sm:$0xff]  ;;  %v254_v61 = vld [vmem:[#allocation5 + $0x28] sm:$0xff] }
  0xbe   :  { %1066 = vmatpush1.bf16.msra.mxu0 %v5881_v35  ;;  %1109 = vmatpush1.bf16.msra.mxu1 %v5883_v36  ;;  %v5850_v0 = vcombine.high %v249_v57, %v253_v58  ;;  %v5852_v1 = vcombine.high %v250_v60, %v254_v61  ;;  %v369_v2 = vld [vmem:[#allocation5 + $0x3c0] sm:$0xff]  ;;  %v370_v4 = vld [vmem:[#allocation5 + $0x3c8] sm:$0xff]  ;;  %v5849_v6 = vcombine.low %v249_v57, %v253_v58 }
  0xbf   :  { %1067 = vmatprep.subr.bf16.mxu0 %v5874_v37  ;;  %1110 = vmatprep.subr.bf16.mxu1 %v5876_v38  ;;  %v373_v3 = vld [vmem:[#allocation5 + $0x3e0] sm:$0xff]  ;;  %v374_v5 = vld [vmem:[#allocation5 + $0x3e8] sm:$0xff]  ;;  %v5851_v7 = vcombine.low %v250_v60, %v254_v61 }
  0xc0   :  { %1091 = vmatprep.mubr.bf16.mxu0 %v7429_v59  ;;  %1134 = vmatprep.mubr.bf16.mxu1 %v7429_v59  ;;  %v5970_v8 = vcombine.high %v369_v2, %v373_v3  ;;  %v5972_v9 = vcombine.high %v370_v4, %v374_v5  ;;  %v361_v10 = vld [vmem:[#allocation5 + $0x380] sm:$0xff]  ;;  %v362_v12 = vld [vmem:[#allocation5 + $0x388] sm:$0xff]  ;;  %v5969_v14 = vcombine.low %v369_v2, %v373_v3 }
  0xc1   :  { %v365_v11 = vld [vmem:[#allocation5 + $0x3a0] sm:$0xff]  ;;  %v366_v13 = vld [vmem:[#allocation5 + $0x3a8] sm:$0xff]  ;;  %v5971_v15 = vcombine.low %v370_v4, %v374_v5  ;;  %v308_v4 = vld [vmem:[#allocation5 + $0x1d8] sm:$0xff] }
  0xc2   :  { %1068 = vmatpush1.bf16.msra.mxu0 %v5873_v43  ;;  %1111 = vmatpush1.bf16.msra.mxu1 %v5875_v44  ;;  %v5962_v16 = vcombine.high %v361_v10, %v365_v11  ;;  %v5964_v17 = vcombine.high %v362_v12, %v366_v13  ;;  %v353_v18 = vld [vmem:[#allocation5 + $0x340] sm:$0xff]  ;;  %v354_v20 = vld [vmem:[#allocation5 + $0x348] sm:$0xff]  ;;  %v5961_v22 = vcombine.low %v361_v10, %v365_v11  ;;  %v312_v5 = vld [vmem:[#allocation5 + $0x1f8] sm:$0xff] }
  0xc3   :  { %1069 = vmatprep.subr.bf16.mxu0 %v5866_v45  ;;  %1112 = vmatprep.subr.bf16.mxu1 %v5868_v46  ;;  %v357_v19 = vld [vmem:[#allocation5 + $0x360] sm:$0xff]  ;;  %v358_v21 = vld [vmem:[#allocation5 + $0x368] sm:$0xff]  ;;  %v5963_v23 = vcombine.low %v362_v12, %v366_v13  ;;  %v299_v10 = vld [vmem:[#allocation5 + $0x190] sm:$0xff] }
  0xc4   :  { %v5954_v24 = vcombine.high %v353_v18, %v357_v19  ;;  %v5956_v25 = vcombine.high %v354_v20, %v358_v21  ;;  %v345_v26 = vld [vmem:[#allocation5 + $0x300] sm:$0xff]  ;;  %v346_v28 = vld [vmem:[#allocation5 + $0x308] sm:$0xff]  ;;  %v5953_v30 = vcombine.low %v353_v18, %v357_v19  ;;  %v5955_v31 = vcombine.low %v354_v20, %v358_v21  ;;  %v303_v11 = vld [vmem:[#allocation5 + $0x1b0] sm:$0xff] }
  0xc5   :  { %v349_v27 = vld [vmem:[#allocation5 + $0x320] sm:$0xff]  ;;  %v350_v29 = vld [vmem:[#allocation5 + $0x328] sm:$0xff]  ;;  %v291_v19 = vld [vmem:[#allocation5 + $0x150] sm:$0xff]  ;;  %v5911_v21 = vcombine.low %v308_v4, %v312_v5 }
  0xc6   :  { %1070 = vmatpush1.bf16.msra.mxu0 %v5865_v51  ;;  %1113 = vmatpush1.bf16.msra.mxu1 %v5867_v52  ;;  %v5946_v32 = vcombine.high %v345_v26, %v349_v27  ;;  %v5948_v33 = vcombine.high %v346_v28, %v350_v29  ;;  %v337_v34 = vld [vmem:[#allocation5 + $0x2c0] sm:$0xff]  ;;  %v338_v36 = vld [vmem:[#allocation5 + $0x2c8] sm:$0xff]  ;;  %v5945_v38 = vcombine.low %v345_v26, %v349_v27  ;;  %v295_v20 = vld [vmem:[#allocation5 + $0x170] sm:$0xff] }
  0xc7   :  { %1071 = vmatprep.subr.bf16.mxu0 %v5858_v53  ;;  %1114 = vmatprep.subr.bf16.mxu1 %v5860_v56  ;;  %v341_v35 = vld [vmem:[#allocation5 + $0x2e0] sm:$0xff]  ;;  %v342_v37 = vld [vmem:[#allocation5 + $0x2e8] sm:$0xff]  ;;  %v5947_v41 = vcombine.low %v346_v28, %v350_v29  ;;  %v5901_v26 = vcombine.low %v299_v10, %v303_v11  ;;  %v5894_v28 = vcombine.high %v291_v19, %v295_v20 }
  0xc8   :  { %v329_v39 = vld [vmem:[#allocation5 + $0x280] sm:$0xff]  ;;  %v5938_v42 = vcombine.high %v337_v34, %v341_v35  ;;  %v330_v43 = vld [vmem:[#allocation5 + $0x288] sm:$0xff]  ;;  %v5940_v45 = vcombine.high %v338_v36, %v342_v37  ;;  %v5937_v46 = vcombine.low %v337_v34, %v341_v35  ;;  %v5939_v49 = vcombine.low %v338_v36, %v342_v37 }
  0xc9   :  { %v333_v40 = vld [vmem:[#allocation5 + $0x2a0] sm:$0xff]  ;;  %v334_v44 = vld [vmem:[#allocation5 + $0x2a8] sm:$0xff]  ;;  %v5893_v34 = vcombine.low %v291_v19, %v295_v20 }
  0xca   :  { %1072 = vmatpush1.bf16.msra.mxu0 %v5857_v62  ;;  %1115 = vmatpush1.bf16.msra.mxu1 %v5859_v63  ;;  %v321_v47 = vld [vmem:[#allocation5 + $0x240] sm:$0xff]  ;;  %v5930_v50 = vcombine.high %v329_v39, %v333_v40  ;;  %v322_v51 = vld [vmem:[#allocation5 + $0x248] sm:$0xff]  ;;  %v5932_v53 = vcombine.high %v330_v43, %v334_v44  ;;  %v5929_v54 = vcombine.low %v329_v39, %v333_v40  ;;  %v279_v39 = vld [vmem:[#allocation5 + $0xf0] sm:$0xff] }
  0xcb   :  { %1073 = vmatprep.subr.bf16.mxu0 %v5850_v0  ;;  %1116 = vmatprep.subr.bf16.mxu1 %v5852_v1  ;;  %v325_v48 = vld [vmem:[#allocation5 + $0x260] sm:$0xff]  ;;  %v326_v52 = vld [vmem:[#allocation5 + $0x268] sm:$0xff]  ;;  %v5931_v57 = vcombine.low %v330_v43, %v334_v44  ;;  %v307_v0 = vld [vmem:[#allocation5 + $0x1d0] sm:$0xff] }
  0xcc   :  { %v313_v55 = vld [vmem:[#allocation5 + $0x200] sm:$0xff]  ;;  %v5922_v58 = vcombine.high %v321_v47, %v325_v48  ;;  %v314_v60 = vld [vmem:[#allocation5 + $0x208] sm:$0xff]  ;;  %v5924_v62 = vcombine.high %v322_v51, %v326_v52  ;;  %v5921_v63 = vcombine.low %v321_v47, %v325_v48  ;;  %v311_v1 = vld [vmem:[#allocation5 + $0x1f0] sm:$0xff]  ;;  %v5923_v2 = vcombine.low %v322_v51, %v326_v52 }
  0xcd   :  { %v317_v56 = vld [vmem:[#allocation5 + $0x220] sm:$0xff]  ;;  %v318_v61 = vld [vmem:[#allocation5 + $0x228] sm:$0xff]  ;;  %v5910_v13 = vcombine.high %v307_v0, %v311_v1  ;;  %v5909_v18 = vcombine.low %v307_v0, %v311_v1  ;;  %v276_v40 = vld [vmem:[#allocation5 + $0xd8] sm:$0xff] }
  0xce   :  { %1074 = vmatpush1.bf16.msra.mxu0 %v5849_v6  ;;  %1117 = vmatpush1.bf16.msra.mxu1 %v5851_v7  ;;  %v5914_v3 = vcombine.high %v313_v55, %v317_v56  ;;  %v5916_v6 = vcombine.high %v314_v60, %v318_v61  ;;  %v243_v7 = vld [vmem:[%s9656_s4] sm:$0xff]  ;;  %v5915_v12 = vcombine.low %v314_v60, %v318_v61 }
  0xcf   :  { %1075 = vmatprep.subr.bf16.mxu0 %v5970_v8  ;;  %1118 = vmatprep.subr.bf16.mxu1 %v5972_v9  ;;  %v245_v8 = vld [vmem:[%s9656_s4 + $0x10] sm:$0xff]  ;;  %v5913_v9 = vcombine.low %v313_v55, %v317_v56  ;;  %v268_v47 = vld [vmem:[#allocation5 + $0x98] sm:$0xff] }
  0xd0   :  { %v272_v48 = vld [vmem:[#allocation5 + $0xb8] sm:$0xff] }
  0xd1   :  { %v5872_v52 = vcombine.high %v268_v47, %v272_v48  ;;  %v260_v55 = vld [vmem:[#allocation5 + $0x58] sm:$0xff] }
  0xd2   :  { %1076 = vmatpush2.bf16.msra.mxu0 %v5969_v14  ;;  %1119 = vmatpush2.bf16.msra.mxu1 %v5971_v15  ;;  %v300_v14 = vld [vmem:[#allocation5 + $0x198] sm:$0xff] }
  0xd3   :  { %1077 = vmatprep.subr.bf16.mxu0 %v5962_v16  ;;  %1120 = vmatprep.subr.bf16.mxu1 %v5964_v17  ;;  %v304_v15 = vld [vmem:[#allocation5 + $0x1b8] sm:$0xff]  ;;  %v5912_v16 = vcombine.high %v308_v4, %v312_v5  ;;  %v7439_v17 = vpack.c.bf16 %v245_v8, %v243_v7  ;;  %v375_v7 = vld [vmem:[#allocation5 + $0x3f0] sm:$0xff] }
  0xd4   :  { %v5903_v27 = vcombine.low %v300_v14, %v304_v15  ;;  %v264_v56 = vld [vmem:[#allocation5 + $0x78] sm:$0xff] }
  0xd5   :  { %v5864_v61 = vcombine.high %v260_v55, %v264_v56  ;;  %v252_v0 = vld [vmem:[#allocation5 + $0x18] sm:$0xff] }
  0xd6   :  { %1078 = vmatpush2.bf16.msra.mxu0 %v5961_v22  ;;  %1121 = vmatpush2.bf16.msra.mxu1 %v5963_v23  ;;  %v5902_v22 = vcombine.high %v299_v10, %v303_v11  ;;  %v292_v23 = vld [vmem:[#allocation5 + $0x158] sm:$0xff] }
  0xd7   :  { %1079 = vmatprep.subr.bf16.mxu0 %v5954_v24  ;;  %1122 = vmatprep.subr.bf16.mxu1 %v5956_v25  ;;  %v296_v24 = vld [vmem:[#allocation5 + $0x178] sm:$0xff]  ;;  %v5904_v25 = vcombine.high %v300_v14, %v304_v15  ;;  %v363_v14 = vld [vmem:[#allocation5 + $0x390] sm:$0xff] }
  0xd8   :  { %v5896_v29 = vcombine.high %v292_v23, %v296_v24  ;;  %v5895_v35 = vcombine.low %v292_v23, %v296_v24  ;;  %v256_v1 = vld [vmem:[#allocation5 + $0x38] sm:$0xff]  ;;  %v367_v15 = vld [vmem:[#allocation5 + $0x3b0] sm:$0xff] }
  0xd9   :  { %v5856_v5 = vcombine.high %v252_v0, %v256_v1  ;;  %v372_v8 = vld [vmem:[#allocation5 + $0x3d8] sm:$0xff]  ;;  %v5855_v11 = vcombine.low %v252_v0, %v256_v1  ;;  %v355_v23 = vld [vmem:[#allocation5 + $0x350] sm:$0xff] }
  0xda   :  { %1080 = vmatpush2.bf16.msra.mxu0 %v5953_v30  ;;  %1123 = vmatpush2.bf16.msra.mxu1 %v5955_v31  ;;  %v283_v30 = vld [vmem:[#allocation5 + $0x110] sm:$0xff]  ;;  %v316_v1 = vld [vmem:[#allocation5 + $0x218] sm:$0xff] }
  0xdb   :  { %1081 = vmatprep.subr.bf16.mxu0 %v5946_v32  ;;  %1124 = vmatprep.subr.bf16.mxu1 %v5948_v33  ;;  %v287_v31 = vld [vmem:[#allocation5 + $0x130] sm:$0xff]  ;;  %v284_v32 = vld [vmem:[#allocation5 + $0x118] sm:$0xff] }
  0xdc   :  { %v288_v33 = vld [vmem:[#allocation5 + $0x138] sm:$0xff]  ;;  %v5886_v36 = vcombine.high %v283_v30, %v287_v31  ;;  %v359_v24 = vld [vmem:[#allocation5 + $0x370] sm:$0xff] }
  0xdd   :  { %v5888_v37 = vcombine.high %v284_v32, %v288_v33  ;;  %v5887_v43 = vcombine.low %v284_v32, %v288_v33  ;;  %v351_v32 = vld [vmem:[#allocation5 + $0x330] sm:$0xff]  ;;  %v348_v33 = vld [vmem:[#allocation5 + $0x318] sm:$0xff] }
  0xde   :  { %1082 = vmatpush2.bf16.msra.mxu0 %v5945_v38  ;;  %1125 = vmatpush2.bf16.msra.mxu1 %v5947_v41  ;;  %v275_v38 = vld [vmem:[#allocation5 + $0xd0] sm:$0xff]  ;;  %v280_v41 = vld [vmem:[#allocation5 + $0xf8] sm:$0xff] }
  0xdf   :  { %1083 = vmatprep.subr.bf16.mxu0 %v5938_v42  ;;  %1126 = vmatprep.subr.bf16.mxu1 %v5940_v45  ;;  %v5885_v42 = vcombine.low %v283_v30, %v287_v31  ;;  %v5878_v44 = vcombine.high %v275_v38, %v279_v39  ;;  %v267_v45 = vld [vmem:[#allocation5 + $0x90] sm:$0xff] }
  0xe0   :  { %v347_v31 = vld [vmem:[#allocation5 + $0x310] sm:$0xff] }
  0xe1   :  { %v319_v0 = vld [vmem:[#allocation5 + $0x230] sm:$0xff] }
  0xe2   :  { %1084 = vmatpush2.bf16.msra.mxu0 %v5937_v46  ;;  %1127 = vmatpush2.bf16.msra.mxu1 %v5939_v49  ;;  %v271_v46 = vld [vmem:[#allocation5 + $0xb0] sm:$0xff]  ;;  %v5877_v49 = vcombine.low %v275_v38, %v279_v39 }
  0xe3   :  { %1085 = vmatprep.subr.bf16.mxu0 %v5930_v50  ;;  %1128 = vmatprep.subr.bf16.mxu1 %v5932_v53  ;;  %v5879_v50 = vcombine.low %v276_v40, %v280_v41  ;;  %v5870_v51 = vcombine.high %v267_v45, %v271_v46  ;;  %v259_v53 = vld [vmem:[#allocation5 + $0x50] sm:$0xff] }
  0xe4   :  { %v339_v39 = vld [vmem:[#allocation5 + $0x2d0] sm:$0xff] }
  0xe6   :  { %1086 = vmatpush2.bf16.msra.mxu0 %v5929_v54  ;;  %1129 = vmatpush2.bf16.msra.mxu1 %v5931_v57  ;;  %v263_v54 = vld [vmem:[#allocation5 + $0x70] sm:$0xff]  ;;  %v5869_v57 = vcombine.low %v267_v45, %v271_v46 }
  0xe7   :  { %1087 = vmatprep.subr.bf16.mxu0 %v5922_v58  ;;  %1130 = vmatprep.subr.bf16.mxu1 %v5924_v62  ;;  %v5871_v58 = vcombine.low %v268_v47, %v272_v48  ;;  %v5862_v60 = vcombine.high %v259_v53, %v263_v54  ;;  %v251_v62 = vld [vmem:[#allocation5 + $0x10] sm:$0xff]  ;;  %v332_v48 = vld [vmem:[#allocation5 + $0x298] sm:$0xff] }
  0xe8   :  { %v331_v46 = vld [vmem:[#allocation5 + $0x290] sm:$0xff] }
  0xe9   :  { %v335_v47 = vld [vmem:[#allocation5 + $0x2b0] sm:$0xff] }
  0xea   :  { %1088 = vmatpush2.bf16.msra.mxu0 %v5921_v63  ;;  %1131 = vmatpush2.bf16.msra.mxu1 %v5923_v2  ;;  %v255_v63 = vld [vmem:[#allocation5 + $0x30] sm:$0xff]  ;;  %v5861_v2 = vcombine.low %v259_v53, %v263_v54 }
  0xeb   :  { %1089 = vmatprep.subr.bf16.mxu0 %v5914_v3  ;;  %1132 = vmatprep.subr.bf16.mxu1 %v5916_v6  ;;  %v5863_v3 = vcombine.low %v260_v55, %v264_v56  ;;  %v5854_v4 = vcombine.high %v251_v62, %v255_v63  ;;  %v371_v6 = vld [vmem:[#allocation5 + $0x3d0] sm:$0xff]  ;;  %v5853_v10 = vcombine.low %v251_v62, %v255_v63  ;;  %v324_v56 = vld [vmem:[#allocation5 + $0x258] sm:$0xff] }
  0xec   :  { %v5973_v19 = vcombine.low %v371_v6, %v375_v7  ;;  %v323_v54 = vld [vmem:[#allocation5 + $0x250] sm:$0xff] }
  0xed   :  { %v327_v55 = vld [vmem:[#allocation5 + $0x270] sm:$0xff] }
  0xee   :  { %1090 = vmatpush2.bf16.msra.mxu0 %v5913_v9  ;;  %1133 = vmatpush2.bf16.msra.mxu1 %v5915_v12  ;;  %v376_v9 = vld [vmem:[#allocation5 + $0x3f8] sm:$0xff]  ;;  %v5974_v12 = vcombine.high %v371_v6, %v375_v7  ;;  %v315_v63 = vld [vmem:[#allocation5 + $0x210] sm:$0xff] }
  0xef   :  { %1145 = vmatprep.subr.bf16.mxu0 %v5910_v13  ;;  %1188 = vmatprep.subr.bf16.mxu1 %v5912_v16  ;;  %v5976_v13 = vcombine.high %v372_v8, %v376_v9  ;;  %v364_v16 = vld [vmem:[#allocation5 + $0x398] sm:$0xff]  ;;  %v5975_v20 = vcombine.low %v372_v8, %v376_v9  ;;  %v5917_v7 = vcombine.low %v315_v63, %v319_v0  ;;  %v1321_v9 = vld [vmem:[#allocation7 + $0x1c0] sm:$0xff] }
  0xf1   :  { %1092 = vmatmul.mubr.bf16.vlgmr.msra.gmra.mxu0 %v7439_v17  ;;  %1135 = vmatmul.mubr.bf16.vlgmr.msra.gmra.mxu1 %v7439_v17 }
  0xf2   :  { %1146 = vmatpush1.bf16.msra.mxu0 %v5909_v18  ;;  %1189 = vmatpush1.bf16.msra.mxu1 %v5911_v21  ;;  %v368_v18 = vld [vmem:[#allocation5 + $0x3b8] sm:$0xff]  ;;  %v5966_v21 = vcombine.high %v363_v14, %v367_v15 }
  0xf3   :  { %1147 = vmatprep.subr.bf16.mxu0 %v5902_v22  ;;  %1190 = vmatprep.subr.bf16.mxu1 %v5904_v25  ;;  %v5968_v22 = vcombine.high %v364_v16, %v368_v18  ;;  %v356_v25 = vld [vmem:[#allocation5 + $0x358] sm:$0xff] }
  0xf4   :  { %1177 = vmatprep.mubr.bf16.mxu0 %v7429_v59  ;;  %1220 = vmatprep.mubr.bf16.mxu1 %v7429_v59  ;;  %v5880_v59 = vcombine.high %v276_v40, %v280_v41  ;;  %v343_v40 = vld [vmem:[#allocation5 + $0x2f0] sm:$0xff]  ;;  %v340_v41 = vld [vmem:[#allocation5 + $0x2d8] sm:$0xff] }
  0xf6   :  { %1148 = vmatpush1.bf16.msra.mxu0 %v5901_v26  ;;  %1191 = vmatpush1.bf16.msra.mxu1 %v5903_v27  ;;  %v360_v26 = vld [vmem:[#allocation5 + $0x378] sm:$0xff]  ;;  %v5965_v27 = vcombine.low %v363_v14, %v367_v15  ;;  %v1313_v15 = vld [vmem:[#allocation7 + $0x180] sm:$0xff] }
  0xf7   :  { %1149 = vmatprep.subr.bf16.mxu0 %v5894_v28  ;;  %1192 = vmatprep.subr.bf16.mxu1 %v5896_v29  ;;  %v5967_v28 = vcombine.low %v364_v16, %v368_v18  ;;  %v5958_v29 = vcombine.high %v355_v23, %v359_v24  ;;  %v5960_v30 = vcombine.high %v356_v25, %v360_v26  ;;  %v1317_v16 = vld [vmem:[#allocation7 + $0x1a0] sm:$0xff] }
  0xfa   :  { %1150 = vmatpush1.bf16.msra.mxu0 %v5893_v34  ;;  %1193 = vmatpush1.bf16.msra.mxu1 %v5895_v35  ;;  %v352_v34 = vld [vmem:[#allocation5 + $0x338] sm:$0xff]  ;;  %v5957_v35 = vcombine.low %v355_v23, %v359_v24  ;;  %v1305_v23 = vld [vmem:[#allocation7 + $0x140] sm:$0xff] }
  0xfb   :  { %1151 = vmatprep.subr.bf16.mxu0 %v5886_v36  ;;  %1194 = vmatprep.subr.bf16.mxu1 %v5888_v37  ;;  %v5959_v36 = vcombine.low %v356_v25, %v360_v26  ;;  %v5950_v37 = vcombine.high %v347_v31, %v351_v32  ;;  %v5952_v38 = vcombine.high %v348_v33, %v352_v34  ;;  %v1309_v24 = vld [vmem:[#allocation7 + $0x160] sm:$0xff]  ;;  %v1306_v25 = vld [vmem:[#allocation7 + $0x148] sm:$0xff] }
  0xfc   :  { %v1310_v26 = vld [vmem:[#allocation7 + $0x168] sm:$0xff] }
  0xfe   :  { %1152 = vmatpush1.bf16.msra.mxu0 %v5885_v42  ;;  %1195 = vmatpush1.bf16.msra.mxu1 %v5887_v43  ;;  %v344_v42 = vld [vmem:[#allocation5 + $0x2f8] sm:$0xff]  ;;  %v5949_v43 = vcombine.low %v347_v31, %v351_v32  ;;  %v1297_v31 = vld [vmem:[#allocation7 + $0x100] sm:$0xff] }
  0xff   :  { %1153 = vmatprep.subr.bf16.mxu0 %v5878_v44  ;;  %1196 = vmatprep.subr.bf16.mxu1 %v5880_v59  ;;  %v5951_v44 = vcombine.low %v348_v33, %v352_v34  ;;  %v5942_v59 = vcombine.high %v339_v39, %v343_v40  ;;  %v5944_v45 = vcombine.high %v340_v41, %v344_v42  ;;  %v1301_v32 = vld [vmem:[#allocation7 + $0x120] sm:$0xff]  ;;  %v1298_v33 = vld [vmem:[#allocation7 + $0x108] sm:$0xff] }
 0x100   :  { %v1302_v34 = vld [vmem:[#allocation7 + $0x128] sm:$0xff] }
 0x102   :  { %1154 = vmatpush1.bf16.msra.mxu0 %v5877_v49  ;;  %1197 = vmatpush1.bf16.msra.mxu1 %v5879_v50  ;;  %v336_v49 = vld [vmem:[#allocation5 + $0x2b8] sm:$0xff]  ;;  %v5941_v50 = vcombine.low %v339_v39, %v343_v40  ;;  %v1289_v39 = vld [vmem:[#allocation7 + $0xc0] sm:$0xff] }
 0x103   :  { %1155 = vmatprep.subr.bf16.mxu0 %v5870_v51  ;;  %1198 = vmatprep.subr.bf16.mxu1 %v5872_v52  ;;  %v5943_v51 = vcombine.low %v340_v41, %v344_v42  ;;  %v5934_v52 = vcombine.high %v331_v46, %v335_v47  ;;  %v5936_v53 = vcombine.high %v332_v48, %v336_v49  ;;  %v1293_v40 = vld [vmem:[#allocation7 + $0xe0] sm:$0xff]  ;;  %v1290_v41 = vld [vmem:[#allocation7 + $0xc8] sm:$0xff] }
 0x104   :  { %v1294_v42 = vld [vmem:[#allocation7 + $0xe8] sm:$0xff] }
 0x106   :  { %1156 = vmatpush1.bf16.msra.mxu0 %v5869_v57  ;;  %1199 = vmatpush1.bf16.msra.mxu1 %v5871_v58  ;;  %v328_v57 = vld [vmem:[#allocation5 + $0x278] sm:$0xff]  ;;  %v5933_v58 = vcombine.low %v331_v46, %v335_v47  ;;  %v1281_v46 = vld [vmem:[#allocation7 + $0x80] sm:$0xff] }
 0x107   :  { %1157 = vmatprep.subr.bf16.mxu0 %v5862_v60  ;;  %1200 = vmatprep.subr.bf16.mxu1 %v5864_v61  ;;  %v5935_v60 = vcombine.low %v332_v48, %v336_v49  ;;  %v5926_v61 = vcombine.high %v323_v54, %v327_v55  ;;  %v5928_v62 = vcombine.high %v324_v56, %v328_v57  ;;  %v1285_v47 = vld [vmem:[#allocation7 + $0xa0] sm:$0xff]  ;;  %v1282_v48 = vld [vmem:[#allocation7 + $0x88] sm:$0xff] }
 0x108   :  { %v1286_v49 = vld [vmem:[#allocation7 + $0xa8] sm:$0xff] }
 0x10a   :  { %1158 = vmatpush1.bf16.msra.mxu0 %v5861_v2  ;;  %1201 = vmatpush1.bf16.msra.mxu1 %v5863_v3  ;;  %v320_v2 = vld [vmem:[#allocation5 + $0x238] sm:$0xff]  ;;  %v5925_v3 = vcombine.low %v323_v54, %v327_v55  ;;  %v7510_v54 = vcombine.low %v1281_v46, %v1285_v47  ;;  %v7514_v55 = vcombine.low %v1282_v48, %v1286_v49 }
 0x10b   :  { %1159 = vmatprep.subr.bf16.mxu0 %v5854_v4  ;;  %1202 = vmatprep.subr.bf16.mxu1 %v5856_v5  ;;  %v5927_v4 = vcombine.low %v324_v56, %v328_v57  ;;  %v5918_v5 = vcombine.high %v315_v63, %v319_v0  ;;  %v5920_v6 = vcombine.high %v316_v1, %v320_v2  ;;  %v1273_v56 = vld [vmem:[#allocation7 + $0x40] sm:$0xff] }
 0x10c   :  { %v5919_v8 = vcombine.low %v316_v1, %v320_v2  ;;  %9679 = vst [vmem:[#allocation52_spill] sm:$0xff] %v7510_v54  ;;  %9680 = vst [vmem:[#allocation53_spill] sm:$0xff] %v7514_v55  ;;  %v1277_v57 = vld [vmem:[#allocation7 + $0x60] sm:$0xff] }
 0x10d   :  { %v7523_v63 = vcombine.low %v1273_v56, %v1277_v57  ;;  %v1265_v1 = vld [vmem:[#allocation7] sm:$0xff] }
 0x10e   :  { %1160 = vmatpush1.bf16.msra.mxu0 %v5853_v10  ;;  %1203 = vmatpush1.bf16.msra.mxu1 %v5855_v11  ;;  %v1325_v10 = vld [vmem:[#allocation7 + $0x1e0] sm:$0xff]  ;;  %v1322_v11 = vld [vmem:[#allocation7 + $0x1c8] sm:$0xff] }
 0x10f   :  { %1161 = vmatprep.subr.bf16.mxu0 %v5974_v12  ;;  %1204 = vmatprep.subr.bf16.mxu1 %v5976_v13  ;;  %v7447_v12 = vcombine.high %v1321_v9, %v1325_v10  ;;  %v1326_v13 = vld [vmem:[#allocation7 + $0x1e8] sm:$0xff]  ;;  %v7449_v14 = vcombine.low %v1321_v9, %v1325_v10  ;;  %9683 = vst [vmem:[#allocation56_spill] sm:$0xff] %v7523_v63  ;;  %v1269_v2 = vld [vmem:[#allocation7 + $0x20] sm:$0xff] }
 0x110   :  { %v7451_v18 = vcombine.high %v1322_v11, %v1326_v13  ;;  %v1385_v9 = vld [vmem:[#allocation7 + $0x3c0] sm:$0xff] }
 0x111   :  { %9657 = vst [vmem:[#allocation30_spill] sm:$0xff] %v7447_v12  ;;  %9658 = vst [vmem:[#allocation31_spill] sm:$0xff] %v7449_v14  ;;  %v1389_v10 = vld [vmem:[#allocation7 + $0x3e0] sm:$0xff] }
 0x112   :  { %1162 = vmatpush2.bf16.msra.mxu0 %v5973_v19  ;;  %1205 = vmatpush2.bf16.msra.mxu1 %v5975_v20  ;;  %9659 = vst [vmem:[#allocation32_spill] sm:$0xff] %v7451_v18  ;;  %v7453_v19 = vcombine.low %v1322_v11, %v1326_v13  ;;  %v7455_v20 = vcombine.high %v1313_v15, %v1317_v16  ;;  %v1386_v11 = vld [vmem:[#allocation7 + $0x3c8] sm:$0xff] }
 0x113   :  { %1163 = vmatprep.subr.bf16.mxu0 %v5966_v21  ;;  %1206 = vmatprep.subr.bf16.mxu1 %v5968_v22  ;;  %v1314_v21 = vld [vmem:[#allocation7 + $0x188] sm:$0xff]  ;;  %v7543_v13 = vcombine.high %v1385_v9, %v1389_v10 }
 0x114   :  { %9660 = vst [vmem:[#allocation33_spill] sm:$0xff] %v7453_v19  ;;  %9661 = vst [vmem:[#allocation34_spill] sm:$0xff] %v7455_v20  ;;  %v1318_v22 = vld [vmem:[#allocation7 + $0x1a8] sm:$0xff] }
 0x115   :  { %9689 = vst [vmem:[#allocation62_spill] sm:$0xff] %v7543_v13 }
 0x116   :  { %1164 = vmatpush2.bf16.msra.mxu0 %v5965_v27  ;;  %1207 = vmatpush2.bf16.msra.mxu1 %v5967_v28  ;;  %v7462_v27 = vcombine.low %v1313_v15, %v1317_v16  ;;  %v7466_v28 = vcombine.low %v1314_v21, %v1318_v22  ;;  %v1390_v15 = vld [vmem:[#allocation7 + $0x3e8] sm:$0xff] }
 0x117   :  { %1165 = vmatprep.subr.bf16.mxu0 %v5958_v29  ;;  %1208 = vmatprep.subr.bf16.mxu1 %v5960_v30  ;;  %v7468_v29 = vcombine.high %v1305_v23, %v1309_v24  ;;  %v7471_v30 = vcombine.high %v1306_v25, %v1310_v26  ;;  %v7545_v16 = vcombine.high %v1386_v11, %v1390_v15 }
 0x118   :  { %9663 = vst [vmem:[#allocation36_spill] sm:$0xff] %v7462_v27  ;;  %9664 = vst [vmem:[#allocation37_spill] sm:$0xff] %v7466_v28 }
 0x119   :  { %9665 = vst [vmem:[#allocation38_spill] sm:$0xff] %v7468_v29  ;;  %9666 = vst [vmem:[#allocation39_spill] sm:$0xff] %v7471_v30 }
 0x11a   :  { %1166 = vmatpush2.bf16.msra.mxu0 %v5957_v35  ;;  %1209 = vmatpush2.bf16.msra.mxu1 %v5959_v36  ;;  %v7474_v35 = vcombine.low %v1305_v23, %v1309_v24  ;;  %v7478_v36 = vcombine.low %v1306_v25, %v1310_v26  ;;  %9690 = vst [vmem:[#allocation63_spill] sm:$0xff] %v7545_v16  ;;  %v1377_v23 = vld [vmem:[#allocation7 + $0x380] sm:$0xff]  ;;  %v1378_v25 = vld [vmem:[#allocation7 + $0x388] sm:$0xff] }
 0x11b   :  { %1167 = vmatprep.subr.bf16.mxu0 %v5950_v37  ;;  %1210 = vmatprep.subr.bf16.mxu1 %v5952_v38  ;;  %v7480_v37 = vcombine.high %v1297_v31, %v1301_v32  ;;  %v7483_v38 = vcombine.high %v1298_v33, %v1302_v34  ;;  %v1381_v24 = vld [vmem:[#allocation7 + $0x3a0] sm:$0xff] }
 0x11c   :  { %9667 = vst [vmem:[#allocation40_spill] sm:$0xff] %v7474_v35  ;;  %9668 = vst [vmem:[#allocation41_spill] sm:$0xff] %v7478_v36  ;;  %v7555_v26 = vcombine.high %v1377_v23, %v1381_v24 }
 0x11d   :  { %9669 = vst [vmem:[#allocation42_spill] sm:$0xff] %v7480_v37  ;;  %9670 = vst [vmem:[#allocation43_spill] sm:$0xff] %v7483_v38 }
 0x11e   :  { %1168 = vmatpush2.bf16.msra.mxu0 %v5949_v43  ;;  %1211 = vmatpush2.bf16.msra.mxu1 %v5951_v44  ;;  %v7486_v43 = vcombine.low %v1297_v31, %v1301_v32  ;;  %v7490_v44 = vcombine.low %v1298_v33, %v1302_v34  ;;  %9693 = vst [vmem:[#allocation66_spill] sm:$0xff] %v7555_v26  ;;  %v1382_v31 = vld [vmem:[#allocation7 + $0x3a8] sm:$0xff] }
 0x11f   :  { %1169 = vmatprep.subr.bf16.mxu0 %v5942_v59  ;;  %1212 = vmatprep.subr.bf16.mxu1 %v5944_v45  ;;  %v7492_v59 = vcombine.high %v1289_v39, %v1293_v40  ;;  %v7495_v45 = vcombine.high %v1290_v41, %v1294_v42  ;;  %v7557_v32 = vcombine.high %v1378_v25, %v1382_v31 }
 0x120   :  { %9671 = vst [vmem:[#allocation44_spill] sm:$0xff] %v7486_v43  ;;  %9672 = vst [vmem:[#allocation45_spill] sm:$0xff] %v7490_v44  ;;  %v7559_v33 = vcombine.low %v1377_v23, %v1381_v24  ;;  %v7561_v34 = vcombine.low %v1378_v25, %v1382_v31  ;;  %v1358_v23 = vld [vmem:[#allocation7 + $0x2e8] sm:$0xff]  ;;  %v1345_v25 = vld [vmem:[#allocation7 + $0x280] sm:$0xff] }
 0x121   :  { %9673 = vst [vmem:[#allocation46_spill] sm:$0xff] %v7492_v59  ;;  %9674 = vst [vmem:[#allocation47_spill] sm:$0xff] %v7495_v45  ;;  %v1349_v31 = vld [vmem:[#allocation7 + $0x2a0] sm:$0xff] }
 0x122   :  { %1170 = vmatpush2.bf16.msra.mxu0 %v5941_v50  ;;  %1213 = vmatpush2.bf16.msra.mxu1 %v5943_v51  ;;  %v7498_v50 = vcombine.low %v1289_v39, %v1293_v40  ;;  %v7502_v51 = vcombine.low %v1290_v41, %v1294_v42  ;;  %9694 = vst [vmem:[#allocation67_spill] sm:$0xff] %v7557_v32  ;;  %9695 = vst [vmem:[#allocation68_spill] sm:$0xff] %v7559_v33  ;;  %v1369_v39 = vld [vmem:[#allocation7 + $0x340] sm:$0xff]  ;;  %v1370_v41 = vld [vmem:[#allocation7 + $0x348] sm:$0xff] }
 0x123   :  { %1171 = vmatprep.subr.bf16.mxu0 %v5934_v52  ;;  %1214 = vmatprep.subr.bf16.mxu1 %v5936_v53  ;;  %v7504_v52 = vcombine.high %v1281_v46, %v1285_v47  ;;  %v7507_v53 = vcombine.high %v1282_v48, %v1286_v49  ;;  %9696 = vst [vmem:[#allocation69_spill] sm:$0xff] %v7561_v34  ;;  %v1373_v40 = vld [vmem:[#allocation7 + $0x360] sm:$0xff]  ;;  %v1374_v46 = vld [vmem:[#allocation7 + $0x368] sm:$0xff] }
 0x124   :  { %9675 = vst [vmem:[#allocation48_spill] sm:$0xff] %v7498_v50  ;;  %9676 = vst [vmem:[#allocation49_spill] sm:$0xff] %v7502_v51  ;;  %v7567_v42 = vcombine.high %v1369_v39, %v1373_v40  ;;  %v7569_v47 = vcombine.high %v1370_v41, %v1374_v46  ;;  %v7571_v48 = vcombine.low %v1369_v39, %v1373_v40 }
 0x125   :  { %9677 = vst [vmem:[#allocation50_spill] sm:$0xff] %v7504_v52  ;;  %9678 = vst [vmem:[#allocation51_spill] sm:$0xff] %v7507_v53  ;;  %v7573_v49 = vcombine.low %v1370_v41, %v1374_v46  ;;  %v7599_v41 = vcombine.high %v1345_v25, %v1349_v31  ;;  %v1346_v46 = vld [vmem:[#allocation7 + $0x288] sm:$0xff] }
 0x126   :  { %1172 = vmatpush2.bf16.msra.mxu0 %v5933_v58  ;;  %1215 = vmatpush2.bf16.msra.mxu1 %v5935_v60  ;;  %v1274_v58 = vld [vmem:[#allocation7 + $0x48] sm:$0xff]  ;;  %v7519_v60 = vcombine.high %v1273_v56, %v1277_v57  ;;  %9697 = vst [vmem:[#allocation70_spill] sm:$0xff] %v7567_v42  ;;  %9698 = vst [vmem:[#allocation71_spill] sm:$0xff] %v7569_v47  ;;  %v1361_v56 = vld [vmem:[#allocation7 + $0x300] sm:$0xff] }
 0x127   :  { %1173 = vmatprep.subr.bf16.mxu0 %v5926_v61  ;;  %1216 = vmatprep.subr.bf16.mxu1 %v5928_v62  ;;  %v1278_v61 = vld [vmem:[#allocation7 + $0x68] sm:$0xff]  ;;  %9699 = vst [vmem:[#allocation72_spill] sm:$0xff] %v7571_v48  ;;  %9700 = vst [vmem:[#allocation73_spill] sm:$0xff] %v7573_v49  ;;  %v1365_v57 = vld [vmem:[#allocation7 + $0x320] sm:$0xff] }
 0x128   :  { %9681 = vst [vmem:[#allocation54_spill] sm:$0xff] %v7519_v60  ;;  %v7521_v62 = vcombine.high %v1274_v58, %v1278_v61  ;;  %v7525_v0 = vcombine.low %v1274_v58, %v1278_v61  ;;  %v1362_v58 = vld [vmem:[#allocation7 + $0x308] sm:$0xff]  ;;  %v7579_v61 = vcombine.high %v1361_v56, %v1365_v57  ;;  %9709 = vst [vmem:[#allocation82_spill] sm:$0xff] %v7599_v41 }
 0x12a   :  { %1174 = vmatpush2.bf16.msra.mxu0 %v5925_v3  ;;  %1217 = vmatpush2.bf16.msra.mxu1 %v5927_v4  ;;  %9682 = vst [vmem:[#allocation55_spill] sm:$0xff] %v7521_v62  ;;  %9684 = vst [vmem:[#allocation57_spill] sm:$0xff] %v7525_v0  ;;  %v1266_v3 = vld [vmem:[#allocation7 + $0x8] sm:$0xff]  ;;  %v7531_v4 = vcombine.high %v1265_v1, %v1269_v2 }
 0x12b   :  { %1175 = vmatprep.subr.bf16.mxu0 %v5918_v5  ;;  %1218 = vmatprep.subr.bf16.mxu1 %v5920_v6  ;;  %v1270_v5 = vld [vmem:[#allocation7 + $0x28] sm:$0xff]  ;;  %9701 = vst [vmem:[#allocation74_spill] sm:$0xff] %v7579_v61 }
 0x12c   :  { %9685 = vst [vmem:[#allocation58_spill] sm:$0xff] %v7531_v4  ;;  %v7533_v6 = vcombine.high %v1266_v3, %v1270_v5 }
 0x12e   :  { %1176 = vmatpush2.bf16.msra.mxu0 %v5917_v7  ;;  %1219 = vmatpush2.bf16.msra.mxu1 %v5919_v8  ;;  %9686 = vst [vmem:[#allocation59_spill] sm:$0xff] %v7533_v6  ;;  %v7535_v7 = vcombine.low %v1265_v1, %v1269_v2  ;;  %v7537_v8 = vcombine.low %v1266_v3, %v1270_v5  ;;  %v1366_v1 = vld [vmem:[#allocation7 + $0x328] sm:$0xff] }
 0x12f   :  { %2033 = vmatprep.subr.bf16.mxu0 %v7447_v12  ;;  %2074 = vmatprep.subr.bf16.mxu1 %v7451_v18  ;;  %v7581_v2 = vcombine.high %v1362_v58, %v1366_v1  ;;  %v7583_v3 = vcombine.low %v1361_v56, %v1365_v57  ;;  %v7585_v5 = vcombine.low %v1362_v58, %v1366_v1  ;;  %v1350_v56 = vld [vmem:[#allocation7 + $0x2a8] sm:$0xff]  ;;  %v1337_v57 = vld [vmem:[#allocation7 + $0x240] sm:$0xff] }
 0x130   :  { %9687 = vst [vmem:[#allocation60_spill] sm:$0xff] %v7535_v7  ;;  %9688 = vst [vmem:[#allocation61_spill] sm:$0xff] %v7537_v8  ;;  %v7602_v58 = vcombine.high %v1346_v46, %v1350_v56  ;;  %v1341_v1 = vld [vmem:[#allocation7 + $0x260] sm:$0xff] }
 0x131   :  { %1178 = vmatmul.mubr.bf16.vlgmr.msra.gmra.mxu0 %v7439_v17  ;;  %1221 = vmatmul.mubr.bf16.vlgmr.msra.gmra.mxu1 %v7439_v17  ;;  %v7458_v17 = vcombine.high %v1314_v21, %v1318_v22  ;;  %v7547_v21 = vcombine.low %v1385_v9, %v1389_v10  ;;  %v7549_v22 = vcombine.low %v1386_v11, %v1390_v15  ;;  %v1353_v9 = vld [vmem:[#allocation7 + $0x2c0] sm:$0xff]  ;;  %v1354_v11 = vld [vmem:[#allocation7 + $0x2c8] sm:$0xff] }
 0x132   :  { %2034 = vmatpush1.bf16.msra.mxu0 %v7449_v14  ;;  %2075 = vmatpush1.bf16.msra.mxu1 %v7453_v19  ;;  %9702 = vst [vmem:[#allocation75_spill] sm:$0xff] %v7581_v2  ;;  %9703 = vst [vmem:[#allocation76_spill] sm:$0xff] %v7583_v3  ;;  %v1357_v10 = vld [vmem:[#allocation7 + $0x2e0] sm:$0xff]  ;;  %v7595_v39 = vcombine.high %v1354_v11, %v1358_v23  ;;  %v7597_v40 = vcombine.low %v1354_v11, %v1358_v23 }
 0x133   :  { %9662 = vst [vmem:[#allocation35_spill] sm:$0xff] %v7458_v17  ;;  %2035 = vmatprep.subr.bf16.mxu0 %v7455_v20  ;;  %2076 = vmatprep.subr.bf16.mxu1 %v7458_v17  ;;  %9691 = vst [vmem:[#allocation64_spill] sm:$0xff] %v7547_v21  ;;  %v7591_v15 = vcombine.high %v1353_v9, %v1357_v10  ;;  %v7593_v24 = vcombine.low %v1353_v9, %v1357_v10 }
 0x134   :  { %9692 = vst [vmem:[#allocation65_spill] sm:$0xff] %v7549_v22  ;;  %9704 = vst [vmem:[#allocation77_spill] sm:$0xff] %v7585_v5  ;;  %v7606_v9 = vcombine.low %v1345_v25, %v1349_v31  ;;  %v7610_v10 = vcombine.low %v1346_v46, %v1350_v56  ;;  %v7612_v11 = vcombine.high %v1337_v57, %v1341_v1 }
 0x135   :  { %9705 = vst [vmem:[#allocation78_spill] sm:$0xff] %v7591_v15  ;;  %9706 = vst [vmem:[#allocation79_spill] sm:$0xff] %v7593_v24  ;;  %v7618_v25 = vcombine.low %v1337_v57, %v1341_v1  ;;  %v1324_v1 = vld [vmem:[#allocation7 + $0x1d8] sm:$0xff] }
 0x136   :  { %2036 = vmatpush1.bf16.msra.mxu0 %v7462_v27  ;;  %2077 = vmatpush1.bf16.msra.mxu1 %v7466_v28  ;;  %9707 = vst [vmem:[#allocation80_spill] sm:$0xff] %v7595_v39  ;;  %9708 = vst [vmem:[#allocation81_spill] sm:$0xff] %v7597_v40 }
 0x137   :  { %2037 = vmatprep.subr.bf16.mxu0 %v7468_v29  ;;  %2078 = vmatprep.subr.bf16.mxu1 %v7471_v30  ;;  %9710 = vst [vmem:[#allocation83_spill] sm:$0xff] %v7602_v58  ;;  %9711 = vst [vmem:[#allocation84_spill] sm:$0xff] %v7606_v9 }
 0x138   :  { %9712 = vst [vmem:[#allocation85_spill] sm:$0xff] %v7610_v10  ;;  %9713 = vst [vmem:[#allocation86_spill] sm:$0xff] %v7612_v11 }
 0x139   :  { %9715 = vst [vmem:[#allocation88_spill] sm:$0xff] %v7618_v25 }
 0x13a   :  { %2038 = vmatpush1.bf16.msra.mxu0 %v7474_v35  ;;  %2079 = vmatpush1.bf16.msra.mxu1 %v7478_v36 }
 0x13b   :  { %2039 = vmatprep.subr.bf16.mxu0 %v7480_v37  ;;  %2080 = vmatprep.subr.bf16.mxu1 %v7483_v38 }
 0x13e   :  { %2040 = vmatpush1.bf16.msra.mxu0 %v7486_v43  ;;  %2081 = vmatpush1.bf16.msra.mxu1 %v7490_v44 }
 0x13f   :  { %2041 = vmatprep.subr.bf16.mxu0 %v7492_v59  ;;  %2082 = vmatprep.subr.bf16.mxu1 %v7495_v45 }
 0x142   :  { %2042 = vmatpush1.bf16.msra.mxu0 %v7498_v50  ;;  %2083 = vmatpush1.bf16.msra.mxu1 %v7502_v51 }
 0x143   :  { %2043 = vmatprep.subr.bf16.mxu0 %v7504_v52  ;;  %2084 = vmatprep.subr.bf16.mxu1 %v7507_v53 }
 0x146   :  { %2044 = vmatpush1.bf16.msra.mxu0 %v7510_v54  ;;  %2085 = vmatpush1.bf16.msra.mxu1 %v7514_v55 }
 0x147   :  { %2045 = vmatprep.subr.bf16.mxu0 %v7519_v60  ;;  %2086 = vmatprep.subr.bf16.mxu1 %v7521_v62 }
 0x14a   :  { %2046 = vmatpush1.bf16.msra.mxu0 %v7523_v63  ;;  %2087 = vmatpush1.bf16.msra.mxu1 %v7525_v0 }
 0x14b   :  { %2047 = vmatprep.subr.bf16.mxu0 %v7531_v4  ;;  %2088 = vmatprep.subr.bf16.mxu1 %v7533_v6 }
 0x14e   :  { %2048 = vmatpush1.bf16.msra.mxu0 %v7535_v7  ;;  %2089 = vmatpush1.bf16.msra.mxu1 %v7537_v8 }
 0x14f   :  { %2049 = vmatprep.subr.bf16.mxu0 %v7543_v13  ;;  %2090 = vmatprep.subr.bf16.mxu1 %v7545_v16 }
 0x152   :  { %2050 = vmatpush2.bf16.msra.mxu0 %v7547_v21  ;;  %2091 = vmatpush2.bf16.msra.mxu1 %v7549_v22 }
 0x153   :  { %2051 = vmatprep.subr.bf16.mxu0 %v7555_v26  ;;  %2092 = vmatprep.subr.bf16.mxu1 %v7557_v32 }
 0x156   :  { %2052 = vmatpush2.bf16.msra.mxu0 %v7559_v33  ;;  %2093 = vmatpush2.bf16.msra.mxu1 %v7561_v34 }
 0x157   :  { %2053 = vmatprep.subr.bf16.mxu0 %v7567_v42  ;;  %2094 = vmatprep.subr.bf16.mxu1 %v7569_v47 }
 0x15a   :  { %2054 = vmatpush2.bf16.msra.mxu0 %v7571_v48  ;;  %2095 = vmatpush2.bf16.msra.mxu1 %v7573_v49 }
 0x15b   :  { %2055 = vmatprep.subr.bf16.mxu0 %v7579_v61  ;;  %2096 = vmatprep.subr.bf16.mxu1 %v7581_v2  ;;  %v1333_v2 = vld [vmem:[#allocation7 + $0x220] sm:$0xff]  ;;  %v1330_v61 = vld [vmem:[#allocation7 + $0x208] sm:$0xff] }
 0x15e   :  { %2056 = vmatpush2.bf16.msra.mxu0 %v7583_v3  ;;  %2097 = vmatpush2.bf16.msra.mxu1 %v7585_v5  ;;  %v1338_v5 = vld [vmem:[#allocation7 + $0x248] sm:$0xff] }
 0x15f   :  { %2057 = vmatprep.subr.bf16.mxu0 %v7591_v15  ;;  %v1342_v3 = vld [vmem:[#allocation7 + $0x268] sm:$0xff]  ;;  %2098 = vmatprep.subr.bf16.mxu1 %v7595_v39  ;;  %v1329_v15 = vld [vmem:[#allocation7 + $0x200] sm:$0xff] }
 0x160   :  { %v7615_v23 = vcombine.high %v1338_v5, %v1342_v3  ;;  %v1334_v39 = vld [vmem:[#allocation7 + $0x228] sm:$0xff]  ;;  %v7622_v31 = vcombine.low %v1338_v5, %v1342_v3  ;;  %v7624_v46 = vcombine.high %v1329_v15, %v1333_v2  ;;  %v1323_v3 = vld [vmem:[#allocation7 + $0x1d0] sm:$0xff] }
 0x161   :  { %v7627_v56 = vcombine.high %v1330_v61, %v1334_v39  ;;  %v7634_v57 = vcombine.low %v1330_v61, %v1334_v39  ;;  %v1327_v5 = vld [vmem:[#allocation7 + $0x1f0] sm:$0xff]  ;;  %v379_v39 = vlaneseq }
 0x162   :  { %2058 = vmatpush2.bf16.msra.mxu0 %v7593_v24  ;;  %2099 = vmatpush2.bf16.msra.mxu1 %v7597_v40  ;;  %9714 = vst [vmem:[#allocation87_spill] sm:$0xff] %v7615_v23  ;;  %9716 = vst [vmem:[#allocation89_spill] sm:$0xff] %v7622_v31 }
 0x163   :  { %2059 = vmatprep.subr.bf16.mxu0 %v7599_v41  ;;  %2100 = vmatprep.subr.bf16.mxu1 %v7602_v58  ;;  %9717 = vst [vmem:[#allocation90_spill] sm:$0xff] %v7624_v46  ;;  %9718 = vst [vmem:[#allocation91_spill] sm:$0xff] %v7627_v56  ;;  %v7630_v58 = vcombine.low %v1329_v15, %v1333_v2  ;;  %v7643_v15 = vcombine.low %v1323_v3, %v1327_v5 }
 0x164   :  { %9720 = vst [vmem:[#allocation93_spill] sm:$0xff] %v7634_v57 }
 0x165   :  { %9719 = vst [vmem:[#allocation92_spill] sm:$0xff] %v7630_v58  ;;  %9723 = vst [vmem:[#allocation96_spill] sm:$0xff] %v7643_v15 }
 0x166   :  { %2060 = vmatpush2.bf16.msra.mxu0 %v7606_v9  ;;  %2101 = vmatpush2.bf16.msra.mxu1 %v7610_v10 }
 0x167   :  { %2061 = vmatprep.subr.bf16.mxu0 %v7612_v11  ;;  %2102 = vmatprep.subr.bf16.mxu1 %v7615_v23  ;;  %v7639_v23 = vcombine.high %v1323_v3, %v1327_v5 }
 0x169   :  { %9721 = vst [vmem:[#allocation94_spill] sm:$0xff] %v7639_v23 }
 0x16a   :  { %2062 = vmatpush2.bf16.msra.mxu0 %v7618_v25  ;;  %2103 = vmatpush2.bf16.msra.mxu1 %v7622_v31  ;;  %v1328_v25 = vld [vmem:[#allocation7 + $0x1f8] sm:$0xff] }
 0x16b   :  { %2063 = vmatprep.subr.bf16.mxu0 %v7624_v46  ;;  %2104 = vmatprep.subr.bf16.mxu1 %v7627_v56  ;;  %v7641_v2 = vcombine.high %v1324_v1, %v1328_v25  ;;  %v7646_v61 = vcombine.low %v1324_v1, %v1328_v25  ;;  %v377_v46 = vld [vmem:[#allocation8] sm:$0xff] }
 0x16d   :  { %9722 = vst [vmem:[#allocation95_spill] sm:$0xff] %v7641_v2  ;;  %9724 = vst [vmem:[#allocation97_spill] sm:$0xff] %v7646_v61 }
 0x16e   :  { %2064 = vmatpush2.bf16.msra.mxu0 %v7630_v58  ;;  %2105 = vmatpush2.bf16.msra.mxu1 %v7634_v57  ;;  %v7649_v58 = vshrl.u32 %v379_v39, 7 }
 0x16f   :  { %2115 = vmatprep.subr.bf16.mxu0 %v7639_v23  ;;  %2156 = vmatprep.subr.bf16.mxu1 %v7641_v2 }
 0x170   :  { %9725 = vst [vmem:[#allocation98_spill] sm:$0xff] %v7649_v58  ;;  %v9376_v56 = vsub.s32 0, %v7649_v58  ;;  %v389_v31 = vsub.s32 2, %v7649_v58  ;;  %v393_v25 = vsub.s32 3, %v7649_v58 }
 0x172   :  { %v382_v11 = vrot.slane %v377_v46, %v9376_v56  ;;  %v7660_v2 = vrot.slane %v377_v46, %v389_v31  ;;  %v7664_v9 = vrot.slane %v377_v46, %v393_v25 }
 0x174   :  { %9728 = vst [vmem:[#allocation101_spill] sm:$0xff] %v7660_v2  ;;  %9730 = vst [vmem:[#allocation103_spill] sm:$0xff] %v7664_v9 }
 0x1b1   :  { %v1093_v57 = vpop.f32.mrf.mxu0  ;;  %v7655_v3 = vpop.f32.mrf.mxu1 }
 0x1b2   :  { %9726 = vst [vmem:[#allocation99_spill] sm:$0xff] %v7655_v3  ;;  %v9380_v3 = vsub.s32 1, %v7649_v58  ;;  %v7677_v31 = vadd.f32 %v1093_v57, %v382_v11 }
 0x1b3   :  { %v1095_v5 = vpop.f32.mrf.mxu0  ;;  %v7658_v1 = vpop.f32.mrf.mxu1 }
 0x1b4   :  { %9727 = vst [vmem:[#allocation100_spill] sm:$0xff] %v7658_v1  ;;  %v7675_v1 = vrot.slane %v377_v46, %v9380_v3  ;;  %9734 = vst [vmem:[#allocation107_spill] sm:$0xff] %v7677_v31  ;;  %v5977_v25 = vmul.f32 -1.442695, %v7677_v31  ;;  %v409_v3 = vsub.s32 7, %v7649_v58 }
 0x1b5   :  { %v1097_v39 = vpop.f32.mrf.mxu0  ;;  %v1140_v10 = vpop.f32.mrf.mxu1 }
 0x1b6   :  { %v7662_v23 = vadd.f32 %v1097_v39, %v382_v11  ;;  %v7667_v41 = vadd.f32 %v1140_v10, %v7660_v2  ;;  %9733 = vst [vmem:[#allocation106_spill] sm:$0xff] %v7675_v1  ;;  %v7680_v39 = vadd.f32 %v1095_v5, %v7675_v1  ;;  %6525 = vpow2.f32 %v5977_v25 }
 0x1b7   :  { %v1142_v40 = vpop.f32.mrf.mxu1  ;;  %v7688_v5 = vpop.f32.mrf.mxu0 }
 0x1b8   :  { %9729 = vst [vmem:[#allocation102_spill] sm:$0xff] %v7662_v23  ;;  %9731 = vst [vmem:[#allocation104_spill] sm:$0xff] %v7667_v41  ;;  %v7670_v56 = vadd.f32 %v1142_v40, %v7664_v9  ;;  %v5978_v10 = vmul.f32 -1.442695, %v7680_v39  ;;  %v397_v40 = vsub.s32 4, %v7649_v58  ;;  %v401_v23 = vsub.s32 5, %v7649_v58 }
 0x1b9   :  { %9735 = vst [vmem:[#allocation108_spill] sm:$0xff] %v7680_v39  ;;  %9736 = vst [vmem:[#allocation109_spill] sm:$0xff] %v7688_v5 }
 0x1ba   :  { %9732 = vst [vmem:[#allocation105_spill] sm:$0xff] %v7670_v56  ;;  %6527 = vpow2.f32 %v5978_v10  ;;  %v405_v56 = vsub.s32 6, %v7649_v58  ;;  %v398_v57 = vrot.slane %v377_v46, %v397_v40  ;;  %v7690_v31 = vrot.slane %v377_v46, %v401_v23 }
 0x1bb   :  { %v7692_v10 = vrot.slane %v377_v46, %v409_v3 }
 0x1bc   :  { %v406_v1 = vrot.slane %v377_v46, %v405_v56  ;;  %9737 = vst [vmem:[#allocation110_spill] sm:$0xff] %v7690_v31 }
 0x1bd   :  { %9738 = vst [vmem:[#allocation111_spill] sm:$0xff] %v7692_v10 }
 0x1c3   :  { %v6526_v41 = vpop.eup %6525 }
 0x1c4   :  { %v1237_v9 = vadd.f32 1.0, %v6526_v41 }
 0x1c6   :  { %6529 = vrcp.f32 %v1237_v9 }
 0x1c7   :  { %v6528_v11 = vpop.eup %6527 }
 0x1c8   :  { %v1238_v39 = vadd.f32 1.0, %v6528_v11 }
 0x1f1   :  { %v1179_v25 = vpop.f32.mrf.mxu0  ;;  %v1222_v24 = vpop.f32.mrf.mxu1 }
 0x1f2   :  { %v7694_v2 = vadd.f32 %v1179_v25, %v398_v57  ;;  %v7696_v49 = vadd.f32 %v1222_v24, %v406_v1 }
 0x1f3   :  { %v1181_v48 = vpop.f32.mrf.mxu0  ;;  %v1224_v40 = vpop.f32.mrf.mxu1 }
 0x1f4   :  { %9739 = vst [vmem:[#allocation112_spill] sm:$0xff] %v7696_v49  ;;  %6531 = vtanh.f32 %v7694_v2  ;;  %v7700_v41 = vadd.f32 %v1181_v48, %v7690_v31  ;;  %v5979_v23 = vmul.f32 -1.442695, %v7696_v49  ;;  %v7704_v56 = vadd.f32 %v1224_v40, %v7692_v10  ;;  %v6530_v48 = vpop.eup %6529  ;;  %v1300_v49 = vld [vmem:[#allocation7 + $0x118] sm:$0xff] }
 0x1f5   :  { %6533 = vrcp.f32 %v1238_v39  ;;  %v1183_v46 = vpop.f32.mrf.mxu0  ;;  %v1226_v24 = vpop.f32.mrf.mxu1 }
 0x1f6   :  { %9740 = vst [vmem:[#allocation113_spill] sm:$0xff] %v7700_v41  ;;  %9741 = vst [vmem:[#allocation114_spill] sm:$0xff] %v7704_v56  ;;  %6535 = vtanh.f32 %v7700_v41  ;;  %v7707_v3 = vadd.f32 %v1183_v46, %v398_v57  ;;  %v5980_v9 = vmul.f32 -1.442695, %v7704_v56  ;;  %v7710_v11 = vadd.f32 %v1226_v24, %v406_v1  ;;  %v1307_v56 = vld [vmem:[#allocation7 + $0x150] sm:$0xff] }
 0x1f7   :  { %6537 = vpow2.f32 %v5979_v23 }
 0x1f8   :  { %9742 = vst [vmem:[#allocation115_spill] sm:$0xff] %v7707_v3  ;;  %9743 = vst [vmem:[#allocation116_spill] sm:$0xff] %v7710_v11  ;;  %6539 = vpow2.f32 %v5980_v9  ;;  %v1319_v11 = vld [vmem:[#allocation7 + $0x1b0] sm:$0xff]  ;;  %v1316_v3 = vld [vmem:[#allocation7 + $0x198] sm:$0xff] }
 0x201   :  { %v6532_v25 = vpop.eup %6531 }
 0x202   :  { %v6534_v39 = vpop.eup %6533  ;;  %v7712_v58 = vmul.f32 %v6532_v25, %v6530_v48  ;;  %v1315_v25 = vld [vmem:[#allocation7 + $0x190] sm:$0xff] }
 0x203   :  { %v6536_v31 = vpop.eup %6535 }
 0x204   :  { %9744 = vst [vmem:[#allocation117_spill] sm:$0xff] %v7712_v58  ;;  %v6538_v40 = vpop.eup %6537  ;;  %v7714_v10 = vmul.f32 %v6536_v31, %v6534_v39  ;;  %6541 = vtanh.f32 %v7712_v58  ;;  %v1320_v31 = vld [vmem:[#allocation7 + $0x1b8] sm:$0xff] }
 0x205   :  { %v1251_v5 = vadd.f32 1.0, %v6538_v40  ;;  %v6540_v41 = vpop.eup %6539  ;;  %v1312_v58 = vld [vmem:[#allocation7 + $0x178] sm:$0xff] }
 0x206   :  { %9745 = vst [vmem:[#allocation118_spill] sm:$0xff] %v7714_v10  ;;  %v1252_v57 = vadd.f32 1.0, %v6540_v41  ;;  %v7722_v41 = vcombine.high %v1316_v3, %v1320_v31 }
 0x207   :  { %6543 = vrcp.f32 %v1251_v5  ;;  %v7720_v5 = vcombine.high %v1315_v25, %v1319_v11 }
 0x208   :  { %6545 = vtanh.f32 %v7714_v10  ;;  %9747 = vst [vmem:[#allocation120_spill] sm:$0xff] %v7722_v41  ;;  %v1308_v10 = vld [vmem:[#allocation7 + $0x158] sm:$0xff] }
 0x209   :  { %6547 = vrcp.f32 %v1252_v57  ;;  %9746 = vst [vmem:[#allocation119_spill] sm:$0xff] %v7720_v5  ;;  %v1311_v57 = vld [vmem:[#allocation7 + $0x170] sm:$0xff] }
 0x211   :  { %v6542_v1 = vpop.eup %6541 }
 0x214   :  { %v6544_v23 = vpop.eup %6543 }
 0x215   :  { %v6546_v46 = vpop.eup %6545  ;;  %v1261_v9 = vmul.f32 %v6544_v23, %v6542_v1  ;;  %v7728_v1 = vcombine.low %v1315_v25, %v1319_v11  ;;  %v7730_v23 = vcombine.low %v1316_v3, %v1320_v31  ;;  %v7740_v3 = vcombine.low %v1307_v56, %v1311_v57 }
 0x216   :  { %v6548_v24 = vpop.eup %6547  ;;  %v7742_v11 = vcombine.low %v1308_v10, %v1312_v58 }
 0x217   :  { %v1262_v48 = vmul.f32 %v6548_v24, %v6546_v46  ;;  %v7718_v40 = vpack.c.bf16 %v1261_v9, %v1261_v9  ;;  %9748 = vst [vmem:[#allocation121_spill] sm:$0xff] %v7728_v1  ;;  %9749 = vst [vmem:[#allocation122_spill] sm:$0xff] %v7730_v23  ;;  %v7732_v46 = vcombine.high %v1307_v56, %v1311_v57  ;;  %v1299_v9 = vld [vmem:[#allocation7 + $0x110] sm:$0xff] }
 0x218   :  { %v7734_v24 = vcombine.high %v1308_v10, %v1312_v58  ;;  %9752 = vst [vmem:[#allocation125_spill] sm:$0xff] %v7740_v3  ;;  %9753 = vst [vmem:[#allocation126_spill] sm:$0xff] %v7742_v11 }
 0x219   :  { %v1264_v39 = vpack.c.bf16 %v1262_v48, %v1262_v48  ;;  %9750 = vst [vmem:[#allocation123_spill] sm:$0xff] %v7732_v46  ;;  %v1303_v48 = vld [vmem:[#allocation7 + $0x130] sm:$0xff] }
 0x21a   :  { %9751 = vst [vmem:[#allocation124_spill] sm:$0xff] %v7734_v24  ;;  %v7746_v25 = vcombine.high %v1299_v9, %v1303_v48  ;;  %v7752_v56 = vcombine.low %v1299_v9, %v1303_v48 }
 0x21b   :  { %2065 = vmatprep.mubr.bf16.mxu0 %v1264_v39  ;;  %2106 = vmatprep.mubr.bf16.mxu1 %v1264_v39 }
 0x21c   :  { %2066 = vmatmul.mubr.bf16.vlgmr.msra.gmra.mxu0 %v7718_v40  ;;  %2107 = vmatmul.mubr.bf16.vlgmr.msra.gmra.mxu1 %v7718_v40  ;;  %9754 = vst [vmem:[#allocation127_spill] sm:$0xff] %v7746_v25  ;;  %9756 = vst [vmem:[#allocation129_spill] sm:$0xff] %v7752_v56 }
 0x21d   :  { %2116 = vmatpush1.bf16.msra.mxu0 %v7643_v15  ;;  %2157 = vmatpush1.bf16.msra.mxu1 %v7646_v61  ;;  %v1304_v15 = vld [vmem:[#allocation7 + $0x138] sm:$0xff] }
 0x21e   :  { %2147 = vmatprep.mubr.bf16.mxu0 %v1264_v39  ;;  %2188 = vmatprep.mubr.bf16.mxu1 %v1264_v39  ;;  %v7748_v31 = vcombine.high %v1300_v49, %v1304_v15  ;;  %v1291_v39 = vld [vmem:[#allocation7 + $0xd0] sm:$0xff]  ;;  %v1296_v61 = vld [vmem:[#allocation7 + $0xf8] sm:$0xff]  ;;  %v7754_v58 = vcombine.low %v1300_v49, %v1304_v15 }
 0x21f   :  { %2117 = vmatprep.subr.bf16.mxu0 %v7720_v5  ;;  %2158 = vmatprep.subr.bf16.mxu1 %v7722_v41  ;;  %v1295_v41 = vld [vmem:[#allocation7 + $0xf0] sm:$0xff]  ;;  %v1292_v5 = vld [vmem:[#allocation7 + $0xd8] sm:$0xff] }
 0x220   :  { %9755 = vst [vmem:[#allocation128_spill] sm:$0xff] %v7748_v31  ;;  %9757 = vst [vmem:[#allocation130_spill] sm:$0xff] %v7754_v58  ;;  %v7758_v10 = vcombine.high %v1291_v39, %v1295_v41  ;;  %v7760_v57 = vcombine.high %v1292_v5, %v1296_v61  ;;  %v7764_v9 = vcombine.low %v1291_v39, %v1295_v41 }
 0x221   :  { %2118 = vmatpush1.bf16.msra.mxu0 %v7728_v1  ;;  %2159 = vmatpush1.bf16.msra.mxu1 %v7730_v23  ;;  %v1284_v23 = vld [vmem:[#allocation7 + $0x98] sm:$0xff]  ;;  %v7766_v49 = vcombine.low %v1292_v5, %v1296_v61 }
 0x222   :  { %2119 = vmatprep.subr.bf16.mxu0 %v7732_v46  ;;  %2160 = vmatprep.subr.bf16.mxu1 %v7734_v24  ;;  %9758 = vst [vmem:[#allocation131_spill] sm:$0xff] %v7758_v10  ;;  %9759 = vst [vmem:[#allocation132_spill] sm:$0xff] %v7760_v57  ;;  %v1283_v24 = vld [vmem:[#allocation7 + $0x90] sm:$0xff]  ;;  %v1288_v1 = vld [vmem:[#allocation7 + $0xb8] sm:$0xff] }
 0x223   :  { %v1287_v46 = vld [vmem:[#allocation7 + $0xb0] sm:$0xff]  ;;  %9760 = vst [vmem:[#allocation133_spill] sm:$0xff] %v7764_v9  ;;  %9761 = vst [vmem:[#allocation134_spill] sm:$0xff] %v7766_v49  ;;  %v7772_v48 = vcombine.high %v1284_v23, %v1288_v1  ;;  %v7778_v61 = vcombine.low %v1284_v23, %v1288_v1 }
 0x224   :  { %v7770_v15 = vcombine.high %v1283_v24, %v1287_v46  ;;  %v7776_v41 = vcombine.low %v1283_v24, %v1287_v46 }
 0x225   :  { %2120 = vmatpush1.bf16.msra.mxu0 %v7740_v3  ;;  %2161 = vmatpush1.bf16.msra.mxu1 %v7742_v11  ;;  %9763 = vst [vmem:[#allocation136_spill] sm:$0xff] %v7772_v48  ;;  %v1276_v11 = vld [vmem:[#allocation7 + $0x58] sm:$0xff]  ;;  %9765 = vst [vmem:[#allocation138_spill] sm:$0xff] %v7778_v61 }
 0x226   :  { %2121 = vmatprep.subr.bf16.mxu0 %v7746_v25  ;;  %2162 = vmatprep.subr.bf16.mxu1 %v7748_v31  ;;  %9762 = vst [vmem:[#allocation135_spill] sm:$0xff] %v7770_v15  ;;  %v1275_v31 = vld [vmem:[#allocation7 + $0x50] sm:$0xff]  ;;  %v1280_v3 = vld [vmem:[#allocation7 + $0x78] sm:$0xff]  ;;  %9764 = vst [vmem:[#allocation137_spill] sm:$0xff] %v7776_v41 }
 0x227   :  { %v1279_v25 = vld [vmem:[#allocation7 + $0x70] sm:$0xff]  ;;  %v7784_v39 = vcombine.high %v1276_v11, %v1280_v3  ;;  %v7790_v1 = vcombine.low %v1276_v11, %v1280_v3 }
 0x228   :  { %v7782_v5 = vcombine.high %v1275_v31, %v1279_v25  ;;  %v7788_v46 = vcombine.low %v1275_v31, %v1279_v25 }
 0x229   :  { %2122 = vmatpush1.bf16.msra.mxu0 %v7752_v56  ;;  %2163 = vmatpush1.bf16.msra.mxu1 %v7754_v58  ;;  %9767 = vst [vmem:[#allocation140_spill] sm:$0xff] %v7784_v39  ;;  %v1268_v58 = vld [vmem:[#allocation7 + $0x18] sm:$0xff]  ;;  %9769 = vst [vmem:[#allocation142_spill] sm:$0xff] %v7790_v1 }
 0x22a   :  { %2123 = vmatprep.subr.bf16.mxu0 %v7758_v10  ;;  %2164 = vmatprep.subr.bf16.mxu1 %v7760_v57  ;;  %9766 = vst [vmem:[#allocation139_spill] sm:$0xff] %v7782_v5  ;;  %v1267_v57 = vld [vmem:[#allocation7 + $0x10] sm:$0xff]  ;;  %v1272_v56 = vld [vmem:[#allocation7 + $0x38] sm:$0xff]  ;;  %9768 = vst [vmem:[#allocation141_spill] sm:$0xff] %v7788_v46 }
 0x22b   :  { %v1271_v10 = vld [vmem:[#allocation7 + $0x30] sm:$0xff]  ;;  %v7796_v24 = vcombine.high %v1268_v58, %v1272_v56  ;;  %v7802_v3 = vcombine.low %v1268_v58, %v1272_v56 }
 0x22c   :  { %v7794_v23 = vcombine.high %v1267_v57, %v1271_v10  ;;  %v7800_v25 = vcombine.low %v1267_v57, %v1271_v10 }
 0x22d   :  { %2124 = vmatpush1.bf16.msra.mxu0 %v7764_v9  ;;  %2165 = vmatpush1.bf16.msra.mxu1 %v7766_v49  ;;  %9771 = vst [vmem:[#allocation144_spill] sm:$0xff] %v7796_v24  ;;  %v1388_v49 = vld [vmem:[#allocation7 + $0x3d8] sm:$0xff]  ;;  %9773 = vst [vmem:[#allocation146_spill] sm:$0xff] %v7802_v3 }
 0x22e   :  { %2125 = vmatprep.subr.bf16.mxu0 %v7770_v15  ;;  %2166 = vmatprep.subr.bf16.mxu1 %v7772_v48  ;;  %9770 = vst [vmem:[#allocation143_spill] sm:$0xff] %v7794_v23  ;;  %v1387_v48 = vld [vmem:[#allocation7 + $0x3d0] sm:$0xff]  ;;  %v1392_v9 = vld [vmem:[#allocation7 + $0x3f8] sm:$0xff]  ;;  %9772 = vst [vmem:[#allocation145_spill] sm:$0xff] %v7800_v25 }
 0x22f   :  { %v1391_v15 = vld [vmem:[#allocation7 + $0x3f0] sm:$0xff]  ;;  %v7808_v31 = vcombine.high %v1388_v49, %v1392_v9  ;;  %v7814_v56 = vcombine.low %v1388_v49, %v1392_v9 }
 0x230   :  { %v7806_v11 = vcombine.high %v1387_v48, %v1391_v15  ;;  %v7812_v10 = vcombine.low %v1387_v48, %v1391_v15 }
 0x231   :  { %2126 = vmatpush1.bf16.msra.mxu0 %v7776_v41  ;;  %2167 = vmatpush1.bf16.msra.mxu1 %v7778_v61  ;;  %9775 = vst [vmem:[#allocation148_spill] sm:$0xff] %v7808_v31  ;;  %v1380_v61 = vld [vmem:[#allocation7 + $0x398] sm:$0xff]  ;;  %9777 = vst [vmem:[#allocation150_spill] sm:$0xff] %v7814_v56 }
 0x232   :  { %2127 = vmatprep.subr.bf16.mxu0 %v7782_v5  ;;  %2168 = vmatprep.subr.bf16.mxu1 %v7784_v39  ;;  %9774 = vst [vmem:[#allocation147_spill] sm:$0xff] %v7806_v11  ;;  %v1379_v39 = vld [vmem:[#allocation7 + $0x390] sm:$0xff]  ;;  %v1384_v41 = vld [vmem:[#allocation7 + $0x3b8] sm:$0xff]  ;;  %9776 = vst [vmem:[#allocation149_spill] sm:$0xff] %v7812_v10 }
 0x233   :  { %v1383_v5 = vld [vmem:[#allocation7 + $0x3b0] sm:$0xff]  ;;  %v7820_v57 = vcombine.high %v1380_v61, %v1384_v41  ;;  %v7826_v9 = vcombine.low %v1380_v61, %v1384_v41 }
 0x234   :  { %v7818_v58 = vcombine.high %v1379_v39, %v1383_v5  ;;  %v7824_v15 = vcombine.low %v1379_v39, %v1383_v5 }
 0x235   :  { %2128 = vmatpush1.bf16.msra.mxu0 %v7788_v46  ;;  %2169 = vmatpush1.bf16.msra.mxu1 %v7790_v1  ;;  %9779 = vst [vmem:[#allocation152_spill] sm:$0xff] %v7820_v57  ;;  %v1372_v1 = vld [vmem:[#allocation7 + $0x358] sm:$0xff]  ;;  %9781 = vst [vmem:[#allocation154_spill] sm:$0xff] %v7826_v9 }
 0x236   :  { %2129 = vmatprep.subr.bf16.mxu0 %v7794_v23  ;;  %2170 = vmatprep.subr.bf16.mxu1 %v7796_v24  ;;  %9778 = vst [vmem:[#allocation151_spill] sm:$0xff] %v7818_v58  ;;  %v1371_v24 = vld [vmem:[#allocation7 + $0x350] sm:$0xff]  ;;  %v1376_v46 = vld [vmem:[#allocation7 + $0x378] sm:$0xff]  ;;  %9780 = vst [vmem:[#allocation153_spill] sm:$0xff] %v7824_v15 }
 0x237   :  { %v1375_v23 = vld [vmem:[#allocation7 + $0x370] sm:$0xff]  ;;  %v7832_v48 = vcombine.high %v1372_v1, %v1376_v46  ;;  %v7838_v41 = vcombine.low %v1372_v1, %v1376_v46 }
 0x238   :  { %v7830_v49 = vcombine.high %v1371_v24, %v1375_v23  ;;  %v7836_v5 = vcombine.low %v1371_v24, %v1375_v23 }
 0x239   :  { %2130 = vmatpush1.bf16.msra.mxu0 %v7800_v25  ;;  %2171 = vmatpush1.bf16.msra.mxu1 %v7802_v3  ;;  %9783 = vst [vmem:[#allocation156_spill] sm:$0xff] %v7832_v48  ;;  %v1364_v3 = vld [vmem:[#allocation7 + $0x318] sm:$0xff]  ;;  %9785 = vst [vmem:[#allocation158_spill] sm:$0xff] %v7838_v41 }
 0x23a   :  { %2131 = vmatprep.subr.bf16.mxu0 %v7806_v11  ;;  %2172 = vmatprep.subr.bf16.mxu1 %v7808_v31  ;;  %9782 = vst [vmem:[#allocation155_spill] sm:$0xff] %v7830_v49  ;;  %v1363_v31 = vld [vmem:[#allocation7 + $0x310] sm:$0xff]  ;;  %v1368_v25 = vld [vmem:[#allocation7 + $0x338] sm:$0xff]  ;;  %9784 = vst [vmem:[#allocation157_spill] sm:$0xff] %v7836_v5 }
 0x23b   :  { %v1367_v11 = vld [vmem:[#allocation7 + $0x330] sm:$0xff]  ;;  %v7844_v39 = vcombine.high %v1364_v3, %v1368_v25  ;;  %v7850_v46 = vcombine.low %v1364_v3, %v1368_v25 }
 0x23c   :  { %v7842_v61 = vcombine.high %v1363_v31, %v1367_v11  ;;  %v7848_v23 = vcombine.low %v1363_v31, %v1367_v11 }
 0x23d   :  { %2132 = vmatpush2.bf16.msra.mxu0 %v7812_v10  ;;  %2173 = vmatpush2.bf16.msra.mxu1 %v7814_v56  ;;  %9787 = vst [vmem:[#allocation160_spill] sm:$0xff] %v7844_v39  ;;  %v1356_v56 = vld [vmem:[#allocation7 + $0x2d8] sm:$0xff]  ;;  %9789 = vst [vmem:[#allocation162_spill] sm:$0xff] %v7850_v46 }
 0x23e   :  { %2133 = vmatprep.subr.bf16.mxu0 %v7818_v58  ;;  %2174 = vmatprep.subr.bf16.mxu1 %v7820_v57  ;;  %9786 = vst [vmem:[#allocation159_spill] sm:$0xff] %v7842_v61  ;;  %v1355_v57 = vld [vmem:[#allocation7 + $0x2d0] sm:$0xff]  ;;  %v1360_v10 = vld [vmem:[#allocation7 + $0x2f8] sm:$0xff]  ;;  %9788 = vst [vmem:[#allocation161_spill] sm:$0xff] %v7848_v23 }
 0x23f   :  { %v1359_v58 = vld [vmem:[#allocation7 + $0x2f0] sm:$0xff]  ;;  %v7856_v24 = vcombine.high %v1356_v56, %v1360_v10  ;;  %v7862_v25 = vcombine.low %v1356_v56, %v1360_v10 }
 0x240   :  { %v7854_v1 = vcombine.high %v1355_v57, %v1359_v58  ;;  %v7860_v11 = vcombine.low %v1355_v57, %v1359_v58 }
 0x241   :  { %2134 = vmatpush2.bf16.msra.mxu0 %v7824_v15  ;;  %2175 = vmatpush2.bf16.msra.mxu1 %v7826_v9  ;;  %9791 = vst [vmem:[#allocation164_spill] sm:$0xff] %v7856_v24  ;;  %v1348_v9 = vld [vmem:[#allocation7 + $0x298] sm:$0xff]  ;;  %9793 = vst [vmem:[#allocation166_spill] sm:$0xff] %v7862_v25 }
 0x242   :  { %2135 = vmatprep.subr.bf16.mxu0 %v7830_v49  ;;  %2176 = vmatprep.subr.bf16.mxu1 %v7832_v48  ;;  %9790 = vst [vmem:[#allocation163_spill] sm:$0xff] %v7854_v1  ;;  %v1347_v48 = vld [vmem:[#allocation7 + $0x290] sm:$0xff]  ;;  %v1352_v15 = vld [vmem:[#allocation7 + $0x2b8] sm:$0xff]  ;;  %9792 = vst [vmem:[#allocation165_spill] sm:$0xff] %v7860_v11 }
 0x243   :  { %v1351_v49 = vld [vmem:[#allocation7 + $0x2b0] sm:$0xff]  ;;  %v7868_v31 = vcombine.high %v1348_v9, %v1352_v15  ;;  %v7874_v10 = vcombine.low %v1348_v9, %v1352_v15 }
 0x244   :  { %v7866_v3 = vcombine.high %v1347_v48, %v1351_v49  ;;  %v7872_v58 = vcombine.low %v1347_v48, %v1351_v49 }
 0x245   :  { %2136 = vmatpush2.bf16.msra.mxu0 %v7836_v5  ;;  %2177 = vmatpush2.bf16.msra.mxu1 %v7838_v41  ;;  %9795 = vst [vmem:[#allocation168_spill] sm:$0xff] %v7868_v31  ;;  %v1340_v41 = vld [vmem:[#allocation7 + $0x258] sm:$0xff]  ;;  %9797 = vst [vmem:[#allocation170_spill] sm:$0xff] %v7874_v10 }
 0x246   :  { %2137 = vmatprep.subr.bf16.mxu0 %v7842_v61  ;;  %2178 = vmatprep.subr.bf16.mxu1 %v7844_v39  ;;  %9794 = vst [vmem:[#allocation167_spill] sm:$0xff] %v7866_v3  ;;  %v1339_v39 = vld [vmem:[#allocation7 + $0x250] sm:$0xff]  ;;  %v1344_v5 = vld [vmem:[#allocation7 + $0x278] sm:$0xff]  ;;  %9796 = vst [vmem:[#allocation169_spill] sm:$0xff] %v7872_v58 }
 0x247   :  { %v1343_v61 = vld [vmem:[#allocation7 + $0x270] sm:$0xff]  ;;  %v7880_v57 = vcombine.high %v1340_v41, %v1344_v5  ;;  %v7886_v15 = vcombine.low %v1340_v41, %v1344_v5  ;;  %v9807_v5 = vld [vmem:[#allocation73_spill] sm:$0xff]  ;;  %v9808_v41 = vld [vmem:[#allocation74_spill] sm:$0xff] }
 0x248   :  { %v7878_v56 = vcombine.high %v1339_v39, %v1343_v61  ;;  %v7884_v49 = vcombine.low %v1339_v39, %v1343_v61  ;;  %v9809_v61 = vld [vmem:[#allocation75_spill] sm:$0xff]  ;;  %v9810_v39 = vld [vmem:[#allocation76_spill] sm:$0xff] }
 0x249   :  { %2138 = vmatpush2.bf16.msra.mxu0 %v7848_v23  ;;  %2179 = vmatpush2.bf16.msra.mxu1 %v7850_v46  ;;  %9799 = vst [vmem:[#allocation172_spill] sm:$0xff] %v7880_v57  ;;  %v1332_v46 = vld [vmem:[#allocation7 + $0x218] sm:$0xff]  ;;  %9801 = vst [vmem:[#allocation174_spill] sm:$0xff] %v7886_v15 }
 0x24a   :  { %2139 = vmatprep.subr.bf16.mxu0 %v7854_v1  ;;  %2180 = vmatprep.subr.bf16.mxu1 %v7856_v24  ;;  %9798 = vst [vmem:[#allocation171_spill] sm:$0xff] %v7878_v56  ;;  %v1331_v24 = vld [vmem:[#allocation7 + $0x210] sm:$0xff]  ;;  %v1336_v23 = vld [vmem:[#allocation7 + $0x238] sm:$0xff]  ;;  %9800 = vst [vmem:[#allocation173_spill] sm:$0xff] %v7884_v49 }
 0x24b   :  { %v1335_v1 = vld [vmem:[#allocation7 + $0x230] sm:$0xff]  ;;  %v7892_v48 = vcombine.high %v1332_v46, %v1336_v23 }
 0x24c   :  { %v7890_v9 = vcombine.high %v1331_v24, %v1335_v1 }
 0x24d   :  { %2140 = vmatpush2.bf16.msra.mxu0 %v7860_v11  ;;  %2181 = vmatpush2.bf16.msra.mxu1 %v7862_v25  ;;  %9803 = vst [vmem:[#allocation176_spill] sm:$0xff] %v7892_v48 }
 0x24e   :  { %2141 = vmatprep.subr.bf16.mxu0 %v7866_v3  ;;  %2182 = vmatprep.subr.bf16.mxu1 %v7868_v31  ;;  %9802 = vst [vmem:[#allocation175_spill] sm:$0xff] %v7890_v9  ;;  %v7896_v31 = vcombine.low %v1331_v24, %v1335_v1  ;;  %v9813_v1 = vld [vmem:[#allocation80_spill] sm:$0xff]  ;;  %v9814_v24 = vld [vmem:[#allocation79_spill] sm:$0xff] }
 0x250   :  { %9804 = vst [vmem:[#allocation177_spill] sm:$0xff] %v7896_v31 }
 0x251   :  { %2142 = vmatpush2.bf16.msra.mxu0 %v7872_v58  ;;  %2183 = vmatpush2.bf16.msra.mxu1 %v7874_v10  ;;  %v7898_v58 = vcombine.low %v1332_v46, %v1336_v23  ;;  %v9811_v23 = vld [vmem:[#allocation77_spill] sm:$0xff]  ;;  %v9812_v46 = vld [vmem:[#allocation78_spill] sm:$0xff] }
 0x252   :  { %2143 = vmatprep.subr.bf16.mxu0 %v7878_v56  ;;  %2184 = vmatprep.subr.bf16.mxu1 %v7880_v57 }
 0x253   :  { %9805 = vst [vmem:[#allocation178_spill] sm:$0xff] %v7898_v58 }
 0x255   :  { %2144 = vmatpush2.bf16.msra.mxu0 %v7884_v49  ;;  %2185 = vmatpush2.bf16.msra.mxu1 %v7886_v15 }
 0x256   :  { %2145 = vmatprep.subr.bf16.mxu0 %v7890_v9  ;;  %2186 = vmatprep.subr.bf16.mxu1 %v7892_v48 }
 0x259   :  { %2146 = vmatpush2.bf16.msra.mxu0 %v7896_v31  ;;  %2187 = vmatpush2.bf16.msra.mxu1 %v7898_v58 }
 0x25a   :  { %2291 = vmatprep.subr.bf16.mxu0 %v7447_v12  ;;  %2332 = vmatprep.subr.bf16.mxu1 %v7451_v18 }
 0x25c   :  { %2148 = vmatmul.mubr.bf16.vlgmr.msra.gmra.mxu0 %v7718_v40  ;;  %2189 = vmatmul.mubr.bf16.vlgmr.msra.gmra.mxu1 %v7718_v40  ;;  %v9806_v40 = vld [vmem:[#allocation72_spill] sm:$0xff] }
 0x25d   :  { %2292 = vmatpush1.bf16.msra.mxu0 %v7449_v14  ;;  %2333 = vmatpush1.bf16.msra.mxu1 %v7453_v19 }
 0x25e   :  { %2293 = vmatprep.subr.bf16.mxu0 %v7455_v20  ;;  %2334 = vmatprep.subr.bf16.mxu1 %v7458_v17 }
 0x261   :  { %2294 = vmatpush1.bf16.msra.mxu0 %v7462_v27  ;;  %2335 = vmatpush1.bf16.msra.mxu1 %v7466_v28 }
 0x262   :  { %2295 = vmatprep.subr.bf16.mxu0 %v7468_v29  ;;  %2336 = vmatprep.subr.bf16.mxu1 %v7471_v30 }
 0x265   :  { %2296 = vmatpush1.bf16.msra.mxu0 %v7474_v35  ;;  %2337 = vmatpush1.bf16.msra.mxu1 %v7478_v36 }
 0x266   :  { %2297 = vmatprep.subr.bf16.mxu0 %v7480_v37  ;;  %2338 = vmatprep.subr.bf16.mxu1 %v7483_v38 }
 0x269   :  { %2298 = vmatpush1.bf16.msra.mxu0 %v7486_v43  ;;  %2339 = vmatpush1.bf16.msra.mxu1 %v7490_v44 }
 0x26a   :  { %2299 = vmatprep.subr.bf16.mxu0 %v7492_v59  ;;  %2340 = vmatprep.subr.bf16.mxu1 %v7495_v45 }
 0x26d   :  { %2300 = vmatpush1.bf16.msra.mxu0 %v7498_v50  ;;  %2341 = vmatpush1.bf16.msra.mxu1 %v7502_v51 }
 0x26e   :  { %2301 = vmatprep.subr.bf16.mxu0 %v7504_v52  ;;  %2342 = vmatprep.subr.bf16.mxu1 %v7507_v53 }
 0x271   :  { %2302 = vmatpush1.bf16.msra.mxu0 %v7510_v54  ;;  %2343 = vmatpush1.bf16.msra.mxu1 %v7514_v55 }
 0x272   :  { %2303 = vmatprep.subr.bf16.mxu0 %v7519_v60  ;;  %2344 = vmatprep.subr.bf16.mxu1 %v7521_v62 }
 0x275   :  { %2304 = vmatpush1.bf16.msra.mxu0 %v7523_v63  ;;  %2345 = vmatpush1.bf16.msra.mxu1 %v7525_v0 }
 0x276   :  { %2305 = vmatprep.subr.bf16.mxu0 %v7531_v4  ;;  %2346 = vmatprep.subr.bf16.mxu1 %v7533_v6 }
 0x279   :  { %2306 = vmatpush1.bf16.msra.mxu0 %v7535_v7  ;;  %2347 = vmatpush1.bf16.msra.mxu1 %v7537_v8  ;;  %v9837_v8 = vld [vmem:[#allocation100_spill] sm:$0xff] }
 0x27a   :  { %2307 = vmatprep.subr.bf16.mxu0 %v7543_v13  ;;  %2348 = vmatprep.subr.bf16.mxu1 %v7545_v16  ;;  %v9836_v13 = vld [vmem:[#allocation103_spill] sm:$0xff] }
 0x27b   :  { %v7984_v7 = vadd.f32 %v9837_v8, %v9836_v13 }
 0x27d   :  { %2308 = vmatpush2.bf16.msra.mxu0 %v7547_v21  ;;  %2349 = vmatpush2.bf16.msra.mxu1 %v7549_v22  ;;  %v9832_v22 = vld [vmem:[#allocation101_spill] sm:$0xff] }
 0x27e   :  { %2309 = vmatprep.subr.bf16.mxu0 %v7555_v26  ;;  %2350 = vmatprep.subr.bf16.mxu1 %v7557_v32 }
 0x281   :  { %2310 = vmatpush2.bf16.msra.mxu0 %v7559_v33  ;;  %2351 = vmatpush2.bf16.msra.mxu1 %v7561_v34 }
 0x282   :  { %2311 = vmatprep.subr.bf16.mxu0 %v7567_v42  ;;  %2352 = vmatprep.subr.bf16.mxu1 %v7569_v47  ;;  %v9815_v42 = vld [vmem:[#allocation81_spill] sm:$0xff]  ;;  %v9816_v47 = vld [vmem:[#allocation82_spill] sm:$0xff] }
 0x285   :  { %2312 = vmatpush2.bf16.msra.mxu0 %v9806_v40  ;;  %2353 = vmatpush2.bf16.msra.mxu1 %v9807_v5  ;;  %v9817_v40 = vld [vmem:[#allocation83_spill] sm:$0xff]  ;;  %v9818_v5 = vld [vmem:[#allocation84_spill] sm:$0xff] }
 0x286   :  { %2313 = vmatprep.subr.bf16.mxu0 %v9808_v41  ;;  %2354 = vmatprep.subr.bf16.mxu1 %v9809_v61  ;;  %v9819_v41 = vld [vmem:[#allocation85_spill] sm:$0xff]  ;;  %v9820_v61 = vld [vmem:[#allocation86_spill] sm:$0xff] }
 0x289   :  { %2314 = vmatpush2.bf16.msra.mxu0 %v9810_v39  ;;  %2355 = vmatpush2.bf16.msra.mxu1 %v9811_v23  ;;  %v9821_v39 = vld [vmem:[#allocation87_spill] sm:$0xff]  ;;  %v9822_v23 = vld [vmem:[#allocation88_spill] sm:$0xff] }
 0x28a   :  { %2315 = vmatprep.subr.bf16.mxu0 %v9812_v46  ;;  %2356 = vmatprep.subr.bf16.mxu1 %v9813_v1  ;;  %v9823_v46 = vld [vmem:[#allocation89_spill] sm:$0xff]  ;;  %v9824_v1 = vld [vmem:[#allocation90_spill] sm:$0xff] }
 0x28d   :  { %2316 = vmatpush2.bf16.msra.mxu0 %v9814_v24  ;;  %2357 = vmatpush2.bf16.msra.mxu1 %v9815_v42  ;;  %v9825_v24 = vld [vmem:[#allocation91_spill] sm:$0xff]  ;;  %v9826_v42 = vld [vmem:[#allocation92_spill] sm:$0xff] }
 0x28e   :  { %2317 = vmatprep.subr.bf16.mxu0 %v9816_v47  ;;  %2358 = vmatprep.subr.bf16.mxu1 %v9817_v40  ;;  %v9827_v47 = vld [vmem:[#allocation93_spill] sm:$0xff]  ;;  %v9828_v40 = vld [vmem:[#allocation94_spill] sm:$0xff] }
 0x291   :  { %2318 = vmatpush2.bf16.msra.mxu0 %v9818_v5  ;;  %2359 = vmatpush2.bf16.msra.mxu1 %v9819_v41  ;;  %v9829_v5 = vld [vmem:[#allocation95_spill] sm:$0xff]  ;;  %v7972_v41 = vpop.f32.mrf.mxu0 }
 0x292   :  { %2319 = vmatprep.subr.bf16.mxu0 %v9820_v61  ;;  %2360 = vmatprep.subr.bf16.mxu1 %v9821_v39  ;;  %9830 = vst [vmem:[#allocation179_spill] sm:$0xff] %v7972_v41  ;;  %v7974_v61 = vpop.f32.mrf.mxu1 }
 0x293   :  { %9831 = vst [vmem:[#allocation180_spill] sm:$0xff] %v7974_v61 }
 0x295   :  { %2320 = vmatpush2.bf16.msra.mxu0 %v9822_v23  ;;  %2361 = vmatpush2.bf16.msra.mxu1 %v9823_v46 }
 0x296   :  { %2321 = vmatprep.subr.bf16.mxu0 %v9824_v1  ;;  %2362 = vmatprep.subr.bf16.mxu1 %v9825_v24 }
 0x299   :  { %2322 = vmatpush2.bf16.msra.mxu0 %v9826_v42  ;;  %2363 = vmatpush2.bf16.msra.mxu1 %v9827_v47  ;;  %v9833_v47 = vld [vmem:[#allocation99_spill] sm:$0xff] }
 0x29a   :  { %2373 = vmatprep.subr.bf16.mxu0 %v9828_v40  ;;  %2414 = vmatprep.subr.bf16.mxu1 %v9829_v5  ;;  %v7978_v21 = vadd.f32 %v9833_v47, %v9832_v22  ;;  %v9835_v5 = vld [vmem:[#allocation107_spill] sm:$0xff]  ;;  %9838 = vst [vmem:[#allocation99_spill] sm:$0xff] %v7984_v7 }
 0x29c   :  { %9834 = vst [vmem:[#allocation101_spill] sm:$0xff] %v7978_v21 }
 0x2dc   :  { %v2067_v39 = vpop.f32.mrf.mxu0  ;;  %v2108_v23 = vpop.f32.mrf.mxu1 }
 0x2dd   :  { %v2205_v26 = vrot.slane %v2067_v39, 6  ;;  %v2207_v42 = vrot.slane %v2108_v23, 6 }
 0x2de   :  { %v2069_v34 = vpop.f32.mrf.mxu0  ;;  %v2110_v46 = vpop.f32.mrf.mxu1 }
 0x2df   :  { %v2206_v40 = vrot.slane %v2069_v34, 6  ;;  %v2221_v16 = vadd.f32 %v2205_v26, %v9835_v5  ;;  %v2223_v41 = vadd.f32 %v2207_v42, %v7978_v21  ;;  %v2208_v61 = vrot.slane %v2110_v46, 6 }
 0x2e0   :  { %v2071_v33 = vpop.f32.mrf.mxu0  ;;  %v2112_v1 = vpop.f32.mrf.mxu1 }
 0x2e1   :  { %v9839_v33 = vld [vmem:[#allocation108_spill] sm:$0xff]  ;;  %v2224_v39 = vadd.f32 %v2208_v61, %v7984_v7  ;;  %v9841_v7 = vld [vmem:[#allocation113_spill] sm:$0xff] }
 0x2e2   :  { %v2072_v32 = vpop.f32.mrf.mxu0  ;;  %v2113_v24 = vpop.f32.mrf.mxu1  ;;  %v2222_v1 = vadd.f32 %v2206_v40, %v9839_v33 }
 0x2e3   :  { %v6109_v32 = vmul.f32 -1.442695, %v2221_v16  ;;  %v6111_v24 = vmul.f32 -1.442695, %v2223_v41  ;;  %v6112_v22 = vmul.f32 -1.442695, %v2224_v39 }
 0x2e4   :  { %v6110_v23 = vmul.f32 -1.442695, %v2222_v1 }
 0x2e5   :  { %6549 = vpow2.f32 %v6109_v32 }
 0x2e6   :  { %6551 = vpow2.f32 %v6111_v24  ;;  %v9840_v24 = vld [vmem:[#allocation112_spill] sm:$0xff] }
 0x2e7   :  { %6553 = vpow2.f32 %v6110_v23 }
 0x2e8   :  { %6555 = vpow2.f32 %v6112_v22 }
 0x2f2   :  { %v6550_v26 = vpop.eup %6549 }
 0x2f3   :  { %v6552_v34 = vpop.eup %6551  ;;  %v2235_v47 = vadd.f32 1.0, %v6550_v26 }
 0x2f4   :  { %v6554_v42 = vpop.eup %6553  ;;  %v2247_v46 = vadd.f32 1.0, %v6552_v34 }
 0x2f5   :  { %v6556_v21 = vpop.eup %6555  ;;  %v2236_v8 = vadd.f32 1.0, %v6554_v42  ;;  %6557 = vrcp.f32 %v2235_v47  ;;  %v9842_v47 = vld [vmem:[#allocation114_spill] sm:$0xff] }
 0x2f6   :  { %6559 = vrcp.f32 %v2247_v46  ;;  %v2248_v41 = vadd.f32 1.0, %v6556_v21 }
 0x2f7   :  { %6561 = vrcp.f32 %v2236_v8 }
 0x31c   :  { %v2149_v13 = vpop.f32.mrf.mxu0  ;;  %v2190_v5 = vpop.f32.mrf.mxu1 }
 0x31d   :  { %v2209_v16 = vrot.slane %v2149_v13, 6  ;;  %v2211_v40 = vrot.slane %v2190_v5, 6 }
 0x31e   :  { %v2151_v61 = vpop.f32.mrf.mxu0  ;;  %v2192_v1 = vpop.f32.mrf.mxu1 }
 0x31f   :  { %v2225_v32 = vadd.f32 %v2209_v16, %v7694_v2  ;;  %v2227_v39 = vadd.f32 %v2211_v40, %v9840_v24  ;;  %v2210_v23 = vrot.slane %v2151_v61, 6  ;;  %v2212_v22 = vrot.slane %v2192_v1, 6  ;;  %v6558_v16 = vpop.eup %6557  ;;  %v9843_v1 = vld [vmem:[#allocation117_spill] sm:$0xff] }
 0x320   :  { %v2153_v26 = vpop.f32.mrf.mxu0  ;;  %v2194_v34 = vpop.f32.mrf.mxu1  ;;  %v2269_v8 = vrot.slane %v9843_v1, 6 }
 0x321   :  { %6563 = vtanh.f32 %v2225_v32  ;;  %v6113_v42 = vmul.f32 -1.442695, %v2227_v39  ;;  %v2226_v33 = vadd.f32 %v2210_v23, %v9841_v7  ;;  %v2228_v13 = vadd.f32 %v2212_v22, %v9842_v47  ;;  %v6560_v40 = vpop.eup %6559  ;;  %v9844_v23 = vld [vmem:[#allocation118_spill] sm:$0xff] }
 0x322   :  { %6565 = vrcp.f32 %v2248_v41  ;;  %v2154_v5 = vpop.f32.mrf.mxu0  ;;  %v2195_v21 = vpop.f32.mrf.mxu1  ;;  %v2273_v32 = vmul.f32 %v6560_v40, %v2269_v8  ;;  %v2270_v7 = vrot.slane %v9844_v23, 6 }
 0x323   :  { %6567 = vpow2.f32 %v6113_v42  ;;  %v6114_v46 = vmul.f32 -1.442695, %v2228_v13  ;;  %v6562_v61 = vpop.eup %6561 }
 0x324   :  { %6569 = vtanh.f32 %v2226_v33 }
 0x325   :  { %6571 = vpow2.f32 %v6114_v46 }
 0x32e   :  { %v6564_v26 = vpop.eup %6563 }
 0x32f   :  { %v6566_v34 = vpop.eup %6565  ;;  %v2275_v39 = vmul.f32 %v6564_v26, %v6558_v16 }
 0x330   :  { %v6568_v24 = vpop.eup %6567  ;;  %v2274_v13 = vmul.f32 %v6566_v34, %v2270_v7  ;;  %v9846_v34 = vld [vmem:[#allocation97_spill] sm:$0xff] }
 0x331   :  { %v6570_v22 = vpop.eup %6569  ;;  %v7994_v41 = vadd.f32 %v2275_v39, %v2273_v32  ;;  %v2261_v5 = vadd.f32 1.0, %v6568_v24 }
 0x332   :  { %v6572_v42 = vpop.eup %6571  ;;  %v2276_v33 = vmul.f32 %v6570_v22, %v6562_v61  ;;  %v9845_v61 = vld [vmem:[#allocation96_spill] sm:$0xff]  ;;  %v9847_v22 = vld [vmem:[#allocation119_spill] sm:$0xff] }
 0x333   :  { %6573 = vtanh.f32 %v7994_v41  ;;  %v2262_v21 = vadd.f32 1.0, %v6572_v42  ;;  %v9849_v42 = vld [vmem:[#allocation121_spill] sm:$0xff] }
 0x334   :  { %6575 = vrcp.f32 %v2261_v5  ;;  %v7997_v46 = vadd.f32 %v2276_v33, %v2274_v13  ;;  %v9848_v5 = vld [vmem:[#allocation120_spill] sm:$0xff]  ;;  %v9850_v13 = vld [vmem:[#allocation122_spill] sm:$0xff]  ;;  %v9851_v33 = vld [vmem:[#allocation123_spill] sm:$0xff] }
 0x335   :  { %6577 = vrcp.f32 %v2262_v21  ;;  %v9852_v21 = vld [vmem:[#allocation124_spill] sm:$0xff] }
 0x336   :  { %6579 = vtanh.f32 %v7997_v46 }
 0x340   :  { %v6574_v16 = vpop.eup %6573 }
 0x341   :  { %v6576_v40 = vpop.eup %6575 }
 0x342   :  { %v6578_v1 = vpop.eup %6577  ;;  %v2281_v8 = vmul.f32 %v6576_v40, %v6574_v16  ;;  %v9853_v16 = vld [vmem:[#allocation125_spill] sm:$0xff]  ;;  %v9854_v40 = vld [vmem:[#allocation126_spill] sm:$0xff] }
 0x343   :  { %v6580_v26 = vpop.eup %6579 }
 0x344   :  { %v2282_v32 = vmul.f32 %v6580_v26, %v6578_v1  ;;  %v2283_v39 = vpack.c.bf16 %v2281_v8, %v2281_v8  ;;  %v9855_v1 = vld [vmem:[#allocation127_spill] sm:$0xff]  ;;  %v9856_v8 = vld [vmem:[#allocation128_spill] sm:$0xff]  ;;  %v9857_v26 = vld [vmem:[#allocation129_spill] sm:$0xff] }
 0x346   :  { %v2284_v24 = vpack.c.bf16 %v2282_v32, %v2282_v32  ;;  %v8000_v7 = vrot.slane %v2283_v39, 1  ;;  %v9858_v32 = vld [vmem:[#allocation130_spill] sm:$0xff]  ;;  %v9859_v39 = vld [vmem:[#allocation131_spill] sm:$0xff] }
 0x348   :  { %v2288_v23 = vrot.slane %v2284_v24, 1  ;;  %v9860_v24 = vld [vmem:[#allocation132_spill] sm:$0xff] }
 0x34a   :  { %2323 = vmatprep.mubr.bf16.mxu0 %v2288_v23  ;;  %2364 = vmatprep.mubr.bf16.mxu1 %v2288_v23 }
 0x34b   :  { %2324 = vmatmul.mubr.bf16.vlgmr.msra.gmra.mxu0 %v8000_v7  ;;  %2365 = vmatmul.mubr.bf16.vlgmr.msra.gmra.mxu1 %v8000_v7 }
 0x34c   :  { %2374 = vmatpush1.bf16.msra.mxu0 %v9845_v61  ;;  %2415 = vmatpush1.bf16.msra.mxu1 %v9846_v34 }
 0x34d   :  { %2405 = vmatprep.mubr.bf16.mxu0 %v2288_v23  ;;  %2446 = vmatprep.mubr.bf16.mxu1 %v2288_v23  ;;  %v9861_v23 = vld [vmem:[#allocation133_spill] sm:$0xff] }
 0x34e   :  { %2375 = vmatprep.subr.bf16.mxu0 %v9847_v22  ;;  %2416 = vmatprep.subr.bf16.mxu1 %v9848_v5 }
 0x350   :  { %2376 = vmatpush1.bf16.msra.mxu0 %v9849_v42  ;;  %2417 = vmatpush1.bf16.msra.mxu1 %v9850_v13 }
 0x351   :  { %2377 = vmatprep.subr.bf16.mxu0 %v9851_v33  ;;  %2418 = vmatprep.subr.bf16.mxu1 %v9852_v21  ;;  %v9862_v33 = vld [vmem:[#allocation134_spill] sm:$0xff]  ;;  %v9863_v21 = vld [vmem:[#allocation135_spill] sm:$0xff] }
 0x354   :  { %2378 = vmatpush1.bf16.msra.mxu0 %v9853_v16  ;;  %2419 = vmatpush1.bf16.msra.mxu1 %v9854_v40  ;;  %v9864_v16 = vld [vmem:[#allocation136_spill] sm:$0xff]  ;;  %v9865_v40 = vld [vmem:[#allocation137_spill] sm:$0xff] }
 0x355   :  { %2379 = vmatprep.subr.bf16.mxu0 %v9855_v1  ;;  %2420 = vmatprep.subr.bf16.mxu1 %v9856_v8  ;;  %v9866_v1 = vld [vmem:[#allocation138_spill] sm:$0xff]  ;;  %v9867_v8 = vld [vmem:[#allocation139_spill] sm:$0xff] }
 0x358   :  { %2380 = vmatpush1.bf16.msra.mxu0 %v9857_v26  ;;  %2421 = vmatpush1.bf16.msra.mxu1 %v9858_v32  ;;  %v9868_v26 = vld [vmem:[#allocation140_spill] sm:$0xff]  ;;  %v9869_v32 = vld [vmem:[#allocation141_spill] sm:$0xff] }
 0x359   :  { %2381 = vmatprep.subr.bf16.mxu0 %v9859_v39  ;;  %2422 = vmatprep.subr.bf16.mxu1 %v9860_v24  ;;  %v9870_v39 = vld [vmem:[#allocation142_spill] sm:$0xff]  ;;  %v9871_v24 = vld [vmem:[#allocation143_spill] sm:$0xff] }
 0x35c   :  { %2382 = vmatpush1.bf16.msra.mxu0 %v9861_v23  ;;  %2423 = vmatpush1.bf16.msra.mxu1 %v9862_v33  ;;  %v9872_v23 = vld [vmem:[#allocation144_spill] sm:$0xff]  ;;  %v9873_v33 = vld [vmem:[#allocation145_spill] sm:$0xff] }
 0x35d   :  { %2383 = vmatprep.subr.bf16.mxu0 %v9863_v21  ;;  %2424 = vmatprep.subr.bf16.mxu1 %v9864_v16  ;;  %v9874_v21 = vld [vmem:[#allocation146_spill] sm:$0xff]  ;;  %v9875_v16 = vld [vmem:[#allocation147_spill] sm:$0xff] }
 0x360   :  { %2384 = vmatpush1.bf16.msra.mxu0 %v9865_v40  ;;  %2425 = vmatpush1.bf16.msra.mxu1 %v9866_v1  ;;  %v9876_v40 = vld [vmem:[#allocation148_spill] sm:$0xff]  ;;  %v9877_v1 = vld [vmem:[#allocation149_spill] sm:$0xff] }
 0x361   :  { %2385 = vmatprep.subr.bf16.mxu0 %v9867_v8  ;;  %2426 = vmatprep.subr.bf16.mxu1 %v9868_v26  ;;  %v9878_v8 = vld [vmem:[#allocation150_spill] sm:$0xff]  ;;  %v9879_v26 = vld [vmem:[#allocation151_spill] sm:$0xff] }
 0x364   :  { %2386 = vmatpush1.bf16.msra.mxu0 %v9869_v32  ;;  %2427 = vmatpush1.bf16.msra.mxu1 %v9870_v39  ;;  %v9880_v32 = vld [vmem:[#allocation152_spill] sm:$0xff]  ;;  %v9881_v39 = vld [vmem:[#allocation153_spill] sm:$0xff] }
 0x365   :  { %2387 = vmatprep.subr.bf16.mxu0 %v9871_v24  ;;  %2428 = vmatprep.subr.bf16.mxu1 %v9872_v23  ;;  %v9882_v24 = vld [vmem:[#allocation154_spill] sm:$0xff]  ;;  %v9883_v23 = vld [vmem:[#allocation155_spill] sm:$0xff] }
 0x368   :  { %2388 = vmatpush1.bf16.msra.mxu0 %v9873_v33  ;;  %2429 = vmatpush1.bf16.msra.mxu1 %v9874_v21  ;;  %v9884_v33 = vld [vmem:[#allocation156_spill] sm:$0xff]  ;;  %v9885_v21 = vld [vmem:[#allocation157_spill] sm:$0xff] }
 0x369   :  { %2389 = vmatprep.subr.bf16.mxu0 %v9875_v16  ;;  %2430 = vmatprep.subr.bf16.mxu1 %v9876_v40  ;;  %v9886_v16 = vld [vmem:[#allocation158_spill] sm:$0xff]  ;;  %v9887_v40 = vld [vmem:[#allocation159_spill] sm:$0xff] }
 0x36c   :  { %2390 = vmatpush2.bf16.msra.mxu0 %v9877_v1  ;;  %2431 = vmatpush2.bf16.msra.mxu1 %v9878_v8  ;;  %v9888_v1 = vld [vmem:[#allocation160_spill] sm:$0xff]  ;;  %v9889_v8 = vld [vmem:[#allocation161_spill] sm:$0xff] }
 0x36d   :  { %2391 = vmatprep.subr.bf16.mxu0 %v9879_v26  ;;  %2432 = vmatprep.subr.bf16.mxu1 %v9880_v32  ;;  %v9890_v26 = vld [vmem:[#allocation162_spill] sm:$0xff]  ;;  %v9891_v32 = vld [vmem:[#allocation163_spill] sm:$0xff] }
 0x370   :  { %2392 = vmatpush2.bf16.msra.mxu0 %v9881_v39  ;;  %2433 = vmatpush2.bf16.msra.mxu1 %v9882_v24  ;;  %v9892_v39 = vld [vmem:[#allocation164_spill] sm:$0xff] }
 0x371   :  { %2393 = vmatprep.subr.bf16.mxu0 %v9883_v23  ;;  %2434 = vmatprep.subr.bf16.mxu1 %v9884_v33 }
 0x374   :  { %2394 = vmatpush2.bf16.msra.mxu0 %v9885_v21  ;;  %2435 = vmatpush2.bf16.msra.mxu1 %v9886_v16  ;;  %v9893_v21 = vld [vmem:[#allocation168_spill] sm:$0xff]  ;;  %v9894_v16 = vld [vmem:[#allocation169_spill] sm:$0xff] }
 0x375   :  { %2395 = vmatprep.subr.bf16.mxu0 %v9887_v40  ;;  %2436 = vmatprep.subr.bf16.mxu1 %v9888_v1 }
 0x378   :  { %2396 = vmatpush2.bf16.msra.mxu0 %v9889_v8  ;;  %2437 = vmatpush2.bf16.msra.mxu1 %v9890_v26 }
 0x379   :  { %2397 = vmatprep.subr.bf16.mxu0 %v9891_v32  ;;  %2438 = vmatprep.subr.bf16.mxu1 %v9892_v39 }
 0x37c   :  { %2398 = vmatpush2.bf16.msra.mxu0 %v7860_v11  ;;  %2439 = vmatpush2.bf16.msra.mxu1 %v7862_v25 }
 0x37d   :  { %2399 = vmatprep.subr.bf16.mxu0 %v7866_v3  ;;  %2440 = vmatprep.subr.bf16.mxu1 %v9893_v21 }
 0x380   :  { %2400 = vmatpush2.bf16.msra.mxu0 %v9894_v16  ;;  %2441 = vmatpush2.bf16.msra.mxu1 %v7874_v10 }
 0x381   :  { %2401 = vmatprep.subr.bf16.mxu0 %v7878_v56  ;;  %2442 = vmatprep.subr.bf16.mxu1 %v7880_v57 }
 0x384   :  { %2402 = vmatpush2.bf16.msra.mxu0 %v7884_v49  ;;  %2443 = vmatpush2.bf16.msra.mxu1 %v7886_v15 }
 0x385   :  { %2403 = vmatprep.subr.bf16.mxu0 %v7890_v9  ;;  %2444 = vmatprep.subr.bf16.mxu1 %v7892_v48 }
 0x388   :  { %2404 = vmatpush2.bf16.msra.mxu0 %v7896_v31  ;;  %2445 = vmatpush2.bf16.msra.mxu1 %v7898_v58 }
 0x389   :  { %2549 = vmatprep.subr.bf16.mxu0 %v7447_v12  ;;  %2590 = vmatprep.subr.bf16.mxu1 %v7451_v18 }
 0x38b   :  { %2406 = vmatmul.mubr.bf16.vlgmr.msra.gmra.mxu0 %v8000_v7  ;;  %2447 = vmatmul.mubr.bf16.vlgmr.msra.gmra.mxu1 %v8000_v7  ;;  %v9895_v7 = vld [vmem:[#allocation60_spill] sm:$0xff] }
 0x38c   :  { %2550 = vmatpush1.bf16.msra.mxu0 %v7449_v14  ;;  %2591 = vmatpush1.bf16.msra.mxu1 %v7453_v19 }
 0x38d   :  { %2551 = vmatprep.subr.bf16.mxu0 %v7455_v20  ;;  %2592 = vmatprep.subr.bf16.mxu1 %v7458_v17 }
 0x390   :  { %2552 = vmatpush1.bf16.msra.mxu0 %v7462_v27  ;;  %2593 = vmatpush1.bf16.msra.mxu1 %v7466_v28 }
 0x391   :  { %2553 = vmatprep.subr.bf16.mxu0 %v7468_v29  ;;  %2594 = vmatprep.subr.bf16.mxu1 %v7471_v30 }
 0x394   :  { %2554 = vmatpush1.bf16.msra.mxu0 %v7474_v35  ;;  %2595 = vmatpush1.bf16.msra.mxu1 %v7478_v36  ;;  %v9934_v35 = vld [vmem:[#allocation99_spill] sm:$0xff] }
 0x395   :  { %2555 = vmatprep.subr.bf16.mxu0 %v7480_v37  ;;  %2596 = vmatprep.subr.bf16.mxu1 %v7483_v38  ;;  %v9933_v37 = vld [vmem:[#allocation108_spill] sm:$0xff] }
 0x398   :  { %2556 = vmatpush1.bf16.msra.mxu0 %v7486_v43  ;;  %2597 = vmatpush1.bf16.msra.mxu1 %v7490_v44 }
 0x399   :  { %2557 = vmatprep.subr.bf16.mxu0 %v7492_v59  ;;  %2598 = vmatprep.subr.bf16.mxu1 %v7495_v45 }
 0x39c   :  { %2558 = vmatpush1.bf16.msra.mxu0 %v7498_v50  ;;  %2599 = vmatpush1.bf16.msra.mxu1 %v7502_v51 }
 0x39d   :  { %2559 = vmatprep.subr.bf16.mxu0 %v7504_v52  ;;  %2600 = vmatprep.subr.bf16.mxu1 %v7507_v53  ;;  %v9896_v52 = vld [vmem:[#allocation61_spill] sm:$0xff]  ;;  %v9897_v53 = vld [vmem:[#allocation62_spill] sm:$0xff] }
 0x3a0   :  { %2560 = vmatpush1.bf16.msra.mxu0 %v7510_v54  ;;  %2601 = vmatpush1.bf16.msra.mxu1 %v7514_v55  ;;  %v9898_v54 = vld [vmem:[#allocation63_spill] sm:$0xff]  ;;  %v9899_v55 = vld [vmem:[#allocation64_spill] sm:$0xff] }
 0x3a1   :  { %2561 = vmatprep.subr.bf16.mxu0 %v7519_v60  ;;  %2602 = vmatprep.subr.bf16.mxu1 %v7521_v62  ;;  %v9900_v60 = vld [vmem:[#allocation65_spill] sm:$0xff]  ;;  %v9901_v62 = vld [vmem:[#allocation66_spill] sm:$0xff] }
 0x3a4   :  { %2562 = vmatpush1.bf16.msra.mxu0 %v7523_v63  ;;  %2603 = vmatpush1.bf16.msra.mxu1 %v7525_v0  ;;  %v9902_v63 = vld [vmem:[#allocation67_spill] sm:$0xff]  ;;  %v9903_v0 = vld [vmem:[#allocation68_spill] sm:$0xff] }
 0x3a5   :  { %2563 = vmatprep.subr.bf16.mxu0 %v7531_v4  ;;  %2604 = vmatprep.subr.bf16.mxu1 %v7533_v6  ;;  %v9904_v4 = vld [vmem:[#allocation69_spill] sm:$0xff]  ;;  %v9905_v6 = vld [vmem:[#allocation70_spill] sm:$0xff] }
 0x3a8   :  { %2564 = vmatpush1.bf16.msra.mxu0 %v9895_v7  ;;  %2605 = vmatpush1.bf16.msra.mxu1 %v9896_v52  ;;  %v9906_v7 = vld [vmem:[#allocation71_spill] sm:$0xff]  ;;  %v9907_v52 = vld [vmem:[#allocation72_spill] sm:$0xff] }
 0x3a9   :  { %2565 = vmatprep.subr.bf16.mxu0 %v9897_v53  ;;  %2606 = vmatprep.subr.bf16.mxu1 %v9898_v54  ;;  %v9908_v53 = vld [vmem:[#allocation73_spill] sm:$0xff]  ;;  %v9909_v54 = vld [vmem:[#allocation74_spill] sm:$0xff] }
 0x3ac   :  { %2566 = vmatpush2.bf16.msra.mxu0 %v9899_v55  ;;  %2607 = vmatpush2.bf16.msra.mxu1 %v9900_v60  ;;  %v9910_v55 = vld [vmem:[#allocation75_spill] sm:$0xff]  ;;  %v9911_v60 = vld [vmem:[#allocation76_spill] sm:$0xff] }
 0x3ad   :  { %2567 = vmatprep.subr.bf16.mxu0 %v9901_v62  ;;  %2608 = vmatprep.subr.bf16.mxu1 %v9902_v63  ;;  %v9912_v62 = vld [vmem:[#allocation77_spill] sm:$0xff]  ;;  %v9913_v63 = vld [vmem:[#allocation78_spill] sm:$0xff] }
 0x3b0   :  { %2568 = vmatpush2.bf16.msra.mxu0 %v9903_v0  ;;  %2609 = vmatpush2.bf16.msra.mxu1 %v9904_v4  ;;  %v9914_v0 = vld [vmem:[#allocation80_spill] sm:$0xff]  ;;  %v9915_v4 = vld [vmem:[#allocation79_spill] sm:$0xff] }
 0x3b1   :  { %2569 = vmatprep.subr.bf16.mxu0 %v9905_v6  ;;  %2610 = vmatprep.subr.bf16.mxu1 %v9906_v7  ;;  %v9916_v6 = vld [vmem:[#allocation81_spill] sm:$0xff]  ;;  %v9917_v7 = vld [vmem:[#allocation82_spill] sm:$0xff] }
 0x3b4   :  { %2570 = vmatpush2.bf16.msra.mxu0 %v9907_v52  ;;  %2611 = vmatpush2.bf16.msra.mxu1 %v9908_v53  ;;  %v9918_v52 = vld [vmem:[#allocation83_spill] sm:$0xff]  ;;  %v9919_v53 = vld [vmem:[#allocation84_spill] sm:$0xff] }
 0x3b5   :  { %2571 = vmatprep.subr.bf16.mxu0 %v9909_v54  ;;  %2612 = vmatprep.subr.bf16.mxu1 %v9910_v55  ;;  %v9920_v54 = vld [vmem:[#allocation85_spill] sm:$0xff]  ;;  %v9921_v55 = vld [vmem:[#allocation86_spill] sm:$0xff] }
 0x3b8   :  { %2572 = vmatpush2.bf16.msra.mxu0 %v9911_v60  ;;  %2613 = vmatpush2.bf16.msra.mxu1 %v9912_v62  ;;  %v9922_v60 = vld [vmem:[#allocation87_spill] sm:$0xff]  ;;  %v9923_v62 = vld [vmem:[#allocation88_spill] sm:$0xff] }
 0x3b9   :  { %2573 = vmatprep.subr.bf16.mxu0 %v9913_v63  ;;  %2614 = vmatprep.subr.bf16.mxu1 %v9914_v0  ;;  %v9924_v63 = vld [vmem:[#allocation89_spill] sm:$0xff]  ;;  %v9925_v0 = vld [vmem:[#allocation90_spill] sm:$0xff] }
 0x3bc   :  { %2574 = vmatpush2.bf16.msra.mxu0 %v9915_v4  ;;  %2615 = vmatpush2.bf16.msra.mxu1 %v9916_v6  ;;  %v9926_v4 = vld [vmem:[#allocation91_spill] sm:$0xff]  ;;  %v9927_v6 = vld [vmem:[#allocation92_spill] sm:$0xff] }
 0x3bd   :  { %2575 = vmatprep.subr.bf16.mxu0 %v9917_v7  ;;  %2616 = vmatprep.subr.bf16.mxu1 %v9918_v52  ;;  %v9928_v7 = vld [vmem:[#allocation93_spill] sm:$0xff]  ;;  %v9929_v52 = vld [vmem:[#allocation94_spill] sm:$0xff] }
 0x3c0   :  { %2576 = vmatpush2.bf16.msra.mxu0 %v9919_v53  ;;  %2617 = vmatpush2.bf16.msra.mxu1 %v9920_v54  ;;  %v9930_v53 = vld [vmem:[#allocation95_spill] sm:$0xff] }
 0x3c1   :  { %2577 = vmatprep.subr.bf16.mxu0 %v9921_v55  ;;  %2618 = vmatprep.subr.bf16.mxu1 %v9922_v60 }
 0x3c4   :  { %2578 = vmatpush2.bf16.msra.mxu0 %v9923_v62  ;;  %2619 = vmatpush2.bf16.msra.mxu1 %v9924_v63 }
 0x3c5   :  { %2579 = vmatprep.subr.bf16.mxu0 %v9925_v0  ;;  %2620 = vmatprep.subr.bf16.mxu1 %v9926_v4  ;;  %v9931_v4 = vld [vmem:[#allocation107_spill] sm:$0xff] }
 0x3c8   :  { %2580 = vmatpush2.bf16.msra.mxu0 %v9927_v6  ;;  %2621 = vmatpush2.bf16.msra.mxu1 %v9928_v7  ;;  %v9932_v6 = vld [vmem:[#allocation101_spill] sm:$0xff] }
 0x3c9   :  { %2631 = vmatprep.subr.bf16.mxu0 %v9929_v52  ;;  %2672 = vmatprep.subr.bf16.mxu1 %v9930_v53 }
 0x40b   :  { %v2325_v54 = vpop.f32.mrf.mxu0  ;;  %v2366_v55 = vpop.f32.mrf.mxu1 }
 0x40c   :  { %v2463_v59 = vrot.slane %v2325_v54, 4  ;;  %v2465_v0 = vrot.slane %v2366_v55, 4 }
 0x40d   :  { %v2327_v51 = vpop.f32.mrf.mxu0  ;;  %v2368_v60 = vpop.f32.mrf.mxu1 }
 0x40e   :  { %v2464_v44 = vrot.slane %v2327_v51, 4  ;;  %v2479_v43 = vadd.f32 %v2463_v59, %v9931_v4  ;;  %v2481_v38 = vadd.f32 %v2465_v0, %v9932_v6  ;;  %v2466_v7 = vrot.slane %v2368_v60, 4 }
 0x40f   :  { %v2329_v50 = vpop.f32.mrf.mxu0  ;;  %v2370_v62 = vpop.f32.mrf.mxu1 }
 0x410   :  { %v2480_v52 = vadd.f32 %v2464_v44, %v9933_v37  ;;  %v6115_v36 = vmul.f32 -1.442695, %v2479_v43  ;;  %v6117_v53 = vmul.f32 -1.442695, %v2481_v38  ;;  %v2482_v30 = vadd.f32 %v2466_v7, %v9934_v35  ;;  %v9936_v35 = vld [vmem:[#allocation113_spill] sm:$0xff] }
 0x411   :  { %v2330_v45 = vpop.f32.mrf.mxu0  ;;  %v2371_v63 = vpop.f32.mrf.mxu1 }
 0x412   :  { %v6116_v29 = vmul.f32 -1.442695, %v2480_v52  ;;  %6581 = vpow2.f32 %v6115_v36  ;;  %v6118_v50 = vmul.f32 -1.442695, %v2482_v30 }
 0x413   :  { %6583 = vpow2.f32 %v6117_v53 }
 0x414   :  { %6585 = vpow2.f32 %v6116_v29  ;;  %v9935_v29 = vld [vmem:[#allocation112_spill] sm:$0xff] }
 0x415   :  { %6587 = vpow2.f32 %v6118_v50 }
 0x41f   :  { %v6582_v45 = vpop.eup %6581 }
 0x420   :  { %v6584_v54 = vpop.eup %6583  ;;  %v2493_v55 = vadd.f32 1.0, %v6582_v45 }
 0x421   :  { %v6586_v51 = vpop.eup %6585  ;;  %v2505_v59 = vadd.f32 1.0, %v6584_v54 }
 0x422   :  { %v6588_v62 = vpop.eup %6587  ;;  %v2494_v63 = vadd.f32 1.0, %v6586_v51  ;;  %6589 = vrcp.f32 %v2493_v55 }
 0x423   :  { %6591 = vrcp.f32 %v2505_v59  ;;  %v2506_v44 = vadd.f32 1.0, %v6588_v62 }
 0x424   :  { %6593 = vrcp.f32 %v2494_v63  ;;  %v2527_v63 = vrot.slane %v7994_v41, 6 }
 0x44b   :  { %v2407_v60 = vpop.f32.mrf.mxu0  ;;  %v2448_v0 = vpop.f32.mrf.mxu1 }
 0x44c   :  { %v2467_v43 = vrot.slane %v2407_v60, 4  ;;  %v2469_v38 = vrot.slane %v2448_v0, 4  ;;  %v6590_v0 = vpop.eup %6589 }
 0x44d   :  { %v2409_v52 = vpop.f32.mrf.mxu0  ;;  %v2450_v36 = vpop.f32.mrf.mxu1 }
 0x44e   :  { %v2483_v30 = vadd.f32 %v2467_v43, %v7694_v2  ;;  %v2485_v53 = vadd.f32 %v2469_v38, %v9935_v29  ;;  %v2468_v7 = vrot.slane %v2409_v52, 4  ;;  %v2470_v50 = vrot.slane %v2450_v36, 4  ;;  %v6592_v43 = vpop.eup %6591 }
 0x44f   :  { %v2411_v45 = vpop.f32.mrf.mxu0  ;;  %v2452_v54 = vpop.f32.mrf.mxu1 }
 0x450   :  { %6595 = vtanh.f32 %v2483_v30  ;;  %v6119_v51 = vmul.f32 -1.442695, %v2485_v53  ;;  %v2484_v37 = vadd.f32 %v2468_v7, %v9936_v35  ;;  %v2486_v55 = vadd.f32 %v2470_v50, %v9842_v47  ;;  %v6594_v38 = vpop.eup %6593 }
 0x451   :  { %6597 = vrcp.f32 %v2506_v44  ;;  %v2412_v59 = vpop.f32.mrf.mxu0  ;;  %v2453_v62 = vpop.f32.mrf.mxu1  ;;  %v2531_v30 = vmul.f32 %v6592_v43, %v2527_v63  ;;  %v2528_v7 = vrot.slane %v7997_v46, 6 }
 0x452   :  { %6599 = vpow2.f32 %v6119_v51  ;;  %v6120_v60 = vmul.f32 -1.442695, %v2486_v55 }
 0x453   :  { %6601 = vtanh.f32 %v2484_v37 }
 0x454   :  { %6603 = vpow2.f32 %v6120_v60 }
 0x45d   :  { %v6596_v52 = vpop.eup %6595 }
 0x45e   :  { %v6598_v36 = vpop.eup %6597  ;;  %v2533_v53 = vmul.f32 %v6596_v52, %v6590_v0 }
 0x45f   :  { %v6600_v45 = vpop.eup %6599  ;;  %v2532_v55 = vmul.f32 %v6598_v36, %v2528_v7  ;;  %v9939_v7 = vld [vmem:[#allocation125_spill] sm:$0xff] }
 0x460   :  { %v6602_v50 = vpop.eup %6601  ;;  %v8144_v44 = vadd.f32 %v2533_v53, %v2531_v30  ;;  %v2519_v54 = vadd.f32 1.0, %v6600_v45  ;;  %v9938_v45 = vld [vmem:[#allocation124_spill] sm:$0xff] }
 0x461   :  { %v6604_v51 = vpop.eup %6603  ;;  %v2534_v37 = vmul.f32 %v6602_v50, %v6594_v38  ;;  %v9937_v38 = vld [vmem:[#allocation123_spill] sm:$0xff]  ;;  %v9940_v50 = vld [vmem:[#allocation126_spill] sm:$0xff] }
 0x462   :  { %6605 = vtanh.f32 %v8144_v44  ;;  %v2520_v59 = vadd.f32 1.0, %v6604_v51  ;;  %v9942_v51 = vld [vmem:[#allocation128_spill] sm:$0xff] }
 0x463   :  { %6607 = vrcp.f32 %v2519_v54  ;;  %v8147_v62 = vadd.f32 %v2534_v37, %v2532_v55  ;;  %v9941_v54 = vld [vmem:[#allocation127_spill] sm:$0xff]  ;;  %v9943_v55 = vld [vmem:[#allocation129_spill] sm:$0xff]  ;;  %v9944_v37 = vld [vmem:[#allocation130_spill] sm:$0xff] }
 0x464   :  { %6609 = vrcp.f32 %v2520_v59  ;;  %v9945_v59 = vld [vmem:[#allocation131_spill] sm:$0xff] }
 0x465   :  { %6611 = vtanh.f32 %v8147_v62 }
 0x46f   :  { %v6606_v41 = vpop.eup %6605 }
 0x470   :  { %v6608_v60 = vpop.eup %6607 }
 0x471   :  { %v6610_v0 = vpop.eup %6609  ;;  %v2539_v46 = vmul.f32 %v6608_v60, %v6606_v41  ;;  %v9946_v41 = vld [vmem:[#allocation132_spill] sm:$0xff]  ;;  %v9947_v60 = vld [vmem:[#allocation133_spill] sm:$0xff] }
 0x472   :  { %v6612_v43 = vpop.eup %6611 }
 0x473   :  { %v2540_v63 = vmul.f32 %v6612_v43, %v6610_v0  ;;  %v2541_v52 = vpack.c.bf16 %v2539_v46, %v2539_v46  ;;  %v9948_v0 = vld [vmem:[#allocation134_spill] sm:$0xff]  ;;  %v9949_v46 = vld [vmem:[#allocation135_spill] sm:$0xff]  ;;  %v9950_v43 = vld [vmem:[#allocation136_spill] sm:$0xff] }
 0x475   :  { %v2542_v30 = vpack.c.bf16 %v2540_v63, %v2540_v63  ;;  %v8150_v36 = vrot.slane %v2541_v52, 2  ;;  %v9951_v63 = vld [vmem:[#allocation137_spill] sm:$0xff]  ;;  %v9952_v52 = vld [vmem:[#allocation138_spill] sm:$0xff] }
 0x477   :  { %v2546_v53 = vrot.slane %v2542_v30, 2  ;;  %v9953_v30 = vld [vmem:[#allocation139_spill] sm:$0xff] }
 0x479   :  { %2581 = vmatprep.mubr.bf16.mxu0 %v2546_v53  ;;  %2622 = vmatprep.mubr.bf16.mxu1 %v2546_v53 }
 0x47a   :  { %2582 = vmatmul.mubr.bf16.vlgmr.msra.gmra.mxu0 %v8150_v36  ;;  %2623 = vmatmul.mubr.bf16.vlgmr.msra.gmra.mxu1 %v8150_v36 }
 0x47b   :  { %2632 = vmatpush1.bf16.msra.mxu0 %v9845_v61  ;;  %2673 = vmatpush1.bf16.msra.mxu1 %v9846_v34 }
 0x47c   :  { %2663 = vmatprep.mubr.bf16.mxu0 %v2546_v53  ;;  %2704 = vmatprep.mubr.bf16.mxu1 %v2546_v53  ;;  %v9954_v53 = vld [vmem:[#allocation140_spill] sm:$0xff] }
 0x47d   :  { %2633 = vmatprep.subr.bf16.mxu0 %v9847_v22  ;;  %2674 = vmatprep.subr.bf16.mxu1 %v9848_v5 }
 0x47f   :  { %2634 = vmatpush1.bf16.msra.mxu0 %v9849_v42  ;;  %2675 = vmatpush1.bf16.msra.mxu1 %v9850_v13 }
 0x480   :  { %2635 = vmatprep.subr.bf16.mxu0 %v9937_v38  ;;  %2676 = vmatprep.subr.bf16.mxu1 %v9938_v45 }
 0x483   :  { %2636 = vmatpush1.bf16.msra.mxu0 %v9939_v7  ;;  %2677 = vmatpush1.bf16.msra.mxu1 %v9940_v50 }
 0x484   :  { %2637 = vmatprep.subr.bf16.mxu0 %v9941_v54  ;;  %2678 = vmatprep.subr.bf16.mxu1 %v9942_v51 }
 0x487   :  { %2638 = vmatpush1.bf16.msra.mxu0 %v9943_v55  ;;  %2679 = vmatpush1.bf16.msra.mxu1 %v9944_v37  ;;  %v9955_v37 = vld [vmem:[#allocation141_spill] sm:$0xff] }
 0x488   :  { %2639 = vmatprep.subr.bf16.mxu0 %v9945_v59  ;;  %2680 = vmatprep.subr.bf16.mxu1 %v9946_v41  ;;  %v9956_v59 = vld [vmem:[#allocation142_spill] sm:$0xff]  ;;  %v9957_v41 = vld [vmem:[#allocation143_spill] sm:$0xff] }
 0x48b   :  { %2640 = vmatpush1.bf16.msra.mxu0 %v9947_v60  ;;  %2681 = vmatpush1.bf16.msra.mxu1 %v9948_v0  ;;  %v9958_v60 = vld [vmem:[#allocation144_spill] sm:$0xff]  ;;  %v9959_v0 = vld [vmem:[#allocation145_spill] sm:$0xff] }
 0x48c   :  { %2641 = vmatprep.subr.bf16.mxu0 %v9949_v46  ;;  %2682 = vmatprep.subr.bf16.mxu1 %v9950_v43  ;;  %v9960_v46 = vld [vmem:[#allocation146_spill] sm:$0xff]  ;;  %v9961_v43 = vld [vmem:[#allocation147_spill] sm:$0xff] }
 0x48f   :  { %2642 = vmatpush1.bf16.msra.mxu0 %v9951_v63  ;;  %2683 = vmatpush1.bf16.msra.mxu1 %v9952_v52  ;;  %v9962_v63 = vld [vmem:[#allocation148_spill] sm:$0xff]  ;;  %v9963_v52 = vld [vmem:[#allocation149_spill] sm:$0xff] }
 0x490   :  { %2643 = vmatprep.subr.bf16.mxu0 %v9953_v30  ;;  %2684 = vmatprep.subr.bf16.mxu1 %v9954_v53  ;;  %v9964_v30 = vld [vmem:[#allocation150_spill] sm:$0xff]  ;;  %v9965_v53 = vld [vmem:[#allocation151_spill] sm:$0xff] }
 0x493   :  { %2644 = vmatpush1.bf16.msra.mxu0 %v9955_v37  ;;  %2685 = vmatpush1.bf16.msra.mxu1 %v9956_v59  ;;  %v9966_v37 = vld [vmem:[#allocation152_spill] sm:$0xff]  ;;  %v9967_v59 = vld [vmem:[#allocation153_spill] sm:$0xff] }
 0x494   :  { %2645 = vmatprep.subr.bf16.mxu0 %v9957_v41  ;;  %2686 = vmatprep.subr.bf16.mxu1 %v9958_v60 }
 0x497   :  { %2646 = vmatpush1.bf16.msra.mxu0 %v9959_v0  ;;  %2687 = vmatpush1.bf16.msra.mxu1 %v9960_v46  ;;  %v9968_v46 = vld [vmem:[#allocation157_spill] sm:$0xff] }
 0x498   :  { %2647 = vmatprep.subr.bf16.mxu0 %v9961_v43  ;;  %2688 = vmatprep.subr.bf16.mxu1 %v9962_v63  ;;  %v9969_v43 = vld [vmem:[#allocation158_spill] sm:$0xff] }
 0x49b   :  { %2648 = vmatpush2.bf16.msra.mxu0 %v9963_v52  ;;  %2689 = vmatpush2.bf16.msra.mxu1 %v9964_v30 }
 0x49c   :  { %2649 = vmatprep.subr.bf16.mxu0 %v9965_v53  ;;  %2690 = vmatprep.subr.bf16.mxu1 %v9966_v37 }
 0x49f   :  { %2650 = vmatpush2.bf16.msra.mxu0 %v9967_v59  ;;  %2691 = vmatpush2.bf16.msra.mxu1 %v9882_v24 }
 0x4a0   :  { %2651 = vmatprep.subr.bf16.mxu0 %v9883_v23  ;;  %2692 = vmatprep.subr.bf16.mxu1 %v9884_v33 }
 0x4a3   :  { %2652 = vmatpush2.bf16.msra.mxu0 %v9968_v46  ;;  %2693 = vmatpush2.bf16.msra.mxu1 %v9969_v43 }
 0x4a4   :  { %2653 = vmatprep.subr.bf16.mxu0 %v9887_v40  ;;  %2694 = vmatprep.subr.bf16.mxu1 %v9888_v1 }
 0x4a7   :  { %2654 = vmatpush2.bf16.msra.mxu0 %v9889_v8  ;;  %2695 = vmatpush2.bf16.msra.mxu1 %v9890_v26 }
 0x4a8   :  { %2655 = vmatprep.subr.bf16.mxu0 %v9891_v32  ;;  %2696 = vmatprep.subr.bf16.mxu1 %v9892_v39 }
 0x4ab   :  { %2656 = vmatpush2.bf16.msra.mxu0 %v7860_v11  ;;  %2697 = vmatpush2.bf16.msra.mxu1 %v7862_v25 }
 0x4ac   :  { %2657 = vmatprep.subr.bf16.mxu0 %v7866_v3  ;;  %2698 = vmatprep.subr.bf16.mxu1 %v9893_v21 }
 0x4af   :  { %2658 = vmatpush2.bf16.msra.mxu0 %v9894_v16  ;;  %2699 = vmatpush2.bf16.msra.mxu1 %v7874_v10  ;;  %v10029_v16 = vld [vmem:[#allocation99_spill] sm:$0xff] }
 0x4b0   :  { %2659 = vmatprep.subr.bf16.mxu0 %v7878_v56  ;;  %2700 = vmatprep.subr.bf16.mxu1 %v7880_v57  ;;  %v10028_v56 = vld [vmem:[#allocation108_spill] sm:$0xff] }
 0x4b3   :  { %2660 = vmatpush2.bf16.msra.mxu0 %v7884_v49  ;;  %2701 = vmatpush2.bf16.msra.mxu1 %v7886_v15 }
 0x4b4   :  { %2661 = vmatprep.subr.bf16.mxu0 %v7890_v9  ;;  %2702 = vmatprep.subr.bf16.mxu1 %v7892_v48 }
 0x4b7   :  { %2662 = vmatpush2.bf16.msra.mxu0 %v7896_v31  ;;  %2703 = vmatpush2.bf16.msra.mxu1 %v7898_v58  ;;  %v9970_v58 = vld [vmem:[#allocation38_spill] sm:$0xff]  ;;  %v9973_v31 = vld [vmem:[#allocation41_spill] sm:$0xff] }
 0x4b8   :  { %2807 = vmatprep.subr.bf16.mxu0 %v7447_v12  ;;  %2848 = vmatprep.subr.bf16.mxu1 %v7451_v18  ;;  %v9971_v12 = vld [vmem:[#allocation39_spill] sm:$0xff]  ;;  %v9972_v18 = vld [vmem:[#allocation40_spill] sm:$0xff] }
 0x4ba   :  { %2664 = vmatmul.mubr.bf16.vlgmr.msra.gmra.mxu0 %v8150_v36  ;;  %2705 = vmatmul.mubr.bf16.vlgmr.msra.gmra.mxu1 %v8150_v36  ;;  %v9974_v36 = vld [vmem:[#allocation42_spill] sm:$0xff] }
 0x4bb   :  { %2808 = vmatpush1.bf16.msra.mxu0 %v7449_v14  ;;  %2849 = vmatpush1.bf16.msra.mxu1 %v7453_v19  ;;  %v9975_v14 = vld [vmem:[#allocation43_spill] sm:$0xff]  ;;  %v9976_v19 = vld [vmem:[#allocation44_spill] sm:$0xff] }
 0x4bc   :  { %2809 = vmatprep.subr.bf16.mxu0 %v7455_v20  ;;  %2850 = vmatprep.subr.bf16.mxu1 %v7458_v17  ;;  %v9977_v20 = vld [vmem:[#allocation45_spill] sm:$0xff]  ;;  %v9978_v17 = vld [vmem:[#allocation46_spill] sm:$0xff] }
 0x4bf   :  { %2810 = vmatpush1.bf16.msra.mxu0 %v7462_v27  ;;  %2851 = vmatpush1.bf16.msra.mxu1 %v7466_v28  ;;  %v9979_v27 = vld [vmem:[#allocation47_spill] sm:$0xff]  ;;  %v9980_v28 = vld [vmem:[#allocation48_spill] sm:$0xff] }
 0x4c0   :  { %2811 = vmatprep.subr.bf16.mxu0 %v9970_v58  ;;  %2852 = vmatprep.subr.bf16.mxu1 %v9971_v12  ;;  %v9981_v58 = vld [vmem:[#allocation49_spill] sm:$0xff]  ;;  %v9982_v12 = vld [vmem:[#allocation50_spill] sm:$0xff] }
 0x4c3   :  { %2812 = vmatpush1.bf16.msra.mxu0 %v9972_v18  ;;  %2853 = vmatpush1.bf16.msra.mxu1 %v9973_v31  ;;  %v9983_v18 = vld [vmem:[#allocation51_spill] sm:$0xff]  ;;  %v9984_v31 = vld [vmem:[#allocation52_spill] sm:$0xff] }
 0x4c4   :  { %2813 = vmatprep.subr.bf16.mxu0 %v9974_v36  ;;  %2854 = vmatprep.subr.bf16.mxu1 %v9975_v14  ;;  %v9985_v36 = vld [vmem:[#allocation53_spill] sm:$0xff]  ;;  %v9986_v14 = vld [vmem:[#allocation54_spill] sm:$0xff] }
 0x4c7   :  { %2814 = vmatpush1.bf16.msra.mxu0 %v9976_v19  ;;  %2855 = vmatpush1.bf16.msra.mxu1 %v9977_v20  ;;  %v9987_v19 = vld [vmem:[#allocation55_spill] sm:$0xff]  ;;  %v9988_v20 = vld [vmem:[#allocation56_spill] sm:$0xff] }
 0x4c8   :  { %2815 = vmatprep.subr.bf16.mxu0 %v9978_v17  ;;  %2856 = vmatprep.subr.bf16.mxu1 %v9979_v27  ;;  %v9989_v17 = vld [vmem:[#allocation57_spill] sm:$0xff]  ;;  %v9990_v27 = vld [vmem:[#allocation58_spill] sm:$0xff] }
 0x4cb   :  { %2816 = vmatpush1.bf16.msra.mxu0 %v9980_v28  ;;  %2857 = vmatpush1.bf16.msra.mxu1 %v9981_v58  ;;  %v9991_v28 = vld [vmem:[#allocation59_spill] sm:$0xff]  ;;  %v9992_v58 = vld [vmem:[#allocation60_spill] sm:$0xff] }
 0x4cc   :  { %2817 = vmatprep.subr.bf16.mxu0 %v9982_v12  ;;  %2858 = vmatprep.subr.bf16.mxu1 %v9983_v18  ;;  %v9993_v12 = vld [vmem:[#allocation61_spill] sm:$0xff]  ;;  %v9994_v18 = vld [vmem:[#allocation62_spill] sm:$0xff] }
 0x4cf   :  { %2818 = vmatpush1.bf16.msra.mxu0 %v9984_v31  ;;  %2859 = vmatpush1.bf16.msra.mxu1 %v9985_v36  ;;  %v9995_v31 = vld [vmem:[#allocation63_spill] sm:$0xff]  ;;  %v9996_v36 = vld [vmem:[#allocation64_spill] sm:$0xff] }
 0x4d0   :  { %2819 = vmatprep.subr.bf16.mxu0 %v9986_v14  ;;  %2860 = vmatprep.subr.bf16.mxu1 %v9987_v19  ;;  %v9997_v14 = vld [vmem:[#allocation65_spill] sm:$0xff]  ;;  %v9998_v19 = vld [vmem:[#allocation66_spill] sm:$0xff] }
 0x4d3   :  { %2820 = vmatpush1.bf16.msra.mxu0 %v9988_v20  ;;  %2861 = vmatpush1.bf16.msra.mxu1 %v9989_v17  ;;  %v9999_v20 = vld [vmem:[#allocation67_spill] sm:$0xff]  ;;  %v10000_v17 = vld [vmem:[#allocation68_spill] sm:$0xff] }
 0x4d4   :  { %2821 = vmatprep.subr.bf16.mxu0 %v9990_v27  ;;  %2862 = vmatprep.subr.bf16.mxu1 %v9991_v28  ;;  %v10001_v27 = vld [vmem:[#allocation69_spill] sm:$0xff]  ;;  %v10002_v28 = vld [vmem:[#allocation70_spill] sm:$0xff] }
 0x4d7   :  { %2822 = vmatpush1.bf16.msra.mxu0 %v9992_v58  ;;  %2863 = vmatpush1.bf16.msra.mxu1 %v9993_v12  ;;  %v10003_v58 = vld [vmem:[#allocation71_spill] sm:$0xff]  ;;  %v10004_v12 = vld [vmem:[#allocation72_spill] sm:$0xff] }
 0x4d8   :  { %2823 = vmatprep.subr.bf16.mxu0 %v9994_v18  ;;  %2864 = vmatprep.subr.bf16.mxu1 %v9995_v31  ;;  %v10005_v18 = vld [vmem:[#allocation73_spill] sm:$0xff]  ;;  %v10006_v31 = vld [vmem:[#allocation74_spill] sm:$0xff] }
 0x4db   :  { %2824 = vmatpush2.bf16.msra.mxu0 %v9996_v36  ;;  %2865 = vmatpush2.bf16.msra.mxu1 %v9997_v14  ;;  %v10007_v36 = vld [vmem:[#allocation75_spill] sm:$0xff]  ;;  %v10008_v14 = vld [vmem:[#allocation76_spill] sm:$0xff] }
 0x4dc   :  { %2825 = vmatprep.subr.bf16.mxu0 %v9998_v19  ;;  %2866 = vmatprep.subr.bf16.mxu1 %v9999_v20  ;;  %v10009_v19 = vld [vmem:[#allocation77_spill] sm:$0xff]  ;;  %v10010_v20 = vld [vmem:[#allocation78_spill] sm:$0xff] }
 0x4df   :  { %2826 = vmatpush2.bf16.msra.mxu0 %v10000_v17  ;;  %2867 = vmatpush2.bf16.msra.mxu1 %v10001_v27  ;;  %v10011_v17 = vld [vmem:[#allocation80_spill] sm:$0xff]  ;;  %v10012_v27 = vld [vmem:[#allocation79_spill] sm:$0xff] }
 0x4e0   :  { %2827 = vmatprep.subr.bf16.mxu0 %v10002_v28  ;;  %2868 = vmatprep.subr.bf16.mxu1 %v10003_v58  ;;  %v10013_v28 = vld [vmem:[#allocation81_spill] sm:$0xff]  ;;  %v10014_v58 = vld [vmem:[#allocation82_spill] sm:$0xff] }
 0x4e3   :  { %2828 = vmatpush2.bf16.msra.mxu0 %v10004_v12  ;;  %2869 = vmatpush2.bf16.msra.mxu1 %v10005_v18  ;;  %v10015_v12 = vld [vmem:[#allocation83_spill] sm:$0xff]  ;;  %v10016_v18 = vld [vmem:[#allocation84_spill] sm:$0xff] }
 0x4e4   :  { %2829 = vmatprep.subr.bf16.mxu0 %v10006_v31  ;;  %2870 = vmatprep.subr.bf16.mxu1 %v10007_v36  ;;  %v10017_v31 = vld [vmem:[#allocation85_spill] sm:$0xff]  ;;  %v10018_v36 = vld [vmem:[#allocation86_spill] sm:$0xff] }
 0x4e7   :  { %2830 = vmatpush2.bf16.msra.mxu0 %v10008_v14  ;;  %2871 = vmatpush2.bf16.msra.mxu1 %v10009_v19  ;;  %v10019_v14 = vld [vmem:[#allocation87_spill] sm:$0xff]  ;;  %v10020_v19 = vld [vmem:[#allocation88_spill] sm:$0xff] }
 0x4e8   :  { %2831 = vmatprep.subr.bf16.mxu0 %v10010_v20  ;;  %2872 = vmatprep.subr.bf16.mxu1 %v10011_v17  ;;  %v10021_v20 = vld [vmem:[#allocation89_spill] sm:$0xff]  ;;  %v10022_v17 = vld [vmem:[#allocation90_spill] sm:$0xff] }
 0x4eb   :  { %2832 = vmatpush2.bf16.msra.mxu0 %v10012_v27  ;;  %2873 = vmatpush2.bf16.msra.mxu1 %v10013_v28  ;;  %v10023_v27 = vld [vmem:[#allocation91_spill] sm:$0xff]  ;;  %v10024_v28 = vld [vmem:[#allocation92_spill] sm:$0xff] }
 0x4ec   :  { %2833 = vmatprep.subr.bf16.mxu0 %v10014_v58  ;;  %2874 = vmatprep.subr.bf16.mxu1 %v10015_v12  ;;  %v10025_v58 = vld [vmem:[#allocation93_spill] sm:$0xff]  ;;  %v10026_v12 = vld [vmem:[#allocation94_spill] sm:$0xff] }
 0x4ef   :  { %2834 = vmatpush2.bf16.msra.mxu0 %v10016_v18  ;;  %2875 = vmatpush2.bf16.msra.mxu1 %v10017_v31  ;;  %v10027_v18 = vld [vmem:[#allocation95_spill] sm:$0xff] }
 0x4f0   :  { %2835 = vmatprep.subr.bf16.mxu0 %v10018_v36  ;;  %2876 = vmatprep.subr.bf16.mxu1 %v10019_v14 }
 0x4f3   :  { %2836 = vmatpush2.bf16.msra.mxu0 %v10020_v19  ;;  %2877 = vmatpush2.bf16.msra.mxu1 %v10021_v20 }
 0x4f4   :  { %2837 = vmatprep.subr.bf16.mxu0 %v10022_v17  ;;  %2878 = vmatprep.subr.bf16.mxu1 %v10023_v27 }
 0x4f7   :  { %2838 = vmatpush2.bf16.msra.mxu0 %v10024_v28  ;;  %2879 = vmatpush2.bf16.msra.mxu1 %v10025_v58 }
 0x4f8   :  { %2889 = vmatprep.subr.bf16.mxu0 %v10026_v12  ;;  %2930 = vmatprep.subr.bf16.mxu1 %v10027_v18 }
 0x53a   :  { %v2583_v31 = vpop.f32.mrf.mxu0  ;;  %v2624_v36 = vpop.f32.mrf.mxu1 }
 0x53b   :  { %v2721_v49 = vrot.slane %v2583_v31, 2  ;;  %v2723_v17 = vrot.slane %v2624_v36, 2 }
 0x53c   :  { %v2585_v48 = vpop.f32.mrf.mxu0  ;;  %v2626_v14 = vpop.f32.mrf.mxu1 }
 0x53d   :  { %v2722_v57 = vrot.slane %v2585_v48, 2  ;;  %v2737_v27 = vadd.f32 %v2721_v49, %v9931_v4  ;;  %v2739_v28 = vadd.f32 %v2723_v17, %v9932_v6  ;;  %v2724_v58 = vrot.slane %v2626_v14, 2 }
 0x53e   :  { %v2587_v9 = vpop.f32.mrf.mxu0  ;;  %v2628_v19 = vpop.f32.mrf.mxu1 }
 0x53f   :  { %v2738_v12 = vadd.f32 %v2722_v57, %v10028_v56  ;;  %v6121_v10 = vmul.f32 -1.442695, %v2737_v27  ;;  %v6123_v18 = vmul.f32 -1.442695, %v2739_v28  ;;  %v2740_v21 = vadd.f32 %v2724_v58, %v10029_v16 }
 0x540   :  { %v2588_v15 = vpop.f32.mrf.mxu0  ;;  %v2629_v20 = vpop.f32.mrf.mxu1 }
 0x541   :  { %v6122_v3 = vmul.f32 -1.442695, %v2738_v12  ;;  %6613 = vpow2.f32 %v6121_v10  ;;  %v6124_v19 = vmul.f32 -1.442695, %v2740_v21 }
 0x542   :  { %6615 = vpow2.f32 %v6123_v18 }
 0x543   :  { %6617 = vpow2.f32 %v6122_v3 }
 0x544   :  { %6619 = vpow2.f32 %v6124_v19 }
 0x54e   :  { %v6614_v20 = vpop.eup %6613 }
 0x54f   :  { %v6616_v31 = vpop.eup %6615  ;;  %v2751_v9 = vadd.f32 1.0, %v6614_v20 }
 0x550   :  { %v6618_v15 = vpop.eup %6617  ;;  %v2763_v4 = vadd.f32 1.0, %v6616_v31 }
 0x551   :  { %v6620_v49 = vpop.eup %6619  ;;  %v2752_v17 = vadd.f32 1.0, %v6618_v15  ;;  %6621 = vrcp.f32 %v2751_v9 }
 0x552   :  { %6623 = vrcp.f32 %v2763_v4  ;;  %v2764_v58 = vadd.f32 1.0, %v6620_v49  ;;  %v2785_v4 = vrot.slane %v8144_v44, 6 }
 0x553   :  { %6625 = vrcp.f32 %v2752_v17 }
 0x57a   :  { %v2665_v14 = vpop.f32.mrf.mxu0  ;;  %v2706_v6 = vpop.f32.mrf.mxu1 }
 0x57b   :  { %v2725_v27 = vrot.slane %v2665_v14, 2  ;;  %v2727_v28 = vrot.slane %v2706_v6, 2 }
 0x57c   :  { %v2667_v12 = vpop.f32.mrf.mxu0  ;;  %v2708_v10 = vpop.f32.mrf.mxu1 }
 0x57d   :  { %v2741_v18 = vadd.f32 %v2725_v27, %v7694_v2  ;;  %v2743_v3 = vadd.f32 %v2727_v28, %v9935_v29  ;;  %v2726_v56 = vrot.slane %v2667_v12, 2  ;;  %v2728_v57 = vrot.slane %v2708_v10, 2  ;;  %v6622_v2 = vpop.eup %6621 }
 0x57e   :  { %v2669_v48 = vpop.f32.mrf.mxu0  ;;  %v2710_v21 = vpop.f32.mrf.mxu1 }
 0x57f   :  { %6627 = vtanh.f32 %v2741_v18  ;;  %v6125_v16 = vmul.f32 -1.442695, %v2743_v3  ;;  %v2742_v36 = vadd.f32 %v2726_v56, %v9936_v35  ;;  %v2744_v19 = vadd.f32 %v2728_v57, %v9842_v47  ;;  %v6624_v29 = vpop.eup %6623 }
 0x580   :  { %6629 = vrcp.f32 %v2764_v58  ;;  %v2670_v20 = vpop.f32.mrf.mxu0  ;;  %v2711_v31 = vpop.f32.mrf.mxu1  ;;  %v2789_v14 = vmul.f32 %v6624_v29, %v2785_v4  ;;  %v2786_v35 = vrot.slane %v8147_v62, 6  ;;  %v10032_v29 = vld [vmem:[#allocation132_spill] sm:$0xff]  ;;  %v10034_v4 = vld [vmem:[#allocation134_spill] sm:$0xff] }
 0x581   :  { %6631 = vpow2.f32 %v6125_v16  ;;  %v6126_v15 = vmul.f32 -1.442695, %v2744_v19  ;;  %v6626_v9 = vpop.eup %6625 }
 0x582   :  { %6633 = vtanh.f32 %v2742_v36 }
 0x583   :  { %6635 = vpow2.f32 %v6126_v15  ;;  %v10030_v15 = vld [vmem:[#allocation130_spill] sm:$0xff] }
 0x58c   :  { %v6628_v49 = vpop.eup %6627 }
 0x58d   :  { %v6630_v17 = vpop.eup %6629  ;;  %v2791_v6 = vmul.f32 %v6628_v49, %v6622_v2  ;;  %v10031_v2 = vld [vmem:[#allocation131_spill] sm:$0xff] }
 0x58e   :  { %v6632_v27 = vpop.eup %6631  ;;  %v2790_v10 = vmul.f32 %v6630_v17, %v2786_v35  ;;  %v10035_v49 = vld [vmem:[#allocation135_spill] sm:$0xff]  ;;  %v10036_v17 = vld [vmem:[#allocation136_spill] sm:$0xff] }
 0x58f   :  { %v6634_v47 = vpop.eup %6633  ;;  %v8294_v28 = vadd.f32 %v2791_v6, %v2789_v14  ;;  %v2777_v58 = vadd.f32 1.0, %v6632_v27  ;;  %v10037_v14 = vld [vmem:[#allocation137_spill] sm:$0xff]  ;;  %v10038_v6 = vld [vmem:[#allocation138_spill] sm:$0xff]  ;;  %v10039_v27 = vld [vmem:[#allocation139_spill] sm:$0xff] }
 0x590   :  { %v6636_v12 = vpop.eup %6635  ;;  %v2792_v18 = vmul.f32 %v6634_v47, %v6626_v9  ;;  %v10033_v9 = vld [vmem:[#allocation133_spill] sm:$0xff]  ;;  %v10040_v35 = vld [vmem:[#allocation140_spill] sm:$0xff] }
 0x591   :  { %6637 = vtanh.f32 %v8294_v28  ;;  %v2778_v3 = vadd.f32 1.0, %v6636_v12  ;;  %v10041_v47 = vld [vmem:[#allocation141_spill] sm:$0xff]  ;;  %v10043_v12 = vld [vmem:[#allocation146_spill] sm:$0xff] }
 0x592   :  { %6639 = vrcp.f32 %v2777_v58  ;;  %v8297_v56 = vadd.f32 %v2792_v18, %v2790_v10  ;;  %v10042_v58 = vld [vmem:[#allocation142_spill] sm:$0xff]  ;;  %v10044_v10 = vld [vmem:[#allocation147_spill] sm:$0xff] }
 0x593   :  { %6641 = vrcp.f32 %v2778_v3  ;;  %v10045_v18 = vld [vmem:[#allocation167_spill] sm:$0xff]  ;;  %v10046_v3 = vld [vmem:[#allocation168_spill] sm:$0xff] }
 0x594   :  { %6643 = vtanh.f32 %v8297_v56 }
 0x59e   :  { %v6638_v44 = vpop.eup %6637 }
 0x59f   :  { %v6640_v57 = vpop.eup %6639 }
 0x5a0   :  { %v6642_v48 = vpop.eup %6641  ;;  %v2797_v62 = vmul.f32 %v6640_v57, %v6638_v44  ;;  %v10047_v44 = vld [vmem:[#allocation169_spill] sm:$0xff]  ;;  %v10048_v57 = vld [vmem:[#allocation170_spill] sm:$0xff] }
 0x5a1   :  { %v6644_v21 = vpop.eup %6643 }
 0x5a2   :  { %v2798_v16 = vmul.f32 %v6644_v21, %v6642_v48  ;;  %v2799_v36 = vpack.c.bf16 %v2797_v62, %v2797_v62  ;;  %v10049_v48 = vld [vmem:[#allocation171_spill] sm:$0xff]  ;;  %v10050_v62 = vld [vmem:[#allocation172_spill] sm:$0xff]  ;;  %v10051_v21 = vld [vmem:[#allocation173_spill] sm:$0xff] }
 0x5a4   :  { %v2800_v19 = vpack.c.bf16 %v2798_v16, %v2798_v16  ;;  %v8300_v31 = vrot.slane %v2799_v36, 3  ;;  %v10052_v16 = vld [vmem:[#allocation174_spill] sm:$0xff]  ;;  %v10053_v36 = vld [vmem:[#allocation175_spill] sm:$0xff] }
 0x5a6   :  { %v2804_v20 = vrot.slane %v2800_v19, 3  ;;  %v10054_v19 = vld [vmem:[#allocation176_spill] sm:$0xff] }
 0x5a8   :  { %2839 = vmatprep.mubr.bf16.mxu0 %v2804_v20  ;;  %2880 = vmatprep.mubr.bf16.mxu1 %v2804_v20 }
 0x5a9   :  { %2840 = vmatmul.mubr.bf16.vlgmr.msra.gmra.mxu0 %v8300_v31  ;;  %2881 = vmatmul.mubr.bf16.vlgmr.msra.gmra.mxu1 %v8300_v31 }
 0x5aa   :  { %2890 = vmatpush1.bf16.msra.mxu0 %v9845_v61  ;;  %2931 = vmatpush1.bf16.msra.mxu1 %v9846_v34 }
 0x5ab   :  { %2921 = vmatprep.mubr.bf16.mxu0 %v2804_v20  ;;  %2962 = vmatprep.mubr.bf16.mxu1 %v2804_v20  ;;  %v10055_v20 = vld [vmem:[#allocation177_spill] sm:$0xff] }
 0x5ac   :  { %2891 = vmatprep.subr.bf16.mxu0 %v9847_v22  ;;  %2932 = vmatprep.subr.bf16.mxu1 %v9848_v5 }
 0x5ae   :  { %2892 = vmatpush1.bf16.msra.mxu0 %v9849_v42  ;;  %2933 = vmatpush1.bf16.msra.mxu1 %v9850_v13 }
 0x5af   :  { %2893 = vmatprep.subr.bf16.mxu0 %v9937_v38  ;;  %2934 = vmatprep.subr.bf16.mxu1 %v9938_v45 }
 0x5b2   :  { %2894 = vmatpush1.bf16.msra.mxu0 %v9939_v7  ;;  %2935 = vmatpush1.bf16.msra.mxu1 %v9940_v50 }
 0x5b3   :  { %2895 = vmatprep.subr.bf16.mxu0 %v9941_v54  ;;  %2936 = vmatprep.subr.bf16.mxu1 %v9942_v51 }
 0x5b6   :  { %2896 = vmatpush1.bf16.msra.mxu0 %v9943_v55  ;;  %2937 = vmatpush1.bf16.msra.mxu1 %v10030_v15 }
 0x5b7   :  { %2897 = vmatprep.subr.bf16.mxu0 %v10031_v2  ;;  %2938 = vmatprep.subr.bf16.mxu1 %v10032_v29 }
 0x5ba   :  { %2898 = vmatpush1.bf16.msra.mxu0 %v10033_v9  ;;  %2939 = vmatpush1.bf16.msra.mxu1 %v10034_v4 }
 0x5bb   :  { %2899 = vmatprep.subr.bf16.mxu0 %v10035_v49  ;;  %2940 = vmatprep.subr.bf16.mxu1 %v10036_v17 }
 0x5be   :  { %2900 = vmatpush1.bf16.msra.mxu0 %v10037_v14  ;;  %2941 = vmatpush1.bf16.msra.mxu1 %v10038_v6 }
 0x5bf   :  { %2901 = vmatprep.subr.bf16.mxu0 %v10039_v27  ;;  %2942 = vmatprep.subr.bf16.mxu1 %v10040_v35 }
 0x5c2   :  { %2902 = vmatpush1.bf16.msra.mxu0 %v10041_v47  ;;  %2943 = vmatpush1.bf16.msra.mxu1 %v10042_v58 }
 0x5c3   :  { %2903 = vmatprep.subr.bf16.mxu0 %v9957_v41  ;;  %2944 = vmatprep.subr.bf16.mxu1 %v9958_v60 }
 0x5c6   :  { %2904 = vmatpush1.bf16.msra.mxu0 %v9959_v0  ;;  %2945 = vmatpush1.bf16.msra.mxu1 %v10043_v12 }
 0x5c7   :  { %2905 = vmatprep.subr.bf16.mxu0 %v10044_v10  ;;  %2946 = vmatprep.subr.bf16.mxu1 %v9962_v63 }
 0x5ca   :  { %2906 = vmatpush2.bf16.msra.mxu0 %v9963_v52  ;;  %2947 = vmatpush2.bf16.msra.mxu1 %v9964_v30 }
 0x5cb   :  { %2907 = vmatprep.subr.bf16.mxu0 %v9965_v53  ;;  %2948 = vmatprep.subr.bf16.mxu1 %v9966_v37 }
 0x5ce   :  { %2908 = vmatpush2.bf16.msra.mxu0 %v9967_v59  ;;  %2949 = vmatpush2.bf16.msra.mxu1 %v9882_v24 }
 0x5cf   :  { %2909 = vmatprep.subr.bf16.mxu0 %v9883_v23  ;;  %2950 = vmatprep.subr.bf16.mxu1 %v9884_v33 }
 0x5d2   :  { %2910 = vmatpush2.bf16.msra.mxu0 %v9968_v46  ;;  %2951 = vmatpush2.bf16.msra.mxu1 %v9969_v43 }
 0x5d3   :  { %2911 = vmatprep.subr.bf16.mxu0 %v9887_v40  ;;  %2952 = vmatprep.subr.bf16.mxu1 %v9888_v1 }
 0x5d6   :  { %2912 = vmatpush2.bf16.msra.mxu0 %v9889_v8  ;;  %2953 = vmatpush2.bf16.msra.mxu1 %v9890_v26  ;;  %v10127_v26 = vld [vmem:[#allocation104_spill] sm:$0xff] }
 0x5d7   :  { %2913 = vmatprep.subr.bf16.mxu0 %v9891_v32  ;;  %2954 = vmatprep.subr.bf16.mxu1 %v9892_v39  ;;  %v10123_v39 = vld [vmem:[#allocation106_spill] sm:$0xff] }
 0x5da   :  { %2914 = vmatpush2.bf16.msra.mxu0 %v7860_v11  ;;  %2955 = vmatpush2.bf16.msra.mxu1 %v7862_v25 }
 0x5db   :  { %2915 = vmatprep.subr.bf16.mxu0 %v10045_v18  ;;  %2956 = vmatprep.subr.bf16.mxu1 %v10046_v3  ;;  %v10056_v18 = vld [vmem:[#allocation178_spill] sm:$0xff] }
 0x5dc   :  { %v10057_v3 = vld [vmem:[#allocation30_spill] sm:$0xff] }
 0x5de   :  { %2916 = vmatpush2.bf16.msra.mxu0 %v10047_v44  ;;  %2957 = vmatpush2.bf16.msra.mxu1 %v10048_v57  ;;  %v10058_v44 = vld [vmem:[#allocation32_spill] sm:$0xff] }
 0x5df   :  { %2917 = vmatprep.subr.bf16.mxu0 %v10049_v48  ;;  %2958 = vmatprep.subr.bf16.mxu1 %v10050_v62  ;;  %v10059_v62 = vld [vmem:[#allocation31_spill] sm:$0xff]  ;;  %v10068_v48 = vld [vmem:[#allocation41_spill] sm:$0xff] }
 0x5e2   :  { %2918 = vmatpush2.bf16.msra.mxu0 %v10051_v21  ;;  %2959 = vmatpush2.bf16.msra.mxu1 %v10052_v16  ;;  %v10060_v21 = vld [vmem:[#allocation33_spill] sm:$0xff]  ;;  %v10061_v16 = vld [vmem:[#allocation34_spill] sm:$0xff] }
 0x5e3   :  { %2919 = vmatprep.subr.bf16.mxu0 %v10053_v36  ;;  %2960 = vmatprep.subr.bf16.mxu1 %v10054_v19  ;;  %v10062_v36 = vld [vmem:[#allocation35_spill] sm:$0xff]  ;;  %v10063_v19 = vld [vmem:[#allocation36_spill] sm:$0xff] }
 0x5e6   :  { %2920 = vmatpush2.bf16.msra.mxu0 %v10055_v20  ;;  %2961 = vmatpush2.bf16.msra.mxu1 %v10056_v18  ;;  %v10064_v20 = vld [vmem:[#allocation37_spill] sm:$0xff]  ;;  %v10065_v18 = vld [vmem:[#allocation38_spill] sm:$0xff] }
 0x5e7   :  { %3035 = vmatprep.subr.bf16.mxu0 %v10057_v3  ;;  %3076 = vmatprep.subr.bf16.mxu1 %v10058_v44  ;;  %v10066_v3 = vld [vmem:[#allocation39_spill] sm:$0xff]  ;;  %v10067_v44 = vld [vmem:[#allocation40_spill] sm:$0xff] }
 0x5e9   :  { %2922 = vmatmul.mubr.bf16.vlgmr.msra.gmra.mxu0 %v8300_v31  ;;  %2963 = vmatmul.mubr.bf16.vlgmr.msra.gmra.mxu1 %v8300_v31  ;;  %v10069_v31 = vld [vmem:[#allocation42_spill] sm:$0xff] }
 0x5ea   :  { %3036 = vmatpush1.bf16.msra.mxu0 %v10059_v62  ;;  %3077 = vmatpush1.bf16.msra.mxu1 %v10060_v21  ;;  %v10070_v62 = vld [vmem:[#allocation43_spill] sm:$0xff]  ;;  %v10071_v21 = vld [vmem:[#allocation44_spill] sm:$0xff] }
 0x5eb   :  { %3037 = vmatprep.subr.bf16.mxu0 %v10061_v16  ;;  %3078 = vmatprep.subr.bf16.mxu1 %v10062_v36  ;;  %v10072_v16 = vld [vmem:[#allocation45_spill] sm:$0xff]  ;;  %v10073_v36 = vld [vmem:[#allocation46_spill] sm:$0xff] }
 0x5ee   :  { %3038 = vmatpush1.bf16.msra.mxu0 %v10063_v19  ;;  %3079 = vmatpush1.bf16.msra.mxu1 %v10064_v20  ;;  %v10074_v19 = vld [vmem:[#allocation47_spill] sm:$0xff]  ;;  %v10075_v20 = vld [vmem:[#allocation48_spill] sm:$0xff] }
 0x5ef   :  { %3039 = vmatprep.subr.bf16.mxu0 %v10065_v18  ;;  %3080 = vmatprep.subr.bf16.mxu1 %v10066_v3  ;;  %v10076_v18 = vld [vmem:[#allocation49_spill] sm:$0xff]  ;;  %v10077_v3 = vld [vmem:[#allocation50_spill] sm:$0xff] }
 0x5f2   :  { %3040 = vmatpush1.bf16.msra.mxu0 %v10067_v44  ;;  %3081 = vmatpush1.bf16.msra.mxu1 %v10068_v48  ;;  %v10078_v44 = vld [vmem:[#allocation51_spill] sm:$0xff]  ;;  %v10079_v48 = vld [vmem:[#allocation52_spill] sm:$0xff] }
 0x5f3   :  { %3041 = vmatprep.subr.bf16.mxu0 %v10069_v31  ;;  %3082 = vmatprep.subr.bf16.mxu1 %v10070_v62  ;;  %v10080_v31 = vld [vmem:[#allocation53_spill] sm:$0xff]  ;;  %v10081_v62 = vld [vmem:[#allocation54_spill] sm:$0xff] }
 0x5f6   :  { %3042 = vmatpush1.bf16.msra.mxu0 %v10071_v21  ;;  %3083 = vmatpush1.bf16.msra.mxu1 %v10072_v16  ;;  %v10082_v21 = vld [vmem:[#allocation55_spill] sm:$0xff]  ;;  %v10083_v16 = vld [vmem:[#allocation56_spill] sm:$0xff] }
 0x5f7   :  { %3043 = vmatprep.subr.bf16.mxu0 %v10073_v36  ;;  %3084 = vmatprep.subr.bf16.mxu1 %v10074_v19  ;;  %v10084_v36 = vld [vmem:[#allocation57_spill] sm:$0xff]  ;;  %v10085_v19 = vld [vmem:[#allocation58_spill] sm:$0xff] }
 0x5fa   :  { %3044 = vmatpush1.bf16.msra.mxu0 %v10075_v20  ;;  %3085 = vmatpush1.bf16.msra.mxu1 %v10076_v18  ;;  %v10086_v20 = vld [vmem:[#allocation59_spill] sm:$0xff]  ;;  %v10087_v18 = vld [vmem:[#allocation60_spill] sm:$0xff] }
 0x5fb   :  { %3045 = vmatprep.subr.bf16.mxu0 %v10077_v3  ;;  %3086 = vmatprep.subr.bf16.mxu1 %v10078_v44  ;;  %v10088_v3 = vld [vmem:[#allocation61_spill] sm:$0xff]  ;;  %v10089_v44 = vld [vmem:[#allocation62_spill] sm:$0xff] }
 0x5fe   :  { %3046 = vmatpush1.bf16.msra.mxu0 %v10079_v48  ;;  %3087 = vmatpush1.bf16.msra.mxu1 %v10080_v31  ;;  %v10090_v48 = vld [vmem:[#allocation63_spill] sm:$0xff]  ;;  %v10091_v31 = vld [vmem:[#allocation64_spill] sm:$0xff] }
 0x5ff   :  { %3047 = vmatprep.subr.bf16.mxu0 %v10081_v62  ;;  %3088 = vmatprep.subr.bf16.mxu1 %v10082_v21  ;;  %v10092_v62 = vld [vmem:[#allocation65_spill] sm:$0xff]  ;;  %v10093_v21 = vld [vmem:[#allocation66_spill] sm:$0xff] }
 0x602   :  { %3048 = vmatpush1.bf16.msra.mxu0 %v10083_v16  ;;  %3089 = vmatpush1.bf16.msra.mxu1 %v10084_v36  ;;  %v10094_v16 = vld [vmem:[#allocation67_spill] sm:$0xff]  ;;  %v10095_v36 = vld [vmem:[#allocation68_spill] sm:$0xff] }
 0x603   :  { %3049 = vmatprep.subr.bf16.mxu0 %v10085_v19  ;;  %3090 = vmatprep.subr.bf16.mxu1 %v10086_v20  ;;  %v10096_v19 = vld [vmem:[#allocation69_spill] sm:$0xff]  ;;  %v10097_v20 = vld [vmem:[#allocation70_spill] sm:$0xff] }
 0x606   :  { %3050 = vmatpush1.bf16.msra.mxu0 %v10087_v18  ;;  %3091 = vmatpush1.bf16.msra.mxu1 %v10088_v3  ;;  %v10098_v18 = vld [vmem:[#allocation71_spill] sm:$0xff]  ;;  %v10099_v3 = vld [vmem:[#allocation72_spill] sm:$0xff] }
 0x607   :  { %3051 = vmatprep.subr.bf16.mxu0 %v10089_v44  ;;  %3092 = vmatprep.subr.bf16.mxu1 %v10090_v48  ;;  %v10100_v44 = vld [vmem:[#allocation73_spill] sm:$0xff]  ;;  %v10101_v48 = vld [vmem:[#allocation74_spill] sm:$0xff] }
 0x60a   :  { %3052 = vmatpush2.bf16.msra.mxu0 %v10091_v31  ;;  %3093 = vmatpush2.bf16.msra.mxu1 %v10092_v62  ;;  %v10102_v31 = vld [vmem:[#allocation75_spill] sm:$0xff]  ;;  %v10103_v62 = vld [vmem:[#allocation76_spill] sm:$0xff] }
 0x60b   :  { %3053 = vmatprep.subr.bf16.mxu0 %v10093_v21  ;;  %3094 = vmatprep.subr.bf16.mxu1 %v10094_v16  ;;  %v10104_v21 = vld [vmem:[#allocation77_spill] sm:$0xff]  ;;  %v10105_v16 = vld [vmem:[#allocation78_spill] sm:$0xff] }
 0x60e   :  { %3054 = vmatpush2.bf16.msra.mxu0 %v10095_v36  ;;  %3095 = vmatpush2.bf16.msra.mxu1 %v10096_v19  ;;  %v10106_v36 = vld [vmem:[#allocation80_spill] sm:$0xff]  ;;  %v10107_v19 = vld [vmem:[#allocation79_spill] sm:$0xff] }
 0x60f   :  { %3055 = vmatprep.subr.bf16.mxu0 %v10097_v20  ;;  %3096 = vmatprep.subr.bf16.mxu1 %v10098_v18  ;;  %v10108_v20 = vld [vmem:[#allocation81_spill] sm:$0xff]  ;;  %v10109_v18 = vld [vmem:[#allocation82_spill] sm:$0xff] }
 0x612   :  { %3056 = vmatpush2.bf16.msra.mxu0 %v10099_v3  ;;  %3097 = vmatpush2.bf16.msra.mxu1 %v10100_v44  ;;  %v10110_v3 = vld [vmem:[#allocation83_spill] sm:$0xff]  ;;  %v10111_v44 = vld [vmem:[#allocation84_spill] sm:$0xff] }
 0x613   :  { %3057 = vmatprep.subr.bf16.mxu0 %v10101_v48  ;;  %3098 = vmatprep.subr.bf16.mxu1 %v10102_v31  ;;  %v10112_v48 = vld [vmem:[#allocation85_spill] sm:$0xff]  ;;  %v10113_v31 = vld [vmem:[#allocation86_spill] sm:$0xff] }
 0x616   :  { %3058 = vmatpush2.bf16.msra.mxu0 %v10103_v62  ;;  %3099 = vmatpush2.bf16.msra.mxu1 %v10104_v21  ;;  %v10114_v62 = vld [vmem:[#allocation87_spill] sm:$0xff]  ;;  %v10115_v21 = vld [vmem:[#allocation88_spill] sm:$0xff] }
 0x617   :  { %3059 = vmatprep.subr.bf16.mxu0 %v10105_v16  ;;  %3100 = vmatprep.subr.bf16.mxu1 %v10106_v36  ;;  %v10116_v16 = vld [vmem:[#allocation89_spill] sm:$0xff]  ;;  %v10117_v36 = vld [vmem:[#allocation90_spill] sm:$0xff] }
 0x61a   :  { %3060 = vmatpush2.bf16.msra.mxu0 %v10107_v19  ;;  %3101 = vmatpush2.bf16.msra.mxu1 %v10108_v20  ;;  %v10118_v19 = vld [vmem:[#allocation91_spill] sm:$0xff]  ;;  %v10119_v20 = vld [vmem:[#allocation92_spill] sm:$0xff] }
 0x61b   :  { %3061 = vmatprep.subr.bf16.mxu0 %v10109_v18  ;;  %3102 = vmatprep.subr.bf16.mxu1 %v10110_v3  ;;  %v10120_v18 = vld [vmem:[#allocation93_spill] sm:$0xff]  ;;  %v10121_v3 = vld [vmem:[#allocation94_spill] sm:$0xff] }
 0x61e   :  { %3062 = vmatpush2.bf16.msra.mxu0 %v10111_v44  ;;  %3103 = vmatpush2.bf16.msra.mxu1 %v10112_v48  ;;  %v10122_v44 = vld [vmem:[#allocation95_spill] sm:$0xff] }
 0x61f   :  { %3063 = vmatprep.subr.bf16.mxu0 %v10113_v31  ;;  %3104 = vmatprep.subr.bf16.mxu1 %v10114_v62 }
 0x622   :  { %3064 = vmatpush2.bf16.msra.mxu0 %v10115_v21  ;;  %3105 = vmatpush2.bf16.msra.mxu1 %v10116_v16 }
 0x623   :  { %3065 = vmatprep.subr.bf16.mxu0 %v10117_v36  ;;  %3106 = vmatprep.subr.bf16.mxu1 %v10118_v19  ;;  %v10124_v36 = vld [vmem:[#allocation109_spill] sm:$0xff]  ;;  %v10126_v19 = vld [vmem:[#allocation102_spill] sm:$0xff] }
 0x624   :  { %v8436_v32 = vadd.f32 %v10124_v36, %v10123_v39 }
 0x626   :  { %3066 = vmatpush2.bf16.msra.mxu0 %v10119_v20  ;;  %3107 = vmatpush2.bf16.msra.mxu1 %v10120_v18  ;;  %10125 = vst [vmem:[#allocation103_spill] sm:$0xff] %v8436_v32 }
 0x627   :  { %3117 = vmatprep.subr.bf16.mxu0 %v10121_v3  ;;  %3158 = vmatprep.subr.bf16.mxu1 %v10122_v44  ;;  %v10128_v44 = vld [vmem:[#allocation105_spill] sm:$0xff] }
 0x669   :  { %v2841_v48 = vpop.f32.mrf.mxu0  ;;  %v2882_v31 = vpop.f32.mrf.mxu1 }
 0x66a   :  { %v2971_v20 = vadd.f32 %v2841_v48, %v10126_v19  ;;  %v2973_v18 = vadd.f32 %v2882_v31, %v10127_v26  ;;  %v10129_v31 = vld [vmem:[#allocation110_spill] sm:$0xff]  ;;  %v10130_v26 = vld [vmem:[#allocation179_spill] sm:$0xff] }
 0x66b   :  { %v2843_v57 = vpop.f32.mrf.mxu0  ;;  %v2884_v62 = vpop.f32.mrf.mxu1 }
 0x66c   :  { %v2972_v3 = vadd.f32 %v2843_v57, %v8436_v32  ;;  %v6127_v8 = vmul.f32 -1.442695, %v2971_v20  ;;  %v2974_v1 = vadd.f32 %v2884_v62, %v10128_v44  ;;  %v6129_v40 = vmul.f32 -1.442695, %v2973_v18 }
 0x66d   :  { %v2845_v25 = vpop.f32.mrf.mxu0  ;;  %v2886_v21 = vpop.f32.mrf.mxu1  ;;  %v8444_v57 = vadd.f32 %v10130_v26, %v10129_v31 }
 0x66e   :  { %v6128_v43 = vmul.f32 -1.442695, %v2972_v3  ;;  %6645 = vpow2.f32 %v6127_v8  ;;  %v6130_v25 = vmul.f32 -1.442695, %v2974_v1  ;;  %v10132_v8 = vld [vmem:[#allocation111_spill] sm:$0xff]  ;;  %v10133_v1 = vld [vmem:[#allocation180_spill] sm:$0xff] }
 0x66f   :  { %v2846_v11 = vpop.f32.mrf.mxu0  ;;  %v2887_v16 = vpop.f32.mrf.mxu1  ;;  %6647 = vpow2.f32 %v6129_v40  ;;  %10131 = vst [vmem:[#allocation100_spill] sm:$0xff] %v8444_v57  ;;  %v8448_v40 = vadd.f32 %v10133_v1, %v10132_v8 }
 0x670   :  { %6649 = vpow2.f32 %v6128_v43  ;;  %v10134_v43 = vld [vmem:[#allocation115_spill] sm:$0xff] }
 0x671   :  { %6651 = vpow2.f32 %v6130_v25  ;;  %v10135_v25 = vld [vmem:[#allocation116_spill] sm:$0xff] }
 0x67b   :  { %v6646_v11 = vpop.eup %6645 }
 0x67c   :  { %v6648_v21 = vpop.eup %6647  ;;  %v2985_v16 = vadd.f32 1.0, %v6646_v11 }
 0x67d   :  { %v6650_v39 = vpop.eup %6649  ;;  %v2997_v48 = vadd.f32 1.0, %v6648_v21 }
 0x67e   :  { %v6652_v36 = vpop.eup %6651  ;;  %v2986_v19 = vadd.f32 1.0, %v6650_v39  ;;  %6653 = vrcp.f32 %v2985_v16 }
 0x67f   :  { %v2998_v62 = vadd.f32 1.0, %v6652_v36  ;;  %6655 = vrcp.f32 %v2997_v48 }
 0x680   :  { %6657 = vrcp.f32 %v2986_v19 }
 0x6a9   :  { %v2923_v18 = vpop.f32.mrf.mxu0  ;;  %v2964_v3 = vpop.f32.mrf.mxu1 }
 0x6aa   :  { %v2975_v20 = vadd.f32 %v2923_v18, %v10134_v43  ;;  %v2977_v11 = vadd.f32 %v2964_v3, %v10135_v25  ;;  %v6654_v18 = vpop.eup %6653  ;;  %v3019_v25 = vrot.slane %v8294_v28, 6 }
 0x6ab   :  { %v2925_v21 = vpop.f32.mrf.mxu0  ;;  %v2966_v39 = vpop.f32.mrf.mxu1 }
 0x6ac   :  { %6659 = vtanh.f32 %v2975_v20  ;;  %v6131_v44 = vmul.f32 -1.442695, %v2977_v11  ;;  %v2976_v26 = vadd.f32 %v2925_v21, %v8444_v57  ;;  %v2978_v16 = vadd.f32 %v2966_v39, %v8448_v40  ;;  %v6656_v3 = vpop.eup %6655 }
 0x6ad   :  { %6661 = vrcp.f32 %v2998_v62  ;;  %v2927_v36 = vpop.f32.mrf.mxu0  ;;  %v2968_v31 = vpop.f32.mrf.mxu1  ;;  %v3023_v43 = vmul.f32 %v6656_v3, %v3019_v25  ;;  %v3020_v62 = vrot.slane %v8297_v56, 6 }
 0x6ae   :  { %6663 = vpow2.f32 %v6131_v44  ;;  %v6132_v8 = vmul.f32 -1.442695, %v2978_v16  ;;  %v6658_v19 = vpop.eup %6657 }
 0x6af   :  { %6665 = vtanh.f32 %v2976_v26  ;;  %v2928_v48 = vpop.f32.mrf.mxu0  ;;  %v2969_v1 = vpop.f32.mrf.mxu1 }
 0x6b0   :  { %6667 = vpow2.f32 %v6132_v8 }
 0x6b9   :  { %v6660_v20 = vpop.eup %6659 }
 0x6ba   :  { %v6662_v11 = vpop.eup %6661  ;;  %v3025_v21 = vmul.f32 %v6660_v20, %v6654_v18  ;;  %v10137_v20 = vld [vmem:[#allocation159_spill] sm:$0xff] }
 0x6bb   :  { %v6664_v57 = vpop.eup %6663  ;;  %v3024_v16 = vmul.f32 %v6662_v11, %v3020_v62  ;;  %v10138_v11 = vld [vmem:[#allocation160_spill] sm:$0xff]  ;;  %v10140_v62 = vld [vmem:[#allocation162_spill] sm:$0xff] }
 0x6bc   :  { %v6666_v39 = vpop.eup %6665  ;;  %v8456_v36 = vadd.f32 %v3025_v21, %v3023_v43  ;;  %v3011_v44 = vadd.f32 1.0, %v6664_v57  ;;  %v10139_v21 = vld [vmem:[#allocation161_spill] sm:$0xff] }
 0x6bd   :  { %v6668_v26 = vpop.eup %6667  ;;  %v3026_v31 = vmul.f32 %v6666_v39, %v6658_v19  ;;  %v10136_v19 = vld [vmem:[#allocation158_spill] sm:$0xff]  ;;  %v10141_v39 = vld [vmem:[#allocation163_spill] sm:$0xff] }
 0x6be   :  { %6669 = vtanh.f32 %v8456_v36  ;;  %v3012_v8 = vadd.f32 1.0, %v6668_v26  ;;  %v10143_v26 = vld [vmem:[#allocation165_spill] sm:$0xff] }
 0x6bf   :  { %6671 = vrcp.f32 %v3011_v44  ;;  %v8459_v48 = vadd.f32 %v3026_v31, %v3024_v16  ;;  %v10142_v44 = vld [vmem:[#allocation164_spill] sm:$0xff]  ;;  %v10144_v16 = vld [vmem:[#allocation166_spill] sm:$0xff]  ;;  %v10145_v31 = vld [vmem:[#allocation167_spill] sm:$0xff] }
 0x6c0   :  { %6673 = vrcp.f32 %v3012_v8  ;;  %v10146_v8 = vld [vmem:[#allocation168_spill] sm:$0xff] }
 0x6c1   :  { %6675 = vtanh.f32 %v8459_v48 }
 0x6cb   :  { %v6670_v28 = vpop.eup %6669 }
 0x6cc   :  { %v6672_v25 = vpop.eup %6671 }
 0x6cd   :  { %v6674_v1 = vpop.eup %6673  ;;  %v3031_v18 = vmul.f32 %v6672_v25, %v6670_v28  ;;  %v10147_v28 = vld [vmem:[#allocation169_spill] sm:$0xff]  ;;  %v10148_v25 = vld [vmem:[#allocation170_spill] sm:$0xff] }
 0x6ce   :  { %v6676_v56 = vpop.eup %6675 }
 0x6cf   :  { %v3032_v43 = vmul.f32 %v6676_v56, %v6674_v1  ;;  %v8462_v57 = vpack.c.bf16 %v3031_v18, %v3031_v18  ;;  %v10149_v1 = vld [vmem:[#allocation171_spill] sm:$0xff]  ;;  %v10150_v56 = vld [vmem:[#allocation172_spill] sm:$0xff]  ;;  %v10151_v18 = vld [vmem:[#allocation173_spill] sm:$0xff] }
 0x6d1   :  { %v3034_v3 = vpack.c.bf16 %v3032_v43, %v3032_v43  ;;  %v10152_v43 = vld [vmem:[#allocation174_spill] sm:$0xff] }
 0x6d3   :  { %3067 = vmatprep.mubr.bf16.mxu0 %v3034_v3  ;;  %3108 = vmatprep.mubr.bf16.mxu1 %v3034_v3 }
 0x6d4   :  { %3068 = vmatmul.mubr.bf16.vlgmr.msra.gmra.mxu0 %v8462_v57  ;;  %3109 = vmatmul.mubr.bf16.vlgmr.msra.gmra.mxu1 %v8462_v57 }
 0x6d5   :  { %3118 = vmatpush1.bf16.msra.mxu0 %v9845_v61  ;;  %3159 = vmatpush1.bf16.msra.mxu1 %v9846_v34 }
 0x6d6   :  { %3149 = vmatprep.mubr.bf16.mxu0 %v3034_v3  ;;  %3190 = vmatprep.mubr.bf16.mxu1 %v3034_v3  ;;  %v10153_v3 = vld [vmem:[#allocation175_spill] sm:$0xff] }
 0x6d7   :  { %3119 = vmatprep.subr.bf16.mxu0 %v9847_v22  ;;  %3160 = vmatprep.subr.bf16.mxu1 %v9848_v5 }
 0x6d9   :  { %3120 = vmatpush1.bf16.msra.mxu0 %v9849_v42  ;;  %3161 = vmatpush1.bf16.msra.mxu1 %v9850_v13 }
 0x6da   :  { %3121 = vmatprep.subr.bf16.mxu0 %v9937_v38  ;;  %3162 = vmatprep.subr.bf16.mxu1 %v9938_v45 }
 0x6dd   :  { %3122 = vmatpush1.bf16.msra.mxu0 %v9939_v7  ;;  %3163 = vmatpush1.bf16.msra.mxu1 %v9940_v50 }
 0x6de   :  { %3123 = vmatprep.subr.bf16.mxu0 %v9941_v54  ;;  %3164 = vmatprep.subr.bf16.mxu1 %v9942_v51 }
 0x6e1   :  { %3124 = vmatpush1.bf16.msra.mxu0 %v9943_v55  ;;  %3165 = vmatpush1.bf16.msra.mxu1 %v10030_v15 }
 0x6e2   :  { %3125 = vmatprep.subr.bf16.mxu0 %v10031_v2  ;;  %3166 = vmatprep.subr.bf16.mxu1 %v10032_v29 }
 0x6e5   :  { %3126 = vmatpush1.bf16.msra.mxu0 %v10033_v9  ;;  %3167 = vmatpush1.bf16.msra.mxu1 %v10034_v4 }
 0x6e6   :  { %3127 = vmatprep.subr.bf16.mxu0 %v10035_v49  ;;  %3168 = vmatprep.subr.bf16.mxu1 %v10036_v17 }
 0x6e9   :  { %3128 = vmatpush1.bf16.msra.mxu0 %v10037_v14  ;;  %3169 = vmatpush1.bf16.msra.mxu1 %v10038_v6 }
 0x6ea   :  { %3129 = vmatprep.subr.bf16.mxu0 %v10039_v27  ;;  %3170 = vmatprep.subr.bf16.mxu1 %v10040_v35 }
 0x6ed   :  { %3130 = vmatpush1.bf16.msra.mxu0 %v10041_v47  ;;  %3171 = vmatpush1.bf16.msra.mxu1 %v10042_v58 }
 0x6ee   :  { %3131 = vmatprep.subr.bf16.mxu0 %v9957_v41  ;;  %3172 = vmatprep.subr.bf16.mxu1 %v9958_v60 }
 0x6f1   :  { %3132 = vmatpush1.bf16.msra.mxu0 %v9959_v0  ;;  %3173 = vmatpush1.bf16.msra.mxu1 %v10043_v12 }
 0x6f2   :  { %3133 = vmatprep.subr.bf16.mxu0 %v10044_v10  ;;  %3174 = vmatprep.subr.bf16.mxu1 %v9962_v63 }
 0x6f5   :  { %3134 = vmatpush2.bf16.msra.mxu0 %v9963_v52  ;;  %3175 = vmatpush2.bf16.msra.mxu1 %v9964_v30 }
 0x6f6   :  { %3135 = vmatprep.subr.bf16.mxu0 %v9965_v53  ;;  %3176 = vmatprep.subr.bf16.mxu1 %v9966_v37 }
 0x6f9   :  { %3136 = vmatpush2.bf16.msra.mxu0 %v9967_v59  ;;  %3177 = vmatpush2.bf16.msra.mxu1 %v9882_v24 }
 0x6fa   :  { %3137 = vmatprep.subr.bf16.mxu0 %v9883_v23  ;;  %3178 = vmatprep.subr.bf16.mxu1 %v9884_v33 }
 0x6fd   :  { %3138 = vmatpush2.bf16.msra.mxu0 %v9968_v46  ;;  %3179 = vmatpush2.bf16.msra.mxu1 %v10136_v19  ;;  %v10225_v46 = vld [vmem:[#allocation105_spill] sm:$0xff] }
 0x6fe   :  { %3139 = vmatprep.subr.bf16.mxu0 %v10137_v20  ;;  %3180 = vmatprep.subr.bf16.mxu1 %v10138_v11 }
 0x701   :  { %3140 = vmatpush2.bf16.msra.mxu0 %v10139_v21  ;;  %3181 = vmatpush2.bf16.msra.mxu1 %v10140_v62 }
 0x702   :  { %3141 = vmatprep.subr.bf16.mxu0 %v10141_v39  ;;  %3182 = vmatprep.subr.bf16.mxu1 %v10142_v44 }
 0x705   :  { %3142 = vmatpush2.bf16.msra.mxu0 %v10143_v26  ;;  %3183 = vmatpush2.bf16.msra.mxu1 %v10144_v16  ;;  %v10154_v26 = vld [vmem:[#allocation176_spill] sm:$0xff]  ;;  %v10155_v16 = vld [vmem:[#allocation177_spill] sm:$0xff] }
 0x706   :  { %3143 = vmatprep.subr.bf16.mxu0 %v10145_v31  ;;  %3184 = vmatprep.subr.bf16.mxu1 %v10146_v8  ;;  %v10156_v31 = vld [vmem:[#allocation178_spill] sm:$0xff] }
 0x707   :  { %v10157_v8 = vld [vmem:[#allocation30_spill] sm:$0xff] }
 0x709   :  { %3144 = vmatpush2.bf16.msra.mxu0 %v10147_v28  ;;  %3185 = vmatpush2.bf16.msra.mxu1 %v10148_v25  ;;  %v10158_v28 = vld [vmem:[#allocation32_spill] sm:$0xff] }
 0x70a   :  { %3145 = vmatprep.subr.bf16.mxu0 %v10149_v1  ;;  %3186 = vmatprep.subr.bf16.mxu1 %v10150_v56  ;;  %v10159_v56 = vld [vmem:[#allocation31_spill] sm:$0xff]  ;;  %v10168_v1 = vld [vmem:[#allocation41_spill] sm:$0xff] }
 0x70d   :  { %3146 = vmatpush2.bf16.msra.mxu0 %v10151_v18  ;;  %3187 = vmatpush2.bf16.msra.mxu1 %v10152_v43  ;;  %v10160_v18 = vld [vmem:[#allocation33_spill] sm:$0xff]  ;;  %v10161_v43 = vld [vmem:[#allocation34_spill] sm:$0xff] }
 0x70e   :  { %3147 = vmatprep.subr.bf16.mxu0 %v10153_v3  ;;  %3188 = vmatprep.subr.bf16.mxu1 %v10154_v26  ;;  %v10162_v3 = vld [vmem:[#allocation35_spill] sm:$0xff]  ;;  %v10163_v26 = vld [vmem:[#allocation36_spill] sm:$0xff] }
 0x711   :  { %3148 = vmatpush2.bf16.msra.mxu0 %v10155_v16  ;;  %3189 = vmatpush2.bf16.msra.mxu1 %v10156_v31  ;;  %v10164_v16 = vld [vmem:[#allocation37_spill] sm:$0xff]  ;;  %v10165_v31 = vld [vmem:[#allocation38_spill] sm:$0xff] }
 0x712   :  { %3293 = vmatprep.subr.bf16.mxu0 %v10157_v8  ;;  %3334 = vmatprep.subr.bf16.mxu1 %v10158_v28  ;;  %v10166_v8 = vld [vmem:[#allocation39_spill] sm:$0xff]  ;;  %v10167_v28 = vld [vmem:[#allocation40_spill] sm:$0xff] }
 0x714   :  { %3150 = vmatmul.mubr.bf16.vlgmr.msra.gmra.mxu0 %v8462_v57  ;;  %3191 = vmatmul.mubr.bf16.vlgmr.msra.gmra.mxu1 %v8462_v57  ;;  %v10169_v57 = vld [vmem:[#allocation42_spill] sm:$0xff] }
 0x715   :  { %3294 = vmatpush1.bf16.msra.mxu0 %v10159_v56  ;;  %3335 = vmatpush1.bf16.msra.mxu1 %v10160_v18  ;;  %v10170_v56 = vld [vmem:[#allocation43_spill] sm:$0xff]  ;;  %v10171_v18 = vld [vmem:[#allocation44_spill] sm:$0xff] }
 0x716   :  { %3295 = vmatprep.subr.bf16.mxu0 %v10161_v43  ;;  %3336 = vmatprep.subr.bf16.mxu1 %v10162_v3  ;;  %v10172_v43 = vld [vmem:[#allocation45_spill] sm:$0xff]  ;;  %v10173_v3 = vld [vmem:[#allocation46_spill] sm:$0xff] }
 0x719   :  { %3296 = vmatpush1.bf16.msra.mxu0 %v10163_v26  ;;  %3337 = vmatpush1.bf16.msra.mxu1 %v10164_v16  ;;  %v10174_v26 = vld [vmem:[#allocation47_spill] sm:$0xff]  ;;  %v10175_v16 = vld [vmem:[#allocation48_spill] sm:$0xff] }
 0x71a   :  { %3297 = vmatprep.subr.bf16.mxu0 %v10165_v31  ;;  %3338 = vmatprep.subr.bf16.mxu1 %v10166_v8  ;;  %v10176_v31 = vld [vmem:[#allocation49_spill] sm:$0xff]  ;;  %v10177_v8 = vld [vmem:[#allocation50_spill] sm:$0xff] }
 0x71d   :  { %3298 = vmatpush1.bf16.msra.mxu0 %v10167_v28  ;;  %3339 = vmatpush1.bf16.msra.mxu1 %v10168_v1  ;;  %v10178_v28 = vld [vmem:[#allocation51_spill] sm:$0xff]  ;;  %v10179_v1 = vld [vmem:[#allocation52_spill] sm:$0xff] }
 0x71e   :  { %3299 = vmatprep.subr.bf16.mxu0 %v10169_v57  ;;  %3340 = vmatprep.subr.bf16.mxu1 %v10170_v56  ;;  %v10180_v57 = vld [vmem:[#allocation53_spill] sm:$0xff]  ;;  %v10181_v56 = vld [vmem:[#allocation54_spill] sm:$0xff] }
 0x721   :  { %3300 = vmatpush1.bf16.msra.mxu0 %v10171_v18  ;;  %3341 = vmatpush1.bf16.msra.mxu1 %v10172_v43  ;;  %v10182_v18 = vld [vmem:[#allocation55_spill] sm:$0xff]  ;;  %v10183_v43 = vld [vmem:[#allocation56_spill] sm:$0xff] }
 0x722   :  { %3301 = vmatprep.subr.bf16.mxu0 %v10173_v3  ;;  %3342 = vmatprep.subr.bf16.mxu1 %v10174_v26  ;;  %v10184_v3 = vld [vmem:[#allocation57_spill] sm:$0xff]  ;;  %v10185_v26 = vld [vmem:[#allocation58_spill] sm:$0xff] }
 0x725   :  { %3302 = vmatpush1.bf16.msra.mxu0 %v10175_v16  ;;  %3343 = vmatpush1.bf16.msra.mxu1 %v10176_v31  ;;  %v10186_v16 = vld [vmem:[#allocation59_spill] sm:$0xff]  ;;  %v10187_v31 = vld [vmem:[#allocation60_spill] sm:$0xff] }
 0x726   :  { %3303 = vmatprep.subr.bf16.mxu0 %v10177_v8  ;;  %3344 = vmatprep.subr.bf16.mxu1 %v10178_v28  ;;  %v10188_v8 = vld [vmem:[#allocation61_spill] sm:$0xff]  ;;  %v10189_v28 = vld [vmem:[#allocation62_spill] sm:$0xff] }
 0x729   :  { %3304 = vmatpush1.bf16.msra.mxu0 %v10179_v1  ;;  %3345 = vmatpush1.bf16.msra.mxu1 %v10180_v57  ;;  %v10190_v1 = vld [vmem:[#allocation63_spill] sm:$0xff]  ;;  %v10191_v57 = vld [vmem:[#allocation64_spill] sm:$0xff] }
 0x72a   :  { %3305 = vmatprep.subr.bf16.mxu0 %v10181_v56  ;;  %3346 = vmatprep.subr.bf16.mxu1 %v10182_v18  ;;  %v10192_v56 = vld [vmem:[#allocation65_spill] sm:$0xff]  ;;  %v10193_v18 = vld [vmem:[#allocation66_spill] sm:$0xff] }
 0x72d   :  { %3306 = vmatpush1.bf16.msra.mxu0 %v10183_v43  ;;  %3347 = vmatpush1.bf16.msra.mxu1 %v10184_v3  ;;  %v10194_v43 = vld [vmem:[#allocation67_spill] sm:$0xff]  ;;  %v10195_v3 = vld [vmem:[#allocation68_spill] sm:$0xff] }
 0x72e   :  { %3307 = vmatprep.subr.bf16.mxu0 %v10185_v26  ;;  %3348 = vmatprep.subr.bf16.mxu1 %v10186_v16  ;;  %v10196_v26 = vld [vmem:[#allocation69_spill] sm:$0xff]  ;;  %v10197_v16 = vld [vmem:[#allocation70_spill] sm:$0xff] }
 0x731   :  { %3308 = vmatpush1.bf16.msra.mxu0 %v10187_v31  ;;  %3349 = vmatpush1.bf16.msra.mxu1 %v10188_v8  ;;  %v10198_v31 = vld [vmem:[#allocation71_spill] sm:$0xff]  ;;  %v10199_v8 = vld [vmem:[#allocation72_spill] sm:$0xff] }
 0x732   :  { %3309 = vmatprep.subr.bf16.mxu0 %v10189_v28  ;;  %3350 = vmatprep.subr.bf16.mxu1 %v10190_v1  ;;  %v10200_v28 = vld [vmem:[#allocation73_spill] sm:$0xff]  ;;  %v10201_v1 = vld [vmem:[#allocation74_spill] sm:$0xff] }
 0x735   :  { %3310 = vmatpush2.bf16.msra.mxu0 %v10191_v57  ;;  %3351 = vmatpush2.bf16.msra.mxu1 %v10192_v56  ;;  %v10202_v57 = vld [vmem:[#allocation75_spill] sm:$0xff]  ;;  %v10203_v56 = vld [vmem:[#allocation76_spill] sm:$0xff] }
 0x736   :  { %3311 = vmatprep.subr.bf16.mxu0 %v10193_v18  ;;  %3352 = vmatprep.subr.bf16.mxu1 %v10194_v43  ;;  %v10204_v18 = vld [vmem:[#allocation77_spill] sm:$0xff]  ;;  %v10205_v43 = vld [vmem:[#allocation78_spill] sm:$0xff] }
 0x739   :  { %3312 = vmatpush2.bf16.msra.mxu0 %v10195_v3  ;;  %3353 = vmatpush2.bf16.msra.mxu1 %v10196_v26  ;;  %v10206_v3 = vld [vmem:[#allocation80_spill] sm:$0xff]  ;;  %v10207_v26 = vld [vmem:[#allocation79_spill] sm:$0xff] }
 0x73a   :  { %3313 = vmatprep.subr.bf16.mxu0 %v10197_v16  ;;  %3354 = vmatprep.subr.bf16.mxu1 %v10198_v31  ;;  %v10208_v16 = vld [vmem:[#allocation81_spill] sm:$0xff]  ;;  %v10209_v31 = vld [vmem:[#allocation82_spill] sm:$0xff] }
 0x73d   :  { %3314 = vmatpush2.bf16.msra.mxu0 %v10199_v8  ;;  %3355 = vmatpush2.bf16.msra.mxu1 %v10200_v28  ;;  %v10210_v8 = vld [vmem:[#allocation83_spill] sm:$0xff]  ;;  %v10211_v28 = vld [vmem:[#allocation84_spill] sm:$0xff] }
 0x73e   :  { %3315 = vmatprep.subr.bf16.mxu0 %v10201_v1  ;;  %3356 = vmatprep.subr.bf16.mxu1 %v10202_v57  ;;  %v10212_v1 = vld [vmem:[#allocation85_spill] sm:$0xff]  ;;  %v10213_v57 = vld [vmem:[#allocation86_spill] sm:$0xff] }
 0x741   :  { %3316 = vmatpush2.bf16.msra.mxu0 %v10203_v56  ;;  %3357 = vmatpush2.bf16.msra.mxu1 %v10204_v18  ;;  %v10214_v56 = vld [vmem:[#allocation87_spill] sm:$0xff]  ;;  %v10215_v18 = vld [vmem:[#allocation88_spill] sm:$0xff] }
 0x742   :  { %3317 = vmatprep.subr.bf16.mxu0 %v10205_v43  ;;  %3358 = vmatprep.subr.bf16.mxu1 %v10206_v3  ;;  %v10216_v43 = vld [vmem:[#allocation89_spill] sm:$0xff]  ;;  %v10217_v3 = vld [vmem:[#allocation90_spill] sm:$0xff] }
 0x745   :  { %3318 = vmatpush2.bf16.msra.mxu0 %v10207_v26  ;;  %3359 = vmatpush2.bf16.msra.mxu1 %v10208_v16  ;;  %v10218_v26 = vld [vmem:[#allocation91_spill] sm:$0xff]  ;;  %v10219_v16 = vld [vmem:[#allocation92_spill] sm:$0xff] }
 0x746   :  { %3319 = vmatprep.subr.bf16.mxu0 %v10209_v31  ;;  %3360 = vmatprep.subr.bf16.mxu1 %v10210_v8  ;;  %v10220_v31 = vld [vmem:[#allocation93_spill] sm:$0xff]  ;;  %v10221_v8 = vld [vmem:[#allocation94_spill] sm:$0xff] }
 0x749   :  { %3320 = vmatpush2.bf16.msra.mxu0 %v10211_v28  ;;  %3361 = vmatpush2.bf16.msra.mxu1 %v10212_v1  ;;  %v10222_v28 = vld [vmem:[#allocation95_spill] sm:$0xff] }
 0x74a   :  { %3321 = vmatprep.subr.bf16.mxu0 %v10213_v57  ;;  %3362 = vmatprep.subr.bf16.mxu1 %v10214_v56 }
 0x74d   :  { %3322 = vmatpush2.bf16.msra.mxu0 %v10215_v18  ;;  %3363 = vmatpush2.bf16.msra.mxu1 %v10216_v43 }
 0x74e   :  { %3323 = vmatprep.subr.bf16.mxu0 %v10217_v3  ;;  %3364 = vmatprep.subr.bf16.mxu1 %v10218_v26  ;;  %v10223_v26 = vld [vmem:[#allocation102_spill] sm:$0xff] }
 0x751   :  { %3324 = vmatpush2.bf16.msra.mxu0 %v10219_v16  ;;  %3365 = vmatpush2.bf16.msra.mxu1 %v10220_v31  ;;  %v10224_v16 = vld [vmem:[#allocation104_spill] sm:$0xff] }
 0x752   :  { %3375 = vmatprep.subr.bf16.mxu0 %v10221_v8  ;;  %3416 = vmatprep.subr.bf16.mxu1 %v10222_v28 }
 0x794   :  { %v3069_v1 = vpop.f32.mrf.mxu0  ;;  %v3110_v57 = vpop.f32.mrf.mxu1 }
 0x795   :  { %v3207_v62 = vrot.slane %v3069_v1, 6  ;;  %v3209_v3 = vrot.slane %v3110_v57, 6 }
 0x796   :  { %v3071_v25 = vpop.f32.mrf.mxu0  ;;  %v3112_v56 = vpop.f32.mrf.mxu1 }
 0x797   :  { %v3208_v21 = vrot.slane %v3071_v25, 6  ;;  %v3223_v11 = vadd.f32 %v3207_v62, %v10223_v26  ;;  %v3225_v20 = vadd.f32 %v3209_v3, %v10224_v16  ;;  %v3210_v31 = vrot.slane %v3112_v56, 6 }
 0x798   :  { %v3073_v44 = vpop.f32.mrf.mxu0  ;;  %v3114_v18 = vpop.f32.mrf.mxu1 }
 0x799   :  { %v3224_v8 = vadd.f32 %v3208_v21, %v8436_v32  ;;  %v6133_v19 = vmul.f32 -1.442695, %v3223_v11  ;;  %v6135_v28 = vmul.f32 -1.442695, %v3225_v20  ;;  %v3226_v33 = vadd.f32 %v3210_v31, %v10225_v46  ;;  %v10228_v32 = vld [vmem:[#allocation100_spill] sm:$0xff] }
 0x79a   :  { %v3074_v39 = vpop.f32.mrf.mxu0  ;;  %v3115_v43 = vpop.f32.mrf.mxu1 }
 0x79b   :  { %v6134_v23 = vmul.f32 -1.442695, %v3224_v8  ;;  %6677 = vpow2.f32 %v6133_v19  ;;  %v6136_v44 = vmul.f32 -1.442695, %v3226_v33  ;;  %v10226_v8 = vld [vmem:[#allocation115_spill] sm:$0xff] }
 0x79c   :  { %6679 = vpow2.f32 %v6135_v28 }
 0x79d   :  { %6681 = vpow2.f32 %v6134_v23  ;;  %v10227_v23 = vld [vmem:[#allocation116_spill] sm:$0xff] }
 0x79e   :  { %6683 = vpow2.f32 %v6136_v44 }
 0x7a8   :  { %v6678_v39 = vpop.eup %6677 }
 0x7a9   :  { %v6680_v1 = vpop.eup %6679  ;;  %v3237_v18 = vadd.f32 1.0, %v6678_v39 }
 0x7aa   :  { %v6682_v25 = vpop.eup %6681  ;;  %v3249_v62 = vadd.f32 1.0, %v6680_v1 }
 0x7ab   :  { %v6684_v43 = vpop.eup %6683  ;;  %v3238_v3 = vadd.f32 1.0, %v6682_v25  ;;  %6685 = vrcp.f32 %v3237_v18 }
 0x7ac   :  { %6687 = vrcp.f32 %v3249_v62  ;;  %v3250_v21 = vadd.f32 1.0, %v6684_v43 }
 0x7ad   :  { %6689 = vrcp.f32 %v3238_v3  ;;  %v3271_v3 = vrot.slane %v8456_v36, 6 }
 0x7d4   :  { %v3151_v56 = vpop.f32.mrf.mxu0  ;;  %v3192_v57 = vpop.f32.mrf.mxu1 }
 0x7d5   :  { %v3211_v11 = vrot.slane %v3151_v56, 6  ;;  %v3213_v20 = vrot.slane %v3192_v57, 6  ;;  %v6686_v57 = vpop.eup %6685 }
 0x7d6   :  { %v3153_v31 = vpop.f32.mrf.mxu0  ;;  %v3194_v19 = vpop.f32.mrf.mxu1 }
 0x7d7   :  { %v3227_v33 = vadd.f32 %v3211_v11, %v10226_v8  ;;  %v3229_v28 = vadd.f32 %v3213_v20, %v10227_v23  ;;  %v3212_v44 = vrot.slane %v3153_v31, 6  ;;  %v3214_v46 = vrot.slane %v3194_v19, 6  ;;  %v6688_v11 = vpop.eup %6687 }
 0x7d8   :  { %v3155_v39 = vpop.f32.mrf.mxu0  ;;  %v3196_v1 = vpop.f32.mrf.mxu1 }
 0x7d9   :  { %6691 = vtanh.f32 %v3227_v33  ;;  %v6137_v25 = vmul.f32 -1.442695, %v3229_v28  ;;  %v3228_v16 = vadd.f32 %v3212_v44, %v10228_v32  ;;  %v3230_v18 = vadd.f32 %v3214_v46, %v8448_v40  ;;  %v6690_v20 = vpop.eup %6689 }
 0x7da   :  { %6693 = vrcp.f32 %v3250_v21  ;;  %v3156_v62 = vpop.f32.mrf.mxu0  ;;  %v3197_v43 = vpop.f32.mrf.mxu1  ;;  %v3275_v33 = vmul.f32 %v6688_v11, %v3271_v3  ;;  %v3272_v44 = vrot.slane %v8459_v48, 6 }
 0x7db   :  { %6695 = vpow2.f32 %v6137_v25  ;;  %v6138_v56 = vmul.f32 -1.442695, %v3230_v18 }
 0x7dc   :  { %6697 = vtanh.f32 %v3228_v16 }
 0x7dd   :  { %6699 = vpow2.f32 %v6138_v56 }
 0x7e6   :  { %v6692_v31 = vpop.eup %6691 }
 0x7e7   :  { %v6694_v19 = vpop.eup %6693  ;;  %v3277_v28 = vmul.f32 %v6692_v31, %v6686_v57 }
 0x7e8   :  { %v6696_v39 = vpop.eup %6695  ;;  %v3276_v18 = vmul.f32 %v6694_v19, %v3272_v44  ;;  %v10231_v44 = vld [vmem:[#allocation157_spill] sm:$0xff] }
 0x7e9   :  { %v6698_v46 = vpop.eup %6697  ;;  %v8606_v21 = vadd.f32 %v3277_v28, %v3275_v33  ;;  %v3263_v1 = vadd.f32 1.0, %v6696_v39  ;;  %v10230_v39 = vld [vmem:[#allocation156_spill] sm:$0xff] }
 0x7ea   :  { %v6700_v25 = vpop.eup %6699  ;;  %v3278_v16 = vmul.f32 %v6698_v46, %v6690_v20  ;;  %v10229_v20 = vld [vmem:[#allocation155_spill] sm:$0xff]  ;;  %v10232_v46 = vld [vmem:[#allocation158_spill] sm:$0xff] }
 0x7eb   :  { %6701 = vtanh.f32 %v8606_v21  ;;  %v3264_v62 = vadd.f32 1.0, %v6700_v25  ;;  %v10234_v25 = vld [vmem:[#allocation160_spill] sm:$0xff] }
 0x7ec   :  { %6703 = vrcp.f32 %v3263_v1  ;;  %v8609_v43 = vadd.f32 %v3278_v16, %v3276_v18  ;;  %v10233_v1 = vld [vmem:[#allocation159_spill] sm:$0xff]  ;;  %v10235_v18 = vld [vmem:[#allocation161_spill] sm:$0xff]  ;;  %v10236_v16 = vld [vmem:[#allocation162_spill] sm:$0xff] }
 0x7ed   :  { %6705 = vrcp.f32 %v3264_v62  ;;  %v10237_v62 = vld [vmem:[#allocation163_spill] sm:$0xff] }
 0x7ee   :  { %6707 = vtanh.f32 %v8609_v43 }
 0x7f8   :  { %v6702_v36 = vpop.eup %6701 }
 0x7f9   :  { %v6704_v56 = vpop.eup %6703 }
 0x7fa   :  { %v6706_v57 = vpop.eup %6705  ;;  %v3283_v48 = vmul.f32 %v6704_v56, %v6702_v36  ;;  %v10238_v36 = vld [vmem:[#allocation164_spill] sm:$0xff]  ;;  %v10239_v56 = vld [vmem:[#allocation165_spill] sm:$0xff] }
 0x7fb   :  { %v6708_v11 = vpop.eup %6707 }
 0x7fc   :  { %v3284_v3 = vmul.f32 %v6708_v11, %v6706_v57  ;;  %v3285_v31 = vpack.c.bf16 %v3283_v48, %v3283_v48  ;;  %v10240_v57 = vld [vmem:[#allocation166_spill] sm:$0xff]  ;;  %v10241_v48 = vld [vmem:[#allocation167_spill] sm:$0xff]  ;;  %v10242_v11 = vld [vmem:[#allocation168_spill] sm:$0xff] }
 0x7fe   :  { %v3286_v33 = vpack.c.bf16 %v3284_v3, %v3284_v3  ;;  %v8612_v19 = vrot.slane %v3285_v31, 1  ;;  %v10243_v3 = vld [vmem:[#allocation169_spill] sm:$0xff]  ;;  %v10244_v31 = vld [vmem:[#allocation170_spill] sm:$0xff] }
 0x800   :  { %v3290_v28 = vrot.slane %v3286_v33, 1  ;;  %v10245_v33 = vld [vmem:[#allocation171_spill] sm:$0xff] }
 0x802   :  { %3325 = vmatprep.mubr.bf16.mxu0 %v3290_v28  ;;  %3366 = vmatprep.mubr.bf16.mxu1 %v3290_v28 }
 0x803   :  { %3326 = vmatmul.mubr.bf16.vlgmr.msra.gmra.mxu0 %v8612_v19  ;;  %3367 = vmatmul.mubr.bf16.vlgmr.msra.gmra.mxu1 %v8612_v19 }
 0x804   :  { %3376 = vmatpush1.bf16.msra.mxu0 %v9845_v61  ;;  %3417 = vmatpush1.bf16.msra.mxu1 %v9846_v34 }
 0x805   :  { %3407 = vmatprep.mubr.bf16.mxu0 %v3290_v28  ;;  %3448 = vmatprep.mubr.bf16.mxu1 %v3290_v28  ;;  %v10246_v28 = vld [vmem:[#allocation172_spill] sm:$0xff] }
 0x806   :  { %3377 = vmatprep.subr.bf16.mxu0 %v9847_v22  ;;  %3418 = vmatprep.subr.bf16.mxu1 %v9848_v5 }
 0x808   :  { %3378 = vmatpush1.bf16.msra.mxu0 %v9849_v42  ;;  %3419 = vmatpush1.bf16.msra.mxu1 %v9850_v13 }
 0x809   :  { %3379 = vmatprep.subr.bf16.mxu0 %v9937_v38  ;;  %3420 = vmatprep.subr.bf16.mxu1 %v9938_v45 }
 0x80c   :  { %3380 = vmatpush1.bf16.msra.mxu0 %v9939_v7  ;;  %3421 = vmatpush1.bf16.msra.mxu1 %v9940_v50 }
 0x80d   :  { %3381 = vmatprep.subr.bf16.mxu0 %v9941_v54  ;;  %3422 = vmatprep.subr.bf16.mxu1 %v9942_v51 }
 0x810   :  { %3382 = vmatpush1.bf16.msra.mxu0 %v9943_v55  ;;  %3423 = vmatpush1.bf16.msra.mxu1 %v10030_v15 }
 0x811   :  { %3383 = vmatprep.subr.bf16.mxu0 %v10031_v2  ;;  %3424 = vmatprep.subr.bf16.mxu1 %v10032_v29 }
 0x814   :  { %3384 = vmatpush1.bf16.msra.mxu0 %v10033_v9  ;;  %3425 = vmatpush1.bf16.msra.mxu1 %v10034_v4 }
 0x815   :  { %3385 = vmatprep.subr.bf16.mxu0 %v10035_v49  ;;  %3426 = vmatprep.subr.bf16.mxu1 %v10036_v17 }
 0x818   :  { %3386 = vmatpush1.bf16.msra.mxu0 %v10037_v14  ;;  %3427 = vmatpush1.bf16.msra.mxu1 %v10038_v6 }
 0x819   :  { %3387 = vmatprep.subr.bf16.mxu0 %v10039_v27  ;;  %3428 = vmatprep.subr.bf16.mxu1 %v10040_v35 }
 0x81c   :  { %3388 = vmatpush1.bf16.msra.mxu0 %v10041_v47  ;;  %3429 = vmatpush1.bf16.msra.mxu1 %v10042_v58 }
 0x81d   :  { %3389 = vmatprep.subr.bf16.mxu0 %v9957_v41  ;;  %3430 = vmatprep.subr.bf16.mxu1 %v9958_v60 }
 0x820   :  { %3390 = vmatpush1.bf16.msra.mxu0 %v9959_v0  ;;  %3431 = vmatpush1.bf16.msra.mxu1 %v10043_v12 }
 0x821   :  { %3391 = vmatprep.subr.bf16.mxu0 %v10044_v10  ;;  %3432 = vmatprep.subr.bf16.mxu1 %v9962_v63 }
 0x824   :  { %3392 = vmatpush2.bf16.msra.mxu0 %v9963_v52  ;;  %3433 = vmatpush2.bf16.msra.mxu1 %v9964_v30 }
 0x825   :  { %3393 = vmatprep.subr.bf16.mxu0 %v9965_v53  ;;  %3434 = vmatprep.subr.bf16.mxu1 %v9966_v37 }
 0x828   :  { %3394 = vmatpush2.bf16.msra.mxu0 %v9967_v59  ;;  %3435 = vmatpush2.bf16.msra.mxu1 %v9882_v24  ;;  %v10321_v24 = vld [vmem:[#allocation105_spill] sm:$0xff] }
 0x829   :  { %3395 = vmatprep.subr.bf16.mxu0 %v10229_v20  ;;  %3436 = vmatprep.subr.bf16.mxu1 %v10230_v39  ;;  %v10320_v39 = vld [vmem:[#allocation103_spill] sm:$0xff] }
 0x82c   :  { %3396 = vmatpush2.bf16.msra.mxu0 %v10231_v44  ;;  %3437 = vmatpush2.bf16.msra.mxu1 %v10232_v46 }
 0x82d   :  { %3397 = vmatprep.subr.bf16.mxu0 %v10233_v1  ;;  %3438 = vmatprep.subr.bf16.mxu1 %v10234_v25 }
 0x830   :  { %3398 = vmatpush2.bf16.msra.mxu0 %v10235_v18  ;;  %3439 = vmatpush2.bf16.msra.mxu1 %v10236_v16  ;;  %v10247_v16 = vld [vmem:[#allocation173_spill] sm:$0xff] }
 0x831   :  { %3399 = vmatprep.subr.bf16.mxu0 %v10237_v62  ;;  %3440 = vmatprep.subr.bf16.mxu1 %v10238_v36  ;;  %v10248_v62 = vld [vmem:[#allocation174_spill] sm:$0xff]  ;;  %v10249_v36 = vld [vmem:[#allocation175_spill] sm:$0xff] }
 0x834   :  { %3400 = vmatpush2.bf16.msra.mxu0 %v10239_v56  ;;  %3441 = vmatpush2.bf16.msra.mxu1 %v10240_v57  ;;  %v10250_v56 = vld [vmem:[#allocation176_spill] sm:$0xff]  ;;  %v10251_v57 = vld [vmem:[#allocation177_spill] sm:$0xff] }
 0x835   :  { %3401 = vmatprep.subr.bf16.mxu0 %v10241_v48  ;;  %3442 = vmatprep.subr.bf16.mxu1 %v10242_v11  ;;  %v10252_v48 = vld [vmem:[#allocation178_spill] sm:$0xff] }
 0x836   :  { %v10253_v11 = vld [vmem:[#allocation30_spill] sm:$0xff] }
 0x838   :  { %3402 = vmatpush2.bf16.msra.mxu0 %v10243_v3  ;;  %3443 = vmatpush2.bf16.msra.mxu1 %v10244_v31  ;;  %v10254_v3 = vld [vmem:[#allocation32_spill] sm:$0xff] }
 0x839   :  { %3403 = vmatprep.subr.bf16.mxu0 %v10245_v33  ;;  %3444 = vmatprep.subr.bf16.mxu1 %v10246_v28  ;;  %v10255_v28 = vld [vmem:[#allocation31_spill] sm:$0xff]  ;;  %v10264_v33 = vld [vmem:[#allocation41_spill] sm:$0xff] }
 0x83c   :  { %3404 = vmatpush2.bf16.msra.mxu0 %v10247_v16  ;;  %3445 = vmatpush2.bf16.msra.mxu1 %v10248_v62  ;;  %v10256_v16 = vld [vmem:[#allocation33_spill] sm:$0xff]  ;;  %v10257_v62 = vld [vmem:[#allocation34_spill] sm:$0xff] }
 0x83d   :  { %3405 = vmatprep.subr.bf16.mxu0 %v10249_v36  ;;  %3446 = vmatprep.subr.bf16.mxu1 %v10250_v56  ;;  %v10258_v36 = vld [vmem:[#allocation35_spill] sm:$0xff]  ;;  %v10259_v56 = vld [vmem:[#allocation36_spill] sm:$0xff] }
 0x840   :  { %3406 = vmatpush2.bf16.msra.mxu0 %v10251_v57  ;;  %3447 = vmatpush2.bf16.msra.mxu1 %v10252_v48  ;;  %v10260_v57 = vld [vmem:[#allocation37_spill] sm:$0xff]  ;;  %v10261_v48 = vld [vmem:[#allocation38_spill] sm:$0xff] }
 0x841   :  { %3551 = vmatprep.subr.bf16.mxu0 %v10253_v11  ;;  %3592 = vmatprep.subr.bf16.mxu1 %v10254_v3  ;;  %v10262_v11 = vld [vmem:[#allocation39_spill] sm:$0xff]  ;;  %v10263_v3 = vld [vmem:[#allocation40_spill] sm:$0xff] }
 0x843   :  { %3408 = vmatmul.mubr.bf16.vlgmr.msra.gmra.mxu0 %v8612_v19  ;;  %3449 = vmatmul.mubr.bf16.vlgmr.msra.gmra.mxu1 %v8612_v19  ;;  %v10265_v19 = vld [vmem:[#allocation42_spill] sm:$0xff] }
 0x844   :  { %3552 = vmatpush1.bf16.msra.mxu0 %v10255_v28  ;;  %3593 = vmatpush1.bf16.msra.mxu1 %v10256_v16  ;;  %v10266_v28 = vld [vmem:[#allocation43_spill] sm:$0xff]  ;;  %v10267_v16 = vld [vmem:[#allocation44_spill] sm:$0xff] }
 0x845   :  { %3553 = vmatprep.subr.bf16.mxu0 %v10257_v62  ;;  %3594 = vmatprep.subr.bf16.mxu1 %v10258_v36  ;;  %v10268_v62 = vld [vmem:[#allocation45_spill] sm:$0xff]  ;;  %v10269_v36 = vld [vmem:[#allocation46_spill] sm:$0xff] }
 0x848   :  { %3554 = vmatpush1.bf16.msra.mxu0 %v10259_v56  ;;  %3595 = vmatpush1.bf16.msra.mxu1 %v10260_v57  ;;  %v10270_v56 = vld [vmem:[#allocation47_spill] sm:$0xff]  ;;  %v10271_v57 = vld [vmem:[#allocation48_spill] sm:$0xff] }
 0x849   :  { %3555 = vmatprep.subr.bf16.mxu0 %v10261_v48  ;;  %3596 = vmatprep.subr.bf16.mxu1 %v10262_v11  ;;  %v10272_v48 = vld [vmem:[#allocation49_spill] sm:$0xff]  ;;  %v10273_v11 = vld [vmem:[#allocation50_spill] sm:$0xff] }
 0x84c   :  { %3556 = vmatpush1.bf16.msra.mxu0 %v10263_v3  ;;  %3597 = vmatpush1.bf16.msra.mxu1 %v10264_v33  ;;  %v10274_v3 = vld [vmem:[#allocation51_spill] sm:$0xff]  ;;  %v10275_v33 = vld [vmem:[#allocation52_spill] sm:$0xff] }
 0x84d   :  { %3557 = vmatprep.subr.bf16.mxu0 %v10265_v19  ;;  %3598 = vmatprep.subr.bf16.mxu1 %v10266_v28  ;;  %v10276_v19 = vld [vmem:[#allocation53_spill] sm:$0xff]  ;;  %v10277_v28 = vld [vmem:[#allocation54_spill] sm:$0xff] }
 0x850   :  { %3558 = vmatpush1.bf16.msra.mxu0 %v10267_v16  ;;  %3599 = vmatpush1.bf16.msra.mxu1 %v10268_v62  ;;  %v10278_v16 = vld [vmem:[#allocation55_spill] sm:$0xff]  ;;  %v10279_v62 = vld [vmem:[#allocation56_spill] sm:$0xff] }
 0x851   :  { %3559 = vmatprep.subr.bf16.mxu0 %v10269_v36  ;;  %3600 = vmatprep.subr.bf16.mxu1 %v10270_v56  ;;  %v10280_v36 = vld [vmem:[#allocation57_spill] sm:$0xff]  ;;  %v10281_v56 = vld [vmem:[#allocation58_spill] sm:$0xff] }
 0x854   :  { %3560 = vmatpush1.bf16.msra.mxu0 %v10271_v57  ;;  %3601 = vmatpush1.bf16.msra.mxu1 %v10272_v48  ;;  %v10282_v57 = vld [vmem:[#allocation59_spill] sm:$0xff]  ;;  %v10283_v48 = vld [vmem:[#allocation60_spill] sm:$0xff] }
 0x855   :  { %3561 = vmatprep.subr.bf16.mxu0 %v10273_v11  ;;  %3602 = vmatprep.subr.bf16.mxu1 %v10274_v3  ;;  %v10284_v11 = vld [vmem:[#allocation61_spill] sm:$0xff]  ;;  %v10285_v3 = vld [vmem:[#allocation62_spill] sm:$0xff] }
 0x858   :  { %3562 = vmatpush1.bf16.msra.mxu0 %v10275_v33  ;;  %3603 = vmatpush1.bf16.msra.mxu1 %v10276_v19  ;;  %v10286_v33 = vld [vmem:[#allocation63_spill] sm:$0xff]  ;;  %v10287_v19 = vld [vmem:[#allocation64_spill] sm:$0xff] }
 0x859   :  { %3563 = vmatprep.subr.bf16.mxu0 %v10277_v28  ;;  %3604 = vmatprep.subr.bf16.mxu1 %v10278_v16  ;;  %v10288_v28 = vld [vmem:[#allocation65_spill] sm:$0xff]  ;;  %v10289_v16 = vld [vmem:[#allocation66_spill] sm:$0xff] }
 0x85c   :  { %3564 = vmatpush1.bf16.msra.mxu0 %v10279_v62  ;;  %3605 = vmatpush1.bf16.msra.mxu1 %v10280_v36  ;;  %v10290_v62 = vld [vmem:[#allocation67_spill] sm:$0xff]  ;;  %v10291_v36 = vld [vmem:[#allocation68_spill] sm:$0xff] }
 0x85d   :  { %3565 = vmatprep.subr.bf16.mxu0 %v10281_v56  ;;  %3606 = vmatprep.subr.bf16.mxu1 %v10282_v57  ;;  %v10292_v56 = vld [vmem:[#allocation69_spill] sm:$0xff]  ;;  %v10293_v57 = vld [vmem:[#allocation70_spill] sm:$0xff] }
 0x860   :  { %3566 = vmatpush1.bf16.msra.mxu0 %v10283_v48  ;;  %3607 = vmatpush1.bf16.msra.mxu1 %v10284_v11  ;;  %v10294_v48 = vld [vmem:[#allocation71_spill] sm:$0xff]  ;;  %v10295_v11 = vld [vmem:[#allocation72_spill] sm:$0xff] }
 0x861   :  { %3567 = vmatprep.subr.bf16.mxu0 %v10285_v3  ;;  %3608 = vmatprep.subr.bf16.mxu1 %v10286_v33  ;;  %v10296_v3 = vld [vmem:[#allocation73_spill] sm:$0xff]  ;;  %v10297_v33 = vld [vmem:[#allocation74_spill] sm:$0xff] }
 0x864   :  { %3568 = vmatpush2.bf16.msra.mxu0 %v10287_v19  ;;  %3609 = vmatpush2.bf16.msra.mxu1 %v10288_v28  ;;  %v10298_v19 = vld [vmem:[#allocation75_spill] sm:$0xff]  ;;  %v10299_v28 = vld [vmem:[#allocation76_spill] sm:$0xff] }
 0x865   :  { %3569 = vmatprep.subr.bf16.mxu0 %v10289_v16  ;;  %3610 = vmatprep.subr.bf16.mxu1 %v10290_v62  ;;  %v10300_v16 = vld [vmem:[#allocation77_spill] sm:$0xff]  ;;  %v10301_v62 = vld [vmem:[#allocation78_spill] sm:$0xff] }
 0x868   :  { %3570 = vmatpush2.bf16.msra.mxu0 %v10291_v36  ;;  %3611 = vmatpush2.bf16.msra.mxu1 %v10292_v56  ;;  %v10302_v36 = vld [vmem:[#allocation80_spill] sm:$0xff]  ;;  %v10303_v56 = vld [vmem:[#allocation79_spill] sm:$0xff] }
 0x869   :  { %3571 = vmatprep.subr.bf16.mxu0 %v10293_v57  ;;  %3612 = vmatprep.subr.bf16.mxu1 %v10294_v48  ;;  %v10304_v57 = vld [vmem:[#allocation81_spill] sm:$0xff]  ;;  %v10305_v48 = vld [vmem:[#allocation82_spill] sm:$0xff] }
 0x86c   :  { %3572 = vmatpush2.bf16.msra.mxu0 %v10295_v11  ;;  %3613 = vmatpush2.bf16.msra.mxu1 %v10296_v3  ;;  %v10306_v11 = vld [vmem:[#allocation83_spill] sm:$0xff]  ;;  %v10307_v3 = vld [vmem:[#allocation84_spill] sm:$0xff] }
 0x86d   :  { %3573 = vmatprep.subr.bf16.mxu0 %v10297_v33  ;;  %3614 = vmatprep.subr.bf16.mxu1 %v10298_v19  ;;  %v10308_v33 = vld [vmem:[#allocation85_spill] sm:$0xff]  ;;  %v10309_v19 = vld [vmem:[#allocation86_spill] sm:$0xff] }
 0x870   :  { %3574 = vmatpush2.bf16.msra.mxu0 %v10299_v28  ;;  %3615 = vmatpush2.bf16.msra.mxu1 %v10300_v16  ;;  %v10310_v28 = vld [vmem:[#allocation87_spill] sm:$0xff]  ;;  %v10311_v16 = vld [vmem:[#allocation88_spill] sm:$0xff] }
 0x871   :  { %3575 = vmatprep.subr.bf16.mxu0 %v10301_v62  ;;  %3616 = vmatprep.subr.bf16.mxu1 %v10302_v36  ;;  %v10312_v62 = vld [vmem:[#allocation89_spill] sm:$0xff]  ;;  %v10313_v36 = vld [vmem:[#allocation90_spill] sm:$0xff] }
 0x874   :  { %3576 = vmatpush2.bf16.msra.mxu0 %v10303_v56  ;;  %3617 = vmatpush2.bf16.msra.mxu1 %v10304_v57  ;;  %v10314_v56 = vld [vmem:[#allocation91_spill] sm:$0xff]  ;;  %v10315_v57 = vld [vmem:[#allocation92_spill] sm:$0xff] }
 0x875   :  { %3577 = vmatprep.subr.bf16.mxu0 %v10305_v48  ;;  %3618 = vmatprep.subr.bf16.mxu1 %v10306_v11  ;;  %v10316_v48 = vld [vmem:[#allocation93_spill] sm:$0xff]  ;;  %v10317_v11 = vld [vmem:[#allocation94_spill] sm:$0xff] }
 0x878   :  { %3578 = vmatpush2.bf16.msra.mxu0 %v10307_v3  ;;  %3619 = vmatpush2.bf16.msra.mxu1 %v10308_v33  ;;  %v10318_v3 = vld [vmem:[#allocation95_spill] sm:$0xff] }
 0x879   :  { %3579 = vmatprep.subr.bf16.mxu0 %v10309_v19  ;;  %3620 = vmatprep.subr.bf16.mxu1 %v10310_v28 }
 0x87c   :  { %3580 = vmatpush2.bf16.msra.mxu0 %v10311_v16  ;;  %3621 = vmatpush2.bf16.msra.mxu1 %v10312_v62 }
 0x87d   :  { %3581 = vmatprep.subr.bf16.mxu0 %v10313_v36  ;;  %3622 = vmatprep.subr.bf16.mxu1 %v10314_v56 }
 0x880   :  { %3582 = vmatpush2.bf16.msra.mxu0 %v10315_v57  ;;  %3623 = vmatpush2.bf16.msra.mxu1 %v10316_v48  ;;  %v10319_v57 = vld [vmem:[#allocation104_spill] sm:$0xff] }
 0x881   :  { %3633 = vmatprep.subr.bf16.mxu0 %v10317_v11  ;;  %3674 = vmatprep.subr.bf16.mxu1 %v10318_v3 }
 0x8c3   :  { %v3327_v33 = vpop.f32.mrf.mxu0  ;;  %v3368_v19 = vpop.f32.mrf.mxu1 }
 0x8c4   :  { %v3465_v1 = vrot.slane %v3327_v33, 4  ;;  %v3467_v36 = vrot.slane %v3368_v19, 4 }
 0x8c5   :  { %v3329_v31 = vpop.f32.mrf.mxu0  ;;  %v3370_v28 = vpop.f32.mrf.mxu1 }
 0x8c6   :  { %v3466_v46 = vrot.slane %v3329_v31, 4  ;;  %v3481_v56 = vadd.f32 %v3465_v1, %v10223_v26  ;;  %v3483_v44 = vadd.f32 %v3467_v36, %v10319_v57  ;;  %v3468_v48 = vrot.slane %v3370_v28, 4 }
 0x8c7   :  { %v3331_v18 = vpop.f32.mrf.mxu0  ;;  %v3372_v16 = vpop.f32.mrf.mxu1 }
 0x8c8   :  { %v3482_v11 = vadd.f32 %v3466_v46, %v10320_v39  ;;  %v6139_v20 = vmul.f32 -1.442695, %v3481_v56  ;;  %v6141_v3 = vmul.f32 -1.442695, %v3483_v44  ;;  %v3484_v59 = vadd.f32 %v3468_v48, %v10321_v24 }
 0x8c9   :  { %v3332_v25 = vpop.f32.mrf.mxu0  ;;  %v3373_v62 = vpop.f32.mrf.mxu1 }
 0x8ca   :  { %v6140_v37 = vmul.f32 -1.442695, %v3482_v11  ;;  %6709 = vpow2.f32 %v6139_v20  ;;  %v6142_v18 = vmul.f32 -1.442695, %v3484_v59  ;;  %v9639_v25 = vmov 0  }
 0x8cb   :  { %6711 = vpow2.f32 %v6141_v3  ;;  %6475 = vset.pattern.permute.xlu1 %v9639_v25  ;;  %6476 = vset.pattern.permute.xlu0 %v9639_v25 }
 0x8cc   :  { %6713 = vpow2.f32 %v6140_v37 }
 0x8cd   :  { %6715 = vpow2.f32 %v6142_v18 }
 0x8d7   :  { %v6710_v1 = vpop.eup %6709 }
 0x8d8   :  { %v6712_v31 = vpop.eup %6711  ;;  %v3495_v19 = vadd.f32 1.0, %v6710_v1 }
 0x8d9   :  { %v6714_v33 = vpop.eup %6713  ;;  %v3507_v46 = vadd.f32 1.0, %v6712_v31 }
 0x8da   :  { %v6716_v28 = vpop.eup %6715  ;;  %v3496_v44 = vadd.f32 1.0, %v6714_v33  ;;  %6717 = vrcp.f32 %v3495_v19 }
 0x8db   :  { %6719 = vrcp.f32 %v3507_v46  ;;  %v3508_v37 = vadd.f32 1.0, %v6716_v28 }
 0x8dc   :  { %6721 = vrcp.f32 %v3496_v44  ;;  %v3529_v44 = vrot.slane %v8606_v21, 6 }
 0x903   :  { %v3409_v16 = vpop.f32.mrf.mxu0  ;;  %v3450_v62 = vpop.f32.mrf.mxu1 }
 0x904   :  { %v3469_v20 = vrot.slane %v3409_v16, 4  ;;  %v3471_v36 = vrot.slane %v3450_v62, 4  ;;  %v6718_v62 = vpop.eup %6717 }
 0x905   :  { %v3411_v59 = vpop.f32.mrf.mxu0  ;;  %v3452_v56 = vpop.f32.mrf.mxu1 }
 0x906   :  { %v3485_v48 = vadd.f32 %v3469_v20, %v10226_v8  ;;  %v3487_v11 = vadd.f32 %v3471_v36, %v10227_v23  ;;  %v3470_v3 = vrot.slane %v3411_v59, 4  ;;  %v3472_v18 = vrot.slane %v3452_v56, 4  ;;  %v6720_v20 = vpop.eup %6719 }
 0x907   :  { %v3413_v1 = vpop.f32.mrf.mxu0  ;;  %v3454_v31 = vpop.f32.mrf.mxu1 }
 0x908   :  { %6723 = vtanh.f32 %v3485_v48  ;;  %v6143_v33 = vmul.f32 -1.442695, %v3487_v11  ;;  %v3486_v25 = vadd.f32 %v3470_v3, %v10228_v32  ;;  %v3488_v19 = vadd.f32 %v3472_v18, %v8448_v40  ;;  %v6722_v36 = vpop.eup %6721 }
 0x909   :  { %6725 = vrcp.f32 %v3508_v37  ;;  %v3414_v46 = vpop.f32.mrf.mxu0  ;;  %v3455_v28 = vpop.f32.mrf.mxu1  ;;  %v3533_v48 = vmul.f32 %v6720_v20, %v3529_v44  ;;  %v3530_v3 = vrot.slane %v8609_v43, 6 }
 0x90a   :  { %6727 = vpow2.f32 %v6143_v33  ;;  %v6144_v16 = vmul.f32 -1.442695, %v3488_v19 }
 0x90b   :  { %6729 = vtanh.f32 %v3486_v25 }
 0x90c   :  { %6731 = vpow2.f32 %v6144_v16 }
 0x915   :  { %v6724_v59 = vpop.eup %6723 }
 0x916   :  { %v6726_v56 = vpop.eup %6725  ;;  %v3535_v11 = vmul.f32 %v6724_v59, %v6718_v62 }
 0x917   :  { %v6728_v1 = vpop.eup %6727  ;;  %v3534_v19 = vmul.f32 %v6726_v56, %v3530_v3 }
 0x918   :  { %v6730_v18 = vpop.eup %6729  ;;  %v8758_v37 = vadd.f32 %v3535_v11, %v3533_v48  ;;  %v3521_v31 = vadd.f32 1.0, %v6728_v1 }
 0x919   :  { %v6732_v33 = vpop.eup %6731  ;;  %v3536_v25 = vmul.f32 %v6730_v18, %v6722_v36 }
 0x91a   :  { %6733 = vtanh.f32 %v8758_v37  ;;  %v3522_v46 = vadd.f32 1.0, %v6732_v33 }
 0x91b   :  { %6735 = vrcp.f32 %v3521_v31  ;;  %v8761_v28 = vadd.f32 %v3536_v25, %v3534_v19 }
 0x91c   :  { %6737 = vrcp.f32 %v3522_v46 }
 0x91d   :  { %6739 = vtanh.f32 %v8761_v28 }
 0x927   :  { %v6734_v21 = vpop.eup %6733 }
 0x928   :  { %v6736_v16 = vpop.eup %6735 }
 0x929   :  { %v6738_v62 = vpop.eup %6737  ;;  %v3541_v43 = vmul.f32 %v6736_v16, %v6734_v21 }
 0x92a   :  { %v6740_v20 = vpop.eup %6739 }
 0x92b   :  { %v3542_v44 = vmul.f32 %v6740_v20, %v6738_v62  ;;  %v3543_v59 = vpack.c.bf16 %v3541_v43, %v3541_v43 }
 0x92d   :  { %v3544_v48 = vpack.c.bf16 %v3542_v44, %v3542_v44  ;;  %v8764_v56 = vrot.slane %v3543_v59, 2 }
 0x92f   :  { %v3548_v11 = vrot.slane %v3544_v48, 2 }
 0x931   :  { %3583 = vmatprep.mubr.bf16.mxu0 %v3548_v11  ;;  %3624 = vmatprep.mubr.bf16.mxu1 %v3548_v11 }
 0x932   :  { %3584 = vmatmul.mubr.bf16.vlgmr.msra.gmra.mxu0 %v8764_v56  ;;  %3625 = vmatmul.mubr.bf16.vlgmr.msra.gmra.mxu1 %v8764_v56 }
 0x933   :  { %3634 = vmatpush1.bf16.msra.mxu0 %v9845_v61  ;;  %3675 = vmatpush1.bf16.msra.mxu1 %v9846_v34  ;;  %v10322_v61 = vld [vmem:[#allocation152_spill] sm:$0xff]  ;;  %v10323_v34 = vld [vmem:[#allocation153_spill] sm:$0xff] }
 0x934   :  { %3665 = vmatprep.mubr.bf16.mxu0 %v3548_v11  ;;  %3706 = vmatprep.mubr.bf16.mxu1 %v3548_v11 }
 0x935   :  { %3635 = vmatprep.subr.bf16.mxu0 %v9847_v22  ;;  %3676 = vmatprep.subr.bf16.mxu1 %v9848_v5  ;;  %v10324_v22 = vld [vmem:[#allocation154_spill] sm:$0xff]  ;;  %v10325_v5 = vld [vmem:[#allocation155_spill] sm:$0xff] }
 0x937   :  { %3636 = vmatpush1.bf16.msra.mxu0 %v9849_v42  ;;  %3677 = vmatpush1.bf16.msra.mxu1 %v9850_v13  ;;  %v10326_v42 = vld [vmem:[#allocation156_spill] sm:$0xff]  ;;  %v10327_v13 = vld [vmem:[#allocation157_spill] sm:$0xff] }
 0x938   :  { %3637 = vmatprep.subr.bf16.mxu0 %v9937_v38  ;;  %3678 = vmatprep.subr.bf16.mxu1 %v9938_v45  ;;  %v10328_v38 = vld [vmem:[#allocation158_spill] sm:$0xff]  ;;  %v10329_v45 = vld [vmem:[#allocation159_spill] sm:$0xff] }
 0x93b   :  { %3638 = vmatpush1.bf16.msra.mxu0 %v9939_v7  ;;  %3679 = vmatpush1.bf16.msra.mxu1 %v9940_v50  ;;  %v10330_v7 = vld [vmem:[#allocation160_spill] sm:$0xff]  ;;  %v10331_v50 = vld [vmem:[#allocation161_spill] sm:$0xff] }
 0x93c   :  { %3639 = vmatprep.subr.bf16.mxu0 %v9941_v54  ;;  %3680 = vmatprep.subr.bf16.mxu1 %v9942_v51  ;;  %v10332_v54 = vld [vmem:[#allocation162_spill] sm:$0xff]  ;;  %v10333_v51 = vld [vmem:[#allocation163_spill] sm:$0xff] }
 0x93f   :  { %3640 = vmatpush1.bf16.msra.mxu0 %v9943_v55  ;;  %3681 = vmatpush1.bf16.msra.mxu1 %v10030_v15  ;;  %v10334_v55 = vld [vmem:[#allocation164_spill] sm:$0xff] }
 0x940   :  { %3641 = vmatprep.subr.bf16.mxu0 %v10031_v2  ;;  %3682 = vmatprep.subr.bf16.mxu1 %v10032_v29  ;;  %v10342_v15 = vld [vmem:[#allocation172_spill] sm:$0xff]  ;;  %v3804_v2 = vld [vmem:[#allocation10] sm:$0xff]  ;;  %v10343_v29 = vld [vmem:[#allocation173_spill] sm:$0xff] }
 0x943   :  { %3642 = vmatpush1.bf16.msra.mxu0 %v10033_v9  ;;  %3683 = vmatpush1.bf16.msra.mxu1 %v10034_v4  ;;  %v10344_v9 = vld [vmem:[#allocation174_spill] sm:$0xff]  ;;  %v10345_v4 = vld [vmem:[#allocation175_spill] sm:$0xff] }
 0x944   :  { %3643 = vmatprep.subr.bf16.mxu0 %v10035_v49  ;;  %3684 = vmatprep.subr.bf16.mxu1 %v10036_v17  ;;  %v10346_v49 = vld [vmem:[#allocation176_spill] sm:$0xff]  ;;  %v6152_v17 = vcombine.high %v3804_v2, %v3804_v2 }
 0x947   :  { %3644 = vmatpush1.bf16.msra.mxu0 %v10037_v14  ;;  %3685 = vmatpush1.bf16.msra.mxu1 %v10038_v6  ;;  %v6151_v14 = vcombine.low %v3804_v2, %v3804_v2  ;;  %v10347_v6 = vld [vmem:[#allocation177_spill] sm:$0xff] }
 0x948   :  { %3645 = vmatprep.subr.bf16.mxu0 %v10039_v27  ;;  %3686 = vmatprep.subr.bf16.mxu1 %v10040_v35  ;;  %v10348_v27 = vld [vmem:[#allocation178_spill] sm:$0xff] }
 0x949   :  { %v3828_v35 = vsel %vm3826_vm0, %v6151_v14, 0 }
 0x94b   :  { %3646 = vmatpush1.bf16.msra.mxu0 %v10041_v47  ;;  %3687 = vmatpush1.bf16.msra.mxu1 %v10042_v58  ;;  %v10349_v47 = vmov 0   ;;  %v3801_v58 = vld [vmem:[%s10350_s7] sm:$0xff] }
 0x94c   :  { %3647 = vmatprep.subr.bf16.mxu0 %v9957_v41  ;;  %3688 = vmatprep.subr.bf16.mxu1 %v9958_v60  ;;  %v10335_v41 = vld [vmem:[#allocation165_spill] sm:$0xff]  ;;  %v10336_v60 = vld [vmem:[#allocation166_spill] sm:$0xff] }
 0x94f   :  { %3648 = vmatpush1.bf16.msra.mxu0 %v9959_v0  ;;  %3689 = vmatpush1.bf16.msra.mxu1 %v10043_v12  ;;  %v10337_v0 = vld [vmem:[#allocation167_spill] sm:$0xff] }
 0x950   :  { %3649 = vmatprep.subr.bf16.mxu0 %v10044_v10  ;;  %3690 = vmatprep.subr.bf16.mxu1 %v9962_v63  ;;  %v10338_v63 = vld [vmem:[#allocation168_spill] sm:$0xff]  ;;  %v3802_v12 = vld [vmem:[%s10350_s7 + $0x8] sm:$0xff]  ;;  %s10355_s7 = sld [smem:[#allocation183_spill]] }
 0x951   :  { %v3803_v10 = vpack.c.bf16 %v3802_v12, %v3801_v58 }
 0x953   :  { %3650 = vmatpush2.bf16.msra.mxu0 %v9963_v52  ;;  %3691 = vmatpush2.bf16.msra.mxu1 %v9964_v30  ;;  %v10339_v52 = vld [vmem:[#allocation169_spill] sm:$0xff]  ;;  %v10340_v30 = vld [vmem:[#allocation170_spill] sm:$0xff] }
 0x954   :  { %3651 = vmatprep.subr.bf16.mxu0 %v9965_v53  ;;  %3692 = vmatprep.subr.bf16.mxu1 %v10322_v61  ;;  %v10341_v53 = vld [vmem:[#allocation171_spill] sm:$0xff] }
 0x957   :  { %3652 = vmatpush2.bf16.msra.mxu0 %v10323_v34  ;;  %3693 = vmatpush2.bf16.msra.mxu1 %v10324_v22  ;;  %v3788_v34 = vrot.slane %v8761_v28, 6  ;;  %v3805_v28 = vld [vmem:[#allocation11] sm:$0x3] }
 0x958   :  { %3653 = vmatprep.subr.bf16.mxu0 %v10325_v5  ;;  %3694 = vmatprep.subr.bf16.mxu1 %v10326_v42 }
 0x95b   :  { %3654 = vmatpush2.bf16.msra.mxu0 %v10327_v13  ;;  %3695 = vmatpush2.bf16.msra.mxu1 %v10328_v38 }
 0x95c   :  { %3655 = vmatprep.subr.bf16.mxu0 %v10329_v45  ;;  %3696 = vmatprep.subr.bf16.mxu1 %v10330_v7 }
 0x95f   :  { %3656 = vmatpush2.bf16.msra.mxu0 %v10331_v50  ;;  %3697 = vmatpush2.bf16.msra.mxu1 %v10332_v54 }
 0x960   :  { %3657 = vmatprep.subr.bf16.mxu0 %v10333_v51  ;;  %3698 = vmatprep.subr.bf16.mxu1 %v10334_v55 }
 0x963   :  { %3658 = vmatpush2.bf16.msra.mxu0 %v10335_v41  ;;  %3699 = vmatpush2.bf16.msra.mxu1 %v10336_v60 }
 0x964   :  { %3659 = vmatprep.subr.bf16.mxu0 %v10337_v0  ;;  %3700 = vmatprep.subr.bf16.mxu1 %v10338_v63 }
 0x967   :  { %3660 = vmatpush2.bf16.msra.mxu0 %v10339_v52  ;;  %3701 = vmatpush2.bf16.msra.mxu1 %v10340_v30 }
 0x968   :  { %3661 = vmatprep.subr.bf16.mxu0 %v10341_v53  ;;  %3702 = vmatprep.subr.bf16.mxu1 %v10342_v15 }
 0x96b   :  { %3662 = vmatpush2.bf16.msra.mxu0 %v10343_v29  ;;  %3703 = vmatpush2.bf16.msra.mxu1 %v10344_v9  ;;  %v10351_v29 = vld [vmem:[#allocation98_spill] sm:$0xff] }
 0x96c   :  { %3663 = vmatprep.subr.bf16.mxu0 %v10345_v4  ;;  %3704 = vmatprep.subr.bf16.mxu1 %v10346_v49  ;;  %v10352_v9 = vsub.s32 0, %v10351_v29 }
 0x96e   :  { %v3810_v4 = vrot.slane %v3805_v28, %v10352_v9 }
 0x96f   :  { %3664 = vmatpush2.bf16.msra.mxu0 %v10347_v6  ;;  %3705 = vmatpush2.bf16.msra.mxu1 %v10348_v27 }
 0x970   :  { %6153 = vmatprep.subr.msk.bf16.mxu0 %vm3826_vm0, %v6152_v17 }
 0x972   :  { %3666 = vmatmul.mubr.bf16.vlgmr.msra.gmra.mxu0 %v8764_v56  ;;  %3707 = vmatmul.mubr.bf16.vlgmr.msra.gmra.mxu1 %v8764_v56  ;;  %v3787_v56 = vrot.slane %v8758_v37, 6 }
 0x973   :  { %3848 = vmatpush1.bf16.msra.mxu0 %v3828_v35  ;;  %3865 = vmatprep.mubr.bf16.mxu0 %v10349_v47 }
 0x974   :  { %3984 = vmatprep.mubr.bf16.mxu1 %v10349_v47 }
 0x97a   :  { %6154 = vmatmul.mubr.msk.bf16.vlgmr.msra.gmra.mxu0 %vm3822_vm1, %v3803_v10 }
 0x97b   :  { %4068 = vmatprep.mubr.bf16.mxu0 %v10349_v47 }
 0x9f2   :  { %v3585_v36 = vpop.f32.mrf.mxu0  ;;  %v3626_v1 = vpop.f32.mrf.mxu1 }
 0x9f3   :  { %v3725_v3 = vrot.slane %v3626_v1, 2 }
 0x9f4   :  { %v3587_v18 = vpop.f32.mrf.mxu0  ;;  %v3628_v31 = vpop.f32.mrf.mxu1 }
 0x9f5   :  { %v3741_v33 = vadd.f32 %v3725_v3, %v10319_v57  ;;  %v3726_v19 = vrot.slane %v3628_v31, 2  ;;  %v3723_v57 = vrot.slane %v3585_v36, 2  ;;  %v3724_v22 = vrot.slane %v3587_v18, 2 }
 0x9f6   :  { %v3589_v25 = vpop.f32.mrf.mxu0  ;;  %v3630_v46 = vpop.f32.mrf.mxu1  ;;  %v10353_v31 = vsub.s32 1, %v10351_v29 }
 0x9f7   :  { %v6147_v21 = vmul.f32 -1.442695, %v3741_v33  ;;  %v3742_v16 = vadd.f32 %v3726_v19, %v10321_v24  ;;  %v3739_v42 = vadd.f32 %v3723_v57, %v10223_v26  ;;  %v3740_v38 = vadd.f32 %v3724_v22, %v10320_v39 }
 0x9f8   :  { %v3590_v62 = vpop.f32.mrf.mxu0  ;;  %v3631_v43 = vpop.f32.mrf.mxu1  ;;  %v8860_v33 = vrot.slane %v3805_v28, %v10353_v31 }
 0x9f9   :  { %v6148_v20 = vmul.f32 -1.442695, %v3742_v16  ;;  %6741 = vpow2.f32 %v6147_v21  ;;  %v6145_v45 = vmul.f32 -1.442695, %v3739_v42  ;;  %v6146_v7 = vmul.f32 -1.442695, %v3740_v38 }
 0x9fa   :  { %v8879_v38 = vld [vmem:[%s10354_s8 + $0x30] ss:$8 sps:$4 sm:$0xff]  }
 0x9fb   :  { %6743 = vpow2.f32 %v6148_v20 }
 0xa06   :  { %v6742_v44 = vpop.eup %6741 }
 0xa07   :  { %v3765_v59 = vadd.f32 1.0, %v6742_v44 }
 0xa08   :  { %v6744_v48 = vpop.eup %6743 }
 0xa09   :  { %6745 = vrcp.f32 %v3765_v59  ;;  %v3766_v11 = vadd.f32 1.0, %v6744_v48 }
 0xa0b   :  { %6747 = vrcp.f32 %v3766_v11 }
 0xa0c   :  { %6749 = vpow2.f32 %v6145_v45  ;;  %v8884_v45 = vld [vmem:[%s10354_s8 + $0x24] ss:$8 sps:$4 sm:$0xff]  }
 0xa0d   :  { %6751 = vpow2.f32 %v6146_v7  ;;  %v8892_v7 = vld [vmem:[%s10354_s8 + $0x20] ss:$8 sps:$4 sm:$0xff]  }
 0xa16   :  { %v6746_v61 = vpop.eup %6745 }
 0xa17   :  { %v3791_v5 = vmul.f32 %v6746_v61, %v3787_v56 }
 0xa18   :  { %v6748_v24 = vpop.eup %6747 }
 0xa19   :  { %v3792_v13 = vmul.f32 %v6748_v24, %v3788_v34  ;;  %v6750_v50 = vpop.eup %6749 }
 0xa1a   :  { %v6752_v54 = vpop.eup %6751  ;;  %v3753_v51 = vadd.f32 1.0, %v6750_v50  ;;  %v8899_v50 = vld [vmem:[%s10354_s8 + $0x14] ss:$8 sps:$4 sm:$0xff]  }
 0xa1b   :  { %v3754_v0 = vadd.f32 1.0, %v6752_v54  ;;  %v8906_v54 = vld [vmem:[%s10354_s8 + $0x10] ss:$8 sps:$4 sm:$0xff]  }
 0xa1c   :  { %6753 = vrcp.f32 %v3753_v51 }
 0xa32   :  { %v3667_v37 = vpop.f32.mrf.mxu0  ;;  %v3708_v55 = vpop.f32.mrf.mxu1 }
 0xa33   :  { %v3727_v41 = vrot.slane %v3667_v37, 2  ;;  %v3729_v60 = vrot.slane %v3708_v55, 2  ;;  %v8913_v37 = vld [vmem:[%s10354_s8 + $0x4] ss:$8 sps:$4 sm:$0xff]   ;;  %v8921_v55 = vld [vmem:[%s10354_s8] ss:$8 sps:$4 sm:$0xff]  }
 0xa34   :  { %v3669_v63 = vpop.f32.mrf.mxu0  ;;  %v3710_v52 = vpop.f32.mrf.mxu1 }
 0xa35   :  { %v3743_v26 = vadd.f32 %v3727_v41, %v10226_v8  ;;  %v3745_v30 = vadd.f32 %v3729_v60, %v10227_v23  ;;  %v3728_v39 = vrot.slane %v3669_v63, 2  ;;  %v3730_v53 = vrot.slane %v3710_v52, 2 }
 0xa36   :  { %v3671_v15 = vpop.f32.mrf.mxu0  ;;  %v3712_v2 = vpop.f32.mrf.mxu1 }
 0xa37   :  { %6755 = vtanh.f32 %v3743_v26  ;;  %v6149_v49 = vmul.f32 -1.442695, %v3745_v30  ;;  %v3744_v17 = vadd.f32 %v3728_v39, %v10228_v32  ;;  %v3746_v14 = vadd.f32 %v3730_v53, %v8448_v40  ;;  %v6754_v32 = vpop.eup %6753 }
 0xa38   :  { %6757 = vrcp.f32 %v3754_v0  ;;  %v3672_v6 = vpop.f32.mrf.mxu0  ;;  %v3713_v27 = vpop.f32.mrf.mxu1 }
 0xa39   :  { %6759 = vpow2.f32 %v6149_v49  ;;  %v6150_v8 = vmul.f32 -1.442695, %v3746_v14 }
 0xa3a   :  { %6761 = vtanh.f32 %v3744_v17  ;;  %v3867_v23 = vpop.f32.mrf.mxu0 }
 0xa3b   :  { %6763 = vpow2.f32 %v6150_v8  ;;  %v8853_v35 = vadd.f32 %v3867_v23, %v3810_v4 }
 0xa3c   :  { %v3869_v58 = vpop.f32.mrf.mxu0 }
 0xa3d   :  { %v6155_v12 = vmul.f32 -1.442695, %v8853_v35  ;;  %v8863_v20 = vadd.f32 %v3869_v58, %v8860_v33 }
 0xa3e   :  { %v3871_v10 = vpop.f32.mrf.mxu0 }
 0xa3f   :  { %6765 = vpow2.f32 %v6155_v12  ;;  %v8856_v36 = vadd.f32 %v3871_v10, %v3810_v4  ;;  %v6156_v41 = vmul.f32 -1.442695, %v8863_v20 }
 0xa44   :  { %v6756_v1 = vpop.eup %6755 }
 0xa45   :  { %v6758_v40 = vpop.eup %6757  ;;  %v3793_v3 = vmul.f32 %v6756_v1, %v6754_v32 }
 0xa46   :  { %v6760_v18 = vpop.eup %6759 }
 0xa47   :  { %v6762_v19 = vpop.eup %6761  ;;  %v3795_v25 = vadd.f32 %v3793_v3, %v3791_v5  ;;  %v3779_v46 = vadd.f32 1.0, %v6760_v18 }
 0xa48   :  { %v6764_v21 = vpop.eup %6763  ;;  %v3794_v16 = vmul.f32 %v6762_v19, %v6758_v40 }
 0xa49   :  { %6767 = vtanh.f32 %v3795_v25  ;;  %v3780_v62 = vadd.f32 1.0, %v6764_v21 }
 0xa4a   :  { %6769 = vrcp.f32 %v3779_v46  ;;  %v3796_v43 = vadd.f32 %v3794_v16, %v3792_v13  ;;  %v8874_v13 = vld [vmem:[%s10354_s8 + $0x34] ss:$8 sps:$4 sm:$0xff]   ;;  %v8956_v16 = vpop.f32.mrf.mxu0  ;;  %s7233_s8 = smov 80  }
 0xa4b   :  { %6771 = vrcp.f32 %v3780_v62  ;;  %3960 = vmatprep.subr.bf16.mxu1 %v8874_v13  ;;  %4044 = vmatprep.subr.bf16.mxu0 %v8874_v13 }
 0xa4c   :  { %v6766_v44 = vpop.eup %6765  ;;  %6773 = vtanh.f32 %v3796_v43  ;;  %3961 = vmatpush1.bf16.msra.mxu1 %v8879_v38  ;;  %4045 = vmatpush1.bf16.msra.mxu0 %v8879_v38 }
 0xa4d   :  { %v3879_v59 = vadd.f32 1.0, %v6766_v44  ;;  %6775 = vtanh.f32 %v8863_v20  ;;  %3962 = vmatprep.subr.bf16.mxu1 %v8884_v45  ;;  %4046 = vmatprep.subr.bf16.mxu0 %v8884_v45 }
 0xa4f   :  { %6777 = vrcp.f32 %v3879_v59 }
 0xa50   :  { %3963 = vmatpush1.bf16.msra.mxu1 %v8892_v7  ;;  %4047 = vmatpush1.bf16.msra.mxu0 %v8892_v7 }
 0xa51   :  { %3964 = vmatprep.subr.bf16.mxu1 %v8899_v50  ;;  %4048 = vmatprep.subr.bf16.mxu0 %v8899_v50 }
 0xa54   :  { %3965 = vmatpush1.bf16.msra.mxu1 %v8906_v54  ;;  %4049 = vmatpush1.bf16.msra.mxu0 %v8906_v54 }
 0xa55   :  { %3966 = vmatprep.subr.bf16.mxu1 %v8913_v37  ;;  %4050 = vmatprep.subr.bf16.mxu0 %v8913_v37 }
 0xa56   :  { %v6768_v48 = vpop.eup %6767 }
 0xa57   :  { %v6770_v11 = vpop.eup %6769 }
 0xa58   :  { %v6772_v56 = vpop.eup %6771  ;;  %v8866_v57 = vmul.f32 %v6770_v11, %v6768_v48  ;;  %3967 = vmatpush1.bf16.msra.mxu1 %v8921_v55  ;;  %4051 = vmatpush1.bf16.msra.mxu0 %v8921_v55 }
 0xa59   :  { %v6774_v61 = vpop.eup %6773  ;;  %4126 = vmatprep.subr.bf16.mxu1 %v8874_v13  ;;  %4208 = vmatprep.subr.bf16.mxu0 %v8874_v13 }
 0xa5a   :  { %v8868_v34 = vmul.f32 %v6774_v61, %v6772_v56  ;;  %v6776_v22 = vpop.eup %6775 }
 0xa5c   :  { %v6778_v5 = vpop.eup %6777 }
 0xa5d   :  { %v3889_v24 = vmul.f32 %v6778_v5, %v6776_v22 }
 0xa5f   :  { %v4015_v42 = vrot.slane %v3889_v24, 6  ;;  %6779 = vtanh.f32 %v3889_v24 }
 0xa60   :  { %6781 = vpow2.f32 %v6156_v41 }
 0xa61   :  { %4016 = vrot.lane.b32.xlu1 %v4015_v42, %s7217_s27 }
 0xa6c   :  { %v6780_v51 = vpop.eup %6779 }
 0xa6d   :  { %3892 = vrot.lane.b32.xlu0 %v6780_v51, %s7217_s27  ;;  %v6782_v60 = vpop.eup %6781 }
 0xa6e   :  { %v3886_v28 = vadd.f32 1.0, %v6782_v60 }
 0xa70   :  { %6783 = vrcp.f32 %v3886_v28 }
 0xa7d   :  { %v6784_v0 = vpop.eup %6783 }
 0xad3   :  { %v4017_v10 = vpop.permute.xlu1 %4016 }
 0xadf   :  { %v3893_v63 = vpop.permute.xlu0 %3892 }
 0xae0   :  { %v3895_v52 = vmul.f32 %v6784_v0, %v3893_v63 }
 0xae2   :  { %v3896_v26 = vpack.c.bf16 %v3895_v52, %v3895_v52 }
 0xae4   :  { %3906 = vrot.lane.b32.xlu0 %v3896_v26, %s7217_s27 }
 0xb56   :  { %v3907_v30 = vpop.permute.xlu0 %3906 }
 0xb57   :  { %6165 = vmatmul.mubr.msk.bf16.vlgmr.msra.gmra.mxu1 %vm3948_vm2, %v3907_v30 }
 0xb58   :  { %4127 = vmatpush1.bf16.msra.mxu1 %v8879_v38  ;;  %4150 = vmatprep.mubr.bf16.mxu1 %v10349_v47 }
 0xb59   :  { %4128 = vmatprep.subr.bf16.mxu1 %v8884_v45 }
 0xb5c   :  { %4129 = vmatpush1.bf16.msra.mxu1 %v8892_v7 }
 0xb5d   :  { %4130 = vmatprep.subr.bf16.mxu1 %v8899_v50 }
 0xb60   :  { %4131 = vmatpush1.bf16.msra.mxu1 %v8906_v54 }
 0xb61   :  { %4132 = vmatprep.subr.bf16.mxu1 %v8913_v37 }
 0xb64   :  { %4133 = vmatpush1.bf16.msra.mxu1 %v8921_v55 }
 0xb65   :  { %4283 = vmatprep.subr.bf16.mxu1 %v8874_v13 }
 0xc17   :  { %v3986_v39 = vpop.f32.mrf.mxu1 }
 0xc18   :  { %v3995_v53 = vrot.slane %v3986_v39, 6 }
 0xc19   :  { %v3988_v15 = vpop.f32.mrf.mxu1 }
 0xc1a   :  { %v3999_v2 = vadd.f32 %v3995_v53, %v8853_v35  ;;  %v3996_v49 = vrot.slane %v3988_v15, 6 }
 0xc1b   :  { %v3990_v29 = vpop.f32.mrf.mxu1 }
 0xc1c   :  { %v6166_v9 = vmul.f32 -1.442695, %v3999_v2  ;;  %v4000_v17 = vadd.f32 %v3996_v49, %v8863_v20 }
 0xc1d   :  { %v3991_v4 = vpop.f32.mrf.mxu1 }
 0xc1e   :  { %6785 = vpow2.f32 %v6166_v9  ;;  %v6167_v58 = vmul.f32 -1.442695, %v4000_v17 }
 0xc1f   :  { %6787 = vtanh.f32 %v4000_v17 }
 0xc2b   :  { %v6786_v14 = vpop.eup %6785 }
 0xc2c   :  { %v4004_v6 = vadd.f32 1.0, %v6786_v14  ;;  %v6788_v27 = vpop.eup %6787 }
 0xc2e   :  { %6789 = vrcp.f32 %v4004_v6 }
 0xc2f   :  { %6791 = vpow2.f32 %v6167_v58 }
 0xc3b   :  { %v6790_v8 = vpop.eup %6789 }
 0xc3c   :  { %v4020_v23 = vmul.f32 %v6790_v8, %v6788_v27  ;;  %v6792_v12 = vpop.eup %6791  ;;  %v4019_v1 = vmul.f32 %v6790_v8, %v4017_v10 }
 0xc3d   :  { %v4011_v32 = vadd.f32 1.0, %v6792_v12 }
 0xc3e   :  { %4022 = vrot.lane.b32.xlu1 %v4020_v23, %s7217_s27 }
 0xc3f   :  { %6793 = vrcp.f32 %v4011_v32 }
 0xc4c   :  { %v6794_v18 = vpop.eup %6793 }
 0xcb0   :  { %v4023_v40 = vpop.permute.xlu1 %4022 }
 0xcb1   :  { %v4025_v3 = vadd.f32 %v4023_v40, %v4019_v1 }
 0xcb3   :  { %6795 = vtanh.f32 %v4025_v3  ;;  %v4099_v51 = vrot.slane %v4025_v3, 6 }
 0xcc0   :  { %v6796_v31 = vpop.eup %6795 }
 0xcc1   :  { %v4027_v19 = vmul.f32 %v6796_v31, %v6794_v18 }
 0xcc3   :  { %v4028_v25 = vpack.c.bf16 %v4027_v19, %v4027_v19 }
 0xcc5   :  { %v4030_v46 = vrot.slane %v4028_v25, 1 }
 0xcc7   :  { %4031 = vrot.lane.b32.xlu0 %v4030_v46, %s7217_s27 }
 0xd39   :  { %v4032_v21 = vpop.permute.xlu0 %4031 }
 0xd3a   :  { %6168 = vmatmul.mubr.msk.bf16.vlgmr.msra.gmra.mxu0 %vm3948_vm2, %v4032_v21 }
 0xd3b   :  { %4209 = vmatpush1.bf16.msra.mxu0 %v8879_v38  ;;  %4232 = vmatprep.mubr.bf16.mxu0 %v10349_v47 }
 0xd3c   :  { %4210 = vmatprep.subr.bf16.mxu0 %v8884_v45 }
 0xd3f   :  { %4211 = vmatpush1.bf16.msra.mxu0 %v8892_v7 }
 0xd40   :  { %4212 = vmatprep.subr.bf16.mxu0 %v8899_v50 }
 0xd43   :  { %4213 = vmatpush1.bf16.msra.mxu0 %v8906_v54 }
 0xd44   :  { %4214 = vmatprep.subr.bf16.mxu0 %v8913_v37 }
 0xd47   :  { %4215 = vmatpush1.bf16.msra.mxu0 %v8921_v55 }
 0xd48   :  { %4365 = vmatprep.subr.bf16.mxu0 %v8874_v13 }
 0xdfa   :  { %v4070_v62 = vpop.f32.mrf.mxu0 }
 0xdfb   :  { %v4079_v43 = vrot.slane %v4070_v62, 4 }
 0xdfc   :  { %v4072_v44 = vpop.f32.mrf.mxu0 }
 0xdfd   :  { %v4083_v59 = vadd.f32 %v4079_v43, %v8853_v35  ;;  %v4080_v61 = vrot.slane %v4072_v44, 4 }
 0xdfe   :  { %v4074_v48 = vpop.f32.mrf.mxu0 }
 0xdff   :  { %v6169_v11 = vmul.f32 -1.442695, %v4083_v59  ;;  %v4084_v22 = vadd.f32 %v4080_v61, %v8863_v20 }
 0xe00   :  { %v4075_v56 = vpop.f32.mrf.mxu0 }
 0xe01   :  { %6797 = vpow2.f32 %v6169_v11  ;;  %v6170_v0 = vmul.f32 -1.442695, %v4084_v22 }
 0xe02   :  { %6799 = vtanh.f32 %v4084_v22 }
 0xe0e   :  { %v6798_v5 = vpop.eup %6797 }
 0xe0f   :  { %v4088_v24 = vadd.f32 1.0, %v6798_v5  ;;  %v6800_v42 = vpop.eup %6799  ;;  %v8988_v5 = vadd.f32 %v8956_v16, %v8860_v33 }
 0xe11   :  { %6801 = vrcp.f32 %v4088_v24 }
 0xe12   :  { %6803 = vpow2.f32 %v6170_v0 }
 0xe1e   :  { %v6802_v41 = vpop.eup %6801 }
 0xe1f   :  { %v4102_v60 = vmul.f32 %v6802_v41, %v6800_v42  ;;  %v4101_v28 = vmul.f32 %v6802_v41, %v4099_v51  ;;  %v6804_v63 = vpop.eup %6803 }
 0xe20   :  { %v4095_v52 = vadd.f32 1.0, %v6804_v63 }
 0xe21   :  { %4104 = vrot.lane.b32.xlu1 %v4102_v60, %s7217_s27 }
 0xe22   :  { %6805 = vrcp.f32 %v4095_v52 }
 0xe2f   :  { %v6806_v39 = vpop.eup %6805 }
 0xe93   :  { %v4105_v26 = vpop.permute.xlu1 %4104 }
 0xe94   :  { %v4107_v30 = vadd.f32 %v4105_v26, %v4101_v28 }
 0xe96   :  { %6807 = vtanh.f32 %v4107_v30  ;;  %v4181_v1 = vrot.slane %v4107_v30, 6 }
 0xea3   :  { %v6808_v53 = vpop.eup %6807 }
 0xea4   :  { %v4109_v15 = vmul.f32 %v6808_v53, %v6806_v39 }
 0xea6   :  { %v4110_v2 = vpack.c.bf16 %v4109_v15, %v4109_v15 }
 0xea8   :  { %v4112_v29 = vrot.slane %v4110_v2, 2 }
 0xeaa   :  { %4113 = vrot.lane.b32.xlu0 %v4112_v29, %s7217_s27 }
 0xf1c   :  { %v4114_v9 = vpop.permute.xlu0 %4113 }
 0xf1d   :  { %6171 = vmatmul.mubr.msk.bf16.vlgmr.msra.gmra.mxu1 %vm3948_vm2, %v4114_v9 }
 0xf1e   :  { %4284 = vmatpush1.bf16.msra.mxu1 %v8879_v38  ;;  %4307 = vmatprep.mubr.bf16.mxu1 %v10349_v47 }
 0xf1f   :  { %4285 = vmatprep.subr.bf16.mxu1 %v8884_v45 }
 0xf22   :  { %4286 = vmatpush1.bf16.msra.mxu1 %v8892_v7 }
 0xf23   :  { %4287 = vmatprep.subr.bf16.mxu1 %v8899_v50 }
 0xf26   :  { %4288 = vmatpush1.bf16.msra.mxu1 %v8906_v54 }
 0xf27   :  { %4289 = vmatprep.subr.bf16.mxu1 %v8913_v37 }
 0xf2a   :  { %4290 = vmatpush1.bf16.msra.mxu1 %v8921_v55 }
 0xf2b   :  { %4447 = vmatprep.subr.bf16.mxu1 %v8874_v13 }
 0xfdd   :  { %v4152_v4 = vpop.f32.mrf.mxu1 }
 0xfde   :  { %v4161_v49 = vrot.slane %v4152_v4, 2 }
 0xfdf   :  { %v4154_v17 = vpop.f32.mrf.mxu1 }
 0xfe0   :  { %v4165_v14 = vadd.f32 %v4161_v49, %v8853_v35  ;;  %v4162_v23 = vrot.slane %v4154_v17, 2 }
 0xfe1   :  { %v4156_v6 = vpop.f32.mrf.mxu1 }
 0xfe2   :  { %v6172_v27 = vmul.f32 -1.442695, %v4165_v14  ;;  %v4166_v58 = vadd.f32 %v4162_v23, %v8863_v20 }
 0xfe3   :  { %v4157_v8 = vpop.f32.mrf.mxu1 }
 0xfe4   :  { %6809 = vpow2.f32 %v6172_v27  ;;  %v6173_v18 = vmul.f32 -1.442695, %v4166_v58 }
 0xfe5   :  { %6811 = vtanh.f32 %v4166_v58 }
 0xff1   :  { %v6810_v12 = vpop.eup %6809 }
 0xff2   :  { %v4170_v10 = vadd.f32 1.0, %v6810_v12  ;;  %v6812_v32 = vpop.eup %6811 }
 0xff4   :  { %6813 = vrcp.f32 %v4170_v10 }
 0xff5   :  { %6815 = vpow2.f32 %v6173_v18 }
0x1001   :  { %v6814_v40 = vpop.eup %6813 }
0x1002   :  { %v4184_v13 = vmul.f32 %v6814_v40, %v6812_v32  ;;  %v4183_v3 = vmul.f32 %v6814_v40, %v4181_v1  ;;  %v6816_v35 = vpop.eup %6815  ;;  %v7229_v1 = vmov 0.0  }
0x1003   :  { %v4177_v31 = vadd.f32 1.0, %v6816_v35 }
0x1004   :  { %4186 = vrot.lane.b32.xlu1 %v4184_v13, %s7217_s27 }
0x1005   :  { %6817 = vrcp.f32 %v4177_v31  ;;  %v4516_v31 = vld [vmem:[#allocation13] sm:$0x3] }
0x1012   :  { %v6818_v20 = vpop.eup %6817 }
0x1076   :  { %v4187_v19 = vpop.permute.xlu1 %4186 }
0x1077   :  { %v4189_v25 = vadd.f32 %v4187_v19, %v4183_v3  ;;  %v4530_v19 = vsel %vm4528_vm3, %v4516_v31, 0 }
0x1079   :  { %6819 = vtanh.f32 %v4189_v25  ;;  %v4257_v60 = vrot.slane %v4189_v25, 6 }
0x1086   :  { %v6820_v46 = vpop.eup %6819 }
0x1087   :  { %v4191_v21 = vmul.f32 %v6820_v46, %v6818_v20  ;;  %v4513_v20 = vld [vmem:[%s10355_s7] sm:$0xff]  ;;  %v4514_v46 = vld [vmem:[%s10355_s7 + $0x8] sm:$0xff] }
0x1089   :  { %v4192_v62 = vpack.c.bf16 %v4191_v21, %v4191_v21  ;;  %v4515_v21 = vpack.c.bf16 %v4514_v46, %v4513_v20 }
0x108b   :  { %v4194_v43 = vrot.slane %v4192_v62, 3 }
0x108d   :  { %4195 = vrot.lane.b32.xlu0 %v4194_v43, %s7217_s27 }
0x10ff   :  { %v4196_v44 = vpop.permute.xlu0 %4195 }
0x1100   :  { %6174 = vmatmul.mubr.msk.bf16.vlgmr.msra.gmra.mxu0 %vm3948_vm2, %v4196_v44 }
0x1101   :  { %4366 = vmatpush1.bf16.msra.mxu0 %v8879_v38  ;;  %4389 = vmatprep.mubr.bf16.mxu0 %v10349_v47 }
0x1102   :  { %4367 = vmatprep.subr.bf16.mxu0 %v8884_v45 }
0x1105   :  { %4368 = vmatpush1.bf16.msra.mxu0 %v8892_v7 }
0x1106   :  { %4369 = vmatprep.subr.bf16.mxu0 %v8899_v50 }
0x1109   :  { %4370 = vmatpush1.bf16.msra.mxu0 %v8906_v54 }
0x110a   :  { %4371 = vmatprep.subr.bf16.mxu0 %v8913_v37 }
0x110d   :  { %4372 = vmatpush1.bf16.msra.mxu0 %v8921_v55 }
0x110e   :  { %6321 = vmatprep.subr.bf16.mxu0 %v7229_v1 }
0x11c0   :  { %v4234_v59 = vpop.f32.mrf.mxu0 }
0x11c1   :  { %v4241_v48 = vadd.f32 %v4234_v59, %v8856_v36 }
0x11c2   :  { %v4236_v11 = vpop.f32.mrf.mxu0 }
0x11c3   :  { %v6175_v56 = vmul.f32 -1.442695, %v4241_v48  ;;  %v4242_v24 = vadd.f32 %v4236_v11, %v8988_v5 }
0x11c4   :  { %v4238_v61 = vpop.f32.mrf.mxu0 }
0x11c5   :  { %6821 = vpow2.f32 %v6175_v56  ;;  %v6176_v52 = vmul.f32 -1.442695, %v4242_v24  ;;  %v6186_v61 = vld [vmem:[#allocation16] ss:$0 sm:$0xff] }
0x11c6   :  { %v4239_v22 = vpop.f32.mrf.mxu0  ;;  %6823 = vtanh.f32 %v4242_v24 }
0x11d2   :  { %v6822_v42 = vpop.eup %6821 }
0x11d3   :  { %v4246_v51 = vadd.f32 1.0, %v6822_v42  ;;  %v6824_v41 = vpop.eup %6823 }
0x11d5   :  { %6825 = vrcp.f32 %v4246_v51 }
0x11d6   :  { %6827 = vpow2.f32 %v6176_v52 }
0x11e2   :  { %v6826_v28 = vpop.eup %6825 }
0x11e3   :  { %v4260_v0 = vmul.f32 %v6826_v28, %v6824_v41  ;;  %v4259_v63 = vmul.f32 %v6826_v28, %v4257_v60  ;;  %v6828_v26 = vpop.eup %6827 }
0x11e4   :  { %v4253_v30 = vadd.f32 1.0, %v6828_v26 }
0x11e5   :  { %4262 = vrot.lane.b32.xlu1 %v4260_v0, %s7217_s27 }
0x11e6   :  { %6829 = vrcp.f32 %v4253_v30 }
0x11f3   :  { %v6830_v16 = vpop.eup %6829 }
0x1257   :  { %v4263_v39 = vpop.permute.xlu1 %4262 }
0x1258   :  { %v4265_v33 = vadd.f32 %v4263_v39, %v4259_v63 }
0x125a   :  { %6831 = vtanh.f32 %v4265_v33 }
0x1267   :  { %v6832_v53 = vpop.eup %6831 }
0x1268   :  { %v4267_v15 = vmul.f32 %v6832_v53, %v6830_v16 }
0x126a   :  { %v4268_v2 = vpack.c.bf16 %v4267_v15, %v4267_v15 }
0x126c   :  { %4270 = vrot.lane.b32.xlu0 %v4268_v2, %s7217_s27 }
0x12de   :  { %v4271_v29 = vpop.permute.xlu0 %4270 }
0x12df   :  { %6177 = vmatmul.mubr.msk.bf16.vlgmr.msra.gmra.mxu1 %vm3948_vm2, %v4271_v29 }
0x12e0   :  { %4448 = vmatpush1.bf16.msra.mxu1 %v8879_v38  ;;  %4471 = vmatprep.mubr.bf16.mxu1 %v10349_v47 }
0x12e1   :  { %4449 = vmatprep.subr.bf16.mxu1 %v8884_v45 }
0x12e4   :  { %4450 = vmatpush1.bf16.msra.mxu1 %v8892_v7 }
0x12e5   :  { %4451 = vmatprep.subr.bf16.mxu1 %v8899_v50 }
0x12e8   :  { %4452 = vmatpush1.bf16.msra.mxu1 %v8906_v54 }
0x12e9   :  { %4453 = vmatprep.subr.bf16.mxu1 %v8913_v37  ;;  %v4338_v37 = vrot.slane %v4265_v33, 6 }
0x12ec   :  { %4454 = vmatpush1.bf16.msra.mxu1 %v8921_v55 }
0x12ed   :  { %6345 = vmatprep.subr.bf16.mxu1 %v7229_v1 }
0x139f   :  { %v4309_v9 = vpop.f32.mrf.mxu1 }
0x13a0   :  { %v4318_v4 = vrot.slane %v4309_v9, 6 }
0x13a1   :  { %v4311_v49 = vpop.f32.mrf.mxu1 }
0x13a2   :  { %v4322_v17 = vadd.f32 %v4318_v4, %v8856_v36  ;;  %v4319_v45 = vrot.slane %v4311_v49, 6 }
0x13a3   :  { %v4313_v38 = vpop.f32.mrf.mxu1 }
0x13a4   :  { %v6178_v14 = vmul.f32 -1.442695, %v4322_v17  ;;  %v4323_v7 = vadd.f32 %v4319_v45, %v8988_v5  ;;  %v9037_v17 = vld [vmem:[#allocation14] sm:$0xff]  }
0x13a5   :  { %v4314_v47 = vpop.f32.mrf.mxu1 }
0x13a6   :  { %6833 = vpow2.f32 %v6178_v14  ;;  %v6179_v23 = vmul.f32 -1.442695, %v4323_v7 }
0x13a7   :  { %6835 = vtanh.f32 %v4323_v7 }
0x13b3   :  { %v6834_v6 = vpop.eup %6833 }
0x13b4   :  { %v4327_v50 = vadd.f32 1.0, %v6834_v6  ;;  %v6836_v54 = vpop.eup %6835 }
0x13b6   :  { %6837 = vrcp.f32 %v4327_v50 }
0x13b7   :  { %6839 = vpow2.f32 %v6179_v23 }
0x13c3   :  { %v6838_v27 = vpop.eup %6837 }
0x13c4   :  { %v4341_v55 = vmul.f32 %v6838_v27, %v6836_v54  ;;  %v4340_v8 = vmul.f32 %v6838_v27, %v4338_v37  ;;  %v6840_v58 = vpop.eup %6839 }
0x13c5   :  { %v4334_v12 = vadd.f32 1.0, %v6840_v58 }
0x13c6   :  { %4343 = vrot.lane.b32.xlu1 %v4341_v55, %s7217_s27 }
0x13c7   :  { %6841 = vrcp.f32 %v4334_v12 }
0x13d4   :  { %v6842_v40 = vpop.eup %6841 }
0x1438   :  { %v4344_v10 = vpop.permute.xlu1 %4343 }
0x1439   :  { %v4346_v32 = vadd.f32 %v4344_v10, %v4340_v8 }
0x143b   :  { %6843 = vtanh.f32 %v4346_v32  ;;  %v4420_v39 = vrot.slane %v4346_v32, 6 }
0x1448   :  { %v6844_v13 = vpop.eup %6843 }
0x1449   :  { %v4348_v3 = vmul.f32 %v6844_v13, %v6842_v40 }
0x144b   :  { %v4349_v18 = vpack.c.bf16 %v4348_v3, %v4348_v3 }
0x144d   :  { %v4351_v35 = vrot.slane %v4349_v18, 1 }
0x144f   :  { %4352 = vrot.lane.b32.xlu0 %v4351_v35, %s7217_s27 }
0x14c1   :  { %v4353_v25 = vpop.permute.xlu0 %4352 }
0x14c2   :  { %6180 = vmatmul.mubr.msk.bf16.vlgmr.msra.gmra.mxu0 %vm3948_vm2, %v4353_v25 }
0x14c3   :  { %6322 = vmatpush3.bf16.msra.mxu0 %v4530_v19  ;;  %6323 = vmatprep.mubr.msk.bf16.mxu0 %vm7230_vm4, %v7229_v1 }
0x14c4   :  { %6327 = vmatprep.subr.bf16.mxu0 %v7229_v1 }
0x14ca   :  { %6324 = vmatmul.mubr.msk.bf16.vlgmr.msra.gmra.mxu0 %vm4524_vm5, %v4515_v21 }
0x14cb   :  { %6329 = vmatprep.mubr.msk.bf16.mxu0 %vm7230_vm4, %v7229_v1  ;;  %6328 = vmatpush3.bf16.msra.mxu0 %v9037_v17 }
0x14cc   :  { %6333 = vmatprep.subr.bf16.mxu0 %v7229_v1 }
0x1582   :  { %v4391_v62 = vpop.f32.mrf.mxu0 }
0x1583   :  { %v4400_v43 = vrot.slane %v4391_v62, 4 }
0x1584   :  { %v4393_v44 = vpop.f32.mrf.mxu0 }
0x1585   :  { %v4404_v59 = vadd.f32 %v4400_v43, %v8856_v36  ;;  %v4401_v60 = vrot.slane %v4393_v44, 4 }
0x1586   :  { %v4395_v48 = vpop.f32.mrf.mxu0 }
0x1587   :  { %v6181_v11 = vmul.f32 -1.442695, %v4404_v59  ;;  %v9028_v0 = vadd.f32 %v4401_v60, %v8988_v5 }
0x1588   :  { %v4396_v56 = vpop.f32.mrf.mxu0 }
0x1589   :  { %6845 = vpow2.f32 %v6181_v11 }
0x158a   :  { %v4566_v22 = vpop.f32.mrf.mxu0 }
0x158b   :  { %v9022_v24 = vadd.f32 %v6186_v61, %v4566_v22 }
0x158c   :  { %v6325_v42 = vpop.f32.mrf.mxu0 }
0x158d   :  { %6847 = vtanh.f32 %v9022_v24  ;;  %v6188_v15 = vmul.f32 -1.442695, %v9022_v24 }
0x158e   :  { %v4569_v51 = vpop.f32.mrf.mxu0  ;;  %6849 = vtanh.f32 %v9028_v0 }
0x158f   :  { %v9025_v41 = vadd.f32 %v6186_v61, %v4569_v51 }
0x1590   :  { %v6326_v28 = vpop.f32.mrf.mxu0 }
0x1596   :  { %v6846_v63 = vpop.eup %6845 }
0x1597   :  { %v4409_v52 = vadd.f32 1.0, %v6846_v63 }
0x1599   :  { %6851 = vrcp.f32 %v4409_v52 }
0x159a   :  { %v6848_v26 = vpop.eup %6847  ;;  %6853 = vpow2.f32 %v6188_v15 }
0x159b   :  { %4581 = vrot.lane.b32.xlu1 %v6848_v26, %s7231_s1  ;;  %v6850_v30 = vpop.eup %6849 }
0x15a6   :  { %v6852_v33 = vpop.eup %6851 }
0x15a7   :  { %v9032_v16 = vmul.f32 %v6852_v33, %v6850_v30  ;;  %v9034_v53 = vmul.f32 %v6852_v33, %v4420_v39  ;;  %v6854_v2 = vpop.eup %6853 }
0x15a8   :  { %v4576_v29 = vadd.f32 1.0, %v6854_v2 }
0x15aa   :  { %6855 = vrcp.f32 %v4576_v29 }
0x15b7   :  { %v6856_v9 = vpop.eup %6855 }
0x160d   :  { %v4582_v4 = vpop.permute.xlu1 %4581 }
0x160e   :  { %v4584_v49 = vmul.f32 %v6856_v9, %v4582_v4 }
0x1610   :  { %6857 = vtanh.f32 %v4584_v49  ;;  %v4659_v7 = vrot.slane %v4584_v49, 6 }
0x161d   :  { %v6858_v38 = vpop.eup %6857 }
0x161e   :  { %4587 = vrot.lane.b32.xlu0 %v6858_v38, %s7232_s11 }
0x1690   :  { %v4588_v14 = vpop.permute.xlu0 %4587 }
0x1691   :  { %v4590_v47 = vmul.f32 %v6856_v9, %v4588_v14 }
0x1693   :  { %v4591_v45 = vpack.c.bf16 %v4590_v47, %v4590_v47 }
0x1695   :  { %4595 = vrot.lane.b32.xlu1 %v4591_v45, %s7233_s8 }
0x1699   :  { %4660 = vrot.lane.b32.xlu1 %v4659_v7, %s7234_s28 }
0x1707   :  { %v4596_v6 = vpop.permute.xlu1 %4595 }
0x1708   :  { %6330 = vmatmul.mubr.msk.bf16.vlgmr.msra.gmra.mxu0 %vm4603_vm6, %v4596_v6 }
0x1709   :  { %6334 = vmatpush3.bf16.msra.mxu0 %v9037_v17  ;;  %6335 = vmatprep.mubr.msk.bf16.mxu0 %vm7230_vm4, %v7229_v1 }
0x170a   :  { %6339 = vmatprep.subr.bf16.mxu0 %v7229_v1 }
0x170b   :  { %v4661_v3 = vpop.permute.xlu1 %4660 }
0x17c8   :  { %v4641_v50 = vpop.f32.mrf.mxu0 }
0x17c9   :  { %v4648_v54 = vrot.slane %v4641_v50, 6 }
0x17ca   :  { %v6331_v37 = vpop.f32.mrf.mxu0 }
0x17cb   :  { %v4650_v27 = vadd.f32 %v4648_v54, %v9022_v24  ;;  %v6182_v37 = vmul.f32 -1.442695, %v9028_v0 }
0x17cc   :  { %v4644_v55 = vpop.f32.mrf.mxu0 }
0x17cd   :  { %6859 = vtanh.f32 %v4650_v27  ;;  %v6191_v58 = vmul.f32 -1.442695, %v4650_v27 }
0x17ce   :  { %v6332_v8 = vpop.f32.mrf.mxu0 }
0x17cf   :  { %6861 = vpow2.f32 %v6191_v58 }
0x17da   :  { %v6860_v23 = vpop.eup %6859 }
0x17db   :  { %4665 = vrot.lane.b32.xlu0 %v6860_v23, %s7231_s1 }
0x17dc   :  { %v6862_v12 = vpop.eup %6861 }
0x17dd   :  { %v4654_v10 = vadd.f32 1.0, %v6862_v12 }
0x17df   :  { %6863 = vrcp.f32 %v4654_v10 }
0x17ec   :  { %v6864_v32 = vpop.eup %6863 }
0x17ed   :  { %v4663_v18 = vmul.f32 %v6864_v32, %v4661_v3 }
0x184d   :  { %v4666_v40 = vpop.permute.xlu0 %4665 }
0x184e   :  { %v4668_v13 = vmul.f32 %v6864_v32, %v4666_v40 }
0x1850   :  { %4670 = vrot.lane.b32.xlu0 %v4668_v13, %s7234_s28 }
0x18c2   :  { %v4671_v35 = vpop.permute.xlu0 %4670 }
0x18c3   :  { %v4673_v31 = vadd.f32 %v4671_v35, %v4663_v18 }
0x18c5   :  { %6865 = vtanh.f32 %v4673_v31  ;;  %v4740_v52 = vrot.slane %v4673_v31, 6 }
0x18d2   :  { %v6866_v19 = vpop.eup %6865 }
0x18d3   :  { %4676 = vrot.lane.b32.xlu1 %v6866_v19, %s7213_s24 }
0x1945   :  { %v4677_v25 = vpop.permute.xlu1 %4676 }
0x1946   :  { %v4679_v20 = vmul.f32 %v6864_v32, %v4677_v25 }
0x1948   :  { %v4680_v46 = vpack.c.bf16 %v4679_v20, %v4679_v20 }
0x194a   :  { %v4682_v21 = vrot.slane %v4680_v46, 1 }
0x194c   :  { %4683 = vrot.lane.b32.xlu0 %v4682_v21, %s7233_s8 }
0x19be   :  { %v4684_v62 = vpop.permute.xlu0 %4683 }
0x19bf   :  { %6336 = vmatmul.mubr.msk.bf16.vlgmr.msra.gmra.mxu0 %vm4603_vm6, %v4684_v62 }
0x19c0   :  { %6340 = vmatpush3.bf16.msra.mxu0 %v9037_v17  ;;  %6341 = vmatprep.mubr.msk.bf16.mxu0 %vm7230_vm4, %v7229_v1 }
0x19c1   :  { %6351 = vmatprep.subr.bf16.mxu0 %v7229_v1 }
0x1a7f   :  { %v4722_v43 = vpop.f32.mrf.mxu0 }
0x1a80   :  { %v4729_v44 = vrot.slane %v4722_v43, 4 }
0x1a81   :  { %v6337_v59 = vpop.f32.mrf.mxu0 }
0x1a82   :  { %v4731_v48 = vadd.f32 %v4729_v44, %v9022_v24 }
0x1a83   :  { %v4725_v11 = vpop.f32.mrf.mxu0 }
0x1a84   :  { %6867 = vtanh.f32 %v4731_v48  ;;  %v6193_v22 = vmul.f32 -1.442695, %v4731_v48 }
0x1a85   :  { %v6338_v56 = vpop.f32.mrf.mxu0 }
0x1a86   :  { %6869 = vpow2.f32 %v6193_v22 }
0x1a91   :  { %v6868_v61 = vpop.eup %6867 }
0x1a92   :  { %4744 = vrot.lane.b32.xlu1 %v6868_v61, %s7231_s1 }
0x1a93   :  { %v6870_v42 = vpop.eup %6869 }
0x1a94   :  { %v4735_v51 = vadd.f32 1.0, %v6870_v42 }
0x1a96   :  { %6871 = vrcp.f32 %v4735_v51 }
0x1aa3   :  { %v6872_v60 = vpop.eup %6871 }
0x1aa4   :  { %v4742_v26 = vmul.f32 %v6872_v60, %v4740_v52 }
0x1b04   :  { %v4745_v28 = vpop.permute.xlu1 %4744 }
0x1b05   :  { %v4747_v63 = vmul.f32 %v6872_v60, %v4745_v28 }
0x1b07   :  { %4749 = vrot.lane.b32.xlu0 %v4747_v63, %s7234_s28 }
0x1b79   :  { %v4750_v30 = vpop.permute.xlu0 %4749 }
0x1b7a   :  { %v4752_v39 = vadd.f32 %v4750_v30, %v4742_v26 }
0x1b7c   :  { %6873 = vtanh.f32 %v4752_v39  ;;  %v4819_v3 = vrot.slane %v4752_v39, 6 }
0x1b89   :  { %v6874_v33 = vpop.eup %6873 }
0x1b8a   :  { %4755 = vrot.lane.b32.xlu1 %v6874_v33, %s7213_s24 }
0x1bfc   :  { %v4756_v15 = vpop.permute.xlu1 %4755 }
0x1bfd   :  { %v4758_v2 = vmul.f32 %v6872_v60, %v4756_v15 }
0x1bff   :  { %v4759_v29 = vpack.c.bf16 %v4758_v2, %v4758_v2 }
0x1c01   :  { %v4761_v9 = vrot.slane %v4759_v29, 2 }
0x1c03   :  { %4762 = vrot.lane.b32.xlu0 %v4761_v9, %s7233_s8 }
0x1c75   :  { %v4763_v4 = vpop.permute.xlu0 %4762 }
0x1c76   :  { %6342 = vmatmul.mubr.msk.bf16.vlgmr.msra.gmra.mxu0 %vm4603_vm6, %v4763_v4 }
0x1c77   :  { %6352 = vmatpush3.bf16.msra.mxu0 %v9037_v17  ;;  %6353 = vmatprep.mubr.msk.bf16.mxu0 %vm7230_vm4, %v7229_v1 }
0x1c78   :  { %6363 = vmatprep.subr.bf16.mxu0 %v7229_v1 }
0x1d36   :  { %v4801_v49 = vpop.f32.mrf.mxu0 }
0x1d37   :  { %v4808_v38 = vrot.slane %v4801_v49, 2 }
0x1d38   :  { %v6343_v14 = vpop.f32.mrf.mxu0 }
0x1d39   :  { %v4810_v47 = vadd.f32 %v4808_v38, %v9022_v24 }
0x1d3a   :  { %v4804_v45 = vpop.f32.mrf.mxu0 }
0x1d3b   :  { %6875 = vtanh.f32 %v4810_v47  ;;  %v6195_v50 = vmul.f32 -1.442695, %v4810_v47 }
0x1d3c   :  { %v6344_v7 = vpop.f32.mrf.mxu0 }
0x1d3d   :  { %6877 = vpow2.f32 %v6195_v50 }
0x1d3e   :  { %6879 = vpow2.f32 %v6182_v37 }
0x1d48   :  { %v6876_v6 = vpop.eup %6875 }
0x1d49   :  { %4823 = vrot.lane.b32.xlu1 %v6876_v6, %s7231_s1 }
0x1d4a   :  { %v6878_v54 = vpop.eup %6877 }
0x1d4b   :  { %v4814_v27 = vadd.f32 1.0, %v6878_v54  ;;  %v6880_v55 = vpop.eup %6879 }
0x1d4c   :  { %v4416_v58 = vadd.f32 1.0, %v6880_v55 }
0x1d4d   :  { %4425 = vrot.lane.b32.xlu1 %v9032_v16, %s7217_s27  ;;  %6881 = vrcp.f32 %v4814_v27 }
0x1d4e   :  { %6883 = vrcp.f32 %v4416_v58 }
0x1d5a   :  { %v6882_v8 = vpop.eup %6881 }
0x1d5b   :  { %v6884_v16 = vpop.eup %6883  ;;  %v4821_v18 = vmul.f32 %v6882_v8, %v4819_v3 }
0x1dbb   :  { %v4824_v24 = vpop.permute.xlu1 %4823 }
0x1dbc   :  { %v4826_v23 = vmul.f32 %v6882_v8, %v4824_v24 }
0x1dbe   :  { %4828 = vrot.lane.b32.xlu0 %v4826_v23, %s7234_s28 }
0x1dbf   :  { %v4426_v12 = vpop.permute.xlu1 %4425 }
0x1dc0   :  { %v4428_v10 = vadd.f32 %v4426_v12, %v9034_v53 }
0x1dc2   :  { %6885 = vtanh.f32 %v4428_v10  ;;  %v4502_v28 = vrot.slane %v4428_v10, 6 }
0x1dcf   :  { %v6886_v32 = vpop.eup %6885 }
0x1dd0   :  { %v4430_v40 = vmul.f32 %v6886_v32, %v6884_v16 }
0x1dd2   :  { %v4431_v13 = vpack.c.bf16 %v4430_v40, %v4430_v40 }
0x1dd4   :  { %v4433_v0 = vrot.slane %v4431_v13, 2 }
0x1dd6   :  { %4434 = vrot.lane.b32.xlu1 %v4433_v0, %s7217_s27 }
0x1e30   :  { %v4829_v35 = vpop.permute.xlu0 %4828 }
0x1e31   :  { %v4831_v31 = vadd.f32 %v4829_v35, %v4821_v18 }
0x1e33   :  { %6887 = vtanh.f32 %v4831_v31  ;;  %v4895_v47 = vrot.slane %v4831_v31, 6 }
0x1e40   :  { %v6888_v19 = vpop.eup %6887 }
0x1e41   :  { %4834 = vrot.lane.b32.xlu0 %v6888_v19, %s7213_s24 }
0x1e48   :  { %v4435_v25 = vpop.permute.xlu1 %4434 }
0x1e49   :  { %6183 = vmatmul.mubr.msk.bf16.vlgmr.msra.gmra.mxu1 %vm3948_vm2, %v4435_v25 }
0x1e4a   :  { %6346 = vmatpush3.bf16.msra.mxu1 %v9037_v17  ;;  %6347 = vmatprep.mubr.msk.bf16.mxu1 %vm7230_vm4, %v7229_v1 }
0x1e4b   :  { %6357 = vmatprep.subr.bf16.mxu1 %v7229_v1 }
0x1eb3   :  { %v4835_v53 = vpop.permute.xlu0 %4834 }
0x1eb4   :  { %v4837_v20 = vmul.f32 %v6882_v8, %v4835_v53 }
0x1eb6   :  { %v4838_v46 = vpack.c.bf16 %v4837_v20, %v4837_v20 }
0x1eb8   :  { %v4840_v21 = vrot.slane %v4838_v46, 3 }
0x1eba   :  { %4841 = vrot.lane.b32.xlu0 %v4840_v21, %s7233_s8 }
0x1f09   :  { %v4473_v62 = vpop.f32.mrf.mxu1 }
0x1f0a   :  { %v4482_v43 = vrot.slane %v4473_v62, 2 }
0x1f0b   :  { %v4475_v44 = vpop.f32.mrf.mxu1 }
0x1f0c   :  { %v4486_v59 = vadd.f32 %v4482_v43, %v8856_v36  ;;  %v4483_v61 = vrot.slane %v4475_v44, 2 }
0x1f0d   :  { %v4477_v48 = vpop.f32.mrf.mxu1 }
0x1f0e   :  { %v6184_v11 = vmul.f32 -1.442695, %v4486_v59  ;;  %v9085_v22 = vadd.f32 %v4483_v61, %v8988_v5 }
0x1f0f   :  { %v4478_v56 = vpop.f32.mrf.mxu1 }
0x1f10   :  { %6889 = vpow2.f32 %v6184_v11 }
0x1f11   :  { %6891 = vtanh.f32 %v9085_v22 }
0x1f1d   :  { %v6890_v42 = vpop.eup %6889 }
0x1f1e   :  { %v4491_v51 = vadd.f32 1.0, %v6890_v42  ;;  %v6892_v60 = vpop.eup %6891 }
0x1f20   :  { %6893 = vrcp.f32 %v4491_v51 }
0x1f2c   :  { %v4842_v63 = vpop.permute.xlu0 %4841 }
0x1f2d   :  { %v6894_v52 = vpop.eup %6893  ;;  %6348 = vmatmul.mubr.msk.bf16.vlgmr.msra.gmra.mxu1 %vm4603_vm6, %v4842_v63 }
0x1f2e   :  { %6358 = vmatpush3.bf16.msra.mxu1 %v9037_v17  ;;  %6359 = vmatprep.mubr.msk.bf16.mxu1 %vm7230_vm4, %v7229_v1  ;;  %v9092_v36 = vmul.f32 %v6894_v52, %v6892_v60  ;;  %v9094_v5 = vmul.f32 %v6894_v52, %v4502_v28 }
0x1fed   :  { %v4880_v26 = vpop.f32.mrf.mxu1 }
0x1fee   :  { %v4886_v30 = vadd.f32 %v4880_v26, %v9025_v41  ;;  %v6492_v26 = vld [vmem:[%s9318_s14 + $0x78] sm:$0xff]  }
0x1fef   :  { %v6349_v39 = vpop.f32.mrf.mxu1  ;;  %6264 = vmatprep.subr.bf16.mxu1 %v6492_v26  ;;  %v6204_v26 = vld [vmem:[#allocation17] ss:$0 sm:$0xff] }
0x1ff0   :  { %6895 = vtanh.f32 %v4886_v30  ;;  %v6197_v29 = vmul.f32 -1.442695, %v4886_v30  ;;  %v6493_v30 = vld [vmem:[%s9318_s14 + $0x38] sm:$0xff]   ;;  %v6494_v39 = vld [vmem:[%s9318_s14 + $0x70] sm:$0xff]  }
0x1ff1   :  { %v4883_v33 = vpop.f32.mrf.mxu1 }
0x1ff2   :  { %6897 = vpow2.f32 %v6197_v29  ;;  %v6495_v33 = vld [vmem:[%s9318_s14 + $0x30] sm:$0xff]  }
0x1ff3   :  { %v6350_v15 = vpop.f32.mrf.mxu1 }
0x1ff4   :  { %v6496_v15 = vld [vmem:[%s9318_s14 + $0x68] sm:$0xff]  }
0x1ffd   :  { %v6896_v2 = vpop.eup %6895 }
0x1ffe   :  { %4899 = vrot.lane.b32.xlu1 %v6896_v2, %s7231_s1  ;;  %v6497_v2 = vld [vmem:[%s9318_s14 + $0x28] sm:$0xff]  }
0x1fff   :  { %v6898_v9 = vpop.eup %6897 }
0x2000   :  { %v4890_v4 = vadd.f32 1.0, %v6898_v9 }
0x2002   :  { %6899 = vrcp.f32 %v4890_v4 }
0x200f   :  { %v6900_v49 = vpop.eup %6899 }
0x2010   :  { %v4897_v45 = vmul.f32 %v6900_v49, %v4895_v47  ;;  %v6500_v47 = vld [vmem:[%s9318_s14 + $0x58] sm:$0xff]  }
0x2070   :  { %v4900_v38 = vpop.permute.xlu1 %4899 }
0x2071   :  { %v4902_v14 = vmul.f32 %v6900_v49, %v4900_v38  ;;  %v6498_v38 = vld [vmem:[%s9318_s14 + $0x60] sm:$0xff]  }
0x2073   :  { %4904 = vrot.lane.b32.xlu0 %v4902_v14, %s7234_s28  ;;  %v6499_v14 = vld [vmem:[%s9318_s14 + $0x20] sm:$0xff]  }
0x20e5   :  { %v4905_v7 = vpop.permute.xlu0 %4904 }
0x20e6   :  { %v4907_v6 = vadd.f32 %v4905_v7, %v4897_v45  ;;  %v6501_v45 = vld [vmem:[%s9318_s14 + $0x18] sm:$0xff]   ;;  %v6502_v7 = vld [vmem:[%s9318_s14 + $0x50] sm:$0xff]  }
0x20e8   :  { %6901 = vtanh.f32 %v4907_v6  ;;  %v4973_v18 = vrot.slane %v4907_v6, 6  ;;  %v6503_v6 = vld [vmem:[%s9318_s14 + $0x10] sm:$0xff]  }
0x20f5   :  { %v6902_v50 = vpop.eup %6901 }
0x20f6   :  { %4910 = vrot.lane.b32.xlu1 %v6902_v50, %s7213_s24 }
0x2168   :  { %v4911_v54 = vpop.permute.xlu1 %4910 }
0x2169   :  { %v4913_v37 = vmul.f32 %v6900_v49, %v4911_v54  ;;  %v6504_v54 = vld [vmem:[%s9318_s14 + $0x48] sm:$0xff]  }
0x216b   :  { %v4914_v27 = vpack.c.bf16 %v4913_v37, %v4913_v37  ;;  %v6505_v37 = vld [vmem:[%s9318_s14 + $0x8] sm:$0xff]  }
0x216d   :  { %4916 = vrot.lane.b32.xlu0 %v4914_v27, %s7233_s8  ;;  %v6506_v27 = vld [vmem:[%s9318_s14 + $0x40] sm:$0xff]  }
0x21df   :  { %v4917_v55 = vpop.permute.xlu0 %4916 }
0x21e0   :  { %6354 = vmatmul.mubr.msk.bf16.vlgmr.msra.gmra.mxu0 %vm4603_vm6, %v4917_v55  ;;  %v5150_v55 = vld [vmem:[%s10356_s18] sm:$0x3] }
0x21e1   :  { %6364 = vmatpush3.bf16.msra.mxu0 %v9037_v17  ;;  %6365 = vmatprep.mubr.msk.bf16.mxu0 %vm7230_vm4, %v7229_v1 }
0x21e2   :  { %6369 = vmatprep.subr.bf16.mxu0 %v7229_v1 }
0x22a0   :  { %v4955_v8 = vpop.f32.mrf.mxu0 }
0x22a1   :  { %v4962_v24 = vrot.slane %v4955_v8, 6  ;;  %v6507_v8 = vld [vmem:[%s9318_s14] sm:$0xff]  }
0x22a2   :  { %v6355_v23 = vpop.f32.mrf.mxu0 }
0x22a3   :  { %v4964_v58 = vadd.f32 %v4962_v24, %v9025_v41 }
0x22a4   :  { %v4958_v12 = vpop.f32.mrf.mxu0 }
0x22a5   :  { %6903 = vtanh.f32 %v4964_v58  ;;  %v6199_v32 = vmul.f32 -1.442695, %v4964_v58 }
0x22a6   :  { %v6356_v10 = vpop.f32.mrf.mxu0 }
0x22a7   :  { %6905 = vpow2.f32 %v6199_v32 }
0x22b2   :  { %v6904_v16 = vpop.eup %6903 }
0x22b3   :  { %4977 = vrot.lane.b32.xlu1 %v6904_v16, %s7231_s1 }
0x22b4   :  { %v6906_v40 = vpop.eup %6905 }
0x22b5   :  { %v4968_v17 = vadd.f32 1.0, %v6906_v40 }
0x22b7   :  { %6907 = vrcp.f32 %v4968_v17 }
0x22c4   :  { %v6908_v13 = vpop.eup %6907 }
0x22c5   :  { %v4975_v35 = vmul.f32 %v6908_v13, %v4973_v18  ;;  %v6508_v18 = vld [vmem:[#allocation19 + $0x18] sm:$0xff]  }
0x2325   :  { %v4978_v0 = vpop.permute.xlu1 %4977 }
0x2326   :  { %v4980_v3 = vmul.f32 %v6908_v13, %v4978_v0 }
0x2328   :  { %4982 = vrot.lane.b32.xlu0 %v4980_v3, %s7234_s28 }
0x239a   :  { %v4983_v31 = vpop.permute.xlu0 %4982 }
0x239b   :  { %v4985_v19 = vadd.f32 %v4983_v31, %v4975_v35 }
0x239d   :  { %6909 = vtanh.f32 %v4985_v19  ;;  %v5052_v29 = vrot.slane %v4985_v19, 6 }
0x23aa   :  { %v6910_v25 = vpop.eup %6909 }
0x23ab   :  { %4988 = vrot.lane.b32.xlu1 %v6910_v25, %s7213_s24 }
0x241d   :  { %v4989_v53 = vpop.permute.xlu1 %4988 }
0x241e   :  { %v4991_v20 = vmul.f32 %v6908_v13, %v4989_v53  ;;  %v6511_v53 = vld [vmem:[#allocation19] sm:$0xff]  }
0x2420   :  { %v4992_v46 = vpack.c.bf16 %v4991_v20, %v4991_v20 }
0x2422   :  { %v4994_v21 = vrot.slane %v4992_v46, 1 }
0x2424   :  { %4995 = vrot.lane.b32.xlu0 %v4994_v21, %s7233_s8 }
0x2496   :  { %v4996_v62 = vpop.permute.xlu0 %4995 }
0x2497   :  { %6360 = vmatmul.mubr.msk.bf16.vlgmr.msra.gmra.mxu1 %vm4603_vm6, %v4996_v62 }
0x2498   :  { %6265 = vmatpush3.bf16.msra.mxu1 %v6493_v30  ;;  %v6518_v30 = vld [vmem:[%s9320_s16 + $0x8] sm:$0xff]  }
0x2499   :  { %6266 = vmatprep.subr.bf16.mxu1 %v6494_v39 }
0x249c   :  { %6267 = vmatpush3.bf16.msra.mxu1 %v6495_v33  ;;  %v6519_v33 = vld [vmem:[%s9320_s16] sm:$0xff]  }
0x249d   :  { %6268 = vmatprep.subr.bf16.mxu1 %v6496_v15 }
0x24a0   :  { %6269 = vmatpush3.bf16.msra.mxu1 %v6497_v2 }
0x24a1   :  { %6270 = vmatprep.subr.bf16.mxu1 %v6498_v38 }
0x24a4   :  { %6271 = vmatpush3.bf16.msra.mxu1 %v6499_v14 }
0x24a5   :  { %6272 = vmatprep.subr.bf16.mxu1 %v6500_v47 }
0x24a8   :  { %6273 = vmatpush3.bf16.msra.mxu1 %v6501_v45 }
0x24a9   :  { %6274 = vmatprep.subr.bf16.mxu1 %v6502_v7 }
0x24ac   :  { %6275 = vmatpush3.bf16.msra.mxu1 %v6503_v6 }
0x24ad   :  { %6276 = vmatprep.subr.bf16.mxu1 %v6504_v54 }
0x24b0   :  { %6277 = vmatpush3.bf16.msra.mxu1 %v6505_v37 }
0x24b1   :  { %6278 = vmatprep.subr.bf16.mxu1 %v6506_v27 }
0x24b4   :  { %6279 = vmatpush3.bf16.msra.mxu1 %v6507_v8 }
0x24b5   :  { %6401 = vmatprep.subr.bf16.mxu1 %v7229_v1 }
0x2557   :  { %v5034_v43 = vpop.f32.mrf.mxu1 }
0x2558   :  { %v5041_v44 = vrot.slane %v5034_v43, 4 }
0x2559   :  { %v6361_v59 = vpop.f32.mrf.mxu1 }
0x255a   :  { %v5043_v48 = vadd.f32 %v5041_v44, %v9025_v41 }
0x255b   :  { %v5037_v11 = vpop.f32.mrf.mxu1 }
0x255c   :  { %6911 = vtanh.f32 %v5043_v48  ;;  %v6201_v42 = vmul.f32 -1.442695, %v5043_v48 }
0x255d   :  { %v6362_v56 = vpop.f32.mrf.mxu1 }
0x255e   :  { %6913 = vpow2.f32 %v6201_v42 }
0x2569   :  { %v6912_v61 = vpop.eup %6911 }
0x256a   :  { %5056 = vrot.lane.b32.xlu1 %v6912_v61, %s7231_s1  ;;  %v6512_v61 = vld [vmem:[%s9320_s16 + $0x38] sm:$0xff]  }
0x256b   :  { %v6914_v51 = vpop.eup %6913 }
0x256c   :  { %v5047_v60 = vadd.f32 1.0, %v6914_v51  ;;  %v6513_v51 = vld [vmem:[%s9320_s16 + $0x30] sm:$0xff]  }
0x256e   :  { %6915 = vrcp.f32 %v5047_v60  ;;  %v6514_v60 = vld [vmem:[%s9320_s16 + $0x28] sm:$0xff]  }
0x257b   :  { %v6916_v28 = vpop.eup %6915 }
0x257c   :  { %v5054_v9 = vmul.f32 %v6916_v28, %v5052_v29 }
0x25dc   :  { %v5057_v63 = vpop.permute.xlu1 %5056 }
0x25dd   :  { %v5059_v52 = vmul.f32 %v6916_v28, %v5057_v63  ;;  %v6516_v63 = vld [vmem:[%s9320_s16 + $0x18] sm:$0xff]  }
0x25df   :  { %5061 = vrot.lane.b32.xlu0 %v5059_v52, %s7234_s28  ;;  %v6517_v52 = vld [vmem:[%s9320_s16 + $0x10] sm:$0xff]  }
0x2651   :  { %v5062_v4 = vpop.permute.xlu0 %5061 }
0x2652   :  { %v9133_v49 = vadd.f32 %v5062_v4, %v5054_v9 }
0x2654   :  { %6917 = vtanh.f32 %v9133_v49 }
0x2661   :  { %v6918_v50 = vpop.eup %6917 }
0x2662   :  { %5067 = vrot.lane.b32.xlu1 %v6918_v50, %s7213_s24 }
0x2666   :  { %5153 = vperm.xlu1 %6475, %v5150_v55  }
0x26d4   :  { %v5068_v24 = vpop.permute.xlu1 %5067 }
0x26d5   :  { %v5070_v23 = vmul.f32 %v6916_v28, %v5068_v24  ;;  %v6515_v28 = vld [vmem:[%s9320_s16 + $0x20] sm:$0xff]  }
0x26d7   :  { %v5071_v58 = vpack.c.bf16 %v5070_v23, %v5070_v23 }
0x26d9   :  { %v5073_v12 = vrot.slane %v5071_v58, 2 }
0x26db   :  { %5074 = vrot.lane.b32.xlu0 %v5073_v12, %s7233_s8 }
0x26df   :  { %4507 = vrot.lane.b32.xlu0 %v9092_v36, %s7217_s27  ;;  %v6185_v36 = vmul.f32 -1.442695, %v9085_v22  ;;  %v6510_v22 = vld [vmem:[#allocation19 + $0x8] sm:$0xff]  }
0x26e1   :  { %v5154_v10 = vpop.permute.xlu1 %5153  ;;  %6919 = vpow2.f32 %v6185_v36 }
0x26e2   :  { %v9174_v16 = vrot.slane %v5154_v10, 2 }
0x26e4   :  { %v5158_v32 = vmul.f32 %v9174_v16, %v8868_v34  ;;  %v5157_v40 = vmul.f32 %v9174_v16, %v8866_v57  ;;  %v6509_v57 = vld [vmem:[#allocation19 + $0x10] sm:$0xff]  }
0x26e6   :  { %v5162_v17 = vpack.c.bf16 %v5158_v32, %v5158_v32  ;;  %v5161_v13 = vpack.c.bf16 %v5157_v40, %v5157_v40  ;;  %v5131_v40 = vrot.slane %v9133_v49, 6 }
0x26e8   :  { %v5205_v0 = vrot.slane %v5162_v17, 3  ;;  %v5204_v3 = vrot.slane %v5161_v13, 3 }
0x26ea   :  { %5336 = vmatprep.mubr.bf16.mxu1 %v5205_v0 }
0x26eb   :  { %5337 = vmatmul.mubr.bf16.vlgmr.msra.gmra.mxu1 %v5204_v3  ;;  %v6520_v3 = vld [vmem:[%s9324_s20] sm:$0xff]  }
0x26ec   :  { %6403 = vmatprep.mubr.msk.bf16.mxu1 %vm7230_vm4, %v7229_v1  ;;  %6402 = vmatpush3.bf16.msra.mxu1 %v6520_v3 }
0x26ed   :  { %6407 = vmatprep.subr.bf16.mxu1 %v7229_v1 }
0x26ee   :  { %v6920_v35 = vpop.eup %6919 }
0x26ef   :  { %v4498_v34 = vadd.f32 1.0, %v6920_v35 }
0x26f1   :  { %6921 = vrcp.f32 %v4498_v34 }
0x26fe   :  { %v6922_v20 = vpop.eup %6921 }
0x274d   :  { %v5075_v31 = vpop.permute.xlu0 %5074 }
0x274e   :  { %6366 = vmatmul.mubr.msk.bf16.vlgmr.msra.gmra.mxu0 %vm4603_vm6, %v5075_v31 }
0x274f   :  { %6370 = vmatpush3.bf16.msra.mxu0 %v6508_v18  ;;  %6377 = vmatprep.mubr.msk.bf16.mxu0 %vm7230_vm4, %v7229_v1  ;;  %v7235_v18 = vmov 65535  }
0x2750   :  { %6371 = vmatprep.subr.bf16.mxu0 %v7229_v1  ;;  %v5679_v35 = vsel %vm4528_vm3, 4294967295, %v7235_v18 }
0x2751   :  { %v4508_v19 = vpop.permute.xlu0 %4507  ;;  %v5680_v31 = vsel %vm5678_vm7, %v5679_v35, 0 }
0x2752   :  { %v4510_v25 = vadd.f32 %v4508_v19, %v9094_v5 }
0x2753   :  { %6372 = vmatpush3.bf16.msra.mxu0 %v6509_v57  ;;  %v5673_v57 = vld [vmem:[%s9325_s21] sm:$0x7] }
0x2754   :  { %6923 = vtanh.f32 %v4510_v25  ;;  %6373 = vmatprep.subr.bf16.mxu0 %v7229_v1  ;;  %v5682_v25 = vand.u32 %v5680_v31, %v5673_v57 }
0x2757   :  { %6374 = vmatpush3.bf16.msra.mxu0 %v6510_v22 }
0x2758   :  { %6375 = vmatprep.subr.bf16.mxu0 %v7229_v1 }
0x275b   :  { %6376 = vmatpush3.bf16.msra.mxu0 %v6511_v53  ;;  %v5671_v53 = vld [vmem:[#allocation3] sm:$0x3] }
0x275c   :  { %6381 = vmatprep.subr.bf16.mxu0 %v7229_v1 }
0x2761   :  { %v6924_v46 = vpop.eup %6923 }
0x2762   :  { %v4512_v21 = vmul.f32 %v6924_v46, %v6922_v20  ;;  %v5672_v20 = vpack.c.bf16 %v5671_v53, %v5671_v53 }
0x2764   :  { %v5159_v62 = vmul.f32 %v9174_v16, %v4512_v21  ;;  %v6521_v21 = vld [vmem:[#allocation22 + $0x18] sm:$0xff]  }
0x2766   :  { %v5362_v43 = vpack.c.bf16 %v5159_v62, %v5159_v62 }
0x2768   :  { %v5372_v5 = vrot.slane %v5362_v43, 3  ;;  %v6522_v43 = vld [vmem:[#allocation22 + $0x10] sm:$0xff]  }
0x276a   :  { %5373 = vrot.lane.b32.xlu1 %v5372_v5, %s7217_s27  ;;  %v6523_v5 = vld [vmem:[#allocation22 + $0x8] sm:$0xff]  }
0x27ab   :  { %v6280_v44 = vpop.f32.mrf.mxu1 }
0x27ad   :  { %v6281_v59 = vpop.f32.mrf.mxu1 }
0x27ae   :  { %v6282_v48 = vadd.f32 %v6281_v59, %v6280_v44  ;;  %v6524_v59 = vld [vmem:[#allocation22] sm:$0xff]  }
0x27af   :  { %v6283_v11 = vpop.f32.mrf.mxu1 }
0x27b0   :  { %v5339_v39 = vadd.f32 %v6282_v48, %v6204_v26  ;;  %v5738_v26 = vld [vmem:[%s9327_s23 + $0x20] sm:$0xff] }
0x27b1   :  { %v6284_v56 = vpop.f32.mrf.mxu1 }
0x27b2   :  { %v5344_v15 = vmax.f32 %v5339_v39, 0.0  ;;  %v5744_v56 = vld [vmem:[%s9327_s23 + $0x50] sm:$0x3f]  ;;  %v5737_v39 = vld [vmem:[%s9327_s23 + $0x18] sm:$0xff] }
0x27b4   :  { %v5345_v2 = vpack.c.bf16 %v5344_v15, %v5344_v15  ;;  %v5736_v15 = vld [vmem:[%s9327_s23 + $0x10] sm:$0xff] }
0x27dc   :  { %v5374_v42 = vpop.permute.xlu1 %5373 }
0x27dd   :  { %6378 = vmatmul.mubr.msk.bf16.vlgmr.msra.gmra.mxu0 %vm3948_vm2, %v5374_v42  ;;  %v5742_v42 = vld [vmem:[%s9327_s23 + $0x40] sm:$0xff] }
0x27de   :  { %6382 = vmatpush3.bf16.msra.mxu0 %v6512_v61  ;;  %6397 = vmatprep.mubr.msk.bf16.mxu0 %vm7230_vm4, %v7229_v1  ;;  %v5743_v61 = vld [vmem:[%s9327_s23 + $0x48] sm:$0xff] }
0x27df   :  { %6383 = vmatprep.subr.bf16.mxu0 %v7229_v1 }
0x27e2   :  { %6384 = vmatpush3.bf16.msra.mxu0 %v6513_v51  ;;  %v5741_v51 = vld [vmem:[%s9327_s23 + $0x38] sm:$0xff] }
0x27e3   :  { %6385 = vmatprep.subr.bf16.mxu0 %v7229_v1 }
0x27e6   :  { %6386 = vmatpush3.bf16.msra.mxu0 %v6514_v60  ;;  %v5740_v60 = vld [vmem:[%s9327_s23 + $0x30] sm:$0xff] }
0x27e7   :  { %6387 = vmatprep.subr.bf16.mxu0 %v7229_v1 }
0x27ea   :  { %6388 = vmatpush3.bf16.msra.mxu0 %v6515_v28  ;;  %v5739_v28 = vld [vmem:[%s9327_s23 + $0x28] sm:$0xff] }
0x27eb   :  { %6389 = vmatprep.subr.bf16.mxu0 %v7229_v1 }
0x27ee   :  { %6390 = vmatpush3.bf16.msra.mxu0 %v6516_v63 }
0x27ef   :  { %6391 = vmatprep.subr.bf16.mxu0 %v7229_v1 }
0x27f2   :  { %6392 = vmatpush3.bf16.msra.mxu0 %v6517_v52 }
0x27f3   :  { %6393 = vmatprep.subr.bf16.mxu0 %v7229_v1 }
0x27f6   :  { %6394 = vmatpush3.bf16.msra.mxu0 %v6518_v30 }
0x27f7   :  { %6395 = vmatprep.subr.bf16.mxu0 %v7229_v1 }
0x27fa   :  { %6396 = vmatpush3.bf16.msra.mxu0 %v6519_v33 }
0x27fb   :  { %6419 = vmatprep.subr.bf16.mxu0 %v7229_v1 }
0x27fd   :  { %6398 = vmatmul.mubr.bf16.vlgmr.msra.gmra.mxu0 %v5345_v2  ;;  %v5735_v2 = vld [vmem:[%s9327_s23 + $0x8] sm:$0xff] }
0x27fe   :  { %6421 = vmatprep.mubr.msk.bf16.mxu0 %vm7230_vm4, %v7229_v1  ;;  %6420 = vmatpush3.bf16.msra.mxu0 %v5682_v25 }
0x2805   :  { %6422 = vmatmul.mubr.msk.bf16.vlgmr.msra.gmra.mxu0 %vm5674_vm8, %v5672_v20 }
0x280e   :  { %v5113_v29 = vpop.f32.mrf.mxu0 }
0x280f   :  { %v5120_v9 = vrot.slane %v5113_v29, 2  ;;  %v5734_v29 = vld [vmem:[%s9327_s23] sm:$0xff] }
0x2810   :  { %v6367_v4 = vpop.f32.mrf.mxu0 }
0x2811   :  { %v5122_v38 = vadd.f32 %v5120_v9, %v9025_v41 }
0x2812   :  { %v5116_v14 = vpop.f32.mrf.mxu0 }
0x2813   :  { %6925 = vtanh.f32 %v5122_v38  ;;  %v6203_v7 = vmul.f32 -1.442695, %v5122_v38 }
0x2814   :  { %v6368_v47 = vpop.f32.mrf.mxu0 }
0x2815   :  { %6927 = vpow2.f32 %v6203_v7  ;;  %v6243_v7 = vld [vmem:[%s9326_s22] ss:$0 sm:$0xff] }
0x2820   :  { %v6926_v45 = vpop.eup %6925 }
0x2821   :  { %5135 = vrot.lane.b32.xlu0 %v6926_v45, %s7231_s1 }
0x2822   :  { %v6928_v6 = vpop.eup %6927 }
0x2823   :  { %v5126_v50 = vadd.f32 1.0, %v6928_v6 }
0x2825   :  { %6929 = vrcp.f32 %v5126_v50 }
0x2832   :  { %v6930_v54 = vpop.eup %6929 }
0x2833   :  { %v5133_v17 = vmul.f32 %v6930_v54, %v5131_v40 }
0x2893   :  { %v5136_v37 = vpop.permute.xlu0 %5135 }
0x2894   :  { %v5138_v27 = vmul.f32 %v6930_v54, %v5136_v37 }
0x2896   :  { %5140 = vrot.lane.b32.xlu1 %v5138_v27, %s7234_s28 }
0x289d   :  { %v5436_v55 = vpop.f32.mrf.mxu0 }
0x289f   :  { %v6379_v8 = vpop.f32.mrf.mxu0 }
0x28a1   :  { %v5439_v24 = vpop.f32.mrf.mxu0 }
0x28a3   :  { %v6380_v41 = vpop.f32.mrf.mxu0 }
0x28bd   :  { %v5524_v23 = vpop.f32.mrf.mxu0 }
0x28be   :  { %v5525_v58 = vadd.f32 %v5524_v23, %v5436_v55  ;;  %v6244_v55 = vld [vmem:[#allocation2] ss:$0 sm:$0xff] }
0x28bf   :  { %v6399_v12 = vpop.f32.mrf.mxu0 }
0x28c1   :  { %v5527_v10 = vpop.f32.mrf.mxu0 }
0x28c3   :  { %v6400_v32 = vpop.f32.mrf.mxu0 }
0x28c5   :  { %v5718_v63 = vpop.f32.mrf.mxu0 }
0x28c7   :  { %v6423_v52 = vpop.f32.mrf.mxu0 }
0x28c9   :  { %v5721_v30 = vpop.f32.mrf.mxu0 }
0x28cb   :  { %v6424_v33 = vpop.f32.mrf.mxu0 }
0x2908   :  { %v5141_v13 = vpop.permute.xlu1 %5140 }
0x2909   :  { %v5143_v0 = vadd.f32 %v5141_v13, %v5133_v17 }
0x290b   :  { %6931 = vtanh.f32 %v5143_v0 }
0x2918   :  { %v6932_v36 = vpop.eup %6931 }
0x2919   :  { %5146 = vrot.lane.b32.xlu0 %v6932_v36, %s7213_s24 }
0x298b   :  { %v5147_v49 = vpop.permute.xlu0 %5146 }
0x298c   :  { %v5149_v34 = vmul.f32 %v6930_v54, %v5147_v49 }
0x298e   :  { %v5160_v19 = vmul.f32 %v9174_v16, %v5149_v34  ;;  %v6234_v16 = vld [vmem:[#allocation20] ss:$0 sm:$0xff] }
0x298f   :  { %v5537_v44 = vadd.f32 %v6234_v16, %v5525_v58 }
0x2990   :  { %v5548_v22 = vpack.c.bf16 %v5160_v19, %v5160_v19 }
0x2991   :  { %v5538_v48 = vmax.f32 %v5537_v44, 0.0 }
0x2992   :  { %v5552_v46 = vrot.slane %v5548_v22, 3 }
0x2993   :  { %v5539_v11 = vpack.c.bf16 %v5538_v48, %v5538_v48 }
0x2994   :  { %5553 = vrot.lane.b32.xlu1 %v5552_v46, %s7233_s8 }
0x2a06   :  { %v5554_v62 = vpop.permute.xlu1 %5553 }
0x2a07   :  { %6404 = vmatmul.mubr.msk.bf16.vlgmr.msra.gmra.mxu1 %vm4603_vm6, %v5554_v62 }
0x2a08   :  { %6408 = vmatpush3.bf16.msra.mxu1 %v6521_v21  ;;  %6415 = vmatprep.mubr.msk.bf16.mxu1 %vm7230_vm4, %v7229_v1 }
0x2a09   :  { %6409 = vmatprep.subr.bf16.mxu1 %v7229_v1 }
0x2a0c   :  { %6410 = vmatpush3.bf16.msra.mxu1 %v6522_v43 }
0x2a0d   :  { %6411 = vmatprep.subr.bf16.mxu1 %v7229_v1 }
0x2a10   :  { %6412 = vmatpush3.bf16.msra.mxu1 %v6523_v5 }
0x2a11   :  { %6413 = vmatprep.subr.bf16.mxu1 %v7229_v1 }
0x2a14   :  { %6414 = vmatpush3.bf16.msra.mxu1 %v6524_v59 }
0x2a15   :  { %6425 = vmatprep.subr.mxu1 %v7229_v1 }
0x2a17   :  { %6416 = vmatmul.mubr.msk.bf16.vlgmr.msra.gmra.mxu1 %vm3948_vm2, %v5539_v11 }
0x2a18   :  { %6447 = vmatprep.mubr.msk.f32.mxu1 %vm7230_vm4, %v7229_v1  ;;  %6426 = vmatpush3.msk.msra.mxu1 %vm5756_vm9, %v5744_v56 }
0x2a19   :  { %6427 = vmatprep.subr.mxu1 %v7229_v1 }
0x2a1a   :  { %6428 = vmatpush3.msra.mxu1 %v5743_v61 }
0x2a1b   :  { %6429 = vmatprep.subr.mxu1 %v7229_v1 }
0x2a1c   :  { %6430 = vmatpush3.msra.mxu1 %v5742_v42 }
0x2a1d   :  { %6431 = vmatprep.subr.mxu1 %v7229_v1 }
0x2a1e   :  { %6432 = vmatpush3.msra.mxu1 %v5741_v51 }
0x2a1f   :  { %6433 = vmatprep.subr.mxu1 %v7229_v1 }
0x2a20   :  { %6434 = vmatpush3.msra.mxu1 %v5740_v60 }
0x2a21   :  { %6435 = vmatprep.subr.mxu1 %v7229_v1 }
0x2a22   :  { %6436 = vmatpush3.msra.mxu1 %v5739_v28 }
0x2a23   :  { %6437 = vmatprep.subr.mxu1 %v7229_v1 }
0x2a24   :  { %6438 = vmatpush3.msra.mxu1 %v5738_v26 }
0x2a25   :  { %6439 = vmatprep.subr.mxu1 %v7229_v1 }
0x2a26   :  { %6440 = vmatpush3.msra.mxu1 %v5737_v39 }
0x2a27   :  { %6441 = vmatprep.subr.mxu1 %v7229_v1 }
0x2a28   :  { %6442 = vmatpush3.msra.mxu1 %v5736_v15 }
0x2a29   :  { %6443 = vmatprep.subr.mxu1 %v7229_v1 }
0x2a2a   :  { %6444 = vmatpush3.msra.mxu1 %v5735_v2 }
0x2a2b   :  { %6445 = vmatprep.subr.mxu1 %v7229_v1 }
0x2a2c   :  { %6446 = vmatpush3.msra.mxu1 %v5734_v29 }
0x2ac7   :  { %v5598_v9 = vpop.f32.mrf.mxu1 }
0x2ac9   :  { %v6405_v4 = vpop.f32.mrf.mxu1 }
0x2acb   :  { %v5601_v38 = vpop.f32.mrf.mxu1 }
0x2acd   :  { %v6406_v14 = vpop.f32.mrf.mxu1 }
0x2ad7   :  { %v5665_v47 = vpop.f32.mrf.mxu1 }
0x2ad8   :  { %v5666_v45 = vadd.f32 %v5665_v47, %v5598_v9 }
0x2ad9   :  { %v6417_v6 = vpop.f32.mrf.mxu1 }
0x2ada   :  { %v5724_v50 = vadd.f32 %v5718_v63, %v5666_v45 }
0x2adb   :  { %v5668_v54 = vpop.f32.mrf.mxu1 }
0x2adc   :  { %v5732_v37 = vadd.f32 %v6243_v7, %v5724_v50 }
0x2add   :  { %v6418_v1 = vpop.f32.mrf.mxu1 }
0x2ade   :  { %v5733_v27 = vmax.f32 %v5732_v37, 0.0 }
0x2ae0   :  { %6448 = vmatmul.mubr.msk.f32.vlgmr.msra.gmra.mxu1 %vm5752_vm10, %v5733_v27 }
0x2ba0   :  { %v5826_v8 = vpop.f32.mrf.mxu1 }
0x2ba1   :  { %v5827_v24 = vadd.f32 %v6244_v55, %v5826_v8 }
0x2ba2   :  { %v6449_v41 = vpop.f32.mrf.mxu1 }
0x2ba3   :  { %v6247_v23 = vmul.f32 -1.442695, %v5827_v24 }
0x2ba5   :  { %6933 = vpow2.f32 %v6247_v23 }
0x2bb2   :  { %v6934_v58 = vpop.eup %6933 }
0x2bb3   :  { %v5833_v12 = vadd.f32 1.0, %v6934_v58 }
0x2bb5   :  { %6935 = vrcp.f32 %v5833_v12 }
0x2bc2   :  { %v6936_v10 = vpop.eup %6935 }
0x2bc3   :  { %5837 = vst.msk [vmem:[%s9329_s25] sm:$0x3] %vm5836_vm11, %v6936_v10 }
0x2bc4   :  { %5842 = vsyncpa [#allocation4], 1 }
0x2bc5   :  { %5843 = vsyncpa [#allocation6], 1 }
0x2bc6   :  { %5844 = vsyncpa [#allocation9], 1 }
0x2bc7   :  { %5845 = vsyncpa [#allocation12], 1 }
0x2bc8   :  { %5846 = vsyncpa [#allocation15], 1 }
0x2bc9   :  { %5847 = vsyncpa [#allocation18], 1 }
0x2bca   :  { %5848 = vsyncpa [#allocation21], 1 }

</bundles_post_ra>
